<compile_context>
chip_gen: v6e
topology: v6e:2x2x1
jax: 0.10.0
libtpu: 0.0.40
codegen_flags: <defaults>
</compile_context>

<pallas_src>
import functools
import math

import jax
import jax.numpy as jnp
from jax import lax
from jax.experimental import pallas as pl
from jax.experimental.pallas import tpu as pltpu

_LANES = 128

# Flat weight arrays, in the order they are passed to the kernel.
_PARAM_ORDER = (
    'pre_w', 'pre_b',
    'enc_in_w', 'enc_in_b',
    'mem_w', 'mem_b',
    'lstm_wih', 'lstm_whh', 'lstm_b',
    'encpre_w1', 'encpre_b1', 'encpre_w2', 'encpre_b2', 'encpre_w3', 'encpre_b3',
    'enc_sa_wqkv', 'enc_sa_bqkv', 'enc_sa_wo', 'enc_sa_bo',
    'enc_ln1_g', 'enc_ln1_b',
    'enc_ff_w1', 'enc_ff_b1', 'enc_ff_w2', 'enc_ff_b2',
    'enc_ln2_g', 'enc_ln2_b',
    'dec_sa_wqkv', 'dec_sa_bqkv', 'dec_sa_wo', 'dec_sa_bo',
    'dec_ln1_g', 'dec_ln1_b',
    'dec_ca_wq', 'dec_ca_bq', 'dec_ca_wkv', 'dec_ca_bkv', 'dec_ca_wo', 'dec_ca_bo',
    'dec_ln2_g', 'dec_ln2_b',
    'dec_ff_w1', 'dec_ff_b1', 'dec_ff_w2', 'dec_ff_b2',
    'dec_ln3_g', 'dec_ln3_b',
    'out_w1', 'out_b1', 'out_w2', 'out_b2', 'out_w3', 'out_b3',
)


def _round_up(n, m):
    return ((n + m - 1) // m) * m


# ---------------------------------------------------------------------------
# In-kernel helpers (operate on values, all f32)
# ---------------------------------------------------------------------------

def _linear(x, w, b, relu=False):
    y = jnp.dot(x, w, preferred_element_type=jnp.float32) + b
    if relu:
        y = jnp.maximum(y, 0.0)
    return y


def _add_layernorm(x, res, g, b, eps=1e-5):
    y = x + res
    mu = jnp.mean(y, axis=-1, keepdims=True)
    var = jnp.mean((y - mu) ** 2, axis=-1, keepdims=True)
    return (y - mu) * lax.rsqrt(var + eps) * g + b


def _mha(q, k, v, wo, bo, num_heads):
    """Single-sequence MHA.  Per-head scores/softmax/values, then the head
    outputs are lane-concatenated and ONE (Sq,H)@(H,H) out-projection is run
    (out-projection hoisted out of the head loop)."""
    sq, hdim = q.shape
    hd = hdim // num_heads
    scale = 1.0 / math.sqrt(hd)
    heads = []
    for hh in range(num_heads):
        sl = slice(hh * hd, (hh + 1) * hd)
        s = lax.dot_general(q[:, sl] * scale, k[:, sl], (((1,), (1,)), ((), ())),
                            preferred_element_type=jnp.float32)          # (Sq, L)
        s = s - jnp.max(s, axis=-1, keepdims=True)
        p = jnp.exp(s)
        # approx reciprocal -> EUP slot; inference-accurate (not bit-exact divide).
        p = p * pl.reciprocal(jnp.sum(p, axis=-1, keepdims=True), approx=True)
        heads.append(jnp.dot(p, v[:, sl], preferred_element_type=jnp.float32))
    o = jnp.concatenate(heads, axis=-1)                                    # (Sq, H)
    return jnp.dot(o, wo, preferred_element_type=jnp.float32) + bo


def _gather_batch_rows(a, b, n, batch):
    """a: (n*batch, C) with row index r*batch + b  ->  (n, C) rows of batch b."""
    return jnp.concatenate(
        [a[r * batch + b: r * batch + b + 1, :] for r in range(n)], axis=0)


def _pad_lanes(a, lanes):
    cur = a.shape[-1]
    if cur == lanes:
        return a
    return jnp.concatenate(
        [a, jnp.zeros(a.shape[:-1] + (lanes - cur,), a.dtype)], axis=-1)


# ---------------------------------------------------------------------------
# Fused forward kernel: single grid step, whole batch in the block
# ---------------------------------------------------------------------------

def _fused_forward_kernel(*refs, seq_len, mem_len, batch, num_heads):
    n_w = len(_PARAM_ORDER)
    x_ref, mem_ref, h0_ref, c0_ref = refs[0:4]
    w = {name: refs[4 + i] for i, name in enumerate(_PARAM_ORDER)}
    out_ref = refs[4 + n_w]            # (B, S, out_lanes)  lane-dense output slab
    hc_ref = refs[5 + n_w]             # (2B, hc_lanes)     rows [h_0..h_B-1, c_0..c_B-1]

    S, B, M, NH = seq_len, batch, mem_len, num_heads

    x = x_ref[...].astype(jnp.float32)        # (S*B, D), row = s*B + b
    mem = mem_ref[...].astype(jnp.float32)    # (M*B, D), row = m*B + b
    h = h0_ref[...].astype(jnp.float32)       # (B, H)
    c = c0_ref[...].astype(jnp.float32)       # (B, H)
    H = h.shape[-1]

    # pre_layer / encoder_input_pre_layer -> ReLU (dropout identity in eval)
    pre = _linear(x, w['pre_w'][...], w['pre_b'][...], relu=True)           # (S*B, H)
    enc_in = _linear(x, w['enc_in_w'][...], w['enc_in_b'][...], relu=True)  # (S*B, H)

    # ---- LSTM: batch folded into sublanes; input projection hoisted out ----
    gates_x = (jnp.dot(pre, w['lstm_wih'][...],
                       preferred_element_type=jnp.float32)
               + w['lstm_b'][...])                                          # (S*B, 4H)
    whh = w['lstm_whh'][...]
    hs = []
    for t in range(S):                          # unrolled recurrence
        g = gates_x[t * B:(t + 1) * B, :] + jnp.dot(
            h, whh, preferred_element_type=jnp.float32)                     # (B, 4H)
        sg = jax.nn.sigmoid(g)                  # full-width EUP pass
        th = jnp.tanh(g)
        i_g = sg[:, 0:H]
        f_g = sg[:, H:2 * H]
        g_g = th[:, 2 * H:3 * H]
        o_g = sg[:, 3 * H:4 * H]
        c = f_g * c + i_g * g_g
        h = o_g * jnp.tanh(c)
        hs.append(h)
    # Kept in registers (no VMEM scratch / masked per-step stores).
    lstm_out = jnp.concatenate(hs, axis=0)      # (S*B, H), row = s*B + b

    # Final (h, c) packed into one lane-dense slab.
    hc_lanes = hc_ref.shape[-1]
    hc = jnp.concatenate([_pad_lanes(h, hc_lanes), _pad_lanes(c, hc_lanes)], axis=0)
    hc_ref[...] = hc.astype(hc_ref.dtype)

    # encoder_pre_layer: first Linear consumes concat([lstm_out, enc_in], -1);
    # split the (2H, H) weight instead of materializing the concat.
    w1 = w['encpre_w1'][...]
    y = (jnp.dot(lstm_out, w1[0:H, :], preferred_element_type=jnp.float32)
         + jnp.dot(enc_in, w1[H:2 * H, :], preferred_element_type=jnp.float32)
         + w['encpre_b1'][...])
    y = jnp.maximum(y, 0.0)
    y = _linear(y, w['encpre_w2'][...], w['encpre_b2'][...], relu=True)
    y = _linear(y, w['encpre_w3'][...], w['encpre_b3'][...], relu=True)     # (S*B, H)

    # memory_pre_layer -> ReLU (dropout identity)
    enc_mem = _linear(mem, w['mem_w'][...], w['mem_b'][...], relu=True)     # (M*B, H)

    # ---- Transformer encoder + decoder layers + output MLP, per batch ----
    # Attention is block-diagonal over batch; B is tiny, loop is unrolled.
    for b in range(B):
        yb = _gather_batch_rows(y, b, S, B)          # (S, H)
        mb = _gather_batch_rows(enc_mem, b, M, B)    # (M, H)

        # TransformerEncoderLayer (post-norm, eval, ReLU FF)
        qkv = _linear(yb, w['enc_sa_wqkv'][...], w['enc_sa_bqkv'][...])     # (S, 3H)
        sa = _mha(qkv[:, 0:H], qkv[:, H:2 * H], qkv[:, 2 * H:3 * H],
                  w['enc_sa_wo'][...], w['enc_sa_bo'][...], NH)
        yb = _add_layernorm(sa, yb, w['enc_ln1_g'][...], w['enc_ln1_b'][...])
        ff = _linear(yb, w['enc_ff_w1'][...], w['enc_ff_b1'][...], relu=True)
        ff = _linear(ff, w['enc_ff_w2'][...], w['enc_ff_b2'][...])
        yb = _add_layernorm(ff, yb, w['enc_ln2_g'][...], w['enc_ln2_b'][...])

        # TransformerDecoderLayer (post-norm, eval, no masks)
        qkv = _linear(yb, w['dec_sa_wqkv'][...], w['dec_sa_bqkv'][...])
        sa = _mha(qkv[:, 0:H], qkv[:, H:2 * H], qkv[:, 2 * H:3 * H],
                  w['dec_sa_wo'][...], w['dec_sa_bo'][...], NH)
        yb = _add_layernorm(sa, yb, w['dec_ln1_g'][...], w['dec_ln1_b'][...])

        q = _linear(yb, w['dec_ca_wq'][...], w['dec_ca_bq'][...])           # (S, H)
        kv = _linear(mb, w['dec_ca_wkv'][...], w['dec_ca_bkv'][...])        # (M, 2H)
        ca = _mha(q, kv[:, 0:H], kv[:, H:2 * H],
                  w['dec_ca_wo'][...], w['dec_ca_bo'][...], NH)
        yb = _add_layernorm(ca, yb, w['dec_ln2_g'][...], w['dec_ln2_b'][...])

        ff = _linear(yb, w['dec_ff_w1'][...], w['dec_ff_b1'][...], relu=True)
        ff = _linear(ff, w['dec_ff_w2'][...], w['dec_ff_b2'][...])
        yb = _add_layernorm(ff, yb, w['dec_ln3_g'][...], w['dec_ln3_b'][...])

        # output_layer: Linear->ReLU->Linear->ReLU->Linear; the final W/b are
        # lane-padded in the wrapper so this store is a full-width (lane-dense) vst.
        o = _linear(yb, w['out_w1'][...], w['out_b1'][...], relu=True)
        o = _linear(o, w['out_w2'][...], w['out_b2'][...], relu=True)
        o = _linear(o, w['out_w3'][...], w['out_b3'][...])                  # (S, out_lanes)
        out_ref[b] = o.astype(out_ref.dtype)


# ---------------------------------------------------------------------------
# Wrapper: layout glue (zero-copy reshapes only) + pallas_call, under jit
# ---------------------------------------------------------------------------

def _full_spec(shape):
    zeros = (0,) * len(shape)
    return pl.BlockSpec(tuple(shape), lambda i: zeros)


@functools.partial(jax.jit, static_argnames=('hidden_dim', 'num_heads', 'output_dim'))
def _forward_impl(weights, inputs, memory, hidden_state, cell_state, *,
                  hidden_dim, num_heads, output_dim):
    S, B, D = inputs.shape
    M = memory.shape[0]
    H = hidden_dim
    out_lanes = _round_up(max(output_dim, 1), _LANES)
    hc_lanes = _round_up(H, _LANES)

    # Zero-copy layout glue: (S,B,D) row-major == (S*B,D) row-major; no transposes.
    x2 = inputs.reshape(S * B, D)
    mem2 = memory.reshape(M * B, D)
    h0 = hidden_state.reshape(B, H)
    c0 = cell_state.reshape(B, H)

    # Lane-pad the final projection so the kernel's main output is lane-dense.
    w_list = []
    for name in _PARAM_ORDER:
        wt = weights[name]
        if name in ('out_w3', 'out_b3'):
            wt = jnp.pad(wt, ((0, 0), (0, out_lanes - wt.shape[1])))
        w_list.append(wt)

    in_arrays = [x2, mem2, h0, c0] + w_list
    in_specs = [_full_spec(a.shape) for a in in_arrays]

    out_shape = (jax.ShapeDtypeStruct((B, S, out_lanes), inputs.dtype),
                 jax.ShapeDtypeStruct((2 * B, hc_lanes), inputs.dtype))
    out_specs = (_full_spec((B, S, out_lanes)),
                 _full_spec((2 * B, hc_lanes)))

    kernel = functools.partial(_fused_forward_kernel, seq_len=S, mem_len=M,
                               batch=B, num_heads=num_heads)

    out_slab, hc_slab = pl.pallas_call(
        kernel,
        grid=(1,),                              # single step: whole batch in-block
        out_shape=out_shape,
        in_specs=in_specs,
        out_specs=out_specs,
        compiler_params=pltpu.CompilerParams(
            dimension_semantics=("arbitrary",),
            vmem_limit_bytes=32 * 1024 * 1024),
    )(*in_arrays)

    # Slice the lane-padded slabs back to the PyTorch return shapes (tiny).
    out = jnp.transpose(out_slab[:, :, :output_dim], (1, 0, 2))   # (S, B, OUT)
    hT = hc_slab[0:B, :H].reshape(1, B, H)
    cT = hc_slab[B:2 * B, :H].reshape(1, B, H)
    return out, hT, cT


def lstm_attention_forward(params, inputs, memory, hidden_state, cell_state):
    """Pallas re-implementation of LSTMAttention.forward (eval semantics)."""
    weights = {name: params[name] for name in _PARAM_ORDER}
    return _forward_impl(weights, inputs, memory, hidden_state, cell_state,
                         hidden_dim=params['hidden_dim'],
                         num_heads=params['num_heads'],
                         output_dim=params['output_dim'])


# ---------------------------------------------------------------------------
# Deterministic parameter initialization (synthetic weights, not a checkpoint)
# ---------------------------------------------------------------------------

def init_params(key, D, H, num_heads, ff_dim, output_dim):
    keys = iter(jax.random.split(key, 128))

    def lin(din, dout, scale=0.1):
        return (jax.random.normal(next(keys), (din, dout), jnp.float32) * scale,
                jax.random.normal(next(keys), (1, dout), jnp.float32) * scale)

    p = {'hidden_dim': H, 'num_heads': num_heads, 'output_dim': output_dim}
    p['pre_w'], p['pre_b'] = lin(D, H)
    p['enc_in_w'], p['enc_in_b'] = lin(D, H)
    p['mem_w'], p['mem_b'] = lin(D, H)

    # LSTM weights in math layout (in, 4H); gate order i, f, g, o.
    # PyTorch's two biases only ever appear summed -> store bias_ih + bias_hh.
    p['lstm_wih'] = jax.random.normal(next(keys), (H, 4 * H), jnp.float32) * 0.1
    p['lstm_whh'] = jax.random.normal(next(keys), (H, 4 * H), jnp.float32) * 0.1
    b_ih = jax.random.normal(next(keys), (1, 4 * H), jnp.float32) * 0.1
    b_hh = jax.random.normal(next(keys), (1, 4 * H), jnp.float32) * 0.1
    p['lstm_b'] = b_ih + b_hh

    p['encpre_w1'], p['encpre_b1'] = lin(2 * H, H)
    p['encpre_w2'], p['encpre_b2'] = lin(H, H)
    p['encpre_w3'], p['encpre_b3'] = lin(H, H)

    # Encoder layer; QKV merged into one (H, 3H) weight (PyTorch in_proj^T).
    p['enc_sa_wqkv'], p['enc_sa_bqkv'] = lin(H, 3 * H)
    p['enc_sa_wo'], p['enc_sa_bo'] = lin(H, H)
    p['enc_ff_w1'], p['enc_ff_b1'] = lin(H, ff_dim)
    p['enc_ff_w2'], p['enc_ff_b2'] = lin(ff_dim, H)
    for n in ('enc_ln1', 'enc_ln2'):
        p[n + '_g'] = jnp.ones((1, H), jnp.float32)
        p[n + '_b'] = jnp.zeros((1, H), jnp.float32)

    # Decoder layer.
    p['dec_sa_wqkv'], p['dec_sa_bqkv'] = lin(H, 3 * H)
    p['dec_sa_wo'], p['dec_sa_bo'] = lin(H, H)
    p['dec_ca_wq'], p['dec_ca_bq'] = lin(H, H)
    p['dec_ca_wkv'], p['dec_ca_bkv'] = lin(H, 2 * H)
    p['dec_ca_wo'], p['dec_ca_bo'] = lin(H, H)
    p['dec_ff_w1'], p['dec_ff_b1'] = lin(H, ff_dim)
    p['dec_ff_w2'], p['dec_ff_b2'] = lin(ff_dim, H)
    for n in ('dec_ln1', 'dec_ln2', 'dec_ln3'):
        p[n + '_g'] = jnp.ones((1, H), jnp.float32)
        p[n + '_b'] = jnp.zeros((1, H), jnp.float32)

    p['out_w1'], p['out_b1'] = lin(H, H)
    p['out_w2'], p['out_b2'] = lin(H, H)
    p['out_w3'], p['out_b3'] = lin(H, output_dim)
    return p


# ---------------------------------------------------------------------------
# Driver
# ---------------------------------------------------------------------------

if __name__ == "__main__":
    S, B, D = 8, 2, 16             # seq_length, batch, input_dim
    H, NH, FF, OUT = 32, 8, 32, 1  # hidden_dim, num_heads, ff_dim, output_dim
    M = 8                          # memory length

    key = jax.random.PRNGKey(0)
    kp, ki, km = jax.random.split(key, 3)

    params = init_params(kp, D, H, NH, FF, OUT)
    inputs = jax.random.normal(ki, (S, B, D), jnp.float32)
    memory = jax.random.normal(km, (M, B, D), jnp.float32)
    hidden_state = jnp.zeros((1, B, H), jnp.float32)
    cell_state = jnp.zeros((1, B, H), jnp.float32)

    out, hT, cT = lstm_attention_forward(params, inputs, memory,
                                         hidden_state, cell_state)
    jax.block_until_ready((out, hT, cT))

    assert out.shape == (S, B, OUT)
    assert hT.shape == (1, B, H) and cT.shape == (1, B, H)
    assert bool(jnp.all(jnp.isfinite(out)))
    assert bool(jnp.all(jnp.isfinite(hT))) and bool(jnp.all(jnp.isfinite(cT)))
    print("KERNEL_OK")
</pallas_src>

<mosaic_0001>
module attributes {stable_mosaic.version = 11 : i64} {
  func.func @_fused_forward_kernel(%arg0: i32, %arg1: memref<16x16xf32, #tpu.memory_space<vmem>>, %arg2: memref<16x16xf32, #tpu.memory_space<vmem>>, %arg3: memref<2x32xf32, #tpu.memory_space<vmem>>, %arg4: memref<2x32xf32, #tpu.memory_space<vmem>>, %arg5: memref<16x32xf32, #tpu.memory_space<vmem>>, %arg6: memref<1x32xf32, #tpu.memory_space<vmem>>, %arg7: memref<16x32xf32, #tpu.memory_space<vmem>>, %arg8: memref<1x32xf32, #tpu.memory_space<vmem>>, %arg9: memref<16x32xf32, #tpu.memory_space<vmem>>, %arg10: memref<1x32xf32, #tpu.memory_space<vmem>>, %arg11: memref<32x128xf32, #tpu.memory_space<vmem>>, %arg12: memref<32x128xf32, #tpu.memory_space<vmem>>, %arg13: memref<1x128xf32, #tpu.memory_space<vmem>>, %arg14: memref<64x32xf32, #tpu.memory_space<vmem>>, %arg15: memref<1x32xf32, #tpu.memory_space<vmem>>, %arg16: memref<32x32xf32, #tpu.memory_space<vmem>>, %arg17: memref<1x32xf32, #tpu.memory_space<vmem>>, %arg18: memref<32x32xf32, #tpu.memory_space<vmem>>, %arg19: memref<1x32xf32, #tpu.memory_space<vmem>>, %arg20: memref<32x96xf32, #tpu.memory_space<vmem>>, %arg21: memref<1x96xf32, #tpu.memory_space<vmem>>, %arg22: memref<32x32xf32, #tpu.memory_space<vmem>>, %arg23: memref<1x32xf32, #tpu.memory_space<vmem>>, %arg24: memref<1x32xf32, #tpu.memory_space<vmem>>, %arg25: memref<1x32xf32, #tpu.memory_space<vmem>>, %arg26: memref<32x32xf32, #tpu.memory_space<vmem>>, %arg27: memref<1x32xf32, #tpu.memory_space<vmem>>, %arg28: memref<32x32xf32, #tpu.memory_space<vmem>>, %arg29: memref<1x32xf32, #tpu.memory_space<vmem>>, %arg30: memref<1x32xf32, #tpu.memory_space<vmem>>, %arg31: memref<1x32xf32, #tpu.memory_space<vmem>>, %arg32: memref<32x96xf32, #tpu.memory_space<vmem>>, %arg33: memref<1x96xf32, #tpu.memory_space<vmem>>, %arg34: memref<32x32xf32, #tpu.memory_space<vmem>>, %arg35: memref<1x32xf32, #tpu.memory_space<vmem>>, %arg36: memref<1x32xf32, #tpu.memory_space<vmem>>, %arg37: memref<1x32xf32, #tpu.memory_space<vmem>>, %arg38: memref<32x32xf32, #tpu.memory_space<vmem>>, %arg39: memref<1x32xf32, #tpu.memory_space<vmem>>, %arg40: memref<32x64xf32, #tpu.memory_space<vmem>>, %arg41: memref<1x64xf32, #tpu.memory_space<vmem>>, %arg42: memref<32x32xf32, #tpu.memory_space<vmem>>, %arg43: memref<1x32xf32, #tpu.memory_space<vmem>>, %arg44: memref<1x32xf32, #tpu.memory_space<vmem>>, %arg45: memref<1x32xf32, #tpu.memory_space<vmem>>, %arg46: memref<32x32xf32, #tpu.memory_space<vmem>>, %arg47: memref<1x32xf32, #tpu.memory_space<vmem>>, %arg48: memref<32x32xf32, #tpu.memory_space<vmem>>, %arg49: memref<1x32xf32, #tpu.memory_space<vmem>>, %arg50: memref<1x32xf32, #tpu.memory_space<vmem>>, %arg51: memref<1x32xf32, #tpu.memory_space<vmem>>, %arg52: memref<32x32xf32, #tpu.memory_space<vmem>>, %arg53: memref<1x32xf32, #tpu.memory_space<vmem>>, %arg54: memref<32x32xf32, #tpu.memory_space<vmem>>, %arg55: memref<1x32xf32, #tpu.memory_space<vmem>>, %arg56: memref<32x128xf32, #tpu.memory_space<vmem>>, %arg57: memref<1x128xf32, #tpu.memory_space<vmem>>, %arg58: memref<2x8x128xf32, #tpu.memory_space<vmem>>, %arg59: memref<4x128xf32, #tpu.memory_space<vmem>>) attributes {dimension_semantics = [#tpu.dimension_semantics<arbitrary>], iteration_bounds = array<i64: 1>, scalar_prefetch = 0 : i64, scratch_operands = 0 : i64, tpu.core_type = #tpu.core_type<tc>, window_params = [{pipeline_mode = #tpu.pipeline_mode<synchronous>, transform_indices = @transform_0, window_bounds = array<i64: 16, 16>}, {pipeline_mode = #tpu.pipeline_mode<synchronous>, transform_indices = @transform_1, window_bounds = array<i64: 16, 16>}, {pipeline_mode = #tpu.pipeline_mode<synchronous>, transform_indices = @transform_2, window_bounds = array<i64: 2, 32>}, {pipeline_mode = #tpu.pipeline_mode<synchronous>, transform_indices = @transform_3, window_bounds = array<i64: 2, 32>}, {pipeline_mode = #tpu.pipeline_mode<synchronous>, transform_indices = @transform_4, window_bounds = array<i64: 16, 32>}, {pipeline_mode = #tpu.pipeline_mode<synchronous>, transform_indices = @transform_5, window_bounds = array<i64: 1, 32>}, {pipeline_mode = #tpu.pipeline_mode<synchronous>, transform_indices = @transform_6, window_bounds = array<i64: 16, 32>}, {pipeline_mode = #tpu.pipeline_mode<synchronous>, transform_indices = @transform_7, window_bounds = array<i64: 1, 32>}, {pipeline_mode = #tpu.pipeline_mode<synchronous>, transform_indices = @transform_8, window_bounds = array<i64: 16, 32>}, {pipeline_mode = #tpu.pipeline_mode<synchronous>, transform_indices = @transform_9, window_bounds = array<i64: 1, 32>}, {pipeline_mode = #tpu.pipeline_mode<synchronous>, transform_indices = @transform_10, window_bounds = array<i64: 32, 128>}, {pipeline_mode = #tpu.pipeline_mode<synchronous>, transform_indices = @transform_11, window_bounds = array<i64: 32, 128>}, {pipeline_mode = #tpu.pipeline_mode<synchronous>, transform_indices = @transform_12, window_bounds = array<i64: 1, 128>}, {pipeline_mode = #tpu.pipeline_mode<synchronous>, transform_indices = @transform_13, window_bounds = array<i64: 64, 32>}, {pipeline_mode = #tpu.pipeline_mode<synchronous>, transform_indices = @transform_14, window_bounds = array<i64: 1, 32>}, {pipeline_mode = #tpu.pipeline_mode<synchronous>, transform_indices = @transform_15, window_bounds = array<i64: 32, 32>}, {pipeline_mode = #tpu.pipeline_mode<synchronous>, transform_indices = @transform_16, window_bounds = array<i64: 1, 32>}, {pipeline_mode = #tpu.pipeline_mode<synchronous>, transform_indices = @transform_17, window_bounds = array<i64: 32, 32>}, {pipeline_mode = #tpu.pipeline_mode<synchronous>, transform_indices = @transform_18, window_bounds = array<i64: 1, 32>}, {pipeline_mode = #tpu.pipeline_mode<synchronous>, transform_indices = @transform_19, window_bounds = array<i64: 32, 96>}, {pipeline_mode = #tpu.pipeline_mode<synchronous>, transform_indices = @transform_20, window_bounds = array<i64: 1, 96>}, {pipeline_mode = #tpu.pipeline_mode<synchronous>, transform_indices = @transform_21, window_bounds = array<i64: 32, 32>}, {pipeline_mode = #tpu.pipeline_mode<synchronous>, transform_indices = @transform_22, window_bounds = array<i64: 1, 32>}, {pipeline_mode = #tpu.pipeline_mode<synchronous>, transform_indices = @transform_23, window_bounds = array<i64: 1, 32>}, {pipeline_mode = #tpu.pipeline_mode<synchronous>, transform_indices = @transform_24, window_bounds = array<i64: 1, 32>}, {pipeline_mode = #tpu.pipeline_mode<synchronous>, transform_indices = @transform_25, window_bounds = array<i64: 32, 32>}, {pipeline_mode = #tpu.pipeline_mode<synchronous>, transform_indices = @transform_26, window_bounds = array<i64: 1, 32>}, {pipeline_mode = #tpu.pipeline_mode<synchronous>, transform_indices = @transform_27, window_bounds = array<i64: 32, 32>}, {pipeline_mode = #tpu.pipeline_mode<synchronous>, transform_indices = @transform_28, window_bounds = array<i64: 1, 32>}, {pipeline_mode = #tpu.pipeline_mode<synchronous>, transform_indices = @transform_29, window_bounds = array<i64: 1, 32>}, {pipeline_mode = #tpu.pipeline_mode<synchronous>, transform_indices = @transform_30, window_bounds = array<i64: 1, 32>}, {pipeline_mode = #tpu.pipeline_mode<synchronous>, transform_indices = @transform_31, window_bounds = array<i64: 32, 96>}, {pipeline_mode = #tpu.pipeline_mode<synchronous>, transform_indices = @transform_32, window_bounds = array<i64: 1, 96>}, {pipeline_mode = #tpu.pipeline_mode<synchronous>, transform_indices = @transform_33, window_bounds = array<i64: 32, 32>}, {pipeline_mode = #tpu.pipeline_mode<synchronous>, transform_indices = @transform_34, window_bounds = array<i64: 1, 32>}, {pipeline_mode = #tpu.pipeline_mode<synchronous>, transform_indices = @transform_35, window_bounds = array<i64: 1, 32>}, {pipeline_mode = #tpu.pipeline_mode<synchronous>, transform_indices = @transform_36, window_bounds = array<i64: 1, 32>}, {pipeline_mode = #tpu.pipeline_mode<synchronous>, transform_indices = @transform_37, window_bounds = array<i64: 32, 32>}, {pipeline_mode = #tpu.pipeline_mode<synchronous>, transform_indices = @transform_38, window_bounds = array<i64: 1, 32>}, {pipeline_mode = #tpu.pipeline_mode<synchronous>, transform_indices = @transform_39, window_bounds = array<i64: 32, 64>}, {pipeline_mode = #tpu.pipeline_mode<synchronous>, transform_indices = @transform_40, window_bounds = array<i64: 1, 64>}, {pipeline_mode = #tpu.pipeline_mode<synchronous>, transform_indices = @transform_41, window_bounds = array<i64: 32, 32>}, {pipeline_mode = #tpu.pipeline_mode<synchronous>, transform_indices = @transform_42, window_bounds = array<i64: 1, 32>}, {pipeline_mode = #tpu.pipeline_mode<synchronous>, transform_indices = @transform_43, window_bounds = array<i64: 1, 32>}, {pipeline_mode = #tpu.pipeline_mode<synchronous>, transform_indices = @transform_44, window_bounds = array<i64: 1, 32>}, {pipeline_mode = #tpu.pipeline_mode<synchronous>, transform_indices = @transform_45, window_bounds = array<i64: 32, 32>}, {pipeline_mode = #tpu.pipeline_mode<synchronous>, transform_indices = @transform_46, window_bounds = array<i64: 1, 32>}, {pipeline_mode = #tpu.pipeline_mode<synchronous>, transform_indices = @transform_47, window_bounds = array<i64: 32, 32>}, {pipeline_mode = #tpu.pipeline_mode<synchronous>, transform_indices = @transform_48, window_bounds = array<i64: 1, 32>}, {pipeline_mode = #tpu.pipeline_mode<synchronous>, transform_indices = @transform_49, window_bounds = array<i64: 1, 32>}, {pipeline_mode = #tpu.pipeline_mode<synchronous>, transform_indices = @transform_50, window_bounds = array<i64: 1, 32>}, {pipeline_mode = #tpu.pipeline_mode<synchronous>, transform_indices = @transform_51, window_bounds = array<i64: 32, 32>}, {pipeline_mode = #tpu.pipeline_mode<synchronous>, transform_indices = @transform_52, window_bounds = array<i64: 1, 32>}, {pipeline_mode = #tpu.pipeline_mode<synchronous>, transform_indices = @transform_53, window_bounds = array<i64: 32, 32>}, {pipeline_mode = #tpu.pipeline_mode<synchronous>, transform_indices = @transform_54, window_bounds = array<i64: 1, 32>}, {pipeline_mode = #tpu.pipeline_mode<synchronous>, transform_indices = @transform_55, window_bounds = array<i64: 32, 128>}, {pipeline_mode = #tpu.pipeline_mode<synchronous>, transform_indices = @transform_56, window_bounds = array<i64: 1, 128>}, {pipeline_mode = #tpu.pipeline_mode<synchronous>, transform_indices = @transform_57, window_bounds = array<i64: 2, 8, 128>}, {pipeline_mode = #tpu.pipeline_mode<synchronous>, transform_indices = @transform_58, window_bounds = array<i64: 4, 128>}]} {
    %c0 = arith.constant 0 : index
    %c0_0 = arith.constant 0 : index
    %0 = vector.load %arg1[%c0, %c0_0] : memref<16x16xf32, #tpu.memory_space<vmem>>, vector<16x16xf32>
    %c0_1 = arith.constant 0 : index
    %c0_2 = arith.constant 0 : index
    %1 = vector.load %arg2[%c0_1, %c0_2] : memref<16x16xf32, #tpu.memory_space<vmem>>, vector<16x16xf32>
    %c0_3 = arith.constant 0 : index
    %c0_4 = arith.constant 0 : index
    %2 = vector.load %arg3[%c0_3, %c0_4] : memref<2x32xf32, #tpu.memory_space<vmem>>, vector<2x32xf32>
    %c0_5 = arith.constant 0 : index
    %c0_6 = arith.constant 0 : index
    %3 = vector.load %arg4[%c0_5, %c0_6] : memref<2x32xf32, #tpu.memory_space<vmem>>, vector<2x32xf32>
    %c0_7 = arith.constant 0 : index
    %c0_8 = arith.constant 0 : index
    %4 = vector.load %arg5[%c0_7, %c0_8] : memref<16x32xf32, #tpu.memory_space<vmem>>, vector<16x32xf32>
    %c0_9 = arith.constant 0 : index
    %c0_10 = arith.constant 0 : index
    %5 = vector.load %arg6[%c0_9, %c0_10] : memref<1x32xf32, #tpu.memory_space<vmem>>, vector<1x32xf32>
    %cst = arith.constant dense<0.000000e+00> : vector<16x32xf32>
    %6 = tpu.matmul %0, %4, %cst {dimension_numbers = #tpu.dot_dimension_numbers<[1], [0], [0], [1], [0, 0, 1, 1], [], []>} : vector<16x16xf32>, vector<16x32xf32>, vector<16x32xf32> -> vector<16x32xf32>
    %7 = vector.broadcast %5 : vector<1x32xf32> to vector<16x32xf32>
    %8 = arith.addf %6, %7 : vector<16x32xf32>
    %cst_11 = arith.constant 0.000000e+00 : f32
    %9 = vector.broadcast %cst_11 : f32 to vector<16x32xf32>
    %10 = arith.maximumf %8, %9 : vector<16x32xf32>
    %c0_12 = arith.constant 0 : index
    %c0_13 = arith.constant 0 : index
    %11 = vector.load %arg7[%c0_12, %c0_13] : memref<16x32xf32, #tpu.memory_space<vmem>>, vector<16x32xf32>
    %c0_14 = arith.constant 0 : index
    %c0_15 = arith.constant 0 : index
    %12 = vector.load %arg8[%c0_14, %c0_15] : memref<1x32xf32, #tpu.memory_space<vmem>>, vector<1x32xf32>
    %cst_16 = arith.constant dense<0.000000e+00> : vector<16x32xf32>
    %13 = tpu.matmul %0, %11, %cst_16 {dimension_numbers = #tpu.dot_dimension_numbers<[1], [0], [0], [1], [0, 0, 1, 1], [], []>} : vector<16x16xf32>, vector<16x32xf32>, vector<16x32xf32> -> vector<16x32xf32>
    %14 = vector.broadcast %12 : vector<1x32xf32> to vector<16x32xf32>
    %15 = arith.addf %13, %14 : vector<16x32xf32>
    %cst_17 = arith.constant 0.000000e+00 : f32
    %16 = vector.broadcast %cst_17 : f32 to vector<16x32xf32>
    %17 = arith.maximumf %15, %16 : vector<16x32xf32>
    %c0_18 = arith.constant 0 : index
    %c0_19 = arith.constant 0 : index
    %18 = vector.load %arg11[%c0_18, %c0_19] : memref<32x128xf32, #tpu.memory_space<vmem>>, vector<32x128xf32>
    %cst_20 = arith.constant dense<0.000000e+00> : vector<16x128xf32>
    %19 = tpu.matmul %10, %18, %cst_20 {dimension_numbers = #tpu.dot_dimension_numbers<[1], [0], [0], [1], [0, 0, 1, 1], [], []>} : vector<16x32xf32>, vector<32x128xf32>, vector<16x128xf32> -> vector<16x128xf32>
    %c0_21 = arith.constant 0 : index
    %c0_22 = arith.constant 0 : index
    %20 = vector.load %arg13[%c0_21, %c0_22] : memref<1x128xf32, #tpu.memory_space<vmem>>, vector<1x128xf32>
    %21 = vector.broadcast %20 : vector<1x128xf32> to vector<16x128xf32>
    %22 = arith.addf %19, %21 : vector<16x128xf32>
    %c0_23 = arith.constant 0 : index
    %c0_24 = arith.constant 0 : index
    %23 = vector.load %arg12[%c0_23, %c0_24] : memref<32x128xf32, #tpu.memory_space<vmem>>, vector<32x128xf32>
    %24 = vector.extract_strided_slice %22 {offsets = [0, 0], sizes = [2, 128], strides = [1, 1]} : vector<16x128xf32> to vector<2x128xf32>
    %cst_25 = arith.constant dense<0.000000e+00> : vector<2x128xf32>
    %25 = tpu.matmul %2, %23, %cst_25 {dimension_numbers = #tpu.dot_dimension_numbers<[1], [0], [0], [1], [0, 0, 1, 1], [], []>} : vector<2x32xf32>, vector<32x128xf32>, vector<2x128xf32> -> vector<2x128xf32>
    %26 = arith.addf %24, %25 : vector<2x128xf32>
    %27 = arith.negf %26 : vector<2x128xf32>
    %28 = math.exp %27 : vector<2x128xf32>
    %cst_26 = arith.constant 1.000000e+00 : f32
    %29 = vector.broadcast %cst_26 : f32 to vector<2x128xf32>
    %30 = arith.addf %29, %28 : vector<2x128xf32>
    %31 = arith.divf %29, %30 : vector<2x128xf32>
    %32 = math.tanh %26 : vector<2x128xf32>
    %33 = vector.extract_strided_slice %31 {offsets = [0, 0], sizes = [2, 32], strides = [1, 1]} : vector<2x128xf32> to vector<2x32xf32>
    %34 = vector.extract_strided_slice %31 {offsets = [0, 32], sizes = [2, 32], strides = [1, 1]} : vector<2x128xf32> to vector<2x32xf32>
    %35 = vector.extract_strided_slice %32 {offsets = [0, 64], sizes = [2, 32], strides = [1, 1]} : vector<2x128xf32> to vector<2x32xf32>
    %36 = vector.extract_strided_slice %31 {offsets = [0, 96], sizes = [2, 32], strides = [1, 1]} : vector<2x128xf32> to vector<2x32xf32>
    %37 = arith.mulf %34, %3 : vector<2x32xf32>
    %38 = arith.mulf %33, %35 : vector<2x32xf32>
    %39 = arith.addf %37, %38 : vector<2x32xf32>
    %40 = math.tanh %39 : vector<2x32xf32>
    %41 = arith.mulf %36, %40 : vector<2x32xf32>
    %42 = vector.extract_strided_slice %22 {offsets = [2, 0], sizes = [2, 128], strides = [1, 1]} : vector<16x128xf32> to vector<2x128xf32>
    %cst_27 = arith.constant dense<0.000000e+00> : vector<2x128xf32>
    %43 = tpu.matmul %41, %23, %cst_27 {dimension_numbers = #tpu.dot_dimension_numbers<[1], [0], [0], [1], [0, 0, 1, 1], [], []>} : vector<2x32xf32>, vector<32x128xf32>, vector<2x128xf32> -> vector<2x128xf32>
    %44 = arith.addf %42, %43 : vector<2x128xf32>
    %45 = arith.negf %44 : vector<2x128xf32>
    %46 = math.exp %45 : vector<2x128xf32>
    %cst_28 = arith.constant 1.000000e+00 : f32
    %47 = vector.broadcast %cst_28 : f32 to vector<2x128xf32>
    %48 = arith.addf %47, %46 : vector<2x128xf32>
    %49 = arith.divf %47, %48 : vector<2x128xf32>
    %50 = math.tanh %44 : vector<2x128xf32>
    %51 = vector.extract_strided_slice %49 {offsets = [0, 0], sizes = [2, 32], strides = [1, 1]} : vector<2x128xf32> to vector<2x32xf32>
    %52 = vector.extract_strided_slice %49 {offsets = [0, 32], sizes = [2, 32], strides = [1, 1]} : vector<2x128xf32> to vector<2x32xf32>
    %53 = vector.extract_strided_slice %50 {offsets = [0, 64], sizes = [2, 32], strides = [1, 1]} : vector<2x128xf32> to vector<2x32xf32>
    %54 = vector.extract_strided_slice %49 {offsets = [0, 96], sizes = [2, 32], strides = [1, 1]} : vector<2x128xf32> to vector<2x32xf32>
    %55 = arith.mulf %52, %39 : vector<2x32xf32>
    %56 = arith.mulf %51, %53 : vector<2x32xf32>
    %57 = arith.addf %55, %56 : vector<2x32xf32>
    %58 = math.tanh %57 : vector<2x32xf32>
    %59 = arith.mulf %54, %58 : vector<2x32xf32>
    %60 = vector.extract_strided_slice %22 {offsets = [4, 0], sizes = [2, 128], strides = [1, 1]} : vector<16x128xf32> to vector<2x128xf32>
    %cst_29 = arith.constant dense<0.000000e+00> : vector<2x128xf32>
    %61 = tpu.matmul %59, %23, %cst_29 {dimension_numbers = #tpu.dot_dimension_numbers<[1], [0], [0], [1], [0, 0, 1, 1], [], []>} : vector<2x32xf32>, vector<32x128xf32>, vector<2x128xf32> -> vector<2x128xf32>
    %62 = arith.addf %60, %61 : vector<2x128xf32>
    %63 = arith.negf %62 : vector<2x128xf32>
    %64 = math.exp %63 : vector<2x128xf32>
    %cst_30 = arith.constant 1.000000e+00 : f32
    %65 = vector.broadcast %cst_30 : f32 to vector<2x128xf32>
    %66 = arith.addf %65, %64 : vector<2x128xf32>
    %67 = arith.divf %65, %66 : vector<2x128xf32>
    %68 = math.tanh %62 : vector<2x128xf32>
    %69 = vector.extract_strided_slice %67 {offsets = [0, 0], sizes = [2, 32], strides = [1, 1]} : vector<2x128xf32> to vector<2x32xf32>
    %70 = vector.extract_strided_slice %67 {offsets = [0, 32], sizes = [2, 32], strides = [1, 1]} : vector<2x128xf32> to vector<2x32xf32>
    %71 = vector.extract_strided_slice %68 {offsets = [0, 64], sizes = [2, 32], strides = [1, 1]} : vector<2x128xf32> to vector<2x32xf32>
    %72 = vector.extract_strided_slice %67 {offsets = [0, 96], sizes = [2, 32], strides = [1, 1]} : vector<2x128xf32> to vector<2x32xf32>
    %73 = arith.mulf %70, %57 : vector<2x32xf32>
    %74 = arith.mulf %69, %71 : vector<2x32xf32>
    %75 = arith.addf %73, %74 : vector<2x32xf32>
    %76 = math.tanh %75 : vector<2x32xf32>
    %77 = arith.mulf %72, %76 : vector<2x32xf32>
    %78 = vector.extract_strided_slice %22 {offsets = [6, 0], sizes = [2, 128], strides = [1, 1]} : vector<16x128xf32> to vector<2x128xf32>
    %cst_31 = arith.constant dense<0.000000e+00> : vector<2x128xf32>
    %79 = tpu.matmul %77, %23, %cst_31 {dimension_numbers = #tpu.dot_dimension_numbers<[1], [0], [0], [1], [0, 0, 1, 1], [], []>} : vector<2x32xf32>, vector<32x128xf32>, vector<2x128xf32> -> vector<2x128xf32>
    %80 = arith.addf %78, %79 : vector<2x128xf32>
    %81 = arith.negf %80 : vector<2x128xf32>
    %82 = math.exp %81 : vector<2x128xf32>
    %cst_32 = arith.constant 1.000000e+00 : f32
    %83 = vector.broadcast %cst_32 : f32 to vector<2x128xf32>
    %84 = arith.addf %83, %82 : vector<2x128xf32>
    %85 = arith.divf %83, %84 : vector<2x128xf32>
    %86 = math.tanh %80 : vector<2x128xf32>
    %87 = vector.extract_strided_slice %85 {offsets = [0, 0], sizes = [2, 32], strides = [1, 1]} : vector<2x128xf32> to vector<2x32xf32>
    %88 = vector.extract_strided_slice %85 {offsets = [0, 32], sizes = [2, 32], strides = [1, 1]} : vector<2x128xf32> to vector<2x32xf32>
    %89 = vector.extract_strided_slice %86 {offsets = [0, 64], sizes = [2, 32], strides = [1, 1]} : vector<2x128xf32> to vector<2x32xf32>
    %90 = vector.extract_strided_slice %85 {offsets = [0, 96], sizes = [2, 32], strides = [1, 1]} : vector<2x128xf32> to vector<2x32xf32>
    %91 = arith.mulf %88, %75 : vector<2x32xf32>
    %92 = arith.mulf %87, %89 : vector<2x32xf32>
    %93 = arith.addf %91, %92 : vector<2x32xf32>
    %94 = math.tanh %93 : vector<2x32xf32>
    %95 = arith.mulf %90, %94 : vector<2x32xf32>
    %96 = vector.extract_strided_slice %22 {offsets = [8, 0], sizes = [2, 128], strides = [1, 1]} : vector<16x128xf32> to vector<2x128xf32>
    %cst_33 = arith.constant dense<0.000000e+00> : vector<2x128xf32>
    %97 = tpu.matmul %95, %23, %cst_33 {dimension_numbers = #tpu.dot_dimension_numbers<[1], [0], [0], [1], [0, 0, 1, 1], [], []>} : vector<2x32xf32>, vector<32x128xf32>, vector<2x128xf32> -> vector<2x128xf32>
    %98 = arith.addf %96, %97 : vector<2x128xf32>
    %99 = arith.negf %98 : vector<2x128xf32>
    %100 = math.exp %99 : vector<2x128xf32>
    %cst_34 = arith.constant 1.000000e+00 : f32
    %101 = vector.broadcast %cst_34 : f32 to vector<2x128xf32>
    %102 = arith.addf %101, %100 : vector<2x128xf32>
    %103 = arith.divf %101, %102 : vector<2x128xf32>
    %104 = math.tanh %98 : vector<2x128xf32>
    %105 = vector.extract_strided_slice %103 {offsets = [0, 0], sizes = [2, 32], strides = [1, 1]} : vector<2x128xf32> to vector<2x32xf32>
    %106 = vector.extract_strided_slice %103 {offsets = [0, 32], sizes = [2, 32], strides = [1, 1]} : vector<2x128xf32> to vector<2x32xf32>
    %107 = vector.extract_strided_slice %104 {offsets = [0, 64], sizes = [2, 32], strides = [1, 1]} : vector<2x128xf32> to vector<2x32xf32>
    %108 = vector.extract_strided_slice %103 {offsets = [0, 96], sizes = [2, 32], strides = [1, 1]} : vector<2x128xf32> to vector<2x32xf32>
    %109 = arith.mulf %106, %93 : vector<2x32xf32>
    %110 = arith.mulf %105, %107 : vector<2x32xf32>
    %111 = arith.addf %109, %110 : vector<2x32xf32>
    %112 = math.tanh %111 : vector<2x32xf32>
    %113 = arith.mulf %108, %112 : vector<2x32xf32>
    %114 = vector.extract_strided_slice %22 {offsets = [10, 0], sizes = [2, 128], strides = [1, 1]} : vector<16x128xf32> to vector<2x128xf32>
    %cst_35 = arith.constant dense<0.000000e+00> : vector<2x128xf32>
    %115 = tpu.matmul %113, %23, %cst_35 {dimension_numbers = #tpu.dot_dimension_numbers<[1], [0], [0], [1], [0, 0, 1, 1], [], []>} : vector<2x32xf32>, vector<32x128xf32>, vector<2x128xf32> -> vector<2x128xf32>
    %116 = arith.addf %114, %115 : vector<2x128xf32>
    %117 = arith.negf %116 : vector<2x128xf32>
    %118 = math.exp %117 : vector<2x128xf32>
    %cst_36 = arith.constant 1.000000e+00 : f32
    %119 = vector.broadcast %cst_36 : f32 to vector<2x128xf32>
    %120 = arith.addf %119, %118 : vector<2x128xf32>
    %121 = arith.divf %119, %120 : vector<2x128xf32>
    %122 = math.tanh %116 : vector<2x128xf32>
    %123 = vector.extract_strided_slice %121 {offsets = [0, 0], sizes = [2, 32], strides = [1, 1]} : vector<2x128xf32> to vector<2x32xf32>
    %124 = vector.extract_strided_slice %121 {offsets = [0, 32], sizes = [2, 32], strides = [1, 1]} : vector<2x128xf32> to vector<2x32xf32>
    %125 = vector.extract_strided_slice %122 {offsets = [0, 64], sizes = [2, 32], strides = [1, 1]} : vector<2x128xf32> to vector<2x32xf32>
    %126 = vector.extract_strided_slice %121 {offsets = [0, 96], sizes = [2, 32], strides = [1, 1]} : vector<2x128xf32> to vector<2x32xf32>
    %127 = arith.mulf %124, %111 : vector<2x32xf32>
    %128 = arith.mulf %123, %125 : vector<2x32xf32>
    %129 = arith.addf %127, %128 : vector<2x32xf32>
    %130 = math.tanh %129 : vector<2x32xf32>
    %131 = arith.mulf %126, %130 : vector<2x32xf32>
    %132 = vector.extract_strided_slice %22 {offsets = [12, 0], sizes = [2, 128], strides = [1, 1]} : vector<16x128xf32> to vector<2x128xf32>
    %cst_37 = arith.constant dense<0.000000e+00> : vector<2x128xf32>
    %133 = tpu.matmul %131, %23, %cst_37 {dimension_numbers = #tpu.dot_dimension_numbers<[1], [0], [0], [1], [0, 0, 1, 1], [], []>} : vector<2x32xf32>, vector<32x128xf32>, vector<2x128xf32> -> vector<2x128xf32>
    %134 = arith.addf %132, %133 : vector<2x128xf32>
    %135 = arith.negf %134 : vector<2x128xf32>
    %136 = math.exp %135 : vector<2x128xf32>
    %cst_38 = arith.constant 1.000000e+00 : f32
    %137 = vector.broadcast %cst_38 : f32 to vector<2x128xf32>
    %138 = arith.addf %137, %136 : vector<2x128xf32>
    %139 = arith.divf %137, %138 : vector<2x128xf32>
    %140 = math.tanh %134 : vector<2x128xf32>
    %141 = vector.extract_strided_slice %139 {offsets = [0, 0], sizes = [2, 32], strides = [1, 1]} : vector<2x128xf32> to vector<2x32xf32>
    %142 = vector.extract_strided_slice %139 {offsets = [0, 32], sizes = [2, 32], strides = [1, 1]} : vector<2x128xf32> to vector<2x32xf32>
    %143 = vector.extract_strided_slice %140 {offsets = [0, 64], sizes = [2, 32], strides = [1, 1]} : vector<2x128xf32> to vector<2x32xf32>
    %144 = vector.extract_strided_slice %139 {offsets = [0, 96], sizes = [2, 32], strides = [1, 1]} : vector<2x128xf32> to vector<2x32xf32>
    %145 = arith.mulf %142, %129 : vector<2x32xf32>
    %146 = arith.mulf %141, %143 : vector<2x32xf32>
    %147 = arith.addf %145, %146 : vector<2x32xf32>
    %148 = math.tanh %147 : vector<2x32xf32>
    %149 = arith.mulf %144, %148 : vector<2x32xf32>
    %150 = vector.extract_strided_slice %22 {offsets = [14, 0], sizes = [2, 128], strides = [1, 1]} : vector<16x128xf32> to vector<2x128xf32>
    %cst_39 = arith.constant dense<0.000000e+00> : vector<2x128xf32>
    %151 = tpu.matmul %149, %23, %cst_39 {dimension_numbers = #tpu.dot_dimension_numbers<[1], [0], [0], [1], [0, 0, 1, 1], [], []>} : vector<2x32xf32>, vector<32x128xf32>, vector<2x128xf32> -> vector<2x128xf32>
    %152 = arith.addf %150, %151 : vector<2x128xf32>
    %153 = arith.negf %152 : vector<2x128xf32>
    %154 = math.exp %153 : vector<2x128xf32>
    %cst_40 = arith.constant 1.000000e+00 : f32
    %155 = vector.broadcast %cst_40 : f32 to vector<2x128xf32>
    %156 = arith.addf %155, %154 : vector<2x128xf32>
    %157 = arith.divf %155, %156 : vector<2x128xf32>
    %158 = math.tanh %152 : vector<2x128xf32>
    %159 = vector.extract_strided_slice %157 {offsets = [0, 0], sizes = [2, 32], strides = [1, 1]} : vector<2x128xf32> to vector<2x32xf32>
    %160 = vector.extract_strided_slice %157 {offsets = [0, 32], sizes = [2, 32], strides = [1, 1]} : vector<2x128xf32> to vector<2x32xf32>
    %161 = vector.extract_strided_slice %158 {offsets = [0, 64], sizes = [2, 32], strides = [1, 1]} : vector<2x128xf32> to vector<2x32xf32>
    %162 = vector.extract_strided_slice %157 {offsets = [0, 96], sizes = [2, 32], strides = [1, 1]} : vector<2x128xf32> to vector<2x32xf32>
    %163 = arith.mulf %160, %147 : vector<2x32xf32>
    %164 = arith.mulf %159, %161 : vector<2x32xf32>
    %165 = arith.addf %163, %164 : vector<2x32xf32>
    %166 = math.tanh %165 : vector<2x32xf32>
    %167 = arith.mulf %162, %166 : vector<2x32xf32>
    %168 = tpu.concatenate %41, %59, %77, %95, %113, %131, %149, %167 in 0 : vector<2x32xf32>, vector<2x32xf32>, vector<2x32xf32>, vector<2x32xf32>, vector<2x32xf32>, vector<2x32xf32>, vector<2x32xf32>, vector<2x32xf32> -> vector<16x32xf32>
    %cst_41 = arith.constant 0.000000e+00 : f32
    %169 = vector.broadcast %cst_41 : f32 to vector<2x96xf32>
    %170 = tpu.concatenate %167, %169 in 1 : vector<2x32xf32>, vector<2x96xf32> -> vector<2x128xf32>
    %cst_42 = arith.constant 0.000000e+00 : f32
    %171 = vector.broadcast %cst_42 : f32 to vector<2x96xf32>
    %172 = tpu.concatenate %165, %171 in 1 : vector<2x32xf32>, vector<2x96xf32> -> vector<2x128xf32>
    %173 = tpu.concatenate %170, %172 in 0 : vector<2x128xf32>, vector<2x128xf32> -> vector<4x128xf32>
    %c0_43 = arith.constant 0 : index
    %c0_44 = arith.constant 0 : index
    %174 = vector.load %arg59[%c0_43, %c0_44] : memref<4x128xf32, #tpu.memory_space<vmem>>, vector<4x128xf32>
    tpu.vector_store %arg59[%c0_43, %c0_44], %173 {strides = array<i32>} : memref<4x128xf32, #tpu.memory_space<vmem>>, vector<4x128xf32>,
    %c0_45 = arith.constant 0 : index
    %c0_46 = arith.constant 0 : index
    %175 = vector.load %arg14[%c0_45, %c0_46] : memref<64x32xf32, #tpu.memory_space<vmem>>, vector<64x32xf32>
    %176 = vector.extract_strided_slice %175 {offsets = [0, 0], sizes = [32, 32], strides = [1, 1]} : vector<64x32xf32> to vector<32x32xf32>
    %cst_47 = arith.constant dense<0.000000e+00> : vector<16x32xf32>
    %177 = tpu.matmul %168, %176, %cst_47 {dimension_numbers = #tpu.dot_dimension_numbers<[1], [0], [0], [1], [0, 0, 1, 1], [], []>} : vector<16x32xf32>, vector<32x32xf32>, vector<16x32xf32> -> vector<16x32xf32>
    %178 = vector.extract_strided_slice %175 {offsets = [32, 0], sizes = [32, 32], strides = [1, 1]} : vector<64x32xf32> to vector<32x32xf32>
    %cst_48 = arith.constant dense<0.000000e+00> : vector<16x32xf32>
    %179 = tpu.matmul %17, %178, %cst_48 {dimension_numbers = #tpu.dot_dimension_numbers<[1], [0], [0], [1], [0, 0, 1, 1], [], []>} : vector<16x32xf32>, vector<32x32xf32>, vector<16x32xf32> -> vector<16x32xf32>
    %180 = arith.addf %177, %179 : vector<16x32xf32>
    %c0_49 = arith.constant 0 : index
    %c0_50 = arith.constant 0 : index
    %181 = vector.load %arg15[%c0_49, %c0_50] : memref<1x32xf32, #tpu.memory_space<vmem>>, vector<1x32xf32>
    %182 = vector.broadcast %181 : vector<1x32xf32> to vector<16x32xf32>
    %183 = arith.addf %180, %182 : vector<16x32xf32>
    %cst_51 = arith.constant 0.000000e+00 : f32
    %184 = vector.broadcast %cst_51 : f32 to vector<16x32xf32>
    %185 = arith.maximumf %183, %184 : vector<16x32xf32>
    %c0_52 = arith.constant 0 : index
    %c0_53 = arith.constant 0 : index
    %186 = vector.load %arg16[%c0_52, %c0_53] : memref<32x32xf32, #tpu.memory_space<vmem>>, vector<32x32xf32>
    %c0_54 = arith.constant 0 : index
    %c0_55 = arith.constant 0 : index
    %187 = vector.load %arg17[%c0_54, %c0_55] : memref<1x32xf32, #tpu.memory_space<vmem>>, vector<1x32xf32>
    %cst_56 = arith.constant dense<0.000000e+00> : vector<16x32xf32>
    %188 = tpu.matmul %185, %186, %cst_56 {dimension_numbers = #tpu.dot_dimension_numbers<[1], [0], [0], [1], [0, 0, 1, 1], [], []>} : vector<16x32xf32>, vector<32x32xf32>, vector<16x32xf32> -> vector<16x32xf32>
    %189 = vector.broadcast %187 : vector<1x32xf32> to vector<16x32xf32>
    %190 = arith.addf %188, %189 : vector<16x32xf32>
    %cst_57 = arith.constant 0.000000e+00 : f32
    %191 = vector.broadcast %cst_57 : f32 to vector<16x32xf32>
    %192 = arith.maximumf %190, %191 : vector<16x32xf32>
    %c0_58 = arith.constant 0 : index
    %c0_59 = arith.constant 0 : index
    %193 = vector.load %arg18[%c0_58, %c0_59] : memref<32x32xf32, #tpu.memory_space<vmem>>, vector<32x32xf32>
    %c0_60 = arith.constant 0 : index
    %c0_61 = arith.constant 0 : index
    %194 = vector.load %arg19[%c0_60, %c0_61] : memref<1x32xf32, #tpu.memory_space<vmem>>, vector<1x32xf32>
    %cst_62 = arith.constant dense<0.000000e+00> : vector<16x32xf32>
    %195 = tpu.matmul %192, %193, %cst_62 {dimension_numbers = #tpu.dot_dimension_numbers<[1], [0], [0], [1], [0, 0, 1, 1], [], []>} : vector<16x32xf32>, vector<32x32xf32>, vector<16x32xf32> -> vector<16x32xf32>
    %196 = vector.broadcast %194 : vector<1x32xf32> to vector<16x32xf32>
    %197 = arith.addf %195, %196 : vector<16x32xf32>
    %cst_63 = arith.constant 0.000000e+00 : f32
    %198 = vector.broadcast %cst_63 : f32 to vector<16x32xf32>
    %199 = arith.maximumf %197, %198 : vector<16x32xf32>
    %c0_64 = arith.constant 0 : index
    %c0_65 = arith.constant 0 : index
    %200 = vector.load %arg9[%c0_64, %c0_65] : memref<16x32xf32, #tpu.memory_space<vmem>>, vector<16x32xf32>
    %c0_66 = arith.constant 0 : index
    %c0_67 = arith.constant 0 : index
    %201 = vector.load %arg10[%c0_66, %c0_67] : memref<1x32xf32, #tpu.memory_space<vmem>>, vector<1x32xf32>
    %cst_68 = arith.constant dense<0.000000e+00> : vector<16x32xf32>
    %202 = tpu.matmul %1, %200, %cst_68 {dimension_numbers = #tpu.dot_dimension_numbers<[1], [0], [0], [1], [0, 0, 1, 1], [], []>} : vector<16x16xf32>, vector<16x32xf32>, vector<16x32xf32> -> vector<16x32xf32>
    %203 = vector.broadcast %201 : vector<1x32xf32> to vector<16x32xf32>
    %204 = arith.addf %202, %203 : vector<16x32xf32>
    %cst_69 = arith.constant 0.000000e+00 : f32
    %205 = vector.broadcast %cst_69 : f32 to vector<16x32xf32>
    %206 = arith.maximumf %204, %205 : vector<16x32xf32>
    %207 = vector.extract_strided_slice %199 {offsets = [0, 0], sizes = [1, 32], strides = [1, 1]} : vector<16x32xf32> to vector<1x32xf32>
    %208 = vector.extract_strided_slice %199 {offsets = [2, 0], sizes = [1, 32], strides = [1, 1]} : vector<16x32xf32> to vector<1x32xf32>
    %209 = vector.extract_strided_slice %199 {offsets = [4, 0], sizes = [1, 32], strides = [1, 1]} : vector<16x32xf32> to vector<1x32xf32>
    %210 = vector.extract_strided_slice %199 {offsets = [6, 0], sizes = [1, 32], strides = [1, 1]} : vector<16x32xf32> to vector<1x32xf32>
    %211 = vector.extract_strided_slice %199 {offsets = [8, 0], sizes = [1, 32], strides = [1, 1]} : vector<16x32xf32> to vector<1x32xf32>
    %212 = vector.extract_strided_slice %199 {offsets = [10, 0], sizes = [1, 32], strides = [1, 1]} : vector<16x32xf32> to vector<1x32xf32>
    %213 = vector.extract_strided_slice %199 {offsets = [12, 0], sizes = [1, 32], strides = [1, 1]} : vector<16x32xf32> to vector<1x32xf32>
    %214 = vector.extract_strided_slice %199 {offsets = [14, 0], sizes = [1, 32], strides = [1, 1]} : vector<16x32xf32> to vector<1x32xf32>
    %215 = tpu.concatenate %207, %208, %209, %210, %211, %212, %213, %214 in 0 : vector<1x32xf32>, vector<1x32xf32>, vector<1x32xf32>, vector<1x32xf32>, vector<1x32xf32>, vector<1x32xf32>, vector<1x32xf32>, vector<1x32xf32> -> vector<8x32xf32>
    %216 = vector.extract_strided_slice %206 {offsets = [0, 0], sizes = [1, 32], strides = [1, 1]} : vector<16x32xf32> to vector<1x32xf32>
    %217 = vector.extract_strided_slice %206 {offsets = [2, 0], sizes = [1, 32], strides = [1, 1]} : vector<16x32xf32> to vector<1x32xf32>
    %218 = vector.extract_strided_slice %206 {offsets = [4, 0], sizes = [1, 32], strides = [1, 1]} : vector<16x32xf32> to vector<1x32xf32>
    %219 = vector.extract_strided_slice %206 {offsets = [6, 0], sizes = [1, 32], strides = [1, 1]} : vector<16x32xf32> to vector<1x32xf32>
    %220 = vector.extract_strided_slice %206 {offsets = [8, 0], sizes = [1, 32], strides = [1, 1]} : vector<16x32xf32> to vector<1x32xf32>
    %221 = vector.extract_strided_slice %206 {offsets = [10, 0], sizes = [1, 32], strides = [1, 1]} : vector<16x32xf32> to vector<1x32xf32>
    %222 = vector.extract_strided_slice %206 {offsets = [12, 0], sizes = [1, 32], strides = [1, 1]} : vector<16x32xf32> to vector<1x32xf32>
    %223 = vector.extract_strided_slice %206 {offsets = [14, 0], sizes = [1, 32], strides = [1, 1]} : vector<16x32xf32> to vector<1x32xf32>
    %224 = tpu.concatenate %216, %217, %218, %219, %220, %221, %222, %223 in 0 : vector<1x32xf32>, vector<1x32xf32>, vector<1x32xf32>, vector<1x32xf32>, vector<1x32xf32>, vector<1x32xf32>, vector<1x32xf32>, vector<1x32xf32> -> vector<8x32xf32>
    %c0_70 = arith.constant 0 : index
    %c0_71 = arith.constant 0 : index
    %225 = vector.load %arg20[%c0_70, %c0_71] : memref<32x96xf32, #tpu.memory_space<vmem>>, vector<32x96xf32>
    %c0_72 = arith.constant 0 : index
    %c0_73 = arith.constant 0 : index
    %226 = vector.load %arg21[%c0_72, %c0_73] : memref<1x96xf32, #tpu.memory_space<vmem>>, vector<1x96xf32>
    %cst_74 = arith.constant dense<0.000000e+00> : vector<8x96xf32>
    %227 = tpu.matmul %215, %225, %cst_74 {dimension_numbers = #tpu.dot_dimension_numbers<[1], [0], [0], [1], [0, 0, 1, 1], [], []>} : vector<8x32xf32>, vector<32x96xf32>, vector<8x96xf32> -> vector<8x96xf32>
    %228 = vector.broadcast %226 : vector<1x96xf32> to vector<8x96xf32>
    %229 = arith.addf %227, %228 : vector<8x96xf32>
    %230 = vector.extract_strided_slice %229 {offsets = [0, 0], sizes = [8, 32], strides = [1, 1]} : vector<8x96xf32> to vector<8x32xf32>
    %231 = vector.extract_strided_slice %229 {offsets = [0, 32], sizes = [8, 32], strides = [1, 1]} : vector<8x96xf32> to vector<8x32xf32>
    %232 = vector.extract_strided_slice %229 {offsets = [0, 64], sizes = [8, 32], strides = [1, 1]} : vector<8x96xf32> to vector<8x32xf32>
    %c0_75 = arith.constant 0 : index
    %c0_76 = arith.constant 0 : index
    %233 = vector.load %arg22[%c0_75, %c0_76] : memref<32x32xf32, #tpu.memory_space<vmem>>, vector<32x32xf32>
    %c0_77 = arith.constant 0 : index
    %c0_78 = arith.constant 0 : index
    %234 = vector.load %arg23[%c0_77, %c0_78] : memref<1x32xf32, #tpu.memory_space<vmem>>, vector<1x32xf32>
    %235 = vector.extract_strided_slice %230 {offsets = [0, 0], sizes = [8, 4], strides = [1, 1]} : vector<8x32xf32> to vector<8x4xf32>
    %cst_79 = arith.constant 5.000000e-01 : f32
    %236 = vector.broadcast %cst_79 : f32 to vector<8x4xf32>
    %237 = arith.mulf %235, %236 : vector<8x4xf32>
    %238 = vector.extract_strided_slice %231 {offsets = [0, 0], sizes = [8, 4], strides = [1, 1]} : vector<8x32xf32> to vector<8x4xf32>
    %cst_80 = arith.constant dense<0.000000e+00> : vector<8x8xf32>
    %239 = tpu.matmul %237, %238, %cst_80 {dimension_numbers = #tpu.dot_dimension_numbers<[1], [1], [0], [0], [0, 0, 1, 0], [], []>} : vector<8x4xf32>, vector<8x4xf32>, vector<8x8xf32> -> vector<8x8xf32>
    %cst_81 = arith.constant dense<0xFF800000> : vector<8xf32>
    %240 = vector.multi_reduction <maximumf>, %239, %cst_81 [1] : vector<8x8xf32> to vector<8xf32>
    %241 = vector.shape_cast %240 : vector<8xf32> to vector<8x1xf32>
    %242 = vector.broadcast %241 : vector<8x1xf32> to vector<8x8xf32>
    %243 = arith.subf %239, %242 : vector<8x8xf32>
    %244 = math.exp %243 : vector<8x8xf32>
    %cst_82 = arith.constant dense<0.000000e+00> : vector<8xf32>
    %245 = vector.multi_reduction <add>, %244, %cst_82 [1] : vector<8x8xf32> to vector<8xf32>
    %246 = vector.shape_cast %245 : vector<8xf32> to vector<8x1xf32>
    %247 = tpu.reciprocal %246 {approx = true} : vector<8x1xf32> -> vector<8x1xf32>
    %248 = vector.broadcast %247 : vector<8x1xf32> to vector<8x8xf32>
    %249 = arith.mulf %244, %248 : vector<8x8xf32>
    %250 = vector.extract_strided_slice %232 {offsets = [0, 0], sizes = [8, 4], strides = [1, 1]} : vector<8x32xf32> to vector<8x4xf32>
    %cst_83 = arith.constant dense<0.000000e+00> : vector<8x4xf32>
    %251 = tpu.matmul %249, %250, %cst_83 {dimension_numbers = #tpu.dot_dimension_numbers<[1], [0], [0], [1], [0, 0, 1, 1], [], []>} : vector<8x8xf32>, vector<8x4xf32>, vector<8x4xf32> -> vector<8x4xf32>
    %252 = vector.extract_strided_slice %230 {offsets = [0, 4], sizes = [8, 4], strides = [1, 1]} : vector<8x32xf32> to vector<8x4xf32>
    %cst_84 = arith.constant 5.000000e-01 : f32
    %253 = vector.broadcast %cst_84 : f32 to vector<8x4xf32>
    %254 = arith.mulf %252, %253 : vector<8x4xf32>
    %255 = vector.extract_strided_slice %231 {offsets = [0, 4], sizes = [8, 4], strides = [1, 1]} : vector<8x32xf32> to vector<8x4xf32>
    %cst_85 = arith.constant dense<0.000000e+00> : vector<8x8xf32>
    %256 = tpu.matmul %254, %255, %cst_85 {dimension_numbers = #tpu.dot_dimension_numbers<[1], [1], [0], [0], [0, 0, 1, 0], [], []>} : vector<8x4xf32>, vector<8x4xf32>, vector<8x8xf32> -> vector<8x8xf32>
    %cst_86 = arith.constant dense<0xFF800000> : vector<8xf32>
    %257 = vector.multi_reduction <maximumf>, %256, %cst_86 [1] : vector<8x8xf32> to vector<8xf32>
    %258 = vector.shape_cast %257 : vector<8xf32> to vector<8x1xf32>
    %259 = vector.broadcast %258 : vector<8x1xf32> to vector<8x8xf32>
    %260 = arith.subf %256, %259 : vector<8x8xf32>
    %261 = math.exp %260 : vector<8x8xf32>
    %cst_87 = arith.constant dense<0.000000e+00> : vector<8xf32>
    %262 = vector.multi_reduction <add>, %261, %cst_87 [1] : vector<8x8xf32> to vector<8xf32>
    %263 = vector.shape_cast %262 : vector<8xf32> to vector<8x1xf32>
    %264 = tpu.reciprocal %263 {approx = true} : vector<8x1xf32> -> vector<8x1xf32>
    %265 = vector.broadcast %264 : vector<8x1xf32> to vector<8x8xf32>
    %266 = arith.mulf %261, %265 : vector<8x8xf32>
    %267 = vector.extract_strided_slice %232 {offsets = [0, 4], sizes = [8, 4], strides = [1, 1]} : vector<8x32xf32> to vector<8x4xf32>
    %cst_88 = arith.constant dense<0.000000e+00> : vector<8x4xf32>
    %268 = tpu.matmul %266, %267, %cst_88 {dimension_numbers = #tpu.dot_dimension_numbers<[1], [0], [0], [1], [0, 0, 1, 1], [], []>} : vector<8x8xf32>, vector<8x4xf32>, vector<8x4xf32> -> vector<8x4xf32>
    %269 = vector.extract_strided_slice %230 {offsets = [0, 8], sizes = [8, 4], strides = [1, 1]} : vector<8x32xf32> to vector<8x4xf32>
    %cst_89 = arith.constant 5.000000e-01 : f32
    %270 = vector.broadcast %cst_89 : f32 to vector<8x4xf32>
    %271 = arith.mulf %269, %270 : vector<8x4xf32>
    %272 = vector.extract_strided_slice %231 {offsets = [0, 8], sizes = [8, 4], strides = [1, 1]} : vector<8x32xf32> to vector<8x4xf32>
    %cst_90 = arith.constant dense<0.000000e+00> : vector<8x8xf32>
    %273 = tpu.matmul %271, %272, %cst_90 {dimension_numbers = #tpu.dot_dimension_numbers<[1], [1], [0], [0], [0, 0, 1, 0], [], []>} : vector<8x4xf32>, vector<8x4xf32>, vector<8x8xf32> -> vector<8x8xf32>
    %cst_91 = arith.constant dense<0xFF800000> : vector<8xf32>
    %274 = vector.multi_reduction <maximumf>, %273, %cst_91 [1] : vector<8x8xf32> to vector<8xf32>
    %275 = vector.shape_cast %274 : vector<8xf32> to vector<8x1xf32>
    %276 = vector.broadcast %275 : vector<8x1xf32> to vector<8x8xf32>
    %277 = arith.subf %273, %276 : vector<8x8xf32>
    %278 = math.exp %277 : vector<8x8xf32>
    %cst_92 = arith.constant dense<0.000000e+00> : vector<8xf32>
    %279 = vector.multi_reduction <add>, %278, %cst_92 [1] : vector<8x8xf32> to vector<8xf32>
    %280 = vector.shape_cast %279 : vector<8xf32> to vector<8x1xf32>
    %281 = tpu.reciprocal %280 {approx = true} : vector<8x1xf32> -> vector<8x1xf32>
    %282 = vector.broadcast %281 : vector<8x1xf32> to vector<8x8xf32>
    %283 = arith.mulf %278, %282 : vector<8x8xf32>
    %284 = vector.extract_strided_slice %232 {offsets = [0, 8], sizes = [8, 4], strides = [1, 1]} : vector<8x32xf32> to vector<8x4xf32>
    %cst_93 = arith.constant dense<0.000000e+00> : vector<8x4xf32>
    %285 = tpu.matmul %283, %284, %cst_93 {dimension_numbers = #tpu.dot_dimension_numbers<[1], [0], [0], [1], [0, 0, 1, 1], [], []>} : vector<8x8xf32>, vector<8x4xf32>, vector<8x4xf32> -> vector<8x4xf32>
    %286 = vector.extract_strided_slice %230 {offsets = [0, 12], sizes = [8, 4], strides = [1, 1]} : vector<8x32xf32> to vector<8x4xf32>
    %cst_94 = arith.constant 5.000000e-01 : f32
    %287 = vector.broadcast %cst_94 : f32 to vector<8x4xf32>
    %288 = arith.mulf %286, %287 : vector<8x4xf32>
    %289 = vector.extract_strided_slice %231 {offsets = [0, 12], sizes = [8, 4], strides = [1, 1]} : vector<8x32xf32> to vector<8x4xf32>
    %cst_95 = arith.constant dense<0.000000e+00> : vector<8x8xf32>
    %290 = tpu.matmul %288, %289, %cst_95 {dimension_numbers = #tpu.dot_dimension_numbers<[1], [1], [0], [0], [0, 0, 1, 0], [], []>} : vector<8x4xf32>, vector<8x4xf32>, vector<8x8xf32> -> vector<8x8xf32>
    %cst_96 = arith.constant dense<0xFF800000> : vector<8xf32>
    %291 = vector.multi_reduction <maximumf>, %290, %cst_96 [1] : vector<8x8xf32> to vector<8xf32>
    %292 = vector.shape_cast %291 : vector<8xf32> to vector<8x1xf32>
    %293 = vector.broadcast %292 : vector<8x1xf32> to vector<8x8xf32>
    %294 = arith.subf %290, %293 : vector<8x8xf32>
    %295 = math.exp %294 : vector<8x8xf32>
    %cst_97 = arith.constant dense<0.000000e+00> : vector<8xf32>
    %296 = vector.multi_reduction <add>, %295, %cst_97 [1] : vector<8x8xf32> to vector<8xf32>
    %297 = vector.shape_cast %296 : vector<8xf32> to vector<8x1xf32>
    %298 = tpu.reciprocal %297 {approx = true} : vector<8x1xf32> -> vector<8x1xf32>
    %299 = vector.broadcast %298 : vector<8x1xf32> to vector<8x8xf32>
    %300 = arith.mulf %295, %299 : vector<8x8xf32>
    %301 = vector.extract_strided_slice %232 {offsets = [0, 12], sizes = [8, 4], strides = [1, 1]} : vector<8x32xf32> to vector<8x4xf32>
    %cst_98 = arith.constant dense<0.000000e+00> : vector<8x4xf32>
    %302 = tpu.matmul %300, %301, %cst_98 {dimension_numbers = #tpu.dot_dimension_numbers<[1], [0], [0], [1], [0, 0, 1, 1], [], []>} : vector<8x8xf32>, vector<8x4xf32>, vector<8x4xf32> -> vector<8x4xf32>
    %303 = vector.extract_strided_slice %230 {offsets = [0, 16], sizes = [8, 4], strides = [1, 1]} : vector<8x32xf32> to vector<8x4xf32>
    %cst_99 = arith.constant 5.000000e-01 : f32
    %304 = vector.broadcast %cst_99 : f32 to vector<8x4xf32>
    %305 = arith.mulf %303, %304 : vector<8x4xf32>
    %306 = vector.extract_strided_slice %231 {offsets = [0, 16], sizes = [8, 4], strides = [1, 1]} : vector<8x32xf32> to vector<8x4xf32>
    %cst_100 = arith.constant dense<0.000000e+00> : vector<8x8xf32>
    %307 = tpu.matmul %305, %306, %cst_100 {dimension_numbers = #tpu.dot_dimension_numbers<[1], [1], [0], [0], [0, 0, 1, 0], [], []>} : vector<8x4xf32>, vector<8x4xf32>, vector<8x8xf32> -> vector<8x8xf32>
    %cst_101 = arith.constant dense<0xFF800000> : vector<8xf32>
    %308 = vector.multi_reduction <maximumf>, %307, %cst_101 [1] : vector<8x8xf32> to vector<8xf32>
    %309 = vector.shape_cast %308 : vector<8xf32> to vector<8x1xf32>
    %310 = vector.broadcast %309 : vector<8x1xf32> to vector<8x8xf32>
    %311 = arith.subf %307, %310 : vector<8x8xf32>
    %312 = math.exp %311 : vector<8x8xf32>
    %cst_102 = arith.constant dense<0.000000e+00> : vector<8xf32>
    %313 = vector.multi_reduction <add>, %312, %cst_102 [1] : vector<8x8xf32> to vector<8xf32>
    %314 = vector.shape_cast %313 : vector<8xf32> to vector<8x1xf32>
    %315 = tpu.reciprocal %314 {approx = true} : vector<8x1xf32> -> vector<8x1xf32>
    %316 = vector.broadcast %315 : vector<8x1xf32> to vector<8x8xf32>
    %317 = arith.mulf %312, %316 : vector<8x8xf32>
    %318 = vector.extract_strided_slice %232 {offsets = [0, 16], sizes = [8, 4], strides = [1, 1]} : vector<8x32xf32> to vector<8x4xf32>
    %cst_103 = arith.constant dense<0.000000e+00> : vector<8x4xf32>
    %319 = tpu.matmul %317, %318, %cst_103 {dimension_numbers = #tpu.dot_dimension_numbers<[1], [0], [0], [1], [0, 0, 1, 1], [], []>} : vector<8x8xf32>, vector<8x4xf32>, vector<8x4xf32> -> vector<8x4xf32>
    %320 = vector.extract_strided_slice %230 {offsets = [0, 20], sizes = [8, 4], strides = [1, 1]} : vector<8x32xf32> to vector<8x4xf32>
    %cst_104 = arith.constant 5.000000e-01 : f32
    %321 = vector.broadcast %cst_104 : f32 to vector<8x4xf32>
    %322 = arith.mulf %320, %321 : vector<8x4xf32>
    %323 = vector.extract_strided_slice %231 {offsets = [0, 20], sizes = [8, 4], strides = [1, 1]} : vector<8x32xf32> to vector<8x4xf32>
    %cst_105 = arith.constant dense<0.000000e+00> : vector<8x8xf32>
    %324 = tpu.matmul %322, %323, %cst_105 {dimension_numbers = #tpu.dot_dimension_numbers<[1], [1], [0], [0], [0, 0, 1, 0], [], []>} : vector<8x4xf32>, vector<8x4xf32>, vector<8x8xf32> -> vector<8x8xf32>
    %cst_106 = arith.constant dense<0xFF800000> : vector<8xf32>
    %325 = vector.multi_reduction <maximumf>, %324, %cst_106 [1] : vector<8x8xf32> to vector<8xf32>
    %326 = vector.shape_cast %325 : vector<8xf32> to vector<8x1xf32>
    %327 = vector.broadcast %326 : vector<8x1xf32> to vector<8x8xf32>
    %328 = arith.subf %324, %327 : vector<8x8xf32>
    %329 = math.exp %328 : vector<8x8xf32>
    %cst_107 = arith.constant dense<0.000000e+00> : vector<8xf32>
    %330 = vector.multi_reduction <add>, %329, %cst_107 [1] : vector<8x8xf32> to vector<8xf32>
    %331 = vector.shape_cast %330 : vector<8xf32> to vector<8x1xf32>
    %332 = tpu.reciprocal %331 {approx = true} : vector<8x1xf32> -> vector<8x1xf32>
    %333 = vector.broadcast %332 : vector<8x1xf32> to vector<8x8xf32>
    %334 = arith.mulf %329, %333 : vector<8x8xf32>
    %335 = vector.extract_strided_slice %232 {offsets = [0, 20], sizes = [8, 4], strides = [1, 1]} : vector<8x32xf32> to vector<8x4xf32>
    %cst_108 = arith.constant dense<0.000000e+00> : vector<8x4xf32>
    %336 = tpu.matmul %334, %335, %cst_108 {dimension_numbers = #tpu.dot_dimension_numbers<[1], [0], [0], [1], [0, 0, 1, 1], [], []>} : vector<8x8xf32>, vector<8x4xf32>, vector<8x4xf32> -> vector<8x4xf32>
    %337 = vector.extract_strided_slice %230 {offsets = [0, 24], sizes = [8, 4], strides = [1, 1]} : vector<8x32xf32> to vector<8x4xf32>
    %cst_109 = arith.constant 5.000000e-01 : f32
    %338 = vector.broadcast %cst_109 : f32 to vector<8x4xf32>
    %339 = arith.mulf %337, %338 : vector<8x4xf32>
    %340 = vector.extract_strided_slice %231 {offsets = [0, 24], sizes = [8, 4], strides = [1, 1]} : vector<8x32xf32> to vector<8x4xf32>
    %cst_110 = arith.constant dense<0.000000e+00> : vector<8x8xf32>
    %341 = tpu.matmul %339, %340, %cst_110 {dimension_numbers = #tpu.dot_dimension_numbers<[1], [1], [0], [0], [0, 0, 1, 0], [], []>} : vector<8x4xf32>, vector<8x4xf32>, vector<8x8xf32> -> vector<8x8xf32>
    %cst_111 = arith.constant dense<0xFF800000> : vector<8xf32>
    %342 = vector.multi_reduction <maximumf>, %341, %cst_111 [1] : vector<8x8xf32> to vector<8xf32>
    %343 = vector.shape_cast %342 : vector<8xf32> to vector<8x1xf32>
    %344 = vector.broadcast %343 : vector<8x1xf32> to vector<8x8xf32>
    %345 = arith.subf %341, %344 : vector<8x8xf32>
    %346 = math.exp %345 : vector<8x8xf32>
    %cst_112 = arith.constant dense<0.000000e+00> : vector<8xf32>
    %347 = vector.multi_reduction <add>, %346, %cst_112 [1] : vector<8x8xf32> to vector<8xf32>
    %348 = vector.shape_cast %347 : vector<8xf32> to vector<8x1xf32>
    %349 = tpu.reciprocal %348 {approx = true} : vector<8x1xf32> -> vector<8x1xf32>
    %350 = vector.broadcast %349 : vector<8x1xf32> to vector<8x8xf32>
    %351 = arith.mulf %346, %350 : vector<8x8xf32>
    %352 = vector.extract_strided_slice %232 {offsets = [0, 24], sizes = [8, 4], strides = [1, 1]} : vector<8x32xf32> to vector<8x4xf32>
    %cst_113 = arith.constant dense<0.000000e+00> : vector<8x4xf32>
    %353 = tpu.matmul %351, %352, %cst_113 {dimension_numbers = #tpu.dot_dimension_numbers<[1], [0], [0], [1], [0, 0, 1, 1], [], []>} : vector<8x8xf32>, vector<8x4xf32>, vector<8x4xf32> -> vector<8x4xf32>
    %354 = vector.extract_strided_slice %230 {offsets = [0, 28], sizes = [8, 4], strides = [1, 1]} : vector<8x32xf32> to vector<8x4xf32>
    %cst_114 = arith.constant 5.000000e-01 : f32
    %355 = vector.broadcast %cst_114 : f32 to vector<8x4xf32>
    %356 = arith.mulf %354, %355 : vector<8x4xf32>
    %357 = vector.extract_strided_slice %231 {offsets = [0, 28], sizes = [8, 4], strides = [1, 1]} : vector<8x32xf32> to vector<8x4xf32>
    %cst_115 = arith.constant dense<0.000000e+00> : vector<8x8xf32>
    %358 = tpu.matmul %356, %357, %cst_115 {dimension_numbers = #tpu.dot_dimension_numbers<[1], [1], [0], [0], [0, 0, 1, 0], [], []>} : vector<8x4xf32>, vector<8x4xf32>, vector<8x8xf32> -> vector<8x8xf32>
    %cst_116 = arith.constant dense<0xFF800000> : vector<8xf32>
    %359 = vector.multi_reduction <maximumf>, %358, %cst_116 [1] : vector<8x8xf32> to vector<8xf32>
    %360 = vector.shape_cast %359 : vector<8xf32> to vector<8x1xf32>
    %361 = vector.broadcast %360 : vector<8x1xf32> to vector<8x8xf32>
    %362 = arith.subf %358, %361 : vector<8x8xf32>
    %363 = math.exp %362 : vector<8x8xf32>
    %cst_117 = arith.constant dense<0.000000e+00> : vector<8xf32>
    %364 = vector.multi_reduction <add>, %363, %cst_117 [1] : vector<8x8xf32> to vector<8xf32>
    %365 = vector.shape_cast %364 : vector<8xf32> to vector<8x1xf32>
    %366 = tpu.reciprocal %365 {approx = true} : vector<8x1xf32> -> vector<8x1xf32>
    %367 = vector.broadcast %366 : vector<8x1xf32> to vector<8x8xf32>
    %368 = arith.mulf %363, %367 : vector<8x8xf32>
    %369 = vector.extract_strided_slice %232 {offsets = [0, 28], sizes = [8, 4], strides = [1, 1]} : vector<8x32xf32> to vector<8x4xf32>
    %cst_118 = arith.constant dense<0.000000e+00> : vector<8x4xf32>
    %370 = tpu.matmul %368, %369, %cst_118 {dimension_numbers = #tpu.dot_dimension_numbers<[1], [0], [0], [1], [0, 0, 1, 1], [], []>} : vector<8x8xf32>, vector<8x4xf32>, vector<8x4xf32> -> vector<8x4xf32>
    %371 = tpu.concatenate %251, %268, %285, %302, %319, %336, %353, %370 in 1 : vector<8x4xf32>, vector<8x4xf32>, vector<8x4xf32>, vector<8x4xf32>, vector<8x4xf32>, vector<8x4xf32>, vector<8x4xf32>, vector<8x4xf32> -> vector<8x32xf32>
    %cst_119 = arith.constant dense<0.000000e+00> : vector<8x32xf32>
    %372 = tpu.matmul %371, %233, %cst_119 {dimension_numbers = #tpu.dot_dimension_numbers<[1], [0], [0], [1], [0, 0, 1, 1], [], []>} : vector<8x32xf32>, vector<32x32xf32>, vector<8x32xf32> -> vector<8x32xf32>
    %373 = vector.broadcast %234 : vector<1x32xf32> to vector<8x32xf32>
    %374 = arith.addf %372, %373 : vector<8x32xf32>
    %c0_120 = arith.constant 0 : index
    %c0_121 = arith.constant 0 : index
    %375 = vector.load %arg24[%c0_120, %c0_121] : memref<1x32xf32, #tpu.memory_space<vmem>>, vector<1x32xf32>
    %c0_122 = arith.constant 0 : index
    %c0_123 = arith.constant 0 : index
    %376 = vector.load %arg25[%c0_122, %c0_123] : memref<1x32xf32, #tpu.memory_space<vmem>>, vector<1x32xf32>
    %377 = arith.addf %374, %215 : vector<8x32xf32>
    %cst_124 = arith.constant dense<0.000000e+00> : vector<8xf32>
    %378 = vector.multi_reduction <add>, %377, %cst_124 [1] : vector<8x32xf32> to vector<8xf32>
    %379 = vector.shape_cast %378 : vector<8xf32> to vector<8x1xf32>
    %cst_125 = arith.constant 3.200000e+01 : f32
    %380 = vector.broadcast %cst_125 : f32 to vector<8x1xf32>
    %381 = arith.divf %379, %380 : vector<8x1xf32>
    %382 = vector.broadcast %381 : vector<8x1xf32> to vector<8x32xf32>
    %383 = arith.subf %377, %382 : vector<8x32xf32>
    %384 = arith.mulf %383, %383 : vector<8x32xf32>
    %cst_126 = arith.constant dense<0.000000e+00> : vector<8xf32>
    %385 = vector.multi_reduction <add>, %384, %cst_126 [1] : vector<8x32xf32> to vector<8xf32>
    %386 = vector.shape_cast %385 : vector<8xf32> to vector<8x1xf32>
    %cst_127 = arith.constant 3.200000e+01 : f32
    %387 = vector.broadcast %cst_127 : f32 to vector<8x1xf32>
    %388 = arith.divf %386, %387 : vector<8x1xf32>
    %389 = vector.broadcast %381 : vector<8x1xf32> to vector<8x32xf32>
    %390 = arith.subf %377, %389 : vector<8x32xf32>
    %cst_128 = arith.constant 9.99999974E-6 : f32
    %391 = vector.broadcast %cst_128 : f32 to vector<8x1xf32>
    %392 = arith.addf %388, %391 : vector<8x1xf32>
    %393 = math.rsqrt %392 : vector<8x1xf32>
    %394 = vector.broadcast %393 : vector<8x1xf32> to vector<8x32xf32>
    %395 = arith.mulf %390, %394 : vector<8x32xf32>
    %396 = vector.broadcast %375 : vector<1x32xf32> to vector<8x32xf32>
    %397 = arith.mulf %395, %396 : vector<8x32xf32>
    %398 = vector.broadcast %376 : vector<1x32xf32> to vector<8x32xf32>
    %399 = arith.addf %397, %398 : vector<8x32xf32>
    %c0_129 = arith.constant 0 : index
    %c0_130 = arith.constant 0 : index
    %400 = vector.load %arg26[%c0_129, %c0_130] : memref<32x32xf32, #tpu.memory_space<vmem>>, vector<32x32xf32>
    %c0_131 = arith.constant 0 : index
    %c0_132 = arith.constant 0 : index
    %401 = vector.load %arg27[%c0_131, %c0_132] : memref<1x32xf32, #tpu.memory_space<vmem>>, vector<1x32xf32>
    %cst_133 = arith.constant dense<0.000000e+00> : vector<8x32xf32>
    %402 = tpu.matmul %399, %400, %cst_133 {dimension_numbers = #tpu.dot_dimension_numbers<[1], [0], [0], [1], [0, 0, 1, 1], [], []>} : vector<8x32xf32>, vector<32x32xf32>, vector<8x32xf32> -> vector<8x32xf32>
    %403 = vector.broadcast %401 : vector<1x32xf32> to vector<8x32xf32>
    %404 = arith.addf %402, %403 : vector<8x32xf32>
    %cst_134 = arith.constant 0.000000e+00 : f32
    %405 = vector.broadcast %cst_134 : f32 to vector<8x32xf32>
    %406 = arith.maximumf %404, %405 : vector<8x32xf32>
    %c0_135 = arith.constant 0 : index
    %c0_136 = arith.constant 0 : index
    %407 = vector.load %arg28[%c0_135, %c0_136] : memref<32x32xf32, #tpu.memory_space<vmem>>, vector<32x32xf32>
    %c0_137 = arith.constant 0 : index
    %c0_138 = arith.constant 0 : index
    %408 = vector.load %arg29[%c0_137, %c0_138] : memref<1x32xf32, #tpu.memory_space<vmem>>, vector<1x32xf32>
    %cst_139 = arith.constant dense<0.000000e+00> : vector<8x32xf32>
    %409 = tpu.matmul %406, %407, %cst_139 {dimension_numbers = #tpu.dot_dimension_numbers<[1], [0], [0], [1], [0, 0, 1, 1], [], []>} : vector<8x32xf32>, vector<32x32xf32>, vector<8x32xf32> -> vector<8x32xf32>
    %410 = vector.broadcast %408 : vector<1x32xf32> to vector<8x32xf32>
    %411 = arith.addf %409, %410 : vector<8x32xf32>
    %c0_140 = arith.constant 0 : index
    %c0_141 = arith.constant 0 : index
    %412 = vector.load %arg30[%c0_140, %c0_141] : memref<1x32xf32, #tpu.memory_space<vmem>>, vector<1x32xf32>
    %c0_142 = arith.constant 0 : index
    %c0_143 = arith.constant 0 : index
    %413 = vector.load %arg31[%c0_142, %c0_143] : memref<1x32xf32, #tpu.memory_space<vmem>>, vector<1x32xf32>
    %414 = arith.addf %411, %399 : vector<8x32xf32>
    %cst_144 = arith.constant dense<0.000000e+00> : vector<8xf32>
    %415 = vector.multi_reduction <add>, %414, %cst_144 [1] : vector<8x32xf32> to vector<8xf32>
    %416 = vector.shape_cast %415 : vector<8xf32> to vector<8x1xf32>
    %cst_145 = arith.constant 3.200000e+01 : f32
    %417 = vector.broadcast %cst_145 : f32 to vector<8x1xf32>
    %418 = arith.divf %416, %417 : vector<8x1xf32>
    %419 = vector.broadcast %418 : vector<8x1xf32> to vector<8x32xf32>
    %420 = arith.subf %414, %419 : vector<8x32xf32>
    %421 = arith.mulf %420, %420 : vector<8x32xf32>
    %cst_146 = arith.constant dense<0.000000e+00> : vector<8xf32>
    %422 = vector.multi_reduction <add>, %421, %cst_146 [1] : vector<8x32xf32> to vector<8xf32>
    %423 = vector.shape_cast %422 : vector<8xf32> to vector<8x1xf32>
    %cst_147 = arith.constant 3.200000e+01 : f32
    %424 = vector.broadcast %cst_147 : f32 to vector<8x1xf32>
    %425 = arith.divf %423, %424 : vector<8x1xf32>
    %426 = vector.broadcast %418 : vector<8x1xf32> to vector<8x32xf32>
    %427 = arith.subf %414, %426 : vector<8x32xf32>
    %cst_148 = arith.constant 9.99999974E-6 : f32
    %428 = vector.broadcast %cst_148 : f32 to vector<8x1xf32>
    %429 = arith.addf %425, %428 : vector<8x1xf32>
    %430 = math.rsqrt %429 : vector<8x1xf32>
    %431 = vector.broadcast %430 : vector<8x1xf32> to vector<8x32xf32>
    %432 = arith.mulf %427, %431 : vector<8x32xf32>
    %433 = vector.broadcast %412 : vector<1x32xf32> to vector<8x32xf32>
    %434 = arith.mulf %432, %433 : vector<8x32xf32>
    %435 = vector.broadcast %413 : vector<1x32xf32> to vector<8x32xf32>
    %436 = arith.addf %434, %435 : vector<8x32xf32>
    %c0_149 = arith.constant 0 : index
    %c0_150 = arith.constant 0 : index
    %437 = vector.load %arg32[%c0_149, %c0_150] : memref<32x96xf32, #tpu.memory_space<vmem>>, vector<32x96xf32>
    %c0_151 = arith.constant 0 : index
    %c0_152 = arith.constant 0 : index
    %438 = vector.load %arg33[%c0_151, %c0_152] : memref<1x96xf32, #tpu.memory_space<vmem>>, vector<1x96xf32>
    %cst_153 = arith.constant dense<0.000000e+00> : vector<8x96xf32>
    %439 = tpu.matmul %436, %437, %cst_153 {dimension_numbers = #tpu.dot_dimension_numbers<[1], [0], [0], [1], [0, 0, 1, 1], [], []>} : vector<8x32xf32>, vector<32x96xf32>, vector<8x96xf32> -> vector<8x96xf32>
    %440 = vector.broadcast %438 : vector<1x96xf32> to vector<8x96xf32>
    %441 = arith.addf %439, %440 : vector<8x96xf32>
    %442 = vector.extract_strided_slice %441 {offsets = [0, 0], sizes = [8, 32], strides = [1, 1]} : vector<8x96xf32> to vector<8x32xf32>
    %443 = vector.extract_strided_slice %441 {offsets = [0, 32], sizes = [8, 32], strides = [1, 1]} : vector<8x96xf32> to vector<8x32xf32>
    %444 = vector.extract_strided_slice %441 {offsets = [0, 64], sizes = [8, 32], strides = [1, 1]} : vector<8x96xf32> to vector<8x32xf32>
    %c0_154 = arith.constant 0 : index
    %c0_155 = arith.constant 0 : index
    %445 = vector.load %arg34[%c0_154, %c0_155] : memref<32x32xf32, #tpu.memory_space<vmem>>, vector<32x32xf32>
    %c0_156 = arith.constant 0 : index
    %c0_157 = arith.constant 0 : index
    %446 = vector.load %arg35[%c0_156, %c0_157] : memref<1x32xf32, #tpu.memory_space<vmem>>, vector<1x32xf32>
    %447 = vector.extract_strided_slice %442 {offsets = [0, 0], sizes = [8, 4], strides = [1, 1]} : vector<8x32xf32> to vector<8x4xf32>
    %cst_158 = arith.constant 5.000000e-01 : f32
    %448 = vector.broadcast %cst_158 : f32 to vector<8x4xf32>
    %449 = arith.mulf %447, %448 : vector<8x4xf32>
    %450 = vector.extract_strided_slice %443 {offsets = [0, 0], sizes = [8, 4], strides = [1, 1]} : vector<8x32xf32> to vector<8x4xf32>
    %cst_159 = arith.constant dense<0.000000e+00> : vector<8x8xf32>
    %451 = tpu.matmul %449, %450, %cst_159 {dimension_numbers = #tpu.dot_dimension_numbers<[1], [1], [0], [0], [0, 0, 1, 0], [], []>} : vector<8x4xf32>, vector<8x4xf32>, vector<8x8xf32> -> vector<8x8xf32>
    %cst_160 = arith.constant dense<0xFF800000> : vector<8xf32>
    %452 = vector.multi_reduction <maximumf>, %451, %cst_160 [1] : vector<8x8xf32> to vector<8xf32>
    %453 = vector.shape_cast %452 : vector<8xf32> to vector<8x1xf32>
    %454 = vector.broadcast %453 : vector<8x1xf32> to vector<8x8xf32>
    %455 = arith.subf %451, %454 : vector<8x8xf32>
    %456 = math.exp %455 : vector<8x8xf32>
    %cst_161 = arith.constant dense<0.000000e+00> : vector<8xf32>
    %457 = vector.multi_reduction <add>, %456, %cst_161 [1] : vector<8x8xf32> to vector<8xf32>
    %458 = vector.shape_cast %457 : vector<8xf32> to vector<8x1xf32>
    %459 = tpu.reciprocal %458 {approx = true} : vector<8x1xf32> -> vector<8x1xf32>
    %460 = vector.broadcast %459 : vector<8x1xf32> to vector<8x8xf32>
    %461 = arith.mulf %456, %460 : vector<8x8xf32>
    %462 = vector.extract_strided_slice %444 {offsets = [0, 0], sizes = [8, 4], strides = [1, 1]} : vector<8x32xf32> to vector<8x4xf32>
    %cst_162 = arith.constant dense<0.000000e+00> : vector<8x4xf32>
    %463 = tpu.matmul %461, %462, %cst_162 {dimension_numbers = #tpu.dot_dimension_numbers<[1], [0], [0], [1], [0, 0, 1, 1], [], []>} : vector<8x8xf32>, vector<8x4xf32>, vector<8x4xf32> -> vector<8x4xf32>
    %464 = vector.extract_strided_slice %442 {offsets = [0, 4], sizes = [8, 4], strides = [1, 1]} : vector<8x32xf32> to vector<8x4xf32>
    %cst_163 = arith.constant 5.000000e-01 : f32
    %465 = vector.broadcast %cst_163 : f32 to vector<8x4xf32>
    %466 = arith.mulf %464, %465 : vector<8x4xf32>
    %467 = vector.extract_strided_slice %443 {offsets = [0, 4], sizes = [8, 4], strides = [1, 1]} : vector<8x32xf32> to vector<8x4xf32>
    %cst_164 = arith.constant dense<0.000000e+00> : vector<8x8xf32>
    %468 = tpu.matmul %466, %467, %cst_164 {dimension_numbers = #tpu.dot_dimension_numbers<[1], [1], [0], [0], [0, 0, 1, 0], [], []>} : vector<8x4xf32>, vector<8x4xf32>, vector<8x8xf32> -> vector<8x8xf32>
    %cst_165 = arith.constant dense<0xFF800000> : vector<8xf32>
    %469 = vector.multi_reduction <maximumf>, %468, %cst_165 [1] : vector<8x8xf32> to vector<8xf32>
    %470 = vector.shape_cast %469 : vector<8xf32> to vector<8x1xf32>
    %471 = vector.broadcast %470 : vector<8x1xf32> to vector<8x8xf32>
    %472 = arith.subf %468, %471 : vector<8x8xf32>
    %473 = math.exp %472 : vector<8x8xf32>
    %cst_166 = arith.constant dense<0.000000e+00> : vector<8xf32>
    %474 = vector.multi_reduction <add>, %473, %cst_166 [1] : vector<8x8xf32> to vector<8xf32>
    %475 = vector.shape_cast %474 : vector<8xf32> to vector<8x1xf32>
    %476 = tpu.reciprocal %475 {approx = true} : vector<8x1xf32> -> vector<8x1xf32>
    %477 = vector.broadcast %476 : vector<8x1xf32> to vector<8x8xf32>
    %478 = arith.mulf %473, %477 : vector<8x8xf32>
    %479 = vector.extract_strided_slice %444 {offsets = [0, 4], sizes = [8, 4], strides = [1, 1]} : vector<8x32xf32> to vector<8x4xf32>
    %cst_167 = arith.constant dense<0.000000e+00> : vector<8x4xf32>
    %480 = tpu.matmul %478, %479, %cst_167 {dimension_numbers = #tpu.dot_dimension_numbers<[1], [0], [0], [1], [0, 0, 1, 1], [], []>} : vector<8x8xf32>, vector<8x4xf32>, vector<8x4xf32> -> vector<8x4xf32>
    %481 = vector.extract_strided_slice %442 {offsets = [0, 8], sizes = [8, 4], strides = [1, 1]} : vector<8x32xf32> to vector<8x4xf32>
    %cst_168 = arith.constant 5.000000e-01 : f32
    %482 = vector.broadcast %cst_168 : f32 to vector<8x4xf32>
    %483 = arith.mulf %481, %482 : vector<8x4xf32>
    %484 = vector.extract_strided_slice %443 {offsets = [0, 8], sizes = [8, 4], strides = [1, 1]} : vector<8x32xf32> to vector<8x4xf32>
    %cst_169 = arith.constant dense<0.000000e+00> : vector<8x8xf32>
    %485 = tpu.matmul %483, %484, %cst_169 {dimension_numbers = #tpu.dot_dimension_numbers<[1], [1], [0], [0], [0, 0, 1, 0], [], []>} : vector<8x4xf32>, vector<8x4xf32>, vector<8x8xf32> -> vector<8x8xf32>
    %cst_170 = arith.constant dense<0xFF800000> : vector<8xf32>
    %486 = vector.multi_reduction <maximumf>, %485, %cst_170 [1] : vector<8x8xf32> to vector<8xf32>
    %487 = vector.shape_cast %486 : vector<8xf32> to vector<8x1xf32>
    %488 = vector.broadcast %487 : vector<8x1xf32> to vector<8x8xf32>
    %489 = arith.subf %485, %488 : vector<8x8xf32>
    %490 = math.exp %489 : vector<8x8xf32>
    %cst_171 = arith.constant dense<0.000000e+00> : vector<8xf32>
    %491 = vector.multi_reduction <add>, %490, %cst_171 [1] : vector<8x8xf32> to vector<8xf32>
    %492 = vector.shape_cast %491 : vector<8xf32> to vector<8x1xf32>
    %493 = tpu.reciprocal %492 {approx = true} : vector<8x1xf32> -> vector<8x1xf32>
    %494 = vector.broadcast %493 : vector<8x1xf32> to vector<8x8xf32>
    %495 = arith.mulf %490, %494 : vector<8x8xf32>
    %496 = vector.extract_strided_slice %444 {offsets = [0, 8], sizes = [8, 4], strides = [1, 1]} : vector<8x32xf32> to vector<8x4xf32>
    %cst_172 = arith.constant dense<0.000000e+00> : vector<8x4xf32>
    %497 = tpu.matmul %495, %496, %cst_172 {dimension_numbers = #tpu.dot_dimension_numbers<[1], [0], [0], [1], [0, 0, 1, 1], [], []>} : vector<8x8xf32>, vector<8x4xf32>, vector<8x4xf32> -> vector<8x4xf32>
    %498 = vector.extract_strided_slice %442 {offsets = [0, 12], sizes = [8, 4], strides = [1, 1]} : vector<8x32xf32> to vector<8x4xf32>
    %cst_173 = arith.constant 5.000000e-01 : f32
    %499 = vector.broadcast %cst_173 : f32 to vector<8x4xf32>
    %500 = arith.mulf %498, %499 : vector<8x4xf32>
    %501 = vector.extract_strided_slice %443 {offsets = [0, 12], sizes = [8, 4], strides = [1, 1]} : vector<8x32xf32> to vector<8x4xf32>
    %cst_174 = arith.constant dense<0.000000e+00> : vector<8x8xf32>
    %502 = tpu.matmul %500, %501, %cst_174 {dimension_numbers = #tpu.dot_dimension_numbers<[1], [1], [0], [0], [0, 0, 1, 0], [], []>} : vector<8x4xf32>, vector<8x4xf32>, vector<8x8xf32> -> vector<8x8xf32>
    %cst_175 = arith.constant dense<0xFF800000> : vector<8xf32>
    %503 = vector.multi_reduction <maximumf>, %502, %cst_175 [1] : vector<8x8xf32> to vector<8xf32>
    %504 = vector.shape_cast %503 : vector<8xf32> to vector<8x1xf32>
    %505 = vector.broadcast %504 : vector<8x1xf32> to vector<8x8xf32>
    %506 = arith.subf %502, %505 : vector<8x8xf32>
    %507 = math.exp %506 : vector<8x8xf32>
    %cst_176 = arith.constant dense<0.000000e+00> : vector<8xf32>
    %508 = vector.multi_reduction <add>, %507, %cst_176 [1] : vector<8x8xf32> to vector<8xf32>
    %509 = vector.shape_cast %508 : vector<8xf32> to vector<8x1xf32>
    %510 = tpu.reciprocal %509 {approx = true} : vector<8x1xf32> -> vector<8x1xf32>
    %511 = vector.broadcast %510 : vector<8x1xf32> to vector<8x8xf32>
    %512 = arith.mulf %507, %511 : vector<8x8xf32>
    %513 = vector.extract_strided_slice %444 {offsets = [0, 12], sizes = [8, 4], strides = [1, 1]} : vector<8x32xf32> to vector<8x4xf32>
    %cst_177 = arith.constant dense<0.000000e+00> : vector<8x4xf32>
    %514 = tpu.matmul %512, %513, %cst_177 {dimension_numbers = #tpu.dot_dimension_numbers<[1], [0], [0], [1], [0, 0, 1, 1], [], []>} : vector<8x8xf32>, vector<8x4xf32>, vector<8x4xf32> -> vector<8x4xf32>
    %515 = vector.extract_strided_slice %442 {offsets = [0, 16], sizes = [8, 4], strides = [1, 1]} : vector<8x32xf32> to vector<8x4xf32>
    %cst_178 = arith.constant 5.000000e-01 : f32
    %516 = vector.broadcast %cst_178 : f32 to vector<8x4xf32>
    %517 = arith.mulf %515, %516 : vector<8x4xf32>
    %518 = vector.extract_strided_slice %443 {offsets = [0, 16], sizes = [8, 4], strides = [1, 1]} : vector<8x32xf32> to vector<8x4xf32>
    %cst_179 = arith.constant dense<0.000000e+00> : vector<8x8xf32>
    %519 = tpu.matmul %517, %518, %cst_179 {dimension_numbers = #tpu.dot_dimension_numbers<[1], [1], [0], [0], [0, 0, 1, 0], [], []>} : vector<8x4xf32>, vector<8x4xf32>, vector<8x8xf32> -> vector<8x8xf32>
    %cst_180 = arith.constant dense<0xFF800000> : vector<8xf32>
    %520 = vector.multi_reduction <maximumf>, %519, %cst_180 [1] : vector<8x8xf32> to vector<8xf32>
    %521 = vector.shape_cast %520 : vector<8xf32> to vector<8x1xf32>
    %522 = vector.broadcast %521 : vector<8x1xf32> to vector<8x8xf32>
    %523 = arith.subf %519, %522 : vector<8x8xf32>
    %524 = math.exp %523 : vector<8x8xf32>
    %cst_181 = arith.constant dense<0.000000e+00> : vector<8xf32>
    %525 = vector.multi_reduction <add>, %524, %cst_181 [1] : vector<8x8xf32> to vector<8xf32>
    %526 = vector.shape_cast %525 : vector<8xf32> to vector<8x1xf32>
    %527 = tpu.reciprocal %526 {approx = true} : vector<8x1xf32> -> vector<8x1xf32>
    %528 = vector.broadcast %527 : vector<8x1xf32> to vector<8x8xf32>
    %529 = arith.mulf %524, %528 : vector<8x8xf32>
    %530 = vector.extract_strided_slice %444 {offsets = [0, 16], sizes = [8, 4], strides = [1, 1]} : vector<8x32xf32> to vector<8x4xf32>
    %cst_182 = arith.constant dense<0.000000e+00> : vector<8x4xf32>
    %531 = tpu.matmul %529, %530, %cst_182 {dimension_numbers = #tpu.dot_dimension_numbers<[1], [0], [0], [1], [0, 0, 1, 1], [], []>} : vector<8x8xf32>, vector<8x4xf32>, vector<8x4xf32> -> vector<8x4xf32>
    %532 = vector.extract_strided_slice %442 {offsets = [0, 20], sizes = [8, 4], strides = [1, 1]} : vector<8x32xf32> to vector<8x4xf32>
    %cst_183 = arith.constant 5.000000e-01 : f32
    %533 = vector.broadcast %cst_183 : f32 to vector<8x4xf32>
    %534 = arith.mulf %532, %533 : vector<8x4xf32>
    %535 = vector.extract_strided_slice %443 {offsets = [0, 20], sizes = [8, 4], strides = [1, 1]} : vector<8x32xf32> to vector<8x4xf32>
    %cst_184 = arith.constant dense<0.000000e+00> : vector<8x8xf32>
    %536 = tpu.matmul %534, %535, %cst_184 {dimension_numbers = #tpu.dot_dimension_numbers<[1], [1], [0], [0], [0, 0, 1, 0], [], []>} : vector<8x4xf32>, vector<8x4xf32>, vector<8x8xf32> -> vector<8x8xf32>
    %cst_185 = arith.constant dense<0xFF800000> : vector<8xf32>
    %537 = vector.multi_reduction <maximumf>, %536, %cst_185 [1] : vector<8x8xf32> to vector<8xf32>
    %538 = vector.shape_cast %537 : vector<8xf32> to vector<8x1xf32>
    %539 = vector.broadcast %538 : vector<8x1xf32> to vector<8x8xf32>
    %540 = arith.subf %536, %539 : vector<8x8xf32>
    %541 = math.exp %540 : vector<8x8xf32>
    %cst_186 = arith.constant dense<0.000000e+00> : vector<8xf32>
    %542 = vector.multi_reduction <add>, %541, %cst_186 [1] : vector<8x8xf32> to vector<8xf32>
    %543 = vector.shape_cast %542 : vector<8xf32> to vector<8x1xf32>
    %544 = tpu.reciprocal %543 {approx = true} : vector<8x1xf32> -> vector<8x1xf32>
    %545 = vector.broadcast %544 : vector<8x1xf32> to vector<8x8xf32>
    %546 = arith.mulf %541, %545 : vector<8x8xf32>
    %547 = vector.extract_strided_slice %444 {offsets = [0, 20], sizes = [8, 4], strides = [1, 1]} : vector<8x32xf32> to vector<8x4xf32>
    %cst_187 = arith.constant dense<0.000000e+00> : vector<8x4xf32>
    %548 = tpu.matmul %546, %547, %cst_187 {dimension_numbers = #tpu.dot_dimension_numbers<[1], [0], [0], [1], [0, 0, 1, 1], [], []>} : vector<8x8xf32>, vector<8x4xf32>, vector<8x4xf32> -> vector<8x4xf32>
    %549 = vector.extract_strided_slice %442 {offsets = [0, 24], sizes = [8, 4], strides = [1, 1]} : vector<8x32xf32> to vector<8x4xf32>
    %cst_188 = arith.constant 5.000000e-01 : f32
    %550 = vector.broadcast %cst_188 : f32 to vector<8x4xf32>
    %551 = arith.mulf %549, %550 : vector<8x4xf32>
    %552 = vector.extract_strided_slice %443 {offsets = [0, 24], sizes = [8, 4], strides = [1, 1]} : vector<8x32xf32> to vector<8x4xf32>
    %cst_189 = arith.constant dense<0.000000e+00> : vector<8x8xf32>
    %553 = tpu.matmul %551, %552, %cst_189 {dimension_numbers = #tpu.dot_dimension_numbers<[1], [1], [0], [0], [0, 0, 1, 0], [], []>} : vector<8x4xf32>, vector<8x4xf32>, vector<8x8xf32> -> vector<8x8xf32>
    %cst_190 = arith.constant dense<0xFF800000> : vector<8xf32>
    %554 = vector.multi_reduction <maximumf>, %553, %cst_190 [1] : vector<8x8xf32> to vector<8xf32>
    %555 = vector.shape_cast %554 : vector<8xf32> to vector<8x1xf32>
    %556 = vector.broadcast %555 : vector<8x1xf32> to vector<8x8xf32>
    %557 = arith.subf %553, %556 : vector<8x8xf32>
    %558 = math.exp %557 : vector<8x8xf32>
    %cst_191 = arith.constant dense<0.000000e+00> : vector<8xf32>
    %559 = vector.multi_reduction <add>, %558, %cst_191 [1] : vector<8x8xf32> to vector<8xf32>
    %560 = vector.shape_cast %559 : vector<8xf32> to vector<8x1xf32>
    %561 = tpu.reciprocal %560 {approx = true} : vector<8x1xf32> -> vector<8x1xf32>
    %562 = vector.broadcast %561 : vector<8x1xf32> to vector<8x8xf32>
    %563 = arith.mulf %558, %562 : vector<8x8xf32>
    %564 = vector.extract_strided_slice %444 {offsets = [0, 24], sizes = [8, 4], strides = [1, 1]} : vector<8x32xf32> to vector<8x4xf32>
    %cst_192 = arith.constant dense<0.000000e+00> : vector<8x4xf32>
    %565 = tpu.matmul %563, %564, %cst_192 {dimension_numbers = #tpu.dot_dimension_numbers<[1], [0], [0], [1], [0, 0, 1, 1], [], []>} : vector<8x8xf32>, vector<8x4xf32>, vector<8x4xf32> -> vector<8x4xf32>
    %566 = vector.extract_strided_slice %442 {offsets = [0, 28], sizes = [8, 4], strides = [1, 1]} : vector<8x32xf32> to vector<8x4xf32>
    %cst_193 = arith.constant 5.000000e-01 : f32
    %567 = vector.broadcast %cst_193 : f32 to vector<8x4xf32>
    %568 = arith.mulf %566, %567 : vector<8x4xf32>
    %569 = vector.extract_strided_slice %443 {offsets = [0, 28], sizes = [8, 4], strides = [1, 1]} : vector<8x32xf32> to vector<8x4xf32>
    %cst_194 = arith.constant dense<0.000000e+00> : vector<8x8xf32>
    %570 = tpu.matmul %568, %569, %cst_194 {dimension_numbers = #tpu.dot_dimension_numbers<[1], [1], [0], [0], [0, 0, 1, 0], [], []>} : vector<8x4xf32>, vector<8x4xf32>, vector<8x8xf32> -> vector<8x8xf32>
    %cst_195 = arith.constant dense<0xFF800000> : vector<8xf32>
    %571 = vector.multi_reduction <maximumf>, %570, %cst_195 [1] : vector<8x8xf32> to vector<8xf32>
    %572 = vector.shape_cast %571 : vector<8xf32> to vector<8x1xf32>
    %573 = vector.broadcast %572 : vector<8x1xf32> to vector<8x8xf32>
    %574 = arith.subf %570, %573 : vector<8x8xf32>
    %575 = math.exp %574 : vector<8x8xf32>
    %cst_196 = arith.constant dense<0.000000e+00> : vector<8xf32>
    %576 = vector.multi_reduction <add>, %575, %cst_196 [1] : vector<8x8xf32> to vector<8xf32>
    %577 = vector.shape_cast %576 : vector<8xf32> to vector<8x1xf32>
    %578 = tpu.reciprocal %577 {approx = true} : vector<8x1xf32> -> vector<8x1xf32>
    %579 = vector.broadcast %578 : vector<8x1xf32> to vector<8x8xf32>
    %580 = arith.mulf %575, %579 : vector<8x8xf32>
    %581 = vector.extract_strided_slice %444 {offsets = [0, 28], sizes = [8, 4], strides = [1, 1]} : vector<8x32xf32> to vector<8x4xf32>
    %cst_197 = arith.constant dense<0.000000e+00> : vector<8x4xf32>
    %582 = tpu.matmul %580, %581, %cst_197 {dimension_numbers = #tpu.dot_dimension_numbers<[1], [0], [0], [1], [0, 0, 1, 1], [], []>} : vector<8x8xf32>, vector<8x4xf32>, vector<8x4xf32> -> vector<8x4xf32>
    %583 = tpu.concatenate %463, %480, %497, %514, %531, %548, %565, %582 in 1 : vector<8x4xf32>, vector<8x4xf32>, vector<8x4xf32>, vector<8x4xf32>, vector<8x4xf32>, vector<8x4xf32>, vector<8x4xf32>, vector<8x4xf32> -> vector<8x32xf32>
    %cst_198 = arith.constant dense<0.000000e+00> : vector<8x32xf32>
    %584 = tpu.matmul %583, %445, %cst_198 {dimension_numbers = #tpu.dot_dimension_numbers<[1], [0], [0], [1], [0, 0, 1, 1], [], []>} : vector<8x32xf32>, vector<32x32xf32>, vector<8x32xf32> -> vector<8x32xf32>
    %585 = vector.broadcast %446 : vector<1x32xf32> to vector<8x32xf32>
    %586 = arith.addf %584, %585 : vector<8x32xf32>
    %c0_199 = arith.constant 0 : index
    %c0_200 = arith.constant 0 : index
    %587 = vector.load %arg36[%c0_199, %c0_200] : memref<1x32xf32, #tpu.memory_space<vmem>>, vector<1x32xf32>
    %c0_201 = arith.constant 0 : index
    %c0_202 = arith.constant 0 : index
    %588 = vector.load %arg37[%c0_201, %c0_202] : memref<1x32xf32, #tpu.memory_space<vmem>>, vector<1x32xf32>
    %589 = arith.addf %586, %436 : vector<8x32xf32>
    %cst_203 = arith.constant dense<0.000000e+00> : vector<8xf32>
    %590 = vector.multi_reduction <add>, %589, %cst_203 [1] : vector<8x32xf32> to vector<8xf32>
    %591 = vector.shape_cast %590 : vector<8xf32> to vector<8x1xf32>
    %cst_204 = arith.constant 3.200000e+01 : f32
    %592 = vector.broadcast %cst_204 : f32 to vector<8x1xf32>
    %593 = arith.divf %591, %592 : vector<8x1xf32>
    %594 = vector.broadcast %593 : vector<8x1xf32> to vector<8x32xf32>
    %595 = arith.subf %589, %594 : vector<8x32xf32>
    %596 = arith.mulf %595, %595 : vector<8x32xf32>
    %cst_205 = arith.constant dense<0.000000e+00> : vector<8xf32>
    %597 = vector.multi_reduction <add>, %596, %cst_205 [1] : vector<8x32xf32> to vector<8xf32>
    %598 = vector.shape_cast %597 : vector<8xf32> to vector<8x1xf32>
    %cst_206 = arith.constant 3.200000e+01 : f32
    %599 = vector.broadcast %cst_206 : f32 to vector<8x1xf32>
    %600 = arith.divf %598, %599 : vector<8x1xf32>
    %601 = vector.broadcast %593 : vector<8x1xf32> to vector<8x32xf32>
    %602 = arith.subf %589, %601 : vector<8x32xf32>
    %cst_207 = arith.constant 9.99999974E-6 : f32
    %603 = vector.broadcast %cst_207 : f32 to vector<8x1xf32>
    %604 = arith.addf %600, %603 : vector<8x1xf32>
    %605 = math.rsqrt %604 : vector<8x1xf32>
    %606 = vector.broadcast %605 : vector<8x1xf32> to vector<8x32xf32>
    %607 = arith.mulf %602, %606 : vector<8x32xf32>
    %608 = vector.broadcast %587 : vector<1x32xf32> to vector<8x32xf32>
    %609 = arith.mulf %607, %608 : vector<8x32xf32>
    %610 = vector.broadcast %588 : vector<1x32xf32> to vector<8x32xf32>
    %611 = arith.addf %609, %610 : vector<8x32xf32>
    %c0_208 = arith.constant 0 : index
    %c0_209 = arith.constant 0 : index
    %612 = vector.load %arg38[%c0_208, %c0_209] : memref<32x32xf32, #tpu.memory_space<vmem>>, vector<32x32xf32>
    %c0_210 = arith.constant 0 : index
    %c0_211 = arith.constant 0 : index
    %613 = vector.load %arg39[%c0_210, %c0_211] : memref<1x32xf32, #tpu.memory_space<vmem>>, vector<1x32xf32>
    %cst_212 = arith.constant dense<0.000000e+00> : vector<8x32xf32>
    %614 = tpu.matmul %611, %612, %cst_212 {dimension_numbers = #tpu.dot_dimension_numbers<[1], [0], [0], [1], [0, 0, 1, 1], [], []>} : vector<8x32xf32>, vector<32x32xf32>, vector<8x32xf32> -> vector<8x32xf32>
    %615 = vector.broadcast %613 : vector<1x32xf32> to vector<8x32xf32>
    %616 = arith.addf %614, %615 : vector<8x32xf32>
    %c0_213 = arith.constant 0 : index
    %c0_214 = arith.constant 0 : index
    %617 = vector.load %arg40[%c0_213, %c0_214] : memref<32x64xf32, #tpu.memory_space<vmem>>, vector<32x64xf32>
    %c0_215 = arith.constant 0 : index
    %c0_216 = arith.constant 0 : index
    %618 = vector.load %arg41[%c0_215, %c0_216] : memref<1x64xf32, #tpu.memory_space<vmem>>, vector<1x64xf32>
    %cst_217 = arith.constant dense<0.000000e+00> : vector<8x64xf32>
    %619 = tpu.matmul %224, %617, %cst_217 {dimension_numbers = #tpu.dot_dimension_numbers<[1], [0], [0], [1], [0, 0, 1, 1], [], []>} : vector<8x32xf32>, vector<32x64xf32>, vector<8x64xf32> -> vector<8x64xf32>
    %620 = vector.broadcast %618 : vector<1x64xf32> to vector<8x64xf32>
    %621 = arith.addf %619, %620 : vector<8x64xf32>
    %622 = vector.extract_strided_slice %621 {offsets = [0, 0], sizes = [8, 32], strides = [1, 1]} : vector<8x64xf32> to vector<8x32xf32>
    %623 = vector.extract_strided_slice %621 {offsets = [0, 32], sizes = [8, 32], strides = [1, 1]} : vector<8x64xf32> to vector<8x32xf32>
    %c0_218 = arith.constant 0 : index
    %c0_219 = arith.constant 0 : index
    %624 = vector.load %arg42[%c0_218, %c0_219] : memref<32x32xf32, #tpu.memory_space<vmem>>, vector<32x32xf32>
    %c0_220 = arith.constant 0 : index
    %c0_221 = arith.constant 0 : index
    %625 = vector.load %arg43[%c0_220, %c0_221] : memref<1x32xf32, #tpu.memory_space<vmem>>, vector<1x32xf32>
    %626 = vector.extract_strided_slice %616 {offsets = [0, 0], sizes = [8, 4], strides = [1, 1]} : vector<8x32xf32> to vector<8x4xf32>
    %cst_222 = arith.constant 5.000000e-01 : f32
    %627 = vector.broadcast %cst_222 : f32 to vector<8x4xf32>
    %628 = arith.mulf %626, %627 : vector<8x4xf32>
    %629 = vector.extract_strided_slice %622 {offsets = [0, 0], sizes = [8, 4], strides = [1, 1]} : vector<8x32xf32> to vector<8x4xf32>
    %cst_223 = arith.constant dense<0.000000e+00> : vector<8x8xf32>
    %630 = tpu.matmul %628, %629, %cst_223 {dimension_numbers = #tpu.dot_dimension_numbers<[1], [1], [0], [0], [0, 0, 1, 0], [], []>} : vector<8x4xf32>, vector<8x4xf32>, vector<8x8xf32> -> vector<8x8xf32>
    %cst_224 = arith.constant dense<0xFF800000> : vector<8xf32>
    %631 = vector.multi_reduction <maximumf>, %630, %cst_224 [1] : vector<8x8xf32> to vector<8xf32>
    %632 = vector.shape_cast %631 : vector<8xf32> to vector<8x1xf32>
    %633 = vector.broadcast %632 : vector<8x1xf32> to vector<8x8xf32>
    %634 = arith.subf %630, %633 : vector<8x8xf32>
    %635 = math.exp %634 : vector<8x8xf32>
    %cst_225 = arith.constant dense<0.000000e+00> : vector<8xf32>
    %636 = vector.multi_reduction <add>, %635, %cst_225 [1] : vector<8x8xf32> to vector<8xf32>
    %637 = vector.shape_cast %636 : vector<8xf32> to vector<8x1xf32>
    %638 = tpu.reciprocal %637 {approx = true} : vector<8x1xf32> -> vector<8x1xf32>
    %639 = vector.broadcast %638 : vector<8x1xf32> to vector<8x8xf32>
    %640 = arith.mulf %635, %639 : vector<8x8xf32>
    %641 = vector.extract_strided_slice %623 {offsets = [0, 0], sizes = [8, 4], strides = [1, 1]} : vector<8x32xf32> to vector<8x4xf32>
    %cst_226 = arith.constant dense<0.000000e+00> : vector<8x4xf32>
    %642 = tpu.matmul %640, %641, %cst_226 {dimension_numbers = #tpu.dot_dimension_numbers<[1], [0], [0], [1], [0, 0, 1, 1], [], []>} : vector<8x8xf32>, vector<8x4xf32>, vector<8x4xf32> -> vector<8x4xf32>
    %643 = vector.extract_strided_slice %616 {offsets = [0, 4], sizes = [8, 4], strides = [1, 1]} : vector<8x32xf32> to vector<8x4xf32>
    %cst_227 = arith.constant 5.000000e-01 : f32
    %644 = vector.broadcast %cst_227 : f32 to vector<8x4xf32>
    %645 = arith.mulf %643, %644 : vector<8x4xf32>
    %646 = vector.extract_strided_slice %622 {offsets = [0, 4], sizes = [8, 4], strides = [1, 1]} : vector<8x32xf32> to vector<8x4xf32>
    %cst_228 = arith.constant dense<0.000000e+00> : vector<8x8xf32>
    %647 = tpu.matmul %645, %646, %cst_228 {dimension_numbers = #tpu.dot_dimension_numbers<[1], [1], [0], [0], [0, 0, 1, 0], [], []>} : vector<8x4xf32>, vector<8x4xf32>, vector<8x8xf32> -> vector<8x8xf32>
    %cst_229 = arith.constant dense<0xFF800000> : vector<8xf32>
    %648 = vector.multi_reduction <maximumf>, %647, %cst_229 [1] : vector<8x8xf32> to vector<8xf32>
    %649 = vector.shape_cast %648 : vector<8xf32> to vector<8x1xf32>
    %650 = vector.broadcast %649 : vector<8x1xf32> to vector<8x8xf32>
    %651 = arith.subf %647, %650 : vector<8x8xf32>
    %652 = math.exp %651 : vector<8x8xf32>
    %cst_230 = arith.constant dense<0.000000e+00> : vector<8xf32>
    %653 = vector.multi_reduction <add>, %652, %cst_230 [1] : vector<8x8xf32> to vector<8xf32>
    %654 = vector.shape_cast %653 : vector<8xf32> to vector<8x1xf32>
    %655 = tpu.reciprocal %654 {approx = true} : vector<8x1xf32> -> vector<8x1xf32>
    %656 = vector.broadcast %655 : vector<8x1xf32> to vector<8x8xf32>
    %657 = arith.mulf %652, %656 : vector<8x8xf32>
    %658 = vector.extract_strided_slice %623 {offsets = [0, 4], sizes = [8, 4], strides = [1, 1]} : vector<8x32xf32> to vector<8x4xf32>
    %cst_231 = arith.constant dense<0.000000e+00> : vector<8x4xf32>
    %659 = tpu.matmul %657, %658, %cst_231 {dimension_numbers = #tpu.dot_dimension_numbers<[1], [0], [0], [1], [0, 0, 1, 1], [], []>} : vector<8x8xf32>, vector<8x4xf32>, vector<8x4xf32> -> vector<8x4xf32>
    %660 = vector.extract_strided_slice %616 {offsets = [0, 8], sizes = [8, 4], strides = [1, 1]} : vector<8x32xf32> to vector<8x4xf32>
    %cst_232 = arith.constant 5.000000e-01 : f32
    %661 = vector.broadcast %cst_232 : f32 to vector<8x4xf32>
    %662 = arith.mulf %660, %661 : vector<8x4xf32>
    %663 = vector.extract_strided_slice %622 {offsets = [0, 8], sizes = [8, 4], strides = [1, 1]} : vector<8x32xf32> to vector<8x4xf32>
    %cst_233 = arith.constant dense<0.000000e+00> : vector<8x8xf32>
    %664 = tpu.matmul %662, %663, %cst_233 {dimension_numbers = #tpu.dot_dimension_numbers<[1], [1], [0], [0], [0, 0, 1, 0], [], []>} : vector<8x4xf32>, vector<8x4xf32>, vector<8x8xf32> -> vector<8x8xf32>
    %cst_234 = arith.constant dense<0xFF800000> : vector<8xf32>
    %665 = vector.multi_reduction <maximumf>, %664, %cst_234 [1] : vector<8x8xf32> to vector<8xf32>
    %666 = vector.shape_cast %665 : vector<8xf32> to vector<8x1xf32>
    %667 = vector.broadcast %666 : vector<8x1xf32> to vector<8x8xf32>
    %668 = arith.subf %664, %667 : vector<8x8xf32>
    %669 = math.exp %668 : vector<8x8xf32>
    %cst_235 = arith.constant dense<0.000000e+00> : vector<8xf32>
    %670 = vector.multi_reduction <add>, %669, %cst_235 [1] : vector<8x8xf32> to vector<8xf32>
    %671 = vector.shape_cast %670 : vector<8xf32> to vector<8x1xf32>
    %672 = tpu.reciprocal %671 {approx = true} : vector<8x1xf32> -> vector<8x1xf32>
    %673 = vector.broadcast %672 : vector<8x1xf32> to vector<8x8xf32>
    %674 = arith.mulf %669, %673 : vector<8x8xf32>
    %675 = vector.extract_strided_slice %623 {offsets = [0, 8], sizes = [8, 4], strides = [1, 1]} : vector<8x32xf32> to vector<8x4xf32>
    %cst_236 = arith.constant dense<0.000000e+00> : vector<8x4xf32>
    %676 = tpu.matmul %674, %675, %cst_236 {dimension_numbers = #tpu.dot_dimension_numbers<[1], [0], [0], [1], [0, 0, 1, 1], [], []>} : vector<8x8xf32>, vector<8x4xf32>, vector<8x4xf32> -> vector<8x4xf32>
    %677 = vector.extract_strided_slice %616 {offsets = [0, 12], sizes = [8, 4], strides = [1, 1]} : vector<8x32xf32> to vector<8x4xf32>
    %cst_237 = arith.constant 5.000000e-01 : f32
    %678 = vector.broadcast %cst_237 : f32 to vector<8x4xf32>
    %679 = arith.mulf %677, %678 : vector<8x4xf32>
    %680 = vector.extract_strided_slice %622 {offsets = [0, 12], sizes = [8, 4], strides = [1, 1]} : vector<8x32xf32> to vector<8x4xf32>
    %cst_238 = arith.constant dense<0.000000e+00> : vector<8x8xf32>
    %681 = tpu.matmul %679, %680, %cst_238 {dimension_numbers = #tpu.dot_dimension_numbers<[1], [1], [0], [0], [0, 0, 1, 0], [], []>} : vector<8x4xf32>, vector<8x4xf32>, vector<8x8xf32> -> vector<8x8xf32>
    %cst_239 = arith.constant dense<0xFF800000> : vector<8xf32>
    %682 = vector.multi_reduction <maximumf>, %681, %cst_239 [1] : vector<8x8xf32> to vector<8xf32>
    %683 = vector.shape_cast %682 : vector<8xf32> to vector<8x1xf32>
    %684 = vector.broadcast %683 : vector<8x1xf32> to vector<8x8xf32>
    %685 = arith.subf %681, %684 : vector<8x8xf32>
    %686 = math.exp %685 : vector<8x8xf32>
    %cst_240 = arith.constant dense<0.000000e+00> : vector<8xf32>
    %687 = vector.multi_reduction <add>, %686, %cst_240 [1] : vector<8x8xf32> to vector<8xf32>
    %688 = vector.shape_cast %687 : vector<8xf32> to vector<8x1xf32>
    %689 = tpu.reciprocal %688 {approx = true} : vector<8x1xf32> -> vector<8x1xf32>
    %690 = vector.broadcast %689 : vector<8x1xf32> to vector<8x8xf32>
    %691 = arith.mulf %686, %690 : vector<8x8xf32>
    %692 = vector.extract_strided_slice %623 {offsets = [0, 12], sizes = [8, 4], strides = [1, 1]} : vector<8x32xf32> to vector<8x4xf32>
    %cst_241 = arith.constant dense<0.000000e+00> : vector<8x4xf32>
    %693 = tpu.matmul %691, %692, %cst_241 {dimension_numbers = #tpu.dot_dimension_numbers<[1], [0], [0], [1], [0, 0, 1, 1], [], []>} : vector<8x8xf32>, vector<8x4xf32>, vector<8x4xf32> -> vector<8x4xf32>
    %694 = vector.extract_strided_slice %616 {offsets = [0, 16], sizes = [8, 4], strides = [1, 1]} : vector<8x32xf32> to vector<8x4xf32>
    %cst_242 = arith.constant 5.000000e-01 : f32
    %695 = vector.broadcast %cst_242 : f32 to vector<8x4xf32>
    %696 = arith.mulf %694, %695 : vector<8x4xf32>
    %697 = vector.extract_strided_slice %622 {offsets = [0, 16], sizes = [8, 4], strides = [1, 1]} : vector<8x32xf32> to vector<8x4xf32>
    %cst_243 = arith.constant dense<0.000000e+00> : vector<8x8xf32>
    %698 = tpu.matmul %696, %697, %cst_243 {dimension_numbers = #tpu.dot_dimension_numbers<[1], [1], [0], [0], [0, 0, 1, 0], [], []>} : vector<8x4xf32>, vector<8x4xf32>, vector<8x8xf32> -> vector<8x8xf32>
    %cst_244 = arith.constant dense<0xFF800000> : vector<8xf32>
    %699 = vector.multi_reduction <maximumf>, %698, %cst_244 [1] : vector<8x8xf32> to vector<8xf32>
    %700 = vector.shape_cast %699 : vector<8xf32> to vector<8x1xf32>
    %701 = vector.broadcast %700 : vector<8x1xf32> to vector<8x8xf32>
    %702 = arith.subf %698, %701 : vector<8x8xf32>
    %703 = math.exp %702 : vector<8x8xf32>
    %cst_245 = arith.constant dense<0.000000e+00> : vector<8xf32>
    %704 = vector.multi_reduction <add>, %703, %cst_245 [1] : vector<8x8xf32> to vector<8xf32>
    %705 = vector.shape_cast %704 : vector<8xf32> to vector<8x1xf32>
    %706 = tpu.reciprocal %705 {approx = true} : vector<8x1xf32> -> vector<8x1xf32>
    %707 = vector.broadcast %706 : vector<8x1xf32> to vector<8x8xf32>
    %708 = arith.mulf %703, %707 : vector<8x8xf32>
    %709 = vector.extract_strided_slice %623 {offsets = [0, 16], sizes = [8, 4], strides = [1, 1]} : vector<8x32xf32> to vector<8x4xf32>
    %cst_246 = arith.constant dense<0.000000e+00> : vector<8x4xf32>
    %710 = tpu.matmul %708, %709, %cst_246 {dimension_numbers = #tpu.dot_dimension_numbers<[1], [0], [0], [1], [0, 0, 1, 1], [], []>} : vector<8x8xf32>, vector<8x4xf32>, vector<8x4xf32> -> vector<8x4xf32>
    %711 = vector.extract_strided_slice %616 {offsets = [0, 20], sizes = [8, 4], strides = [1, 1]} : vector<8x32xf32> to vector<8x4xf32>
    %cst_247 = arith.constant 5.000000e-01 : f32
    %712 = vector.broadcast %cst_247 : f32 to vector<8x4xf32>
    %713 = arith.mulf %711, %712 : vector<8x4xf32>
    %714 = vector.extract_strided_slice %622 {offsets = [0, 20], sizes = [8, 4], strides = [1, 1]} : vector<8x32xf32> to vector<8x4xf32>
    %cst_248 = arith.constant dense<0.000000e+00> : vector<8x8xf32>
    %715 = tpu.matmul %713, %714, %cst_248 {dimension_numbers = #tpu.dot_dimension_numbers<[1], [1], [0], [0], [0, 0, 1, 0], [], []>} : vector<8x4xf32>, vector<8x4xf32>, vector<8x8xf32> -> vector<8x8xf32>
    %cst_249 = arith.constant dense<0xFF800000> : vector<8xf32>
    %716 = vector.multi_reduction <maximumf>, %715, %cst_249 [1] : vector<8x8xf32> to vector<8xf32>
    %717 = vector.shape_cast %716 : vector<8xf32> to vector<8x1xf32>
    %718 = vector.broadcast %717 : vector<8x1xf32> to vector<8x8xf32>
    %719 = arith.subf %715, %718 : vector<8x8xf32>
    %720 = math.exp %719 : vector<8x8xf32>
    %cst_250 = arith.constant dense<0.000000e+00> : vector<8xf32>
    %721 = vector.multi_reduction <add>, %720, %cst_250 [1] : vector<8x8xf32> to vector<8xf32>
    %722 = vector.shape_cast %721 : vector<8xf32> to vector<8x1xf32>
    %723 = tpu.reciprocal %722 {approx = true} : vector<8x1xf32> -> vector<8x1xf32>
    %724 = vector.broadcast %723 : vector<8x1xf32> to vector<8x8xf32>
    %725 = arith.mulf %720, %724 : vector<8x8xf32>
    %726 = vector.extract_strided_slice %623 {offsets = [0, 20], sizes = [8, 4], strides = [1, 1]} : vector<8x32xf32> to vector<8x4xf32>
    %cst_251 = arith.constant dense<0.000000e+00> : vector<8x4xf32>
    %727 = tpu.matmul %725, %726, %cst_251 {dimension_numbers = #tpu.dot_dimension_numbers<[1], [0], [0], [1], [0, 0, 1, 1], [], []>} : vector<8x8xf32>, vector<8x4xf32>, vector<8x4xf32> -> vector<8x4xf32>
    %728 = vector.extract_strided_slice %616 {offsets = [0, 24], sizes = [8, 4], strides = [1, 1]} : vector<8x32xf32> to vector<8x4xf32>
    %cst_252 = arith.constant 5.000000e-01 : f32
    %729 = vector.broadcast %cst_252 : f32 to vector<8x4xf32>
    %730 = arith.mulf %728, %729 : vector<8x4xf32>
    %731 = vector.extract_strided_slice %622 {offsets = [0, 24], sizes = [8, 4], strides = [1, 1]} : vector<8x32xf32> to vector<8x4xf32>
    %cst_253 = arith.constant dense<0.000000e+00> : vector<8x8xf32>
    %732 = tpu.matmul %730, %731, %cst_253 {dimension_numbers = #tpu.dot_dimension_numbers<[1], [1], [0], [0], [0, 0, 1, 0], [], []>} : vector<8x4xf32>, vector<8x4xf32>, vector<8x8xf32> -> vector<8x8xf32>
    %cst_254 = arith.constant dense<0xFF800000> : vector<8xf32>
    %733 = vector.multi_reduction <maximumf>, %732, %cst_254 [1] : vector<8x8xf32> to vector<8xf32>
    %734 = vector.shape_cast %733 : vector<8xf32> to vector<8x1xf32>
    %735 = vector.broadcast %734 : vector<8x1xf32> to vector<8x8xf32>
    %736 = arith.subf %732, %735 : vector<8x8xf32>
    %737 = math.exp %736 : vector<8x8xf32>
    %cst_255 = arith.constant dense<0.000000e+00> : vector<8xf32>
    %738 = vector.multi_reduction <add>, %737, %cst_255 [1] : vector<8x8xf32> to vector<8xf32>
    %739 = vector.shape_cast %738 : vector<8xf32> to vector<8x1xf32>
    %740 = tpu.reciprocal %739 {approx = true} : vector<8x1xf32> -> vector<8x1xf32>
    %741 = vector.broadcast %740 : vector<8x1xf32> to vector<8x8xf32>
    %742 = arith.mulf %737, %741 : vector<8x8xf32>
    %743 = vector.extract_strided_slice %623 {offsets = [0, 24], sizes = [8, 4], strides = [1, 1]} : vector<8x32xf32> to vector<8x4xf32>
    %cst_256 = arith.constant dense<0.000000e+00> : vector<8x4xf32>
    %744 = tpu.matmul %742, %743, %cst_256 {dimension_numbers = #tpu.dot_dimension_numbers<[1], [0], [0], [1], [0, 0, 1, 1], [], []>} : vector<8x8xf32>, vector<8x4xf32>, vector<8x4xf32> -> vector<8x4xf32>
    %745 = vector.extract_strided_slice %616 {offsets = [0, 28], sizes = [8, 4], strides = [1, 1]} : vector<8x32xf32> to vector<8x4xf32>
    %cst_257 = arith.constant 5.000000e-01 : f32
    %746 = vector.broadcast %cst_257 : f32 to vector<8x4xf32>
    %747 = arith.mulf %745, %746 : vector<8x4xf32>
    %748 = vector.extract_strided_slice %622 {offsets = [0, 28], sizes = [8, 4], strides = [1, 1]} : vector<8x32xf32> to vector<8x4xf32>
    %cst_258 = arith.constant dense<0.000000e+00> : vector<8x8xf32>
    %749 = tpu.matmul %747, %748, %cst_258 {dimension_numbers = #tpu.dot_dimension_numbers<[1], [1], [0], [0], [0, 0, 1, 0], [], []>} : vector<8x4xf32>, vector<8x4xf32>, vector<8x8xf32> -> vector<8x8xf32>
    %cst_259 = arith.constant dense<0xFF800000> : vector<8xf32>
    %750 = vector.multi_reduction <maximumf>, %749, %cst_259 [1] : vector<8x8xf32> to vector<8xf32>
    %751 = vector.shape_cast %750 : vector<8xf32> to vector<8x1xf32>
    %752 = vector.broadcast %751 : vector<8x1xf32> to vector<8x8xf32>
    %753 = arith.subf %749, %752 : vector<8x8xf32>
    %754 = math.exp %753 : vector<8x8xf32>
    %cst_260 = arith.constant dense<0.000000e+00> : vector<8xf32>
    %755 = vector.multi_reduction <add>, %754, %cst_260 [1] : vector<8x8xf32> to vector<8xf32>
    %756 = vector.shape_cast %755 : vector<8xf32> to vector<8x1xf32>
    %757 = tpu.reciprocal %756 {approx = true} : vector<8x1xf32> -> vector<8x1xf32>
    %758 = vector.broadcast %757 : vector<8x1xf32> to vector<8x8xf32>
    %759 = arith.mulf %754, %758 : vector<8x8xf32>
    %760 = vector.extract_strided_slice %623 {offsets = [0, 28], sizes = [8, 4], strides = [1, 1]} : vector<8x32xf32> to vector<8x4xf32>
    %cst_261 = arith.constant dense<0.000000e+00> : vector<8x4xf32>
    %761 = tpu.matmul %759, %760, %cst_261 {dimension_numbers = #tpu.dot_dimension_numbers<[1], [0], [0], [1], [0, 0, 1, 1], [], []>} : vector<8x8xf32>, vector<8x4xf32>, vector<8x4xf32> -> vector<8x4xf32>
    %762 = tpu.concatenate %642, %659, %676, %693, %710, %727, %744, %761 in 1 : vector<8x4xf32>, vector<8x4xf32>, vector<8x4xf32>, vector<8x4xf32>, vector<8x4xf32>, vector<8x4xf32>, vector<8x4xf32>, vector<8x4xf32> -> vector<8x32xf32>
    %cst_262 = arith.constant dense<0.000000e+00> : vector<8x32xf32>
    %763 = tpu.matmul %762, %624, %cst_262 {dimension_numbers = #tpu.dot_dimension_numbers<[1], [0], [0], [1], [0, 0, 1, 1], [], []>} : vector<8x32xf32>, vector<32x32xf32>, vector<8x32xf32> -> vector<8x32xf32>
    %764 = vector.broadcast %625 : vector<1x32xf32> to vector<8x32xf32>
    %765 = arith.addf %763, %764 : vector<8x32xf32>
    %c0_263 = arith.constant 0 : index
    %c0_264 = arith.constant 0 : index
    %766 = vector.load %arg44[%c0_263, %c0_264] : memref<1x32xf32, #tpu.memory_space<vmem>>, vector<1x32xf32>
    %c0_265 = arith.constant 0 : index
    %c0_266 = arith.constant 0 : index
    %767 = vector.load %arg45[%c0_265, %c0_266] : memref<1x32xf32, #tpu.memory_space<vmem>>, vector<1x32xf32>
    %768 = arith.addf %765, %611 : vector<8x32xf32>
    %cst_267 = arith.constant dense<0.000000e+00> : vector<8xf32>
    %769 = vector.multi_reduction <add>, %768, %cst_267 [1] : vector<8x32xf32> to vector<8xf32>
    %770 = vector.shape_cast %769 : vector<8xf32> to vector<8x1xf32>
    %cst_268 = arith.constant 3.200000e+01 : f32
    %771 = vector.broadcast %cst_268 : f32 to vector<8x1xf32>
    %772 = arith.divf %770, %771 : vector<8x1xf32>
    %773 = vector.broadcast %772 : vector<8x1xf32> to vector<8x32xf32>
    %774 = arith.subf %768, %773 : vector<8x32xf32>
    %775 = arith.mulf %774, %774 : vector<8x32xf32>
    %cst_269 = arith.constant dense<0.000000e+00> : vector<8xf32>
    %776 = vector.multi_reduction <add>, %775, %cst_269 [1] : vector<8x32xf32> to vector<8xf32>
    %777 = vector.shape_cast %776 : vector<8xf32> to vector<8x1xf32>
    %cst_270 = arith.constant 3.200000e+01 : f32
    %778 = vector.broadcast %cst_270 : f32 to vector<8x1xf32>
    %779 = arith.divf %777, %778 : vector<8x1xf32>
    %780 = vector.broadcast %772 : vector<8x1xf32> to vector<8x32xf32>
    %781 = arith.subf %768, %780 : vector<8x32xf32>
    %cst_271 = arith.constant 9.99999974E-6 : f32
    %782 = vector.broadcast %cst_271 : f32 to vector<8x1xf32>
    %783 = arith.addf %779, %782 : vector<8x1xf32>
    %784 = math.rsqrt %783 : vector<8x1xf32>
    %785 = vector.broadcast %784 : vector<8x1xf32> to vector<8x32xf32>
    %786 = arith.mulf %781, %785 : vector<8x32xf32>
    %787 = vector.broadcast %766 : vector<1x32xf32> to vector<8x32xf32>
    %788 = arith.mulf %786, %787 : vector<8x32xf32>
    %789 = vector.broadcast %767 : vector<1x32xf32> to vector<8x32xf32>
    %790 = arith.addf %788, %789 : vector<8x32xf32>
    %c0_272 = arith.constant 0 : index
    %c0_273 = arith.constant 0 : index
    %791 = vector.load %arg46[%c0_272, %c0_273] : memref<32x32xf32, #tpu.memory_space<vmem>>, vector<32x32xf32>
    %c0_274 = arith.constant 0 : index
    %c0_275 = arith.constant 0 : index
    %792 = vector.load %arg47[%c0_274, %c0_275] : memref<1x32xf32, #tpu.memory_space<vmem>>, vector<1x32xf32>
    %cst_276 = arith.constant dense<0.000000e+00> : vector<8x32xf32>
    %793 = tpu.matmul %790, %791, %cst_276 {dimension_numbers = #tpu.dot_dimension_numbers<[1], [0], [0], [1], [0, 0, 1, 1], [], []>} : vector<8x32xf32>, vector<32x32xf32>, vector<8x32xf32> -> vector<8x32xf32>
    %794 = vector.broadcast %792 : vector<1x32xf32> to vector<8x32xf32>
    %795 = arith.addf %793, %794 : vector<8x32xf32>
    %cst_277 = arith.constant 0.000000e+00 : f32
    %796 = vector.broadcast %cst_277 : f32 to vector<8x32xf32>
    %797 = arith.maximumf %795, %796 : vector<8x32xf32>
    %c0_278 = arith.constant 0 : index
    %c0_279 = arith.constant 0 : index
    %798 = vector.load %arg48[%c0_278, %c0_279] : memref<32x32xf32, #tpu.memory_space<vmem>>, vector<32x32xf32>
    %c0_280 = arith.constant 0 : index
    %c0_281 = arith.constant 0 : index
    %799 = vector.load %arg49[%c0_280, %c0_281] : memref<1x32xf32, #tpu.memory_space<vmem>>, vector<1x32xf32>
    %cst_282 = arith.constant dense<0.000000e+00> : vector<8x32xf32>
    %800 = tpu.matmul %797, %798, %cst_282 {dimension_numbers = #tpu.dot_dimension_numbers<[1], [0], [0], [1], [0, 0, 1, 1], [], []>} : vector<8x32xf32>, vector<32x32xf32>, vector<8x32xf32> -> vector<8x32xf32>
    %801 = vector.broadcast %799 : vector<1x32xf32> to vector<8x32xf32>
    %802 = arith.addf %800, %801 : vector<8x32xf32>
    %c0_283 = arith.constant 0 : index
    %c0_284 = arith.constant 0 : index
    %803 = vector.load %arg50[%c0_283, %c0_284] : memref<1x32xf32, #tpu.memory_space<vmem>>, vector<1x32xf32>
    %c0_285 = arith.constant 0 : index
    %c0_286 = arith.constant 0 : index
    %804 = vector.load %arg51[%c0_285, %c0_286] : memref<1x32xf32, #tpu.memory_space<vmem>>, vector<1x32xf32>
    %805 = arith.addf %802, %790 : vector<8x32xf32>
    %cst_287 = arith.constant dense<0.000000e+00> : vector<8xf32>
    %806 = vector.multi_reduction <add>, %805, %cst_287 [1] : vector<8x32xf32> to vector<8xf32>
    %807 = vector.shape_cast %806 : vector<8xf32> to vector<8x1xf32>
    %cst_288 = arith.constant 3.200000e+01 : f32
    %808 = vector.broadcast %cst_288 : f32 to vector<8x1xf32>
    %809 = arith.divf %807, %808 : vector<8x1xf32>
    %810 = vector.broadcast %809 : vector<8x1xf32> to vector<8x32xf32>
    %811 = arith.subf %805, %810 : vector<8x32xf32>
    %812 = arith.mulf %811, %811 : vector<8x32xf32>
    %cst_289 = arith.constant dense<0.000000e+00> : vector<8xf32>
    %813 = vector.multi_reduction <add>, %812, %cst_289 [1] : vector<8x32xf32> to vector<8xf32>
    %814 = vector.shape_cast %813 : vector<8xf32> to vector<8x1xf32>
    %cst_290 = arith.constant 3.200000e+01 : f32
    %815 = vector.broadcast %cst_290 : f32 to vector<8x1xf32>
    %816 = arith.divf %814, %815 : vector<8x1xf32>
    %817 = vector.broadcast %809 : vector<8x1xf32> to vector<8x32xf32>
    %818 = arith.subf %805, %817 : vector<8x32xf32>
    %cst_291 = arith.constant 9.99999974E-6 : f32
    %819 = vector.broadcast %cst_291 : f32 to vector<8x1xf32>
    %820 = arith.addf %816, %819 : vector<8x1xf32>
    %821 = math.rsqrt %820 : vector<8x1xf32>
    %822 = vector.broadcast %821 : vector<8x1xf32> to vector<8x32xf32>
    %823 = arith.mulf %818, %822 : vector<8x32xf32>
    %824 = vector.broadcast %803 : vector<1x32xf32> to vector<8x32xf32>
    %825 = arith.mulf %823, %824 : vector<8x32xf32>
    %826 = vector.broadcast %804 : vector<1x32xf32> to vector<8x32xf32>
    %827 = arith.addf %825, %826 : vector<8x32xf32>
    %c0_292 = arith.constant 0 : index
    %c0_293 = arith.constant 0 : index
    %828 = vector.load %arg52[%c0_292, %c0_293] : memref<32x32xf32, #tpu.memory_space<vmem>>, vector<32x32xf32>
    %c0_294 = arith.constant 0 : index
    %c0_295 = arith.constant 0 : index
    %829 = vector.load %arg53[%c0_294, %c0_295] : memref<1x32xf32, #tpu.memory_space<vmem>>, vector<1x32xf32>
    %cst_296 = arith.constant dense<0.000000e+00> : vector<8x32xf32>
    %830 = tpu.matmul %827, %828, %cst_296 {dimension_numbers = #tpu.dot_dimension_numbers<[1], [0], [0], [1], [0, 0, 1, 1], [], []>} : vector<8x32xf32>, vector<32x32xf32>, vector<8x32xf32> -> vector<8x32xf32>
    %831 = vector.broadcast %829 : vector<1x32xf32> to vector<8x32xf32>
    %832 = arith.addf %830, %831 : vector<8x32xf32>
    %cst_297 = arith.constant 0.000000e+00 : f32
    %833 = vector.broadcast %cst_297 : f32 to vector<8x32xf32>
    %834 = arith.maximumf %832, %833 : vector<8x32xf32>
    %c0_298 = arith.constant 0 : index
    %c0_299 = arith.constant 0 : index
    %835 = vector.load %arg54[%c0_298, %c0_299] : memref<32x32xf32, #tpu.memory_space<vmem>>, vector<32x32xf32>
    %c0_300 = arith.constant 0 : index
    %c0_301 = arith.constant 0 : index
    %836 = vector.load %arg55[%c0_300, %c0_301] : memref<1x32xf32, #tpu.memory_space<vmem>>, vector<1x32xf32>
    %cst_302 = arith.constant dense<0.000000e+00> : vector<8x32xf32>
    %837 = tpu.matmul %834, %835, %cst_302 {dimension_numbers = #tpu.dot_dimension_numbers<[1], [0], [0], [1], [0, 0, 1, 1], [], []>} : vector<8x32xf32>, vector<32x32xf32>, vector<8x32xf32> -> vector<8x32xf32>
    %838 = vector.broadcast %836 : vector<1x32xf32> to vector<8x32xf32>
    %839 = arith.addf %837, %838 : vector<8x32xf32>
    %cst_303 = arith.constant 0.000000e+00 : f32
    %840 = vector.broadcast %cst_303 : f32 to vector<8x32xf32>
    %841 = arith.maximumf %839, %840 : vector<8x32xf32>
    %c0_304 = arith.constant 0 : index
    %c0_305 = arith.constant 0 : index
    %842 = vector.load %arg56[%c0_304, %c0_305] : memref<32x128xf32, #tpu.memory_space<vmem>>, vector<32x128xf32>
    %c0_306 = arith.constant 0 : index
    %c0_307 = arith.constant 0 : index
    %843 = vector.load %arg57[%c0_306, %c0_307] : memref<1x128xf32, #tpu.memory_space<vmem>>, vector<1x128xf32>
    %cst_308 = arith.constant dense<0.000000e+00> : vector<8x128xf32>
    %844 = tpu.matmul %841, %842, %cst_308 {dimension_numbers = #tpu.dot_dimension_numbers<[1], [0], [0], [1], [0, 0, 1, 1], [], []>} : vector<8x32xf32>, vector<32x128xf32>, vector<8x128xf32> -> vector<8x128xf32>
    %845 = vector.broadcast %843 : vector<1x128xf32> to vector<8x128xf32>
    %846 = arith.addf %844, %845 : vector<8x128xf32>
    %c0_309 = arith.constant 0 : index
    %c0_310 = arith.constant 0 : index
    %c0_311 = arith.constant 0 : index
    %847 = vector.load %arg58[%c0_309, %c0_310, %c0_311] : memref<2x8x128xf32, #tpu.memory_space<vmem>>, vector<1x8x128xf32>
    %848 = vector.shape_cast %847 : vector<1x8x128xf32> to vector<8x128xf32>
    %849 = vector.shape_cast %846 : vector<8x128xf32> to vector<1x8x128xf32>
    tpu.vector_store %arg58[%c0_309, %c0_310, %c0_311], %849 {strides = array<i32>} : memref<2x8x128xf32, #tpu.memory_space<vmem>>, vector<1x8x128xf32>,
    %850 = vector.extract_strided_slice %199 {offsets = [1, 0], sizes = [1, 32], strides = [1, 1]} : vector<16x32xf32> to vector<1x32xf32>
    %851 = vector.extract_strided_slice %199 {offsets = [3, 0], sizes = [1, 32], strides = [1, 1]} : vector<16x32xf32> to vector<1x32xf32>
    %852 = vector.extract_strided_slice %199 {offsets = [5, 0], sizes = [1, 32], strides = [1, 1]} : vector<16x32xf32> to vector<1x32xf32>
    %853 = vector.extract_strided_slice %199 {offsets = [7, 0], sizes = [1, 32], strides = [1, 1]} : vector<16x32xf32> to vector<1x32xf32>
    %854 = vector.extract_strided_slice %199 {offsets = [9, 0], sizes = [1, 32], strides = [1, 1]} : vector<16x32xf32> to vector<1x32xf32>
    %855 = vector.extract_strided_slice %199 {offsets = [11, 0], sizes = [1, 32], strides = [1, 1]} : vector<16x32xf32> to vector<1x32xf32>
    %856 = vector.extract_strided_slice %199 {offsets = [13, 0], sizes = [1, 32], strides = [1, 1]} : vector<16x32xf32> to vector<1x32xf32>
    %857 = vector.extract_strided_slice %199 {offsets = [15, 0], sizes = [1, 32], strides = [1, 1]} : vector<16x32xf32> to vector<1x32xf32>
    %858 = tpu.concatenate %850, %851, %852, %853, %854, %855, %856, %857 in 0 : vector<1x32xf32>, vector<1x32xf32>, vector<1x32xf32>, vector<1x32xf32>, vector<1x32xf32>, vector<1x32xf32>, vector<1x32xf32>, vector<1x32xf32> -> vector<8x32xf32>
    %859 = vector.extract_strided_slice %206 {offsets = [1, 0], sizes = [1, 32], strides = [1, 1]} : vector<16x32xf32> to vector<1x32xf32>
    %860 = vector.extract_strided_slice %206 {offsets = [3, 0], sizes = [1, 32], strides = [1, 1]} : vector<16x32xf32> to vector<1x32xf32>
    %861 = vector.extract_strided_slice %206 {offsets = [5, 0], sizes = [1, 32], strides = [1, 1]} : vector<16x32xf32> to vector<1x32xf32>
    %862 = vector.extract_strided_slice %206 {offsets = [7, 0], sizes = [1, 32], strides = [1, 1]} : vector<16x32xf32> to vector<1x32xf32>
    %863 = vector.extract_strided_slice %206 {offsets = [9, 0], sizes = [1, 32], strides = [1, 1]} : vector<16x32xf32> to vector<1x32xf32>
    %864 = vector.extract_strided_slice %206 {offsets = [11, 0], sizes = [1, 32], strides = [1, 1]} : vector<16x32xf32> to vector<1x32xf32>
    %865 = vector.extract_strided_slice %206 {offsets = [13, 0], sizes = [1, 32], strides = [1, 1]} : vector<16x32xf32> to vector<1x32xf32>
    %866 = vector.extract_strided_slice %206 {offsets = [15, 0], sizes = [1, 32], strides = [1, 1]} : vector<16x32xf32> to vector<1x32xf32>
    %867 = tpu.concatenate %859, %860, %861, %862, %863, %864, %865, %866 in 0 : vector<1x32xf32>, vector<1x32xf32>, vector<1x32xf32>, vector<1x32xf32>, vector<1x32xf32>, vector<1x32xf32>, vector<1x32xf32>, vector<1x32xf32> -> vector<8x32xf32>
    %c0_312 = arith.constant 0 : index
    %c0_313 = arith.constant 0 : index
    %868 = vector.load %arg20[%c0_312, %c0_313] : memref<32x96xf32, #tpu.memory_space<vmem>>, vector<32x96xf32>
    %c0_314 = arith.constant 0 : index
    %c0_315 = arith.constant 0 : index
    %869 = vector.load %arg21[%c0_314, %c0_315] : memref<1x96xf32, #tpu.memory_space<vmem>>, vector<1x96xf32>
    %cst_316 = arith.constant dense<0.000000e+00> : vector<8x96xf32>
    %870 = tpu.matmul %858, %868, %cst_316 {dimension_numbers = #tpu.dot_dimension_numbers<[1], [0], [0], [1], [0, 0, 1, 1], [], []>} : vector<8x32xf32>, vector<32x96xf32>, vector<8x96xf32> -> vector<8x96xf32>
    %871 = vector.broadcast %869 : vector<1x96xf32> to vector<8x96xf32>
    %872 = arith.addf %870, %871 : vector<8x96xf32>
    %873 = vector.extract_strided_slice %872 {offsets = [0, 0], sizes = [8, 32], strides = [1, 1]} : vector<8x96xf32> to vector<8x32xf32>
    %874 = vector.extract_strided_slice %872 {offsets = [0, 32], sizes = [8, 32], strides = [1, 1]} : vector<8x96xf32> to vector<8x32xf32>
    %875 = vector.extract_strided_slice %872 {offsets = [0, 64], sizes = [8, 32], strides = [1, 1]} : vector<8x96xf32> to vector<8x32xf32>
    %c0_317 = arith.constant 0 : index
    %c0_318 = arith.constant 0 : index
    %876 = vector.load %arg22[%c0_317, %c0_318] : memref<32x32xf32, #tpu.memory_space<vmem>>, vector<32x32xf32>
    %c0_319 = arith.constant 0 : index
    %c0_320 = arith.constant 0 : index
    %877 = vector.load %arg23[%c0_319, %c0_320] : memref<1x32xf32, #tpu.memory_space<vmem>>, vector<1x32xf32>
    %878 = vector.extract_strided_slice %873 {offsets = [0, 0], sizes = [8, 4], strides = [1, 1]} : vector<8x32xf32> to vector<8x4xf32>
    %cst_321 = arith.constant 5.000000e-01 : f32
    %879 = vector.broadcast %cst_321 : f32 to vector<8x4xf32>
    %880 = arith.mulf %878, %879 : vector<8x4xf32>
    %881 = vector.extract_strided_slice %874 {offsets = [0, 0], sizes = [8, 4], strides = [1, 1]} : vector<8x32xf32> to vector<8x4xf32>
    %cst_322 = arith.constant dense<0.000000e+00> : vector<8x8xf32>
    %882 = tpu.matmul %880, %881, %cst_322 {dimension_numbers = #tpu.dot_dimension_numbers<[1], [1], [0], [0], [0, 0, 1, 0], [], []>} : vector<8x4xf32>, vector<8x4xf32>, vector<8x8xf32> -> vector<8x8xf32>
    %cst_323 = arith.constant dense<0xFF800000> : vector<8xf32>
    %883 = vector.multi_reduction <maximumf>, %882, %cst_323 [1] : vector<8x8xf32> to vector<8xf32>
    %884 = vector.shape_cast %883 : vector<8xf32> to vector<8x1xf32>
    %885 = vector.broadcast %884 : vector<8x1xf32> to vector<8x8xf32>
    %886 = arith.subf %882, %885 : vector<8x8xf32>
    %887 = math.exp %886 : vector<8x8xf32>
    %cst_324 = arith.constant dense<0.000000e+00> : vector<8xf32>
    %888 = vector.multi_reduction <add>, %887, %cst_324 [1] : vector<8x8xf32> to vector<8xf32>
    %889 = vector.shape_cast %888 : vector<8xf32> to vector<8x1xf32>
    %890 = tpu.reciprocal %889 {approx = true} : vector<8x1xf32> -> vector<8x1xf32>
    %891 = vector.broadcast %890 : vector<8x1xf32> to vector<8x8xf32>
    %892 = arith.mulf %887, %891 : vector<8x8xf32>
    %893 = vector.extract_strided_slice %875 {offsets = [0, 0], sizes = [8, 4], strides = [1, 1]} : vector<8x32xf32> to vector<8x4xf32>
    %cst_325 = arith.constant dense<0.000000e+00> : vector<8x4xf32>
    %894 = tpu.matmul %892, %893, %cst_325 {dimension_numbers = #tpu.dot_dimension_numbers<[1], [0], [0], [1], [0, 0, 1, 1], [], []>} : vector<8x8xf32>, vector<8x4xf32>, vector<8x4xf32> -> vector<8x4xf32>
    %895 = vector.extract_strided_slice %873 {offsets = [0, 4], sizes = [8, 4], strides = [1, 1]} : vector<8x32xf32> to vector<8x4xf32>
    %cst_326 = arith.constant 5.000000e-01 : f32
    %896 = vector.broadcast %cst_326 : f32 to vector<8x4xf32>
    %897 = arith.mulf %895, %896 : vector<8x4xf32>
    %898 = vector.extract_strided_slice %874 {offsets = [0, 4], sizes = [8, 4], strides = [1, 1]} : vector<8x32xf32> to vector<8x4xf32>
    %cst_327 = arith.constant dense<0.000000e+00> : vector<8x8xf32>
    %899 = tpu.matmul %897, %898, %cst_327 {dimension_numbers = #tpu.dot_dimension_numbers<[1], [1], [0], [0], [0, 0, 1, 0], [], []>} : vector<8x4xf32>, vector<8x4xf32>, vector<8x8xf32> -> vector<8x8xf32>
    %cst_328 = arith.constant dense<0xFF800000> : vector<8xf32>
    %900 = vector.multi_reduction <maximumf>, %899, %cst_328 [1] : vector<8x8xf32> to vector<8xf32>
    %901 = vector.shape_cast %900 : vector<8xf32> to vector<8x1xf32>
    %902 = vector.broadcast %901 : vector<8x1xf32> to vector<8x8xf32>
    %903 = arith.subf %899, %902 : vector<8x8xf32>
    %904 = math.exp %903 : vector<8x8xf32>
    %cst_329 = arith.constant dense<0.000000e+00> : vector<8xf32>
    %905 = vector.multi_reduction <add>, %904, %cst_329 [1] : vector<8x8xf32> to vector<8xf32>
    %906 = vector.shape_cast %905 : vector<8xf32> to vector<8x1xf32>
    %907 = tpu.reciprocal %906 {approx = true} : vector<8x1xf32> -> vector<8x1xf32>
    %908 = vector.broadcast %907 : vector<8x1xf32> to vector<8x8xf32>
    %909 = arith.mulf %904, %908 : vector<8x8xf32>
    %910 = vector.extract_strided_slice %875 {offsets = [0, 4], sizes = [8, 4], strides = [1, 1]} : vector<8x32xf32> to vector<8x4xf32>
    %cst_330 = arith.constant dense<0.000000e+00> : vector<8x4xf32>
    %911 = tpu.matmul %909, %910, %cst_330 {dimension_numbers = #tpu.dot_dimension_numbers<[1], [0], [0], [1], [0, 0, 1, 1], [], []>} : vector<8x8xf32>, vector<8x4xf32>, vector<8x4xf32> -> vector<8x4xf32>
    %912 = vector.extract_strided_slice %873 {offsets = [0, 8], sizes = [8, 4], strides = [1, 1]} : vector<8x32xf32> to vector<8x4xf32>
    %cst_331 = arith.constant 5.000000e-01 : f32
    %913 = vector.broadcast %cst_331 : f32 to vector<8x4xf32>
    %914 = arith.mulf %912, %913 : vector<8x4xf32>
    %915 = vector.extract_strided_slice %874 {offsets = [0, 8], sizes = [8, 4], strides = [1, 1]} : vector<8x32xf32> to vector<8x4xf32>
    %cst_332 = arith.constant dense<0.000000e+00> : vector<8x8xf32>
    %916 = tpu.matmul %914, %915, %cst_332 {dimension_numbers = #tpu.dot_dimension_numbers<[1], [1], [0], [0], [0, 0, 1, 0], [], []>} : vector<8x4xf32>, vector<8x4xf32>, vector<8x8xf32> -> vector<8x8xf32>
    %cst_333 = arith.constant dense<0xFF800000> : vector<8xf32>
    %917 = vector.multi_reduction <maximumf>, %916, %cst_333 [1] : vector<8x8xf32> to vector<8xf32>
    %918 = vector.shape_cast %917 : vector<8xf32> to vector<8x1xf32>
    %919 = vector.broadcast %918 : vector<8x1xf32> to vector<8x8xf32>
    %920 = arith.subf %916, %919 : vector<8x8xf32>
    %921 = math.exp %920 : vector<8x8xf32>
    %cst_334 = arith.constant dense<0.000000e+00> : vector<8xf32>
    %922 = vector.multi_reduction <add>, %921, %cst_334 [1] : vector<8x8xf32> to vector<8xf32>
    %923 = vector.shape_cast %922 : vector<8xf32> to vector<8x1xf32>
    %924 = tpu.reciprocal %923 {approx = true} : vector<8x1xf32> -> vector<8x1xf32>
    %925 = vector.broadcast %924 : vector<8x1xf32> to vector<8x8xf32>
    %926 = arith.mulf %921, %925 : vector<8x8xf32>
    %927 = vector.extract_strided_slice %875 {offsets = [0, 8], sizes = [8, 4], strides = [1, 1]} : vector<8x32xf32> to vector<8x4xf32>
    %cst_335 = arith.constant dense<0.000000e+00> : vector<8x4xf32>
    %928 = tpu.matmul %926, %927, %cst_335 {dimension_numbers = #tpu.dot_dimension_numbers<[1], [0], [0], [1], [0, 0, 1, 1], [], []>} : vector<8x8xf32>, vector<8x4xf32>, vector<8x4xf32> -> vector<8x4xf32>
    %929 = vector.extract_strided_slice %873 {offsets = [0, 12], sizes = [8, 4], strides = [1, 1]} : vector<8x32xf32> to vector<8x4xf32>
    %cst_336 = arith.constant 5.000000e-01 : f32
    %930 = vector.broadcast %cst_336 : f32 to vector<8x4xf32>
    %931 = arith.mulf %929, %930 : vector<8x4xf32>
    %932 = vector.extract_strided_slice %874 {offsets = [0, 12], sizes = [8, 4], strides = [1, 1]} : vector<8x32xf32> to vector<8x4xf32>
    %cst_337 = arith.constant dense<0.000000e+00> : vector<8x8xf32>
    %933 = tpu.matmul %931, %932, %cst_337 {dimension_numbers = #tpu.dot_dimension_numbers<[1], [1], [0], [0], [0, 0, 1, 0], [], []>} : vector<8x4xf32>, vector<8x4xf32>, vector<8x8xf32> -> vector<8x8xf32>
    %cst_338 = arith.constant dense<0xFF800000> : vector<8xf32>
    %934 = vector.multi_reduction <maximumf>, %933, %cst_338 [1] : vector<8x8xf32> to vector<8xf32>
    %935 = vector.shape_cast %934 : vector<8xf32> to vector<8x1xf32>
    %936 = vector.broadcast %935 : vector<8x1xf32> to vector<8x8xf32>
    %937 = arith.subf %933, %936 : vector<8x8xf32>
    %938 = math.exp %937 : vector<8x8xf32>
    %cst_339 = arith.constant dense<0.000000e+00> : vector<8xf32>
    %939 = vector.multi_reduction <add>, %938, %cst_339 [1] : vector<8x8xf32> to vector<8xf32>
    %940 = vector.shape_cast %939 : vector<8xf32> to vector<8x1xf32>
    %941 = tpu.reciprocal %940 {approx = true} : vector<8x1xf32> -> vector<8x1xf32>
    %942 = vector.broadcast %941 : vector<8x1xf32> to vector<8x8xf32>
    %943 = arith.mulf %938, %942 : vector<8x8xf32>
    %944 = vector.extract_strided_slice %875 {offsets = [0, 12], sizes = [8, 4], strides = [1, 1]} : vector<8x32xf32> to vector<8x4xf32>
    %cst_340 = arith.constant dense<0.000000e+00> : vector<8x4xf32>
    %945 = tpu.matmul %943, %944, %cst_340 {dimension_numbers = #tpu.dot_dimension_numbers<[1], [0], [0], [1], [0, 0, 1, 1], [], []>} : vector<8x8xf32>, vector<8x4xf32>, vector<8x4xf32> -> vector<8x4xf32>
    %946 = vector.extract_strided_slice %873 {offsets = [0, 16], sizes = [8, 4], strides = [1, 1]} : vector<8x32xf32> to vector<8x4xf32>
    %cst_341 = arith.constant 5.000000e-01 : f32
    %947 = vector.broadcast %cst_341 : f32 to vector<8x4xf32>
    %948 = arith.mulf %946, %947 : vector<8x4xf32>
    %949 = vector.extract_strided_slice %874 {offsets = [0, 16], sizes = [8, 4], strides = [1, 1]} : vector<8x32xf32> to vector<8x4xf32>
    %cst_342 = arith.constant dense<0.000000e+00> : vector<8x8xf32>
    %950 = tpu.matmul %948, %949, %cst_342 {dimension_numbers = #tpu.dot_dimension_numbers<[1], [1], [0], [0], [0, 0, 1, 0], [], []>} : vector<8x4xf32>, vector<8x4xf32>, vector<8x8xf32> -> vector<8x8xf32>
    %cst_343 = arith.constant dense<0xFF800000> : vector<8xf32>
    %951 = vector.multi_reduction <maximumf>, %950, %cst_343 [1] : vector<8x8xf32> to vector<8xf32>
    %952 = vector.shape_cast %951 : vector<8xf32> to vector<8x1xf32>
    %953 = vector.broadcast %952 : vector<8x1xf32> to vector<8x8xf32>
    %954 = arith.subf %950, %953 : vector<8x8xf32>
    %955 = math.exp %954 : vector<8x8xf32>
    %cst_344 = arith.constant dense<0.000000e+00> : vector<8xf32>
    %956 = vector.multi_reduction <add>, %955, %cst_344 [1] : vector<8x8xf32> to vector<8xf32>
    %957 = vector.shape_cast %956 : vector<8xf32> to vector<8x1xf32>
    %958 = tpu.reciprocal %957 {approx = true} : vector<8x1xf32> -> vector<8x1xf32>
    %959 = vector.broadcast %958 : vector<8x1xf32> to vector<8x8xf32>
    %960 = arith.mulf %955, %959 : vector<8x8xf32>
    %961 = vector.extract_strided_slice %875 {offsets = [0, 16], sizes = [8, 4], strides = [1, 1]} : vector<8x32xf32> to vector<8x4xf32>
    %cst_345 = arith.constant dense<0.000000e+00> : vector<8x4xf32>
    %962 = tpu.matmul %960, %961, %cst_345 {dimension_numbers = #tpu.dot_dimension_numbers<[1], [0], [0], [1], [0, 0, 1, 1], [], []>} : vector<8x8xf32>, vector<8x4xf32>, vector<8x4xf32> -> vector<8x4xf32>
    %963 = vector.extract_strided_slice %873 {offsets = [0, 20], sizes = [8, 4], strides = [1, 1]} : vector<8x32xf32> to vector<8x4xf32>
    %cst_346 = arith.constant 5.000000e-01 : f32
    %964 = vector.broadcast %cst_346 : f32 to vector<8x4xf32>
    %965 = arith.mulf %963, %964 : vector<8x4xf32>
    %966 = vector.extract_strided_slice %874 {offsets = [0, 20], sizes = [8, 4], strides = [1, 1]} : vector<8x32xf32> to vector<8x4xf32>
    %cst_347 = arith.constant dense<0.000000e+00> : vector<8x8xf32>
    %967 = tpu.matmul %965, %966, %cst_347 {dimension_numbers = #tpu.dot_dimension_numbers<[1], [1], [0], [0], [0, 0, 1, 0], [], []>} : vector<8x4xf32>, vector<8x4xf32>, vector<8x8xf32> -> vector<8x8xf32>
    %cst_348 = arith.constant dense<0xFF800000> : vector<8xf32>
    %968 = vector.multi_reduction <maximumf>, %967, %cst_348 [1] : vector<8x8xf32> to vector<8xf32>
    %969 = vector.shape_cast %968 : vector<8xf32> to vector<8x1xf32>
    %970 = vector.broadcast %969 : vector<8x1xf32> to vector<8x8xf32>
    %971 = arith.subf %967, %970 : vector<8x8xf32>
    %972 = math.exp %971 : vector<8x8xf32>
    %cst_349 = arith.constant dense<0.000000e+00> : vector<8xf32>
    %973 = vector.multi_reduction <add>, %972, %cst_349 [1] : vector<8x8xf32> to vector<8xf32>
    %974 = vector.shape_cast %973 : vector<8xf32> to vector<8x1xf32>
    %975 = tpu.reciprocal %974 {approx = true} : vector<8x1xf32> -> vector<8x1xf32>
    %976 = vector.broadcast %975 : vector<8x1xf32> to vector<8x8xf32>
    %977 = arith.mulf %972, %976 : vector<8x8xf32>
    %978 = vector.extract_strided_slice %875 {offsets = [0, 20], sizes = [8, 4], strides = [1, 1]} : vector<8x32xf32> to vector<8x4xf32>
    %cst_350 = arith.constant dense<0.000000e+00> : vector<8x4xf32>
    %979 = tpu.matmul %977, %978, %cst_350 {dimension_numbers = #tpu.dot_dimension_numbers<[1], [0], [0], [1], [0, 0, 1, 1], [], []>} : vector<8x8xf32>, vector<8x4xf32>, vector<8x4xf32> -> vector<8x4xf32>
    %980 = vector.extract_strided_slice %873 {offsets = [0, 24], sizes = [8, 4], strides = [1, 1]} : vector<8x32xf32> to vector<8x4xf32>
    %cst_351 = arith.constant 5.000000e-01 : f32
    %981 = vector.broadcast %cst_351 : f32 to vector<8x4xf32>
    %982 = arith.mulf %980, %981 : vector<8x4xf32>
    %983 = vector.extract_strided_slice %874 {offsets = [0, 24], sizes = [8, 4], strides = [1, 1]} : vector<8x32xf32> to vector<8x4xf32>
    %cst_352 = arith.constant dense<0.000000e+00> : vector<8x8xf32>
    %984 = tpu.matmul %982, %983, %cst_352 {dimension_numbers = #tpu.dot_dimension_numbers<[1], [1], [0], [0], [0, 0, 1, 0], [], []>} : vector<8x4xf32>, vector<8x4xf32>, vector<8x8xf32> -> vector<8x8xf32>
    %cst_353 = arith.constant dense<0xFF800000> : vector<8xf32>
    %985 = vector.multi_reduction <maximumf>, %984, %cst_353 [1] : vector<8x8xf32> to vector<8xf32>
    %986 = vector.shape_cast %985 : vector<8xf32> to vector<8x1xf32>
    %987 = vector.broadcast %986 : vector<8x1xf32> to vector<8x8xf32>
    %988 = arith.subf %984, %987 : vector<8x8xf32>
    %989 = math.exp %988 : vector<8x8xf32>
    %cst_354 = arith.constant dense<0.000000e+00> : vector<8xf32>
    %990 = vector.multi_reduction <add>, %989, %cst_354 [1] : vector<8x8xf32> to vector<8xf32>
    %991 = vector.shape_cast %990 : vector<8xf32> to vector<8x1xf32>
    %992 = tpu.reciprocal %991 {approx = true} : vector<8x1xf32> -> vector<8x1xf32>
    %993 = vector.broadcast %992 : vector<8x1xf32> to vector<8x8xf32>
    %994 = arith.mulf %989, %993 : vector<8x8xf32>
    %995 = vector.extract_strided_slice %875 {offsets = [0, 24], sizes = [8, 4], strides = [1, 1]} : vector<8x32xf32> to vector<8x4xf32>
    %cst_355 = arith.constant dense<0.000000e+00> : vector<8x4xf32>
    %996 = tpu.matmul %994, %995, %cst_355 {dimension_numbers = #tpu.dot_dimension_numbers<[1], [0], [0], [1], [0, 0, 1, 1], [], []>} : vector<8x8xf32>, vector<8x4xf32>, vector<8x4xf32> -> vector<8x4xf32>
    %997 = vector.extract_strided_slice %873 {offsets = [0, 28], sizes = [8, 4], strides = [1, 1]} : vector<8x32xf32> to vector<8x4xf32>
    %cst_356 = arith.constant 5.000000e-01 : f32
    %998 = vector.broadcast %cst_356 : f32 to vector<8x4xf32>
    %999 = arith.mulf %997, %998 : vector<8x4xf32>
    %1000 = vector.extract_strided_slice %874 {offsets = [0, 28], sizes = [8, 4], strides = [1, 1]} : vector<8x32xf32> to vector<8x4xf32>
    %cst_357 = arith.constant dense<0.000000e+00> : vector<8x8xf32>
    %1001 = tpu.matmul %999, %1000, %cst_357 {dimension_numbers = #tpu.dot_dimension_numbers<[1], [1], [0], [0], [0, 0, 1, 0], [], []>} : vector<8x4xf32>, vector<8x4xf32>, vector<8x8xf32> -> vector<8x8xf32>
    %cst_358 = arith.constant dense<0xFF800000> : vector<8xf32>
    %1002 = vector.multi_reduction <maximumf>, %1001, %cst_358 [1] : vector<8x8xf32> to vector<8xf32>
    %1003 = vector.shape_cast %1002 : vector<8xf32> to vector<8x1xf32>
    %1004 = vector.broadcast %1003 : vector<8x1xf32> to vector<8x8xf32>
    %1005 = arith.subf %1001, %1004 : vector<8x8xf32>
    %1006 = math.exp %1005 : vector<8x8xf32>
    %cst_359 = arith.constant dense<0.000000e+00> : vector<8xf32>
    %1007 = vector.multi_reduction <add>, %1006, %cst_359 [1] : vector<8x8xf32> to vector<8xf32>
    %1008 = vector.shape_cast %1007 : vector<8xf32> to vector<8x1xf32>
    %1009 = tpu.reciprocal %1008 {approx = true} : vector<8x1xf32> -> vector<8x1xf32>
    %1010 = vector.broadcast %1009 : vector<8x1xf32> to vector<8x8xf32>
    %1011 = arith.mulf %1006, %1010 : vector<8x8xf32>
    %1012 = vector.extract_strided_slice %875 {offsets = [0, 28], sizes = [8, 4], strides = [1, 1]} : vector<8x32xf32> to vector<8x4xf32>
    %cst_360 = arith.constant dense<0.000000e+00> : vector<8x4xf32>
    %1013 = tpu.matmul %1011, %1012, %cst_360 {dimension_numbers = #tpu.dot_dimension_numbers<[1], [0], [0], [1], [0, 0, 1, 1], [], []>} : vector<8x8xf32>, vector<8x4xf32>, vector<8x4xf32> -> vector<8x4xf32>
    %1014 = tpu.concatenate %894, %911, %928, %945, %962, %979, %996, %1013 in 1 : vector<8x4xf32>, vector<8x4xf32>, vector<8x4xf32>, vector<8x4xf32>, vector<8x4xf32>, vector<8x4xf32>, vector<8x4xf32>, vector<8x4xf32> -> vector<8x32xf32>
    %cst_361 = arith.constant dense<0.000000e+00> : vector<8x32xf32>
    %1015 = tpu.matmul %1014, %876, %cst_361 {dimension_numbers = #tpu.dot_dimension_numbers<[1], [0], [0], [1], [0, 0, 1, 1], [], []>} : vector<8x32xf32>, vector<32x32xf32>, vector<8x32xf32> -> vector<8x32xf32>
    %1016 = vector.broadcast %877 : vector<1x32xf32> to vector<8x32xf32>
    %1017 = arith.addf %1015, %1016 : vector<8x32xf32>
    %c0_362 = arith.constant 0 : index
    %c0_363 = arith.constant 0 : index
    %1018 = vector.load %arg24[%c0_362, %c0_363] : memref<1x32xf32, #tpu.memory_space<vmem>>, vector<1x32xf32>
    %c0_364 = arith.constant 0 : index
    %c0_365 = arith.constant 0 : index
    %1019 = vector.load %arg25[%c0_364, %c0_365] : memref<1x32xf32, #tpu.memory_space<vmem>>, vector<1x32xf32>
    %1020 = arith.addf %1017, %858 : vector<8x32xf32>
    %cst_366 = arith.constant dense<0.000000e+00> : vector<8xf32>
    %1021 = vector.multi_reduction <add>, %1020, %cst_366 [1] : vector<8x32xf32> to vector<8xf32>
    %1022 = vector.shape_cast %1021 : vector<8xf32> to vector<8x1xf32>
    %cst_367 = arith.constant 3.200000e+01 : f32
    %1023 = vector.broadcast %cst_367 : f32 to vector<8x1xf32>
    %1024 = arith.divf %1022, %1023 : vector<8x1xf32>
    %1025 = vector.broadcast %1024 : vector<8x1xf32> to vector<8x32xf32>
    %1026 = arith.subf %1020, %1025 : vector<8x32xf32>
    %1027 = arith.mulf %1026, %1026 : vector<8x32xf32>
    %cst_368 = arith.constant dense<0.000000e+00> : vector<8xf32>
    %1028 = vector.multi_reduction <add>, %1027, %cst_368 [1] : vector<8x32xf32> to vector<8xf32>
    %1029 = vector.shape_cast %1028 : vector<8xf32> to vector<8x1xf32>
    %cst_369 = arith.constant 3.200000e+01 : f32
    %1030 = vector.broadcast %cst_369 : f32 to vector<8x1xf32>
    %1031 = arith.divf %1029, %1030 : vector<8x1xf32>
    %1032 = vector.broadcast %1024 : vector<8x1xf32> to vector<8x32xf32>
    %1033 = arith.subf %1020, %1032 : vector<8x32xf32>
    %cst_370 = arith.constant 9.99999974E-6 : f32
    %1034 = vector.broadcast %cst_370 : f32 to vector<8x1xf32>
    %1035 = arith.addf %1031, %1034 : vector<8x1xf32>
    %1036 = math.rsqrt %1035 : vector<8x1xf32>
    %1037 = vector.broadcast %1036 : vector<8x1xf32> to vector<8x32xf32>
    %1038 = arith.mulf %1033, %1037 : vector<8x32xf32>
    %1039 = vector.broadcast %1018 : vector<1x32xf32> to vector<8x32xf32>
    %1040 = arith.mulf %1038, %1039 : vector<8x32xf32>
    %1041 = vector.broadcast %1019 : vector<1x32xf32> to vector<8x32xf32>
    %1042 = arith.addf %1040, %1041 : vector<8x32xf32>
    %c0_371 = arith.constant 0 : index
    %c0_372 = arith.constant 0 : index
    %1043 = vector.load %arg26[%c0_371, %c0_372] : memref<32x32xf32, #tpu.memory_space<vmem>>, vector<32x32xf32>
    %c0_373 = arith.constant 0 : index
    %c0_374 = arith.constant 0 : index
    %1044 = vector.load %arg27[%c0_373, %c0_374] : memref<1x32xf32, #tpu.memory_space<vmem>>, vector<1x32xf32>
    %cst_375 = arith.constant dense<0.000000e+00> : vector<8x32xf32>
    %1045 = tpu.matmul %1042, %1043, %cst_375 {dimension_numbers = #tpu.dot_dimension_numbers<[1], [0], [0], [1], [0, 0, 1, 1], [], []>} : vector<8x32xf32>, vector<32x32xf32>, vector<8x32xf32> -> vector<8x32xf32>
    %1046 = vector.broadcast %1044 : vector<1x32xf32> to vector<8x32xf32>
    %1047 = arith.addf %1045, %1046 : vector<8x32xf32>
    %cst_376 = arith.constant 0.000000e+00 : f32
    %1048 = vector.broadcast %cst_376 : f32 to vector<8x32xf32>
    %1049 = arith.maximumf %1047, %1048 : vector<8x32xf32>
    %c0_377 = arith.constant 0 : index
    %c0_378 = arith.constant 0 : index
    %1050 = vector.load %arg28[%c0_377, %c0_378] : memref<32x32xf32, #tpu.memory_space<vmem>>, vector<32x32xf32>
    %c0_379 = arith.constant 0 : index
    %c0_380 = arith.constant 0 : index
    %1051 = vector.load %arg29[%c0_379, %c0_380] : memref<1x32xf32, #tpu.memory_space<vmem>>, vector<1x32xf32>
    %cst_381 = arith.constant dense<0.000000e+00> : vector<8x32xf32>
    %1052 = tpu.matmul %1049, %1050, %cst_381 {dimension_numbers = #tpu.dot_dimension_numbers<[1], [0], [0], [1], [0, 0, 1, 1], [], []>} : vector<8x32xf32>, vector<32x32xf32>, vector<8x32xf32> -> vector<8x32xf32>
    %1053 = vector.broadcast %1051 : vector<1x32xf32> to vector<8x32xf32>
    %1054 = arith.addf %1052, %1053 : vector<8x32xf32>
    %c0_382 = arith.constant 0 : index
    %c0_383 = arith.constant 0 : index
    %1055 = vector.load %arg30[%c0_382, %c0_383] : memref<1x32xf32, #tpu.memory_space<vmem>>, vector<1x32xf32>
    %c0_384 = arith.constant 0 : index
    %c0_385 = arith.constant 0 : index
    %1056 = vector.load %arg31[%c0_384, %c0_385] : memref<1x32xf32, #tpu.memory_space<vmem>>, vector<1x32xf32>
    %1057 = arith.addf %1054, %1042 : vector<8x32xf32>
    %cst_386 = arith.constant dense<0.000000e+00> : vector<8xf32>
    %1058 = vector.multi_reduction <add>, %1057, %cst_386 [1] : vector<8x32xf32> to vector<8xf32>
    %1059 = vector.shape_cast %1058 : vector<8xf32> to vector<8x1xf32>
    %cst_387 = arith.constant 3.200000e+01 : f32
    %1060 = vector.broadcast %cst_387 : f32 to vector<8x1xf32>
    %1061 = arith.divf %1059, %1060 : vector<8x1xf32>
    %1062 = vector.broadcast %1061 : vector<8x1xf32> to vector<8x32xf32>
    %1063 = arith.subf %1057, %1062 : vector<8x32xf32>
    %1064 = arith.mulf %1063, %1063 : vector<8x32xf32>
    %cst_388 = arith.constant dense<0.000000e+00> : vector<8xf32>
    %1065 = vector.multi_reduction <add>, %1064, %cst_388 [1] : vector<8x32xf32> to vector<8xf32>
    %1066 = vector.shape_cast %1065 : vector<8xf32> to vector<8x1xf32>
    %cst_389 = arith.constant 3.200000e+01 : f32
    %1067 = vector.broadcast %cst_389 : f32 to vector<8x1xf32>
    %1068 = arith.divf %1066, %1067 : vector<8x1xf32>
    %1069 = vector.broadcast %1061 : vector<8x1xf32> to vector<8x32xf32>
    %1070 = arith.subf %1057, %1069 : vector<8x32xf32>
    %cst_390 = arith.constant 9.99999974E-6 : f32
    %1071 = vector.broadcast %cst_390 : f32 to vector<8x1xf32>
    %1072 = arith.addf %1068, %1071 : vector<8x1xf32>
    %1073 = math.rsqrt %1072 : vector<8x1xf32>
    %1074 = vector.broadcast %1073 : vector<8x1xf32> to vector<8x32xf32>
    %1075 = arith.mulf %1070, %1074 : vector<8x32xf32>
    %1076 = vector.broadcast %1055 : vector<1x32xf32> to vector<8x32xf32>
    %1077 = arith.mulf %1075, %1076 : vector<8x32xf32>
    %1078 = vector.broadcast %1056 : vector<1x32xf32> to vector<8x32xf32>
    %1079 = arith.addf %1077, %1078 : vector<8x32xf32>
    %c0_391 = arith.constant 0 : index
    %c0_392 = arith.constant 0 : index
    %1080 = vector.load %arg32[%c0_391, %c0_392] : memref<32x96xf32, #tpu.memory_space<vmem>>, vector<32x96xf32>
    %c0_393 = arith.constant 0 : index
    %c0_394 = arith.constant 0 : index
    %1081 = vector.load %arg33[%c0_393, %c0_394] : memref<1x96xf32, #tpu.memory_space<vmem>>, vector<1x96xf32>
    %cst_395 = arith.constant dense<0.000000e+00> : vector<8x96xf32>
    %1082 = tpu.matmul %1079, %1080, %cst_395 {dimension_numbers = #tpu.dot_dimension_numbers<[1], [0], [0], [1], [0, 0, 1, 1], [], []>} : vector<8x32xf32>, vector<32x96xf32>, vector<8x96xf32> -> vector<8x96xf32>
    %1083 = vector.broadcast %1081 : vector<1x96xf32> to vector<8x96xf32>
    %1084 = arith.addf %1082, %1083 : vector<8x96xf32>
    %1085 = vector.extract_strided_slice %1084 {offsets = [0, 0], sizes = [8, 32], strides = [1, 1]} : vector<8x96xf32> to vector<8x32xf32>
    %1086 = vector.extract_strided_slice %1084 {offsets = [0, 32], sizes = [8, 32], strides = [1, 1]} : vector<8x96xf32> to vector<8x32xf32>
    %1087 = vector.extract_strided_slice %1084 {offsets = [0, 64], sizes = [8, 32], strides = [1, 1]} : vector<8x96xf32> to vector<8x32xf32>
    %c0_396 = arith.constant 0 : index
    %c0_397 = arith.constant 0 : index
    %1088 = vector.load %arg34[%c0_396, %c0_397] : memref<32x32xf32, #tpu.memory_space<vmem>>, vector<32x32xf32>
    %c0_398 = arith.constant 0 : index
    %c0_399 = arith.constant 0 : index
    %1089 = vector.load %arg35[%c0_398, %c0_399] : memref<1x32xf32, #tpu.memory_space<vmem>>, vector<1x32xf32>
    %1090 = vector.extract_strided_slice %1085 {offsets = [0, 0], sizes = [8, 4], strides = [1, 1]} : vector<8x32xf32> to vector<8x4xf32>
    %cst_400 = arith.constant 5.000000e-01 : f32
    %1091 = vector.broadcast %cst_400 : f32 to vector<8x4xf32>
    %1092 = arith.mulf %1090, %1091 : vector<8x4xf32>
    %1093 = vector.extract_strided_slice %1086 {offsets = [0, 0], sizes = [8, 4], strides = [1, 1]} : vector<8x32xf32> to vector<8x4xf32>
    %cst_401 = arith.constant dense<0.000000e+00> : vector<8x8xf32>
    %1094 = tpu.matmul %1092, %1093, %cst_401 {dimension_numbers = #tpu.dot_dimension_numbers<[1], [1], [0], [0], [0, 0, 1, 0], [], []>} : vector<8x4xf32>, vector<8x4xf32>, vector<8x8xf32> -> vector<8x8xf32>
    %cst_402 = arith.constant dense<0xFF800000> : vector<8xf32>
    %1095 = vector.multi_reduction <maximumf>, %1094, %cst_402 [1] : vector<8x8xf32> to vector<8xf32>
    %1096 = vector.shape_cast %1095 : vector<8xf32> to vector<8x1xf32>
    %1097 = vector.broadcast %1096 : vector<8x1xf32> to vector<8x8xf32>
    %1098 = arith.subf %1094, %1097 : vector<8x8xf32>
    %1099 = math.exp %1098 : vector<8x8xf32>
    %cst_403 = arith.constant dense<0.000000e+00> : vector<8xf32>
    %1100 = vector.multi_reduction <add>, %1099, %cst_403 [1] : vector<8x8xf32> to vector<8xf32>
    %1101 = vector.shape_cast %1100 : vector<8xf32> to vector<8x1xf32>
    %1102 = tpu.reciprocal %1101 {approx = true} : vector<8x1xf32> -> vector<8x1xf32>
    %1103 = vector.broadcast %1102 : vector<8x1xf32> to vector<8x8xf32>
    %1104 = arith.mulf %1099, %1103 : vector<8x8xf32>
    %1105 = vector.extract_strided_slice %1087 {offsets = [0, 0], sizes = [8, 4], strides = [1, 1]} : vector<8x32xf32> to vector<8x4xf32>
    %cst_404 = arith.constant dense<0.000000e+00> : vector<8x4xf32>
    %1106 = tpu.matmul %1104, %1105, %cst_404 {dimension_numbers = #tpu.dot_dimension_numbers<[1], [0], [0], [1], [0, 0, 1, 1], [], []>} : vector<8x8xf32>, vector<8x4xf32>, vector<8x4xf32> -> vector<8x4xf32>
    %1107 = vector.extract_strided_slice %1085 {offsets = [0, 4], sizes = [8, 4], strides = [1, 1]} : vector<8x32xf32> to vector<8x4xf32>
    %cst_405 = arith.constant 5.000000e-01 : f32
    %1108 = vector.broadcast %cst_405 : f32 to vector<8x4xf32>
    %1109 = arith.mulf %1107, %1108 : vector<8x4xf32>
    %1110 = vector.extract_strided_slice %1086 {offsets = [0, 4], sizes = [8, 4], strides = [1, 1]} : vector<8x32xf32> to vector<8x4xf32>
    %cst_406 = arith.constant dense<0.000000e+00> : vector<8x8xf32>
    %1111 = tpu.matmul %1109, %1110, %cst_406 {dimension_numbers = #tpu.dot_dimension_numbers<[1], [1], [0], [0], [0, 0, 1, 0], [], []>} : vector<8x4xf32>, vector<8x4xf32>, vector<8x8xf32> -> vector<8x8xf32>
    %cst_407 = arith.constant dense<0xFF800000> : vector<8xf32>
    %1112 = vector.multi_reduction <maximumf>, %1111, %cst_407 [1] : vector<8x8xf32> to vector<8xf32>
    %1113 = vector.shape_cast %1112 : vector<8xf32> to vector<8x1xf32>
    %1114 = vector.broadcast %1113 : vector<8x1xf32> to vector<8x8xf32>
    %1115 = arith.subf %1111, %1114 : vector<8x8xf32>
    %1116 = math.exp %1115 : vector<8x8xf32>
    %cst_408 = arith.constant dense<0.000000e+00> : vector<8xf32>
    %1117 = vector.multi_reduction <add>, %1116, %cst_408 [1] : vector<8x8xf32> to vector<8xf32>
    %1118 = vector.shape_cast %1117 : vector<8xf32> to vector<8x1xf32>
    %1119 = tpu.reciprocal %1118 {approx = true} : vector<8x1xf32> -> vector<8x1xf32>
    %1120 = vector.broadcast %1119 : vector<8x1xf32> to vector<8x8xf32>
    %1121 = arith.mulf %1116, %1120 : vector<8x8xf32>
    %1122 = vector.extract_strided_slice %1087 {offsets = [0, 4], sizes = [8, 4], strides = [1, 1]} : vector<8x32xf32> to vector<8x4xf32>
    %cst_409 = arith.constant dense<0.000000e+00> : vector<8x4xf32>
    %1123 = tpu.matmul %1121, %1122, %cst_409 {dimension_numbers = #tpu.dot_dimension_numbers<[1], [0], [0], [1], [0, 0, 1, 1], [], []>} : vector<8x8xf32>, vector<8x4xf32>, vector<8x4xf32> -> vector<8x4xf32>
    %1124 = vector.extract_strided_slice %1085 {offsets = [0, 8], sizes = [8, 4], strides = [1, 1]} : vector<8x32xf32> to vector<8x4xf32>
    %cst_410 = arith.constant 5.000000e-01 : f32
    %1125 = vector.broadcast %cst_410 : f32 to vector<8x4xf32>
    %1126 = arith.mulf %1124, %1125 : vector<8x4xf32>
    %1127 = vector.extract_strided_slice %1086 {offsets = [0, 8], sizes = [8, 4], strides = [1, 1]} : vector<8x32xf32> to vector<8x4xf32>
    %cst_411 = arith.constant dense<0.000000e+00> : vector<8x8xf32>
    %1128 = tpu.matmul %1126, %1127, %cst_411 {dimension_numbers = #tpu.dot_dimension_numbers<[1], [1], [0], [0], [0, 0, 1, 0], [], []>} : vector<8x4xf32>, vector<8x4xf32>, vector<8x8xf32> -> vector<8x8xf32>
    %cst_412 = arith.constant dense<0xFF800000> : vector<8xf32>
    %1129 = vector.multi_reduction <maximumf>, %1128, %cst_412 [1] : vector<8x8xf32> to vector<8xf32>
    %1130 = vector.shape_cast %1129 : vector<8xf32> to vector<8x1xf32>
    %1131 = vector.broadcast %1130 : vector<8x1xf32> to vector<8x8xf32>
    %1132 = arith.subf %1128, %1131 : vector<8x8xf32>
    %1133 = math.exp %1132 : vector<8x8xf32>
    %cst_413 = arith.constant dense<0.000000e+00> : vector<8xf32>
    %1134 = vector.multi_reduction <add>, %1133, %cst_413 [1] : vector<8x8xf32> to vector<8xf32>
    %1135 = vector.shape_cast %1134 : vector<8xf32> to vector<8x1xf32>
    %1136 = tpu.reciprocal %1135 {approx = true} : vector<8x1xf32> -> vector<8x1xf32>
    %1137 = vector.broadcast %1136 : vector<8x1xf32> to vector<8x8xf32>
    %1138 = arith.mulf %1133, %1137 : vector<8x8xf32>
    %1139 = vector.extract_strided_slice %1087 {offsets = [0, 8], sizes = [8, 4], strides = [1, 1]} : vector<8x32xf32> to vector<8x4xf32>
    %cst_414 = arith.constant dense<0.000000e+00> : vector<8x4xf32>
    %1140 = tpu.matmul %1138, %1139, %cst_414 {dimension_numbers = #tpu.dot_dimension_numbers<[1], [0], [0], [1], [0, 0, 1, 1], [], []>} : vector<8x8xf32>, vector<8x4xf32>, vector<8x4xf32> -> vector<8x4xf32>
    %1141 = vector.extract_strided_slice %1085 {offsets = [0, 12], sizes = [8, 4], strides = [1, 1]} : vector<8x32xf32> to vector<8x4xf32>
    %cst_415 = arith.constant 5.000000e-01 : f32
    %1142 = vector.broadcast %cst_415 : f32 to vector<8x4xf32>
    %1143 = arith.mulf %1141, %1142 : vector<8x4xf32>
    %1144 = vector.extract_strided_slice %1086 {offsets = [0, 12], sizes = [8, 4], strides = [1, 1]} : vector<8x32xf32> to vector<8x4xf32>
    %cst_416 = arith.constant dense<0.000000e+00> : vector<8x8xf32>
    %1145 = tpu.matmul %1143, %1144, %cst_416 {dimension_numbers = #tpu.dot_dimension_numbers<[1], [1], [0], [0], [0, 0, 1, 0], [], []>} : vector<8x4xf32>, vector<8x4xf32>, vector<8x8xf32> -> vector<8x8xf32>
    %cst_417 = arith.constant dense<0xFF800000> : vector<8xf32>
    %1146 = vector.multi_reduction <maximumf>, %1145, %cst_417 [1] : vector<8x8xf32> to vector<8xf32>
    %1147 = vector.shape_cast %1146 : vector<8xf32> to vector<8x1xf32>
    %1148 = vector.broadcast %1147 : vector<8x1xf32> to vector<8x8xf32>
    %1149 = arith.subf %1145, %1148 : vector<8x8xf32>
    %1150 = math.exp %1149 : vector<8x8xf32>
    %cst_418 = arith.constant dense<0.000000e+00> : vector<8xf32>
    %1151 = vector.multi_reduction <add>, %1150, %cst_418 [1] : vector<8x8xf32> to vector<8xf32>
    %1152 = vector.shape_cast %1151 : vector<8xf32> to vector<8x1xf32>
    %1153 = tpu.reciprocal %1152 {approx = true} : vector<8x1xf32> -> vector<8x1xf32>
    %1154 = vector.broadcast %1153 : vector<8x1xf32> to vector<8x8xf32>
    %1155 = arith.mulf %1150, %1154 : vector<8x8xf32>
    %1156 = vector.extract_strided_slice %1087 {offsets = [0, 12], sizes = [8, 4], strides = [1, 1]} : vector<8x32xf32> to vector<8x4xf32>
    %cst_419 = arith.constant dense<0.000000e+00> : vector<8x4xf32>
    %1157 = tpu.matmul %1155, %1156, %cst_419 {dimension_numbers = #tpu.dot_dimension_numbers<[1], [0], [0], [1], [0, 0, 1, 1], [], []>} : vector<8x8xf32>, vector<8x4xf32>, vector<8x4xf32> -> vector<8x4xf32>
    %1158 = vector.extract_strided_slice %1085 {offsets = [0, 16], sizes = [8, 4], strides = [1, 1]} : vector<8x32xf32> to vector<8x4xf32>
    %cst_420 = arith.constant 5.000000e-01 : f32
    %1159 = vector.broadcast %cst_420 : f32 to vector<8x4xf32>
    %1160 = arith.mulf %1158, %1159 : vector<8x4xf32>
    %1161 = vector.extract_strided_slice %1086 {offsets = [0, 16], sizes = [8, 4], strides = [1, 1]} : vector<8x32xf32> to vector<8x4xf32>
    %cst_421 = arith.constant dense<0.000000e+00> : vector<8x8xf32>
    %1162 = tpu.matmul %1160, %1161, %cst_421 {dimension_numbers = #tpu.dot_dimension_numbers<[1], [1], [0], [0], [0, 0, 1, 0], [], []>} : vector<8x4xf32>, vector<8x4xf32>, vector<8x8xf32> -> vector<8x8xf32>
    %cst_422 = arith.constant dense<0xFF800000> : vector<8xf32>
    %1163 = vector.multi_reduction <maximumf>, %1162, %cst_422 [1] : vector<8x8xf32> to vector<8xf32>
    %1164 = vector.shape_cast %1163 : vector<8xf32> to vector<8x1xf32>
    %1165 = vector.broadcast %1164 : vector<8x1xf32> to vector<8x8xf32>
    %1166 = arith.subf %1162, %1165 : vector<8x8xf32>
    %1167 = math.exp %1166 : vector<8x8xf32>
    %cst_423 = arith.constant dense<0.000000e+00> : vector<8xf32>
    %1168 = vector.multi_reduction <add>, %1167, %cst_423 [1] : vector<8x8xf32> to vector<8xf32>
    %1169 = vector.shape_cast %1168 : vector<8xf32> to vector<8x1xf32>
    %1170 = tpu.reciprocal %1169 {approx = true} : vector<8x1xf32> -> vector<8x1xf32>
    %1171 = vector.broadcast %1170 : vector<8x1xf32> to vector<8x8xf32>
    %1172 = arith.mulf %1167, %1171 : vector<8x8xf32>
    %1173 = vector.extract_strided_slice %1087 {offsets = [0, 16], sizes = [8, 4], strides = [1, 1]} : vector<8x32xf32> to vector<8x4xf32>
    %cst_424 = arith.constant dense<0.000000e+00> : vector<8x4xf32>
    %1174 = tpu.matmul %1172, %1173, %cst_424 {dimension_numbers = #tpu.dot_dimension_numbers<[1], [0], [0], [1], [0, 0, 1, 1], [], []>} : vector<8x8xf32>, vector<8x4xf32>, vector<8x4xf32> -> vector<8x4xf32>
    %1175 = vector.extract_strided_slice %1085 {offsets = [0, 20], sizes = [8, 4], strides = [1, 1]} : vector<8x32xf32> to vector<8x4xf32>
    %cst_425 = arith.constant 5.000000e-01 : f32
    %1176 = vector.broadcast %cst_425 : f32 to vector<8x4xf32>
    %1177 = arith.mulf %1175, %1176 : vector<8x4xf32>
    %1178 = vector.extract_strided_slice %1086 {offsets = [0, 20], sizes = [8, 4], strides = [1, 1]} : vector<8x32xf32> to vector<8x4xf32>
    %cst_426 = arith.constant dense<0.000000e+00> : vector<8x8xf32>
    %1179 = tpu.matmul %1177, %1178, %cst_426 {dimension_numbers = #tpu.dot_dimension_numbers<[1], [1], [0], [0], [0, 0, 1, 0], [], []>} : vector<8x4xf32>, vector<8x4xf32>, vector<8x8xf32> -> vector<8x8xf32>
    %cst_427 = arith.constant dense<0xFF800000> : vector<8xf32>
    %1180 = vector.multi_reduction <maximumf>, %1179, %cst_427 [1] : vector<8x8xf32> to vector<8xf32>
    %1181 = vector.shape_cast %1180 : vector<8xf32> to vector<8x1xf32>
    %1182 = vector.broadcast %1181 : vector<8x1xf32> to vector<8x8xf32>
    %1183 = arith.subf %1179, %1182 : vector<8x8xf32>
    %1184 = math.exp %1183 : vector<8x8xf32>
    %cst_428 = arith.constant dense<0.000000e+00> : vector<8xf32>
    %1185 = vector.multi_reduction <add>, %1184, %cst_428 [1] : vector<8x8xf32> to vector<8xf32>
    %1186 = vector.shape_cast %1185 : vector<8xf32> to vector<8x1xf32>
    %1187 = tpu.reciprocal %1186 {approx = true} : vector<8x1xf32> -> vector<8x1xf32>
    %1188 = vector.broadcast %1187 : vector<8x1xf32> to vector<8x8xf32>
    %1189 = arith.mulf %1184, %1188 : vector<8x8xf32>
    %1190 = vector.extract_strided_slice %1087 {offsets = [0, 20], sizes = [8, 4], strides = [1, 1]} : vector<8x32xf32> to vector<8x4xf32>
    %cst_429 = arith.constant dense<0.000000e+00> : vector<8x4xf32>
    %1191 = tpu.matmul %1189, %1190, %cst_429 {dimension_numbers = #tpu.dot_dimension_numbers<[1], [0], [0], [1], [0, 0, 1, 1], [], []>} : vector<8x8xf32>, vector<8x4xf32>, vector<8x4xf32> -> vector<8x4xf32>
    %1192 = vector.extract_strided_slice %1085 {offsets = [0, 24], sizes = [8, 4], strides = [1, 1]} : vector<8x32xf32> to vector<8x4xf32>
    %cst_430 = arith.constant 5.000000e-01 : f32
    %1193 = vector.broadcast %cst_430 : f32 to vector<8x4xf32>
    %1194 = arith.mulf %1192, %1193 : vector<8x4xf32>
    %1195 = vector.extract_strided_slice %1086 {offsets = [0, 24], sizes = [8, 4], strides = [1, 1]} : vector<8x32xf32> to vector<8x4xf32>
    %cst_431 = arith.constant dense<0.000000e+00> : vector<8x8xf32>
    %1196 = tpu.matmul %1194, %1195, %cst_431 {dimension_numbers = #tpu.dot_dimension_numbers<[1], [1], [0], [0], [0, 0, 1, 0], [], []>} : vector<8x4xf32>, vector<8x4xf32>, vector<8x8xf32> -> vector<8x8xf32>
    %cst_432 = arith.constant dense<0xFF800000> : vector<8xf32>
    %1197 = vector.multi_reduction <maximumf>, %1196, %cst_432 [1] : vector<8x8xf32> to vector<8xf32>
    %1198 = vector.shape_cast %1197 : vector<8xf32> to vector<8x1xf32>
    %1199 = vector.broadcast %1198 : vector<8x1xf32> to vector<8x8xf32>
    %1200 = arith.subf %1196, %1199 : vector<8x8xf32>
    %1201 = math.exp %1200 : vector<8x8xf32>
    %cst_433 = arith.constant dense<0.000000e+00> : vector<8xf32>
    %1202 = vector.multi_reduction <add>, %1201, %cst_433 [1] : vector<8x8xf32> to vector<8xf32>
    %1203 = vector.shape_cast %1202 : vector<8xf32> to vector<8x1xf32>
    %1204 = tpu.reciprocal %1203 {approx = true} : vector<8x1xf32> -> vector<8x1xf32>
    %1205 = vector.broadcast %1204 : vector<8x1xf32> to vector<8x8xf32>
    %1206 = arith.mulf %1201, %1205 : vector<8x8xf32>
    %1207 = vector.extract_strided_slice %1087 {offsets = [0, 24], sizes = [8, 4], strides = [1, 1]} : vector<8x32xf32> to vector<8x4xf32>
    %cst_434 = arith.constant dense<0.000000e+00> : vector<8x4xf32>
    %1208 = tpu.matmul %1206, %1207, %cst_434 {dimension_numbers = #tpu.dot_dimension_numbers<[1], [0], [0], [1], [0, 0, 1, 1], [], []>} : vector<8x8xf32>, vector<8x4xf32>, vector<8x4xf32> -> vector<8x4xf32>
    %1209 = vector.extract_strided_slice %1085 {offsets = [0, 28], sizes = [8, 4], strides = [1, 1]} : vector<8x32xf32> to vector<8x4xf32>
    %cst_435 = arith.constant 5.000000e-01 : f32
    %1210 = vector.broadcast %cst_435 : f32 to vector<8x4xf32>
    %1211 = arith.mulf %1209, %1210 : vector<8x4xf32>
    %1212 = vector.extract_strided_slice %1086 {offsets = [0, 28], sizes = [8, 4], strides = [1, 1]} : vector<8x32xf32> to vector<8x4xf32>
    %cst_436 = arith.constant dense<0.000000e+00> : vector<8x8xf32>
    %1213 = tpu.matmul %1211, %1212, %cst_436 {dimension_numbers = #tpu.dot_dimension_numbers<[1], [1], [0], [0], [0, 0, 1, 0], [], []>} : vector<8x4xf32>, vector<8x4xf32>, vector<8x8xf32> -> vector<8x8xf32>
    %cst_437 = arith.constant dense<0xFF800000> : vector<8xf32>
    %1214 = vector.multi_reduction <maximumf>, %1213, %cst_437 [1] : vector<8x8xf32> to vector<8xf32>
    %1215 = vector.shape_cast %1214 : vector<8xf32> to vector<8x1xf32>
    %1216 = vector.broadcast %1215 : vector<8x1xf32> to vector<8x8xf32>
    %1217 = arith.subf %1213, %1216 : vector<8x8xf32>
    %1218 = math.exp %1217 : vector<8x8xf32>
    %cst_438 = arith.constant dense<0.000000e+00> : vector<8xf32>
    %1219 = vector.multi_reduction <add>, %1218, %cst_438 [1] : vector<8x8xf32> to vector<8xf32>
    %1220 = vector.shape_cast %1219 : vector<8xf32> to vector<8x1xf32>
    %1221 = tpu.reciprocal %1220 {approx = true} : vector<8x1xf32> -> vector<8x1xf32>
    %1222 = vector.broadcast %1221 : vector<8x1xf32> to vector<8x8xf32>
    %1223 = arith.mulf %1218, %1222 : vector<8x8xf32>
    %1224 = vector.extract_strided_slice %1087 {offsets = [0, 28], sizes = [8, 4], strides = [1, 1]} : vector<8x32xf32> to vector<8x4xf32>
    %cst_439 = arith.constant dense<0.000000e+00> : vector<8x4xf32>
    %1225 = tpu.matmul %1223, %1224, %cst_439 {dimension_numbers = #tpu.dot_dimension_numbers<[1], [0], [0], [1], [0, 0, 1, 1], [], []>} : vector<8x8xf32>, vector<8x4xf32>, vector<8x4xf32> -> vector<8x4xf32>
    %1226 = tpu.concatenate %1106, %1123, %1140, %1157, %1174, %1191, %1208, %1225 in 1 : vector<8x4xf32>, vector<8x4xf32>, vector<8x4xf32>, vector<8x4xf32>, vector<8x4xf32>, vector<8x4xf32>, vector<8x4xf32>, vector<8x4xf32> -> vector<8x32xf32>
    %cst_440 = arith.constant dense<0.000000e+00> : vector<8x32xf32>
    %1227 = tpu.matmul %1226, %1088, %cst_440 {dimension_numbers = #tpu.dot_dimension_numbers<[1], [0], [0], [1], [0, 0, 1, 1], [], []>} : vector<8x32xf32>, vector<32x32xf32>, vector<8x32xf32> -> vector<8x32xf32>
    %1228 = vector.broadcast %1089 : vector<1x32xf32> to vector<8x32xf32>
    %1229 = arith.addf %1227, %1228 : vector<8x32xf32>
    %c0_441 = arith.constant 0 : index
    %c0_442 = arith.constant 0 : index
    %1230 = vector.load %arg36[%c0_441, %c0_442] : memref<1x32xf32, #tpu.memory_space<vmem>>, vector<1x32xf32>
    %c0_443 = arith.constant 0 : index
    %c0_444 = arith.constant 0 : index
    %1231 = vector.load %arg37[%c0_443, %c0_444] : memref<1x32xf32, #tpu.memory_space<vmem>>, vector<1x32xf32>
    %1232 = arith.addf %1229, %1079 : vector<8x32xf32>
    %cst_445 = arith.constant dense<0.000000e+00> : vector<8xf32>
    %1233 = vector.multi_reduction <add>, %1232, %cst_445 [1] : vector<8x32xf32> to vector<8xf32>
    %1234 = vector.shape_cast %1233 : vector<8xf32> to vector<8x1xf32>
    %cst_446 = arith.constant 3.200000e+01 : f32
    %1235 = vector.broadcast %cst_446 : f32 to vector<8x1xf32>
    %1236 = arith.divf %1234, %1235 : vector<8x1xf32>
    %1237 = vector.broadcast %1236 : vector<8x1xf32> to vector<8x32xf32>
    %1238 = arith.subf %1232, %1237 : vector<8x32xf32>
    %1239 = arith.mulf %1238, %1238 : vector<8x32xf32>
    %cst_447 = arith.constant dense<0.000000e+00> : vector<8xf32>
    %1240 = vector.multi_reduction <add>, %1239, %cst_447 [1] : vector<8x32xf32> to vector<8xf32>
    %1241 = vector.shape_cast %1240 : vector<8xf32> to vector<8x1xf32>
    %cst_448 = arith.constant 3.200000e+01 : f32
    %1242 = vector.broadcast %cst_448 : f32 to vector<8x1xf32>
    %1243 = arith.divf %1241, %1242 : vector<8x1xf32>
    %1244 = vector.broadcast %1236 : vector<8x1xf32> to vector<8x32xf32>
    %1245 = arith.subf %1232, %1244 : vector<8x32xf32>
    %cst_449 = arith.constant 9.99999974E-6 : f32
    %1246 = vector.broadcast %cst_449 : f32 to vector<8x1xf32>
    %1247 = arith.addf %1243, %1246 : vector<8x1xf32>
    %1248 = math.rsqrt %1247 : vector<8x1xf32>
    %1249 = vector.broadcast %1248 : vector<8x1xf32> to vector<8x32xf32>
    %1250 = arith.mulf %1245, %1249 : vector<8x32xf32>
    %1251 = vector.broadcast %1230 : vector<1x32xf32> to vector<8x32xf32>
    %1252 = arith.mulf %1250, %1251 : vector<8x32xf32>
    %1253 = vector.broadcast %1231 : vector<1x32xf32> to vector<8x32xf32>
    %1254 = arith.addf %1252, %1253 : vector<8x32xf32>
    %c0_450 = arith.constant 0 : index
    %c0_451 = arith.constant 0 : index
    %1255 = vector.load %arg38[%c0_450, %c0_451] : memref<32x32xf32, #tpu.memory_space<vmem>>, vector<32x32xf32>
    %c0_452 = arith.constant 0 : index
    %c0_453 = arith.constant 0 : index
    %1256 = vector.load %arg39[%c0_452, %c0_453] : memref<1x32xf32, #tpu.memory_space<vmem>>, vector<1x32xf32>
    %cst_454 = arith.constant dense<0.000000e+00> : vector<8x32xf32>
    %1257 = tpu.matmul %1254, %1255, %cst_454 {dimension_numbers = #tpu.dot_dimension_numbers<[1], [0], [0], [1], [0, 0, 1, 1], [], []>} : vector<8x32xf32>, vector<32x32xf32>, vector<8x32xf32> -> vector<8x32xf32>
    %1258 = vector.broadcast %1256 : vector<1x32xf32> to vector<8x32xf32>
    %1259 = arith.addf %1257, %1258 : vector<8x32xf32>
    %c0_455 = arith.constant 0 : index
    %c0_456 = arith.constant 0 : index
    %1260 = vector.load %arg40[%c0_455, %c0_456] : memref<32x64xf32, #tpu.memory_space<vmem>>, vector<32x64xf32>
    %c0_457 = arith.constant 0 : index
    %c0_458 = arith.constant 0 : index
    %1261 = vector.load %arg41[%c0_457, %c0_458] : memref<1x64xf32, #tpu.memory_space<vmem>>, vector<1x64xf32>
    %cst_459 = arith.constant dense<0.000000e+00> : vector<8x64xf32>
    %1262 = tpu.matmul %867, %1260, %cst_459 {dimension_numbers = #tpu.dot_dimension_numbers<[1], [0], [0], [1], [0, 0, 1, 1], [], []>} : vector<8x32xf32>, vector<32x64xf32>, vector<8x64xf32> -> vector<8x64xf32>
    %1263 = vector.broadcast %1261 : vector<1x64xf32> to vector<8x64xf32>
    %1264 = arith.addf %1262, %1263 : vector<8x64xf32>
    %1265 = vector.extract_strided_slice %1264 {offsets = [0, 0], sizes = [8, 32], strides = [1, 1]} : vector<8x64xf32> to vector<8x32xf32>
    %1266 = vector.extract_strided_slice %1264 {offsets = [0, 32], sizes = [8, 32], strides = [1, 1]} : vector<8x64xf32> to vector<8x32xf32>
    %c0_460 = arith.constant 0 : index
    %c0_461 = arith.constant 0 : index
    %1267 = vector.load %arg42[%c0_460, %c0_461] : memref<32x32xf32, #tpu.memory_space<vmem>>, vector<32x32xf32>
    %c0_462 = arith.constant 0 : index
    %c0_463 = arith.constant 0 : index
    %1268 = vector.load %arg43[%c0_462, %c0_463] : memref<1x32xf32, #tpu.memory_space<vmem>>, vector<1x32xf32>
    %1269 = vector.extract_strided_slice %1259 {offsets = [0, 0], sizes = [8, 4], strides = [1, 1]} : vector<8x32xf32> to vector<8x4xf32>
    %cst_464 = arith.constant 5.000000e-01 : f32
    %1270 = vector.broadcast %cst_464 : f32 to vector<8x4xf32>
    %1271 = arith.mulf %1269, %1270 : vector<8x4xf32>
    %1272 = vector.extract_strided_slice %1265 {offsets = [0, 0], sizes = [8, 4], strides = [1, 1]} : vector<8x32xf32> to vector<8x4xf32>
    %cst_465 = arith.constant dense<0.000000e+00> : vector<8x8xf32>
    %1273 = tpu.matmul %1271, %1272, %cst_465 {dimension_numbers = #tpu.dot_dimension_numbers<[1], [1], [0], [0], [0, 0, 1, 0], [], []>} : vector<8x4xf32>, vector<8x4xf32>, vector<8x8xf32> -> vector<8x8xf32>
    %cst_466 = arith.constant dense<0xFF800000> : vector<8xf32>
    %1274 = vector.multi_reduction <maximumf>, %1273, %cst_466 [1] : vector<8x8xf32> to vector<8xf32>
    %1275 = vector.shape_cast %1274 : vector<8xf32> to vector<8x1xf32>
    %1276 = vector.broadcast %1275 : vector<8x1xf32> to vector<8x8xf32>
    %1277 = arith.subf %1273, %1276 : vector<8x8xf32>
    %1278 = math.exp %1277 : vector<8x8xf32>
    %cst_467 = arith.constant dense<0.000000e+00> : vector<8xf32>
    %1279 = vector.multi_reduction <add>, %1278, %cst_467 [1] : vector<8x8xf32> to vector<8xf32>
    %1280 = vector.shape_cast %1279 : vector<8xf32> to vector<8x1xf32>
    %1281 = tpu.reciprocal %1280 {approx = true} : vector<8x1xf32> -> vector<8x1xf32>
    %1282 = vector.broadcast %1281 : vector<8x1xf32> to vector<8x8xf32>
    %1283 = arith.mulf %1278, %1282 : vector<8x8xf32>
    %1284 = vector.extract_strided_slice %1266 {offsets = [0, 0], sizes = [8, 4], strides = [1, 1]} : vector<8x32xf32> to vector<8x4xf32>
    %cst_468 = arith.constant dense<0.000000e+00> : vector<8x4xf32>
    %1285 = tpu.matmul %1283, %1284, %cst_468 {dimension_numbers = #tpu.dot_dimension_numbers<[1], [0], [0], [1], [0, 0, 1, 1], [], []>} : vector<8x8xf32>, vector<8x4xf32>, vector<8x4xf32> -> vector<8x4xf32>
    %1286 = vector.extract_strided_slice %1259 {offsets = [0, 4], sizes = [8, 4], strides = [1, 1]} : vector<8x32xf32> to vector<8x4xf32>
    %cst_469 = arith.constant 5.000000e-01 : f32
    %1287 = vector.broadcast %cst_469 : f32 to vector<8x4xf32>
    %1288 = arith.mulf %1286, %1287 : vector<8x4xf32>
    %1289 = vector.extract_strided_slice %1265 {offsets = [0, 4], sizes = [8, 4], strides = [1, 1]} : vector<8x32xf32> to vector<8x4xf32>
    %cst_470 = arith.constant dense<0.000000e+00> : vector<8x8xf32>
    %1290 = tpu.matmul %1288, %1289, %cst_470 {dimension_numbers = #tpu.dot_dimension_numbers<[1], [1], [0], [0], [0, 0, 1, 0], [], []>} : vector<8x4xf32>, vector<8x4xf32>, vector<8x8xf32> -> vector<8x8xf32>
    %cst_471 = arith.constant dense<0xFF800000> : vector<8xf32>
    %1291 = vector.multi_reduction <maximumf>, %1290, %cst_471 [1] : vector<8x8xf32> to vector<8xf32>
    %1292 = vector.shape_cast %1291 : vector<8xf32> to vector<8x1xf32>
    %1293 = vector.broadcast %1292 : vector<8x1xf32> to vector<8x8xf32>
    %1294 = arith.subf %1290, %1293 : vector<8x8xf32>
    %1295 = math.exp %1294 : vector<8x8xf32>
    %cst_472 = arith.constant dense<0.000000e+00> : vector<8xf32>
    %1296 = vector.multi_reduction <add>, %1295, %cst_472 [1] : vector<8x8xf32> to vector<8xf32>
    %1297 = vector.shape_cast %1296 : vector<8xf32> to vector<8x1xf32>
    %1298 = tpu.reciprocal %1297 {approx = true} : vector<8x1xf32> -> vector<8x1xf32>
    %1299 = vector.broadcast %1298 : vector<8x1xf32> to vector<8x8xf32>
    %1300 = arith.mulf %1295, %1299 : vector<8x8xf32>
    %1301 = vector.extract_strided_slice %1266 {offsets = [0, 4], sizes = [8, 4], strides = [1, 1]} : vector<8x32xf32> to vector<8x4xf32>
    %cst_473 = arith.constant dense<0.000000e+00> : vector<8x4xf32>
    %1302 = tpu.matmul %1300, %1301, %cst_473 {dimension_numbers = #tpu.dot_dimension_numbers<[1], [0], [0], [1], [0, 0, 1, 1], [], []>} : vector<8x8xf32>, vector<8x4xf32>, vector<8x4xf32> -> vector<8x4xf32>
    %1303 = vector.extract_strided_slice %1259 {offsets = [0, 8], sizes = [8, 4], strides = [1, 1]} : vector<8x32xf32> to vector<8x4xf32>
    %cst_474 = arith.constant 5.000000e-01 : f32
    %1304 = vector.broadcast %cst_474 : f32 to vector<8x4xf32>
    %1305 = arith.mulf %1303, %1304 : vector<8x4xf32>
    %1306 = vector.extract_strided_slice %1265 {offsets = [0, 8], sizes = [8, 4], strides = [1, 1]} : vector<8x32xf32> to vector<8x4xf32>
    %cst_475 = arith.constant dense<0.000000e+00> : vector<8x8xf32>
    %1307 = tpu.matmul %1305, %1306, %cst_475 {dimension_numbers = #tpu.dot_dimension_numbers<[1], [1], [0], [0], [0, 0, 1, 0], [], []>} : vector<8x4xf32>, vector<8x4xf32>, vector<8x8xf32> -> vector<8x8xf32>
    %cst_476 = arith.constant dense<0xFF800000> : vector<8xf32>
    %1308 = vector.multi_reduction <maximumf>, %1307, %cst_476 [1] : vector<8x8xf32> to vector<8xf32>
    %1309 = vector.shape_cast %1308 : vector<8xf32> to vector<8x1xf32>
    %1310 = vector.broadcast %1309 : vector<8x1xf32> to vector<8x8xf32>
    %1311 = arith.subf %1307, %1310 : vector<8x8xf32>
    %1312 = math.exp %1311 : vector<8x8xf32>
    %cst_477 = arith.constant dense<0.000000e+00> : vector<8xf32>
    %1313 = vector.multi_reduction <add>, %1312, %cst_477 [1] : vector<8x8xf32> to vector<8xf32>
    %1314 = vector.shape_cast %1313 : vector<8xf32> to vector<8x1xf32>
    %1315 = tpu.reciprocal %1314 {approx = true} : vector<8x1xf32> -> vector<8x1xf32>
    %1316 = vector.broadcast %1315 : vector<8x1xf32> to vector<8x8xf32>
    %1317 = arith.mulf %1312, %1316 : vector<8x8xf32>
    %1318 = vector.extract_strided_slice %1266 {offsets = [0, 8], sizes = [8, 4], strides = [1, 1]} : vector<8x32xf32> to vector<8x4xf32>
    %cst_478 = arith.constant dense<0.000000e+00> : vector<8x4xf32>
    %1319 = tpu.matmul %1317, %1318, %cst_478 {dimension_numbers = #tpu.dot_dimension_numbers<[1], [0], [0], [1], [0, 0, 1, 1], [], []>} : vector<8x8xf32>, vector<8x4xf32>, vector<8x4xf32> -> vector<8x4xf32>
    %1320 = vector.extract_strided_slice %1259 {offsets = [0, 12], sizes = [8, 4], strides = [1, 1]} : vector<8x32xf32> to vector<8x4xf32>
    %cst_479 = arith.constant 5.000000e-01 : f32
    %1321 = vector.broadcast %cst_479 : f32 to vector<8x4xf32>
    %1322 = arith.mulf %1320, %1321 : vector<8x4xf32>
    %1323 = vector.extract_strided_slice %1265 {offsets = [0, 12], sizes = [8, 4], strides = [1, 1]} : vector<8x32xf32> to vector<8x4xf32>
    %cst_480 = arith.constant dense<0.000000e+00> : vector<8x8xf32>
    %1324 = tpu.matmul %1322, %1323, %cst_480 {dimension_numbers = #tpu.dot_dimension_numbers<[1], [1], [0], [0], [0, 0, 1, 0], [], []>} : vector<8x4xf32>, vector<8x4xf32>, vector<8x8xf32> -> vector<8x8xf32>
    %cst_481 = arith.constant dense<0xFF800000> : vector<8xf32>
    %1325 = vector.multi_reduction <maximumf>, %1324, %cst_481 [1] : vector<8x8xf32> to vector<8xf32>
    %1326 = vector.shape_cast %1325 : vector<8xf32> to vector<8x1xf32>
    %1327 = vector.broadcast %1326 : vector<8x1xf32> to vector<8x8xf32>
    %1328 = arith.subf %1324, %1327 : vector<8x8xf32>
    %1329 = math.exp %1328 : vector<8x8xf32>
    %cst_482 = arith.constant dense<0.000000e+00> : vector<8xf32>
    %1330 = vector.multi_reduction <add>, %1329, %cst_482 [1] : vector<8x8xf32> to vector<8xf32>
    %1331 = vector.shape_cast %1330 : vector<8xf32> to vector<8x1xf32>
    %1332 = tpu.reciprocal %1331 {approx = true} : vector<8x1xf32> -> vector<8x1xf32>
    %1333 = vector.broadcast %1332 : vector<8x1xf32> to vector<8x8xf32>
    %1334 = arith.mulf %1329, %1333 : vector<8x8xf32>
    %1335 = vector.extract_strided_slice %1266 {offsets = [0, 12], sizes = [8, 4], strides = [1, 1]} : vector<8x32xf32> to vector<8x4xf32>
    %cst_483 = arith.constant dense<0.000000e+00> : vector<8x4xf32>
    %1336 = tpu.matmul %1334, %1335, %cst_483 {dimension_numbers = #tpu.dot_dimension_numbers<[1], [0], [0], [1], [0, 0, 1, 1], [], []>} : vector<8x8xf32>, vector<8x4xf32>, vector<8x4xf32> -> vector<8x4xf32>
    %1337 = vector.extract_strided_slice %1259 {offsets = [0, 16], sizes = [8, 4], strides = [1, 1]} : vector<8x32xf32> to vector<8x4xf32>
    %cst_484 = arith.constant 5.000000e-01 : f32
    %1338 = vector.broadcast %cst_484 : f32 to vector<8x4xf32>
    %1339 = arith.mulf %1337, %1338 : vector<8x4xf32>
    %1340 = vector.extract_strided_slice %1265 {offsets = [0, 16], sizes = [8, 4], strides = [1, 1]} : vector<8x32xf32> to vector<8x4xf32>
    %cst_485 = arith.constant dense<0.000000e+00> : vector<8x8xf32>
    %1341 = tpu.matmul %1339, %1340, %cst_485 {dimension_numbers = #tpu.dot_dimension_numbers<[1], [1], [0], [0], [0, 0, 1, 0], [], []>} : vector<8x4xf32>, vector<8x4xf32>, vector<8x8xf32> -> vector<8x8xf32>
    %cst_486 = arith.constant dense<0xFF800000> : vector<8xf32>
    %1342 = vector.multi_reduction <maximumf>, %1341, %cst_486 [1] : vector<8x8xf32> to vector<8xf32>
    %1343 = vector.shape_cast %1342 : vector<8xf32> to vector<8x1xf32>
    %1344 = vector.broadcast %1343 : vector<8x1xf32> to vector<8x8xf32>
    %1345 = arith.subf %1341, %1344 : vector<8x8xf32>
    %1346 = math.exp %1345 : vector<8x8xf32>
    %cst_487 = arith.constant dense<0.000000e+00> : vector<8xf32>
    %1347 = vector.multi_reduction <add>, %1346, %cst_487 [1] : vector<8x8xf32> to vector<8xf32>
    %1348 = vector.shape_cast %1347 : vector<8xf32> to vector<8x1xf32>
    %1349 = tpu.reciprocal %1348 {approx = true} : vector<8x1xf32> -> vector<8x1xf32>
    %1350 = vector.broadcast %1349 : vector<8x1xf32> to vector<8x8xf32>
    %1351 = arith.mulf %1346, %1350 : vector<8x8xf32>
    %1352 = vector.extract_strided_slice %1266 {offsets = [0, 16], sizes = [8, 4], strides = [1, 1]} : vector<8x32xf32> to vector<8x4xf32>
    %cst_488 = arith.constant dense<0.000000e+00> : vector<8x4xf32>
    %1353 = tpu.matmul %1351, %1352, %cst_488 {dimension_numbers = #tpu.dot_dimension_numbers<[1], [0], [0], [1], [0, 0, 1, 1], [], []>} : vector<8x8xf32>, vector<8x4xf32>, vector<8x4xf32> -> vector<8x4xf32>
    %1354 = vector.extract_strided_slice %1259 {offsets = [0, 20], sizes = [8, 4], strides = [1, 1]} : vector<8x32xf32> to vector<8x4xf32>
    %cst_489 = arith.constant 5.000000e-01 : f32
    %1355 = vector.broadcast %cst_489 : f32 to vector<8x4xf32>
    %1356 = arith.mulf %1354, %1355 : vector<8x4xf32>
    %1357 = vector.extract_strided_slice %1265 {offsets = [0, 20], sizes = [8, 4], strides = [1, 1]} : vector<8x32xf32> to vector<8x4xf32>
    %cst_490 = arith.constant dense<0.000000e+00> : vector<8x8xf32>
    %1358 = tpu.matmul %1356, %1357, %cst_490 {dimension_numbers = #tpu.dot_dimension_numbers<[1], [1], [0], [0], [0, 0, 1, 0], [], []>} : vector<8x4xf32>, vector<8x4xf32>, vector<8x8xf32> -> vector<8x8xf32>
    %cst_491 = arith.constant dense<0xFF800000> : vector<8xf32>
    %1359 = vector.multi_reduction <maximumf>, %1358, %cst_491 [1] : vector<8x8xf32> to vector<8xf32>
    %1360 = vector.shape_cast %1359 : vector<8xf32> to vector<8x1xf32>
    %1361 = vector.broadcast %1360 : vector<8x1xf32> to vector<8x8xf32>
    %1362 = arith.subf %1358, %1361 : vector<8x8xf32>
    %1363 = math.exp %1362 : vector<8x8xf32>
    %cst_492 = arith.constant dense<0.000000e+00> : vector<8xf32>
    %1364 = vector.multi_reduction <add>, %1363, %cst_492 [1] : vector<8x8xf32> to vector<8xf32>
    %1365 = vector.shape_cast %1364 : vector<8xf32> to vector<8x1xf32>
    %1366 = tpu.reciprocal %1365 {approx = true} : vector<8x1xf32> -> vector<8x1xf32>
    %1367 = vector.broadcast %1366 : vector<8x1xf32> to vector<8x8xf32>
    %1368 = arith.mulf %1363, %1367 : vector<8x8xf32>
    %1369 = vector.extract_strided_slice %1266 {offsets = [0, 20], sizes = [8, 4], strides = [1, 1]} : vector<8x32xf32> to vector<8x4xf32>
    %cst_493 = arith.constant dense<0.000000e+00> : vector<8x4xf32>
    %1370 = tpu.matmul %1368, %1369, %cst_493 {dimension_numbers = #tpu.dot_dimension_numbers<[1], [0], [0], [1], [0, 0, 1, 1], [], []>} : vector<8x8xf32>, vector<8x4xf32>, vector<8x4xf32> -> vector<8x4xf32>
    %1371 = vector.extract_strided_slice %1259 {offsets = [0, 24], sizes = [8, 4], strides = [1, 1]} : vector<8x32xf32> to vector<8x4xf32>
    %cst_494 = arith.constant 5.000000e-01 : f32
    %1372 = vector.broadcast %cst_494 : f32 to vector<8x4xf32>
    %1373 = arith.mulf %1371, %1372 : vector<8x4xf32>
    %1374 = vector.extract_strided_slice %1265 {offsets = [0, 24], sizes = [8, 4], strides = [1, 1]} : vector<8x32xf32> to vector<8x4xf32>
    %cst_495 = arith.constant dense<0.000000e+00> : vector<8x8xf32>
    %1375 = tpu.matmul %1373, %1374, %cst_495 {dimension_numbers = #tpu.dot_dimension_numbers<[1], [1], [0], [0], [0, 0, 1, 0], [], []>} : vector<8x4xf32>, vector<8x4xf32>, vector<8x8xf32> -> vector<8x8xf32>
    %cst_496 = arith.constant dense<0xFF800000> : vector<8xf32>
    %1376 = vector.multi_reduction <maximumf>, %1375, %cst_496 [1] : vector<8x8xf32> to vector<8xf32>
    %1377 = vector.shape_cast %1376 : vector<8xf32> to vector<8x1xf32>
    %1378 = vector.broadcast %1377 : vector<8x1xf32> to vector<8x8xf32>
    %1379 = arith.subf %1375, %1378 : vector<8x8xf32>
    %1380 = math.exp %1379 : vector<8x8xf32>
    %cst_497 = arith.constant dense<0.000000e+00> : vector<8xf32>
    %1381 = vector.multi_reduction <add>, %1380, %cst_497 [1] : vector<8x8xf32> to vector<8xf32>
    %1382 = vector.shape_cast %1381 : vector<8xf32> to vector<8x1xf32>
    %1383 = tpu.reciprocal %1382 {approx = true} : vector<8x1xf32> -> vector<8x1xf32>
    %1384 = vector.broadcast %1383 : vector<8x1xf32> to vector<8x8xf32>
    %1385 = arith.mulf %1380, %1384 : vector<8x8xf32>
    %1386 = vector.extract_strided_slice %1266 {offsets = [0, 24], sizes = [8, 4], strides = [1, 1]} : vector<8x32xf32> to vector<8x4xf32>
    %cst_498 = arith.constant dense<0.000000e+00> : vector<8x4xf32>
    %1387 = tpu.matmul %1385, %1386, %cst_498 {dimension_numbers = #tpu.dot_dimension_numbers<[1], [0], [0], [1], [0, 0, 1, 1], [], []>} : vector<8x8xf32>, vector<8x4xf32>, vector<8x4xf32> -> vector<8x4xf32>
    %1388 = vector.extract_strided_slice %1259 {offsets = [0, 28], sizes = [8, 4], strides = [1, 1]} : vector<8x32xf32> to vector<8x4xf32>
    %cst_499 = arith.constant 5.000000e-01 : f32
    %1389 = vector.broadcast %cst_499 : f32 to vector<8x4xf32>
    %1390 = arith.mulf %1388, %1389 : vector<8x4xf32>
    %1391 = vector.extract_strided_slice %1265 {offsets = [0, 28], sizes = [8, 4], strides = [1, 1]} : vector<8x32xf32> to vector<8x4xf32>
    %cst_500 = arith.constant dense<0.000000e+00> : vector<8x8xf32>
    %1392 = tpu.matmul %1390, %1391, %cst_500 {dimension_numbers = #tpu.dot_dimension_numbers<[1], [1], [0], [0], [0, 0, 1, 0], [], []>} : vector<8x4xf32>, vector<8x4xf32>, vector<8x8xf32> -> vector<8x8xf32>
    %cst_501 = arith.constant dense<0xFF800000> : vector<8xf32>
    %1393 = vector.multi_reduction <maximumf>, %1392, %cst_501 [1] : vector<8x8xf32> to vector<8xf32>
    %1394 = vector.shape_cast %1393 : vector<8xf32> to vector<8x1xf32>
    %1395 = vector.broadcast %1394 : vector<8x1xf32> to vector<8x8xf32>
    %1396 = arith.subf %1392, %1395 : vector<8x8xf32>
    %1397 = math.exp %1396 : vector<8x8xf32>
    %cst_502 = arith.constant dense<0.000000e+00> : vector<8xf32>
    %1398 = vector.multi_reduction <add>, %1397, %cst_502 [1] : vector<8x8xf32> to vector<8xf32>
    %1399 = vector.shape_cast %1398 : vector<8xf32> to vector<8x1xf32>
    %1400 = tpu.reciprocal %1399 {approx = true} : vector<8x1xf32> -> vector<8x1xf32>
    %1401 = vector.broadcast %1400 : vector<8x1xf32> to vector<8x8xf32>
    %1402 = arith.mulf %1397, %1401 : vector<8x8xf32>
    %1403 = vector.extract_strided_slice %1266 {offsets = [0, 28], sizes = [8, 4], strides = [1, 1]} : vector<8x32xf32> to vector<8x4xf32>
    %cst_503 = arith.constant dense<0.000000e+00> : vector<8x4xf32>
    %1404 = tpu.matmul %1402, %1403, %cst_503 {dimension_numbers = #tpu.dot_dimension_numbers<[1], [0], [0], [1], [0, 0, 1, 1], [], []>} : vector<8x8xf32>, vector<8x4xf32>, vector<8x4xf32> -> vector<8x4xf32>
    %1405 = tpu.concatenate %1285, %1302, %1319, %1336, %1353, %1370, %1387, %1404 in 1 : vector<8x4xf32>, vector<8x4xf32>, vector<8x4xf32>, vector<8x4xf32>, vector<8x4xf32>, vector<8x4xf32>, vector<8x4xf32>, vector<8x4xf32> -> vector<8x32xf32>
    %cst_504 = arith.constant dense<0.000000e+00> : vector<8x32xf32>
    %1406 = tpu.matmul %1405, %1267, %cst_504 {dimension_numbers = #tpu.dot_dimension_numbers<[1], [0], [0], [1], [0, 0, 1, 1], [], []>} : vector<8x32xf32>, vector<32x32xf32>, vector<8x32xf32> -> vector<8x32xf32>
    %1407 = vector.broadcast %1268 : vector<1x32xf32> to vector<8x32xf32>
    %1408 = arith.addf %1406, %1407 : vector<8x32xf32>
    %c0_505 = arith.constant 0 : index
    %c0_506 = arith.constant 0 : index
    %1409 = vector.load %arg44[%c0_505, %c0_506] : memref<1x32xf32, #tpu.memory_space<vmem>>, vector<1x32xf32>
    %c0_507 = arith.constant 0 : index
    %c0_508 = arith.constant 0 : index
    %1410 = vector.load %arg45[%c0_507, %c0_508] : memref<1x32xf32, #tpu.memory_space<vmem>>, vector<1x32xf32>
    %1411 = arith.addf %1408, %1254 : vector<8x32xf32>
    %cst_509 = arith.constant dense<0.000000e+00> : vector<8xf32>
    %1412 = vector.multi_reduction <add>, %1411, %cst_509 [1] : vector<8x32xf32> to vector<8xf32>
    %1413 = vector.shape_cast %1412 : vector<8xf32> to vector<8x1xf32>
    %cst_510 = arith.constant 3.200000e+01 : f32
    %1414 = vector.broadcast %cst_510 : f32 to vector<8x1xf32>
    %1415 = arith.divf %1413, %1414 : vector<8x1xf32>
    %1416 = vector.broadcast %1415 : vector<8x1xf32> to vector<8x32xf32>
    %1417 = arith.subf %1411, %1416 : vector<8x32xf32>
    %1418 = arith.mulf %1417, %1417 : vector<8x32xf32>
    %cst_511 = arith.constant dense<0.000000e+00> : vector<8xf32>
    %1419 = vector.multi_reduction <add>, %1418, %cst_511 [1] : vector<8x32xf32> to vector<8xf32>
    %1420 = vector.shape_cast %1419 : vector<8xf32> to vector<8x1xf32>
    %cst_512 = arith.constant 3.200000e+01 : f32
    %1421 = vector.broadcast %cst_512 : f32 to vector<8x1xf32>
    %1422 = arith.divf %1420, %1421 : vector<8x1xf32>
    %1423 = vector.broadcast %1415 : vector<8x1xf32> to vector<8x32xf32>
    %1424 = arith.subf %1411, %1423 : vector<8x32xf32>
    %cst_513 = arith.constant 9.99999974E-6 : f32
    %1425 = vector.broadcast %cst_513 : f32 to vector<8x1xf32>
    %1426 = arith.addf %1422, %1425 : vector<8x1xf32>
    %1427 = math.rsqrt %1426 : vector<8x1xf32>
    %1428 = vector.broadcast %1427 : vector<8x1xf32> to vector<8x32xf32>
    %1429 = arith.mulf %1424, %1428 : vector<8x32xf32>
    %1430 = vector.broadcast %1409 : vector<1x32xf32> to vector<8x32xf32>
    %1431 = arith.mulf %1429, %1430 : vector<8x32xf32>
    %1432 = vector.broadcast %1410 : vector<1x32xf32> to vector<8x32xf32>
    %1433 = arith.addf %1431, %1432 : vector<8x32xf32>
    %c0_514 = arith.constant 0 : index
    %c0_515 = arith.constant 0 : index
    %1434 = vector.load %arg46[%c0_514, %c0_515] : memref<32x32xf32, #tpu.memory_space<vmem>>, vector<32x32xf32>
    %c0_516 = arith.constant 0 : index
    %c0_517 = arith.constant 0 : index
    %1435 = vector.load %arg47[%c0_516, %c0_517] : memref<1x32xf32, #tpu.memory_space<vmem>>, vector<1x32xf32>
    %cst_518 = arith.constant dense<0.000000e+00> : vector<8x32xf32>
    %1436 = tpu.matmul %1433, %1434, %cst_518 {dimension_numbers = #tpu.dot_dimension_numbers<[1], [0], [0], [1], [0, 0, 1, 1], [], []>} : vector<8x32xf32>, vector<32x32xf32>, vector<8x32xf32> -> vector<8x32xf32>
    %1437 = vector.broadcast %1435 : vector<1x32xf32> to vector<8x32xf32>
    %1438 = arith.addf %1436, %1437 : vector<8x32xf32>
    %cst_519 = arith.constant 0.000000e+00 : f32
    %1439 = vector.broadcast %cst_519 : f32 to vector<8x32xf32>
    %1440 = arith.maximumf %1438, %1439 : vector<8x32xf32>
    %c0_520 = arith.constant 0 : index
    %c0_521 = arith.constant 0 : index
    %1441 = vector.load %arg48[%c0_520, %c0_521] : memref<32x32xf32, #tpu.memory_space<vmem>>, vector<32x32xf32>
    %c0_522 = arith.constant 0 : index
    %c0_523 = arith.constant 0 : index
    %1442 = vector.load %arg49[%c0_522, %c0_523] : memref<1x32xf32, #tpu.memory_space<vmem>>, vector<1x32xf32>
    %cst_524 = arith.constant dense<0.000000e+00> : vector<8x32xf32>
    %1443 = tpu.matmul %1440, %1441, %cst_524 {dimension_numbers = #tpu.dot_dimension_numbers<[1], [0], [0], [1], [0, 0, 1, 1], [], []>} : vector<8x32xf32>, vector<32x32xf32>, vector<8x32xf32> -> vector<8x32xf32>
    %1444 = vector.broadcast %1442 : vector<1x32xf32> to vector<8x32xf32>
    %1445 = arith.addf %1443, %1444 : vector<8x32xf32>
    %c0_525 = arith.constant 0 : index
    %c0_526 = arith.constant 0 : index
    %1446 = vector.load %arg50[%c0_525, %c0_526] : memref<1x32xf32, #tpu.memory_space<vmem>>, vector<1x32xf32>
    %c0_527 = arith.constant 0 : index
    %c0_528 = arith.constant 0 : index
    %1447 = vector.load %arg51[%c0_527, %c0_528] : memref<1x32xf32, #tpu.memory_space<vmem>>, vector<1x32xf32>
    %1448 = arith.addf %1445, %1433 : vector<8x32xf32>
    %cst_529 = arith.constant dense<0.000000e+00> : vector<8xf32>
    %1449 = vector.multi_reduction <add>, %1448, %cst_529 [1] : vector<8x32xf32> to vector<8xf32>
    %1450 = vector.shape_cast %1449 : vector<8xf32> to vector<8x1xf32>
    %cst_530 = arith.constant 3.200000e+01 : f32
    %1451 = vector.broadcast %cst_530 : f32 to vector<8x1xf32>
    %1452 = arith.divf %1450, %1451 : vector<8x1xf32>
    %1453 = vector.broadcast %1452 : vector<8x1xf32> to vector<8x32xf32>
    %1454 = arith.subf %1448, %1453 : vector<8x32xf32>
    %1455 = arith.mulf %1454, %1454 : vector<8x32xf32>
    %cst_531 = arith.constant dense<0.000000e+00> : vector<8xf32>
    %1456 = vector.multi_reduction <add>, %1455, %cst_531 [1] : vector<8x32xf32> to vector<8xf32>
    %1457 = vector.shape_cast %1456 : vector<8xf32> to vector<8x1xf32>
    %cst_532 = arith.constant 3.200000e+01 : f32
    %1458 = vector.broadcast %cst_532 : f32 to vector<8x1xf32>
    %1459 = arith.divf %1457, %1458 : vector<8x1xf32>
    %1460 = vector.broadcast %1452 : vector<8x1xf32> to vector<8x32xf32>
    %1461 = arith.subf %1448, %1460 : vector<8x32xf32>
    %cst_533 = arith.constant 9.99999974E-6 : f32
    %1462 = vector.broadcast %cst_533 : f32 to vector<8x1xf32>
    %1463 = arith.addf %1459, %1462 : vector<8x1xf32>
    %1464 = math.rsqrt %1463 : vector<8x1xf32>
    %1465 = vector.broadcast %1464 : vector<8x1xf32> to vector<8x32xf32>
    %1466 = arith.mulf %1461, %1465 : vector<8x32xf32>
    %1467 = vector.broadcast %1446 : vector<1x32xf32> to vector<8x32xf32>
    %1468 = arith.mulf %1466, %1467 : vector<8x32xf32>
    %1469 = vector.broadcast %1447 : vector<1x32xf32> to vector<8x32xf32>
    %1470 = arith.addf %1468, %1469 : vector<8x32xf32>
    %c0_534 = arith.constant 0 : index
    %c0_535 = arith.constant 0 : index
    %1471 = vector.load %arg52[%c0_534, %c0_535] : memref<32x32xf32, #tpu.memory_space<vmem>>, vector<32x32xf32>
    %c0_536 = arith.constant 0 : index
    %c0_537 = arith.constant 0 : index
    %1472 = vector.load %arg53[%c0_536, %c0_537] : memref<1x32xf32, #tpu.memory_space<vmem>>, vector<1x32xf32>
    %cst_538 = arith.constant dense<0.000000e+00> : vector<8x32xf32>
    %1473 = tpu.matmul %1470, %1471, %cst_538 {dimension_numbers = #tpu.dot_dimension_numbers<[1], [0], [0], [1], [0, 0, 1, 1], [], []>} : vector<8x32xf32>, vector<32x32xf32>, vector<8x32xf32> -> vector<8x32xf32>
    %1474 = vector.broadcast %1472 : vector<1x32xf32> to vector<8x32xf32>
    %1475 = arith.addf %1473, %1474 : vector<8x32xf32>
    %cst_539 = arith.constant 0.000000e+00 : f32
    %1476 = vector.broadcast %cst_539 : f32 to vector<8x32xf32>
    %1477 = arith.maximumf %1475, %1476 : vector<8x32xf32>
    %c0_540 = arith.constant 0 : index
    %c0_541 = arith.constant 0 : index
    %1478 = vector.load %arg54[%c0_540, %c0_541] : memref<32x32xf32, #tpu.memory_space<vmem>>, vector<32x32xf32>
    %c0_542 = arith.constant 0 : index
    %c0_543 = arith.constant 0 : index
    %1479 = vector.load %arg55[%c0_542, %c0_543] : memref<1x32xf32, #tpu.memory_space<vmem>>, vector<1x32xf32>
    %cst_544 = arith.constant dense<0.000000e+00> : vector<8x32xf32>
    %1480 = tpu.matmul %1477, %1478, %cst_544 {dimension_numbers = #tpu.dot_dimension_numbers<[1], [0], [0], [1], [0, 0, 1, 1], [], []>} : vector<8x32xf32>, vector<32x32xf32>, vector<8x32xf32> -> vector<8x32xf32>
    %1481 = vector.broadcast %1479 : vector<1x32xf32> to vector<8x32xf32>
    %1482 = arith.addf %1480, %1481 : vector<8x32xf32>
    %cst_545 = arith.constant 0.000000e+00 : f32
    %1483 = vector.broadcast %cst_545 : f32 to vector<8x32xf32>
    %1484 = arith.maximumf %1482, %1483 : vector<8x32xf32>
    %c0_546 = arith.constant 0 : index
    %c0_547 = arith.constant 0 : index
    %1485 = vector.load %arg56[%c0_546, %c0_547] : memref<32x128xf32, #tpu.memory_space<vmem>>, vector<32x128xf32>
    %c0_548 = arith.constant 0 : index
    %c0_549 = arith.constant 0 : index
    %1486 = vector.load %arg57[%c0_548, %c0_549] : memref<1x128xf32, #tpu.memory_space<vmem>>, vector<1x128xf32>
    %cst_550 = arith.constant dense<0.000000e+00> : vector<8x128xf32>
    %1487 = tpu.matmul %1484, %1485, %cst_550 {dimension_numbers = #tpu.dot_dimension_numbers<[1], [0], [0], [1], [0, 0, 1, 1], [], []>} : vector<8x32xf32>, vector<32x128xf32>, vector<8x128xf32> -> vector<8x128xf32>
    %1488 = vector.broadcast %1486 : vector<1x128xf32> to vector<8x128xf32>
    %1489 = arith.addf %1487, %1488 : vector<8x128xf32>
    %c1 = arith.constant 1 : index
    %c0_551 = arith.constant 0 : index
    %c0_552 = arith.constant 0 : index
    %1490 = vector.load %arg58[%c1, %c0_551, %c0_552] : memref<2x8x128xf32, #tpu.memory_space<vmem>>, vector<1x8x128xf32>
    %1491 = vector.shape_cast %1490 : vector<1x8x128xf32> to vector<8x128xf32>
    %1492 = vector.shape_cast %1489 : vector<8x128xf32> to vector<1x8x128xf32>
    tpu.vector_store %arg58[%c1, %c0_551, %c0_552], %1492 {strides = array<i32>} : memref<2x8x128xf32, #tpu.memory_space<vmem>>, vector<1x8x128xf32>,
    return
  }
  func.func @transform_0(%arg0: i32) -> (i32, i32) {
    %c0_i32 = arith.constant 0 : i32
    %c0_i32_0 = arith.constant 0 : i32
    %c0_i32_1 = arith.constant 0 : i32
    return %c0_i32, %c0_i32_0 : i32, i32
  }
  func.func @transform_1(%arg0: i32) -> (i32, i32) {
    %c0_i32 = arith.constant 0 : i32
    %c0_i32_0 = arith.constant 0 : i32
    %c0_i32_1 = arith.constant 0 : i32
    return %c0_i32, %c0_i32_0 : i32, i32
  }
  func.func @transform_2(%arg0: i32) -> (i32, i32) {
    %c0_i32 = arith.constant 0 : i32
    %c0_i32_0 = arith.constant 0 : i32
    %c0_i32_1 = arith.constant 0 : i32
    return %c0_i32, %c0_i32_0 : i32, i32
  }
  func.func @transform_3(%arg0: i32) -> (i32, i32) {
    %c0_i32 = arith.constant 0 : i32
    %c0_i32_0 = arith.constant 0 : i32
    %c0_i32_1 = arith.constant 0 : i32
    return %c0_i32, %c0_i32_0 : i32, i32
  }
  func.func @transform_4(%arg0: i32) -> (i32, i32) {
    %c0_i32 = arith.constant 0 : i32
    %c0_i32_0 = arith.constant 0 : i32
    %c0_i32_1 = arith.constant 0 : i32
    return %c0_i32, %c0_i32_0 : i32, i32
  }
  func.func @transform_5(%arg0: i32) -> (i32, i32) {
    %c0_i32 = arith.constant 0 : i32
    %c0_i32_0 = arith.constant 0 : i32
    %c0_i32_1 = arith.constant 0 : i32
    return %c0_i32, %c0_i32_0 : i32, i32
  }
  func.func @transform_6(%arg0: i32) -> (i32, i32) {
    %c0_i32 = arith.constant 0 : i32
    %c0_i32_0 = arith.constant 0 : i32
    %c0_i32_1 = arith.constant 0 : i32
    return %c0_i32, %c0_i32_0 : i32, i32
  }
  func.func @transform_7(%arg0: i32) -> (i32, i32) {
    %c0_i32 = arith.constant 0 : i32
    %c0_i32_0 = arith.constant 0 : i32
    %c0_i32_1 = arith.constant 0 : i32
    return %c0_i32, %c0_i32_0 : i32, i32
  }
  func.func @transform_8(%arg0: i32) -> (i32, i32) {
    %c0_i32 = arith.constant 0 : i32
    %c0_i32_0 = arith.constant 0 : i32
    %c0_i32_1 = arith.constant 0 : i32
    return %c0_i32, %c0_i32_0 : i32, i32
  }
  func.func @transform_9(%arg0: i32) -> (i32, i32) {
    %c0_i32 = arith.constant 0 : i32
    %c0_i32_0 = arith.constant 0 : i32
    %c0_i32_1 = arith.constant 0 : i32
    return %c0_i32, %c0_i32_0 : i32, i32
  }
  func.func @transform_10(%arg0: i32) -> (i32, i32) {
    %c0_i32 = arith.constant 0 : i32
    %c0_i32_0 = arith.constant 0 : i32
    %c0_i32_1 = arith.constant 0 : i32
    return %c0_i32, %c0_i32_0 : i32, i32
  }
  func.func @transform_11(%arg0: i32) -> (i32, i32) {
    %c0_i32 = arith.constant 0 : i32
    %c0_i32_0 = arith.constant 0 : i32
    %c0_i32_1 = arith.constant 0 : i32
    return %c0_i32, %c0_i32_0 : i32, i32
  }
  func.func @transform_12(%arg0: i32) -> (i32, i32) {
    %c0_i32 = arith.constant 0 : i32
    %c0_i32_0 = arith.constant 0 : i32
    %c0_i32_1 = arith.constant 0 : i32
    return %c0_i32, %c0_i32_0 : i32, i32
  }
  func.func @transform_13(%arg0: i32) -> (i32, i32) {
    %c0_i32 = arith.constant 0 : i32
    %c0_i32_0 = arith.constant 0 : i32
    %c0_i32_1 = arith.constant 0 : i32
    return %c0_i32, %c0_i32_0 : i32, i32
  }
  func.func @transform_14(%arg0: i32) -> (i32, i32) {
    %c0_i32 = arith.constant 0 : i32
    %c0_i32_0 = arith.constant 0 : i32
    %c0_i32_1 = arith.constant 0 : i32
    return %c0_i32, %c0_i32_0 : i32, i32
  }
  func.func @transform_15(%arg0: i32) -> (i32, i32) {
    %c0_i32 = arith.constant 0 : i32
    %c0_i32_0 = arith.constant 0 : i32
    %c0_i32_1 = arith.constant 0 : i32
    return %c0_i32, %c0_i32_0 : i32, i32
  }
  func.func @transform_16(%arg0: i32) -> (i32, i32) {
    %c0_i32 = arith.constant 0 : i32
    %c0_i32_0 = arith.constant 0 : i32
    %c0_i32_1 = arith.constant 0 : i32
    return %c0_i32, %c0_i32_0 : i32, i32
  }
  func.func @transform_17(%arg0: i32) -> (i32, i32) {
    %c0_i32 = arith.constant 0 : i32
    %c0_i32_0 = arith.constant 0 : i32
    %c0_i32_1 = arith.constant 0 : i32
    return %c0_i32, %c0_i32_0 : i32, i32
  }
  func.func @transform_18(%arg0: i32) -> (i32, i32) {
    %c0_i32 = arith.constant 0 : i32
    %c0_i32_0 = arith.constant 0 : i32
    %c0_i32_1 = arith.constant 0 : i32
    return %c0_i32, %c0_i32_0 : i32, i32
  }
  func.func @transform_19(%arg0: i32) -> (i32, i32) {
    %c0_i32 = arith.constant 0 : i32
    %c0_i32_0 = arith.constant 0 : i32
    %c0_i32_1 = arith.constant 0 : i32
    return %c0_i32, %c0_i32_0 : i32, i32
  }
  func.func @transform_20(%arg0: i32) -> (i32, i32) {
    %c0_i32 = arith.constant 0 : i32
    %c0_i32_0 = arith.constant 0 : i32
    %c0_i32_1 = arith.constant 0 : i32
    return %c0_i32, %c0_i32_0 : i32, i32
  }
  func.func @transform_21(%arg0: i32) -> (i32, i32) {
    %c0_i32 = arith.constant 0 : i32
    %c0_i32_0 = arith.constant 0 : i32
    %c0_i32_1 = arith.constant 0 : i32
    return %c0_i32, %c0_i32_0 : i32, i32
  }
  func.func @transform_22(%arg0: i32) -> (i32, i32) {
    %c0_i32 = arith.constant 0 : i32
    %c0_i32_0 = arith.constant 0 : i32
    %c0_i32_1 = arith.constant 0 : i32
    return %c0_i32, %c0_i32_0 : i32, i32
  }
  func.func @transform_23(%arg0: i32) -> (i32, i32) {
    %c0_i32 = arith.constant 0 : i32
    %c0_i32_0 = arith.constant 0 : i32
    %c0_i32_1 = arith.constant 0 : i32
    return %c0_i32, %c0_i32_0 : i32, i32
  }
  func.func @transform_24(%arg0: i32) -> (i32, i32) {
    %c0_i32 = arith.constant 0 : i32
    %c0_i32_0 = arith.constant 0 : i32
    %c0_i32_1 = arith.constant 0 : i32
    return %c0_i32, %c0_i32_0 : i32, i32
  }
  func.func @transform_25(%arg0: i32) -> (i32, i32) {
    %c0_i32 = arith.constant 0 : i32
    %c0_i32_0 = arith.constant 0 : i32
    %c0_i32_1 = arith.constant 0 : i32
    return %c0_i32, %c0_i32_0 : i32, i32
  }
  func.func @transform_26(%arg0: i32) -> (i32, i32) {
    %c0_i32 = arith.constant 0 : i32
    %c0_i32_0 = arith.constant 0 : i32
    %c0_i32_1 = arith.constant 0 : i32
    return %c0_i32, %c0_i32_0 : i32, i32
  }
  func.func @transform_27(%arg0: i32) -> (i32, i32) {
    %c0_i32 = arith.constant 0 : i32
    %c0_i32_0 = arith.constant 0 : i32
    %c0_i32_1 = arith.constant 0 : i32
    return %c0_i32, %c0_i32_0 : i32, i32
  }
  func.func @transform_28(%arg0: i32) -> (i32, i32) {
    %c0_i32 = arith.constant 0 : i32
    %c0_i32_0 = arith.constant 0 : i32
    %c0_i32_1 = arith.constant 0 : i32
    return %c0_i32, %c0_i32_0 : i32, i32
  }
  func.func @transform_29(%arg0: i32) -> (i32, i32) {
    %c0_i32 = arith.constant 0 : i32
    %c0_i32_0 = arith.constant 0 : i32
    %c0_i32_1 = arith.constant 0 : i32
    return %c0_i32, %c0_i32_0 : i32, i32
  }
  func.func @transform_30(%arg0: i32) -> (i32, i32) {
    %c0_i32 = arith.constant 0 : i32
    %c0_i32_0 = arith.constant 0 : i32
    %c0_i32_1 = arith.constant 0 : i32
    return %c0_i32, %c0_i32_0 : i32, i32
  }
  func.func @transform_31(%arg0: i32) -> (i32, i32) {
    %c0_i32 = arith.constant 0 : i32
    %c0_i32_0 = arith.constant 0 : i32
    %c0_i32_1 = arith.constant 0 : i32
    return %c0_i32, %c0_i32_0 : i32, i32
  }
  func.func @transform_32(%arg0: i32) -> (i32, i32) {
    %c0_i32 = arith.constant 0 : i32
    %c0_i32_0 = arith.constant 0 : i32
    %c0_i32_1 = arith.constant 0 : i32
    return %c0_i32, %c0_i32_0 : i32, i32
  }
  func.func @transform_33(%arg0: i32) -> (i32, i32) {
    %c0_i32 = arith.constant 0 : i32
    %c0_i32_0 = arith.constant 0 : i32
    %c0_i32_1 = arith.constant 0 : i32
    return %c0_i32, %c0_i32_0 : i32, i32
  }
  func.func @transform_34(%arg0: i32) -> (i32, i32) {
    %c0_i32 = arith.constant 0 : i32
    %c0_i32_0 = arith.constant 0 : i32
    %c0_i32_1 = arith.constant 0 : i32
    return %c0_i32, %c0_i32_0 : i32, i32
  }
  func.func @transform_35(%arg0: i32) -> (i32, i32) {
    %c0_i32 = arith.constant 0 : i32
    %c0_i32_0 = arith.constant 0 : i32
    %c0_i32_1 = arith.constant 0 : i32
    return %c0_i32, %c0_i32_0 : i32, i32
  }
  func.func @transform_36(%arg0: i32) -> (i32, i32) {
    %c0_i32 = arith.constant 0 : i32
    %c0_i32_0 = arith.constant 0 : i32
    %c0_i32_1 = arith.constant 0 : i32
    return %c0_i32, %c0_i32_0 : i32, i32
  }
  func.func @transform_37(%arg0: i32) -> (i32, i32) {
    %c0_i32 = arith.constant 0 : i32
    %c0_i32_0 = arith.constant 0 : i32
    %c0_i32_1 = arith.constant 0 : i32
    return %c0_i32, %c0_i32_0 : i32, i32
  }
  func.func @transform_38(%arg0: i32) -> (i32, i32) {
    %c0_i32 = arith.constant 0 : i32
    %c0_i32_0 = arith.constant 0 : i32
    %c0_i32_1 = arith.constant 0 : i32
    return %c0_i32, %c0_i32_0 : i32, i32
  }
  func.func @transform_39(%arg0: i32) -> (i32, i32) {
    %c0_i32 = arith.constant 0 : i32
    %c0_i32_0 = arith.constant 0 : i32
    %c0_i32_1 = arith.constant 0 : i32
    return %c0_i32, %c0_i32_0 : i32, i32
  }
  func.func @transform_40(%arg0: i32) -> (i32, i32) {
    %c0_i32 = arith.constant 0 : i32
    %c0_i32_0 = arith.constant 0 : i32
    %c0_i32_1 = arith.constant 0 : i32
    return %c0_i32, %c0_i32_0 : i32, i32
  }
  func.func @transform_41(%arg0: i32) -> (i32, i32) {
    %c0_i32 = arith.constant 0 : i32
    %c0_i32_0 = arith.constant 0 : i32
    %c0_i32_1 = arith.constant 0 : i32
    return %c0_i32, %c0_i32_0 : i32, i32
  }
  func.func @transform_42(%arg0: i32) -> (i32, i32) {
    %c0_i32 = arith.constant 0 : i32
    %c0_i32_0 = arith.constant 0 : i32
    %c0_i32_1 = arith.constant 0 : i32
    return %c0_i32, %c0_i32_0 : i32, i32
  }
  func.func @transform_43(%arg0: i32) -> (i32, i32) {
    %c0_i32 = arith.constant 0 : i32
    %c0_i32_0 = arith.constant 0 : i32
    %c0_i32_1 = arith.constant 0 : i32
    return %c0_i32, %c0_i32_0 : i32, i32
  }
  func.func @transform_44(%arg0: i32) -> (i32, i32) {
    %c0_i32 = arith.constant 0 : i32
    %c0_i32_0 = arith.constant 0 : i32
    %c0_i32_1 = arith.constant 0 : i32
    return %c0_i32, %c0_i32_0 : i32, i32
  }
  func.func @transform_45(%arg0: i32) -> (i32, i32) {
    %c0_i32 = arith.constant 0 : i32
    %c0_i32_0 = arith.constant 0 : i32
    %c0_i32_1 = arith.constant 0 : i32
    return %c0_i32, %c0_i32_0 : i32, i32
  }
  func.func @transform_46(%arg0: i32) -> (i32, i32) {
    %c0_i32 = arith.constant 0 : i32
    %c0_i32_0 = arith.constant 0 : i32
    %c0_i32_1 = arith.constant 0 : i32
    return %c0_i32, %c0_i32_0 : i32, i32
  }
  func.func @transform_47(%arg0: i32) -> (i32, i32) {
    %c0_i32 = arith.constant 0 : i32
    %c0_i32_0 = arith.constant 0 : i32
    %c0_i32_1 = arith.constant 0 : i32
    return %c0_i32, %c0_i32_0 : i32, i32
  }
  func.func @transform_48(%arg0: i32) -> (i32, i32) {
    %c0_i32 = arith.constant 0 : i32
    %c0_i32_0 = arith.constant 0 : i32
    %c0_i32_1 = arith.constant 0 : i32
    return %c0_i32, %c0_i32_0 : i32, i32
  }
  func.func @transform_49(%arg0: i32) -> (i32, i32) {
    %c0_i32 = arith.constant 0 : i32
    %c0_i32_0 = arith.constant 0 : i32
    %c0_i32_1 = arith.constant 0 : i32
    return %c0_i32, %c0_i32_0 : i32, i32
  }
  func.func @transform_50(%arg0: i32) -> (i32, i32) {
    %c0_i32 = arith.constant 0 : i32
    %c0_i32_0 = arith.constant 0 : i32
    %c0_i32_1 = arith.constant 0 : i32
    return %c0_i32, %c0_i32_0 : i32, i32
  }
  func.func @transform_51(%arg0: i32) -> (i32, i32) {
    %c0_i32 = arith.constant 0 : i32
    %c0_i32_0 = arith.constant 0 : i32
    %c0_i32_1 = arith.constant 0 : i32
    return %c0_i32, %c0_i32_0 : i32, i32
  }
  func.func @transform_52(%arg0: i32) -> (i32, i32) {
    %c0_i32 = arith.constant 0 : i32
    %c0_i32_0 = arith.constant 0 : i32
    %c0_i32_1 = arith.constant 0 : i32
    return %c0_i32, %c0_i32_0 : i32, i32
  }
  func.func @transform_53(%arg0: i32) -> (i32, i32) {
    %c0_i32 = arith.constant 0 : i32
    %c0_i32_0 = arith.constant 0 : i32
    %c0_i32_1 = arith.constant 0 : i32
    return %c0_i32, %c0_i32_0 : i32, i32
  }
  func.func @transform_54(%arg0: i32) -> (i32, i32) {
    %c0_i32 = arith.constant 0 : i32
    %c0_i32_0 = arith.constant 0 : i32
    %c0_i32_1 = arith.constant 0 : i32
    return %c0_i32, %c0_i32_0 : i32, i32
  }
  func.func @transform_55(%arg0: i32) -> (i32, i32) {
    %c0_i32 = arith.constant 0 : i32
    %c0_i32_0 = arith.constant 0 : i32
    %c0_i32_1 = arith.constant 0 : i32
    return %c0_i32, %c0_i32_0 : i32, i32
  }
  func.func @transform_56(%arg0: i32) -> (i32, i32) {
    %c0_i32 = arith.constant 0 : i32
    %c0_i32_0 = arith.constant 0 : i32
    %c0_i32_1 = arith.constant 0 : i32
    return %c0_i32, %c0_i32_0 : i32, i32
  }
  func.func @transform_57(%arg0: i32) -> (i32, i32, i32) {
    %c0_i32 = arith.constant 0 : i32
    %c0_i32_0 = arith.constant 0 : i32
    %c0_i32_1 = arith.constant 0 : i32
    %c0_i32_2 = arith.constant 0 : i32
    return %c0_i32, %c0_i32_0, %c0_i32_1 : i32, i32, i32
  }
  func.func @transform_58(%arg0: i32) -> (i32, i32) {
    %c0_i32 = arith.constant 0 : i32
    %c0_i32_0 = arith.constant 0 : i32
    %c0_i32_1 = arith.constant 0 : i32
    return %c0_i32, %c0_i32_0 : i32, i32
  }
}

</mosaic_0001>

<bundles_post_ra>
// kernel: _forward_impl.1
= control target key start
LH: loop header
LB: loop body
LE: loop exit
PB: predicated region body
PF: predicated region fallthrough
CT: control target
= control target key end

     0   :  { %s16279_s6 = smov 1   ;;  %s16280_s10 = smov 2   ;;  %s18344_s0 = inlined_call_operand.smem [shape: u32[59], index: -1, kind: input, shape index: {}] }
   0x1   :  { %s16422_s5 = sld [smem:[%s18344_s0]]   ;;  %s16281_s14 = smov 3  }
   0x2   :  { %s16427_s9 = sld [smem:[%s18344_s0 + %s16279_s6]]   ;;  %s16282_s18 = smov 4  }
   0x3   :  { %s16432_s13 = sld [smem:[%s18344_s0 + %s16280_s10]]   ;;  %s16283_s22 = smov 5  }
   0x4   :  { %s16437_s17 = sld [smem:[%s18344_s0 + %s16281_s14]]   ;;  %s16284_s26 = smov 6  }
   0x5   :  { %s16442_s21 = sld [smem:[%s18344_s0 + %s16282_s18]]   ;;  %s16285_s30 = smov 7  }
   0x6   :  { %s16447_s25 = sld [smem:[%s18344_s0 + %s16283_s22]]   ;;  %s16286_s4 = smov 8  }
   0x7   :  { %18396 = sst [smem:[#allocation89_spill]] %s16422_s5  ;;  %s16287_s10 = smov 9  }
   0x8   :  { %s16452_s29 = sld [smem:[%s18344_s0 + %s16284_s26]]   ;;  %s16288_s15 = smov 10  }
   0x9   :  { %18397 = sst [smem:[#allocation90_spill]] %s16432_s13  ;;  %s16289_s20 = smov 11  }
   0xa   :  { %18398 = sst [smem:[#allocation91_spill]] %s16437_s17  ;;  %s16290_s26 = smov 12  }
   0xb   :  { %18399 = sst [smem:[#allocation92_spill]] %s16442_s21  ;;  %s16291_s1 = smov 13  }
   0xc   :  { %18400 = sst [smem:[#allocation93_spill]] %s16447_s25  ;;  %s16292_s7 = smov 14  }
   0xd   :  { %s16457_s3 = sld [smem:[%s18344_s0 + %s16285_s30]]   ;;  %s16294_s22 = smov 16  }
   0xe   :  { %s16462_s8 = sld [smem:[%s18344_s0 + %s16286_s4]]   ;;  %s16295_s28 = smov 17  }
   0xf   :  { %s16467_s14 = sld [smem:[%s18344_s0 + %s16287_s10]]  }
  0x10   :  { %s16472_s19 = sld [smem:[%s18344_s0 + %s16288_s15]]   ;;  %s16293_s15 = smov 15  }
  0x11   :  { %s16477_s24 = sld [smem:[%s18344_s0 + %s16289_s20]]  }
  0x12   :  { %s16482_s30 = sld [smem:[%s18344_s0 + %s16290_s26]]  }
  0x13   :  { %18401 = sst [smem:[#allocation94_spill]] %s16457_s3 }
  0x14   :  { %s16487_s6 = sld [smem:[%s18344_s0 + %s16291_s1]]  }
  0x15   :  { %18402 = sst [smem:[#allocation95_spill]] %s16467_s14 }
  0x16   :  { %18403 = sst [smem:[#allocation96_spill]] %s16472_s19 }
  0x17   :  { %18404 = sst [smem:[#allocation97_spill]] %s16477_s24 }
  0x18   :  { %s16492_s12 = sld [smem:[%s18344_s0 + %s16292_s7]]   ;;  %s16296_s7 = smov 18  }
  0x19   :  { %s16497_s20 = sld [smem:[%s18344_s0 + %s16293_s15]]   ;;  %s16297_s15 = smov 19  }
  0x1a   :  { %18405 = sst [smem:[#allocation98_spill]] %s16487_s6 }
  0x1b   :  { %s16502_s27 = sld [smem:[%s18344_s0 + %s16294_s22]]   ;;  %s16298_s22 = smov 20  }
  0x1c   :  { %s16507_s4 = sld [smem:[%s18344_s0 + %s16295_s28]]   ;;  %s16299_s28 = smov 21  }
  0x1d   :  { %s16512_s6 = sld [smem:[%s18344_s0 + %s16296_s7]]   ;;  %s16300_s7 = smov 22  }
  0x1e   :  { %18406 = sst [smem:[#allocation99_spill]] %s16492_s12 }
  0x1f   :  { %18407 = sst [smem:[#allocation100_spill]] %s16497_s20 }
  0x20   :  { %s16517_s20 = sld [smem:[%s18344_s0 + %s16297_s15]]   ;;  %s16301_s15 = smov 23  }
  0x21   :  { %s16522_s17 = sld [smem:[%s18344_s0 + %s16298_s22]]   ;;  %s16302_s22 = smov 24  }
  0x22   :  { %18408 = sst [smem:[#allocation101_spill]] %s16507_s4 }
  0x23   :  { %18409 = sst [smem:[#allocation102_spill]] %s16512_s6 }
  0x24   :  { %s16527_s4 = sld [smem:[%s18344_s0 + %s16299_s28]]   ;;  %s16303_s28 = smov 25  }
  0x25   :  { %s16532_s25 = sld [smem:[%s18344_s0 + %s16300_s7]]   ;;  %s16304_s7 = smov 26  }
  0x26   :  { %18410 = sst [smem:[#allocation103_spill]] %s16517_s20 }
  0x27   :  { %s16537_s20 = sld [smem:[%s18344_s0 + %s16301_s15]]   ;;  %s16305_s15 = smov 27  }
  0x28   :  { %s16542_s13 = sld [smem:[%s18344_s0 + %s16302_s22]]   ;;  %s16306_s22 = smov 28  }
  0x29   :  { %s16552_s24 = sld [smem:[%s18344_s0 + %s16304_s7]]   ;;  %s16308_s7 = smov 30  }
  0x2a   :  { %18411 = sst [smem:[#allocation104_spill]] %s16527_s4 }
  0x2b   :  { %18412 = sst [smem:[#allocation105_spill]] %s16532_s25 }
  0x2c   :  { %s16547_s4 = sld [smem:[%s18344_s0 + %s16303_s28]]   ;;  %s16307_s28 = smov 29  }
  0x2d   :  { %s16557_s19 = sld [smem:[%s18344_s0 + %s16305_s15]]   ;;  %s16309_s15 = smov 31  }
  0x2e   :  { %18413 = sst [smem:[#allocation106_spill]] %s16542_s13 }
  0x2f   :  { %18414 = sst [smem:[#allocation107_spill]] %s16552_s24 }
  0x30   :  { %s16562_s13 = sld [smem:[%s18344_s0 + %s16306_s22]]   ;;  %s16310_s22 = smov 32  }
  0x31   :  { %s16567_s25 = sld [smem:[%s18344_s0 + %s16307_s28]]   ;;  %s16311_s28 = smov 33  }
  0x32   :  { %s16572_s24 = sld [smem:[%s18344_s0 + %s16308_s7]]   ;;  %s16312_s7 = smov 34  }
  0x33   :  { %s16577_s6 = sld [smem:[%s18344_s0 + %s16309_s15]]   ;;  %s16313_s15 = smov 35  }
  0x34   :  { %s16587_s12 = sld [smem:[%s18344_s0 + %s16311_s28]]   ;;  %s16315_s28 = smov 37  }
  0x35   :  { %s16597_s14 = sld [smem:[%s18344_s0 + %s16313_s15]]   ;;  %s16317_s15 = smov 39  }
  0x36   :  { %18415 = sst [smem:[#allocation108_spill]] %s16562_s13 }
  0x37   :  { %s16582_s13 = sld [smem:[%s18344_s0 + %s16310_s22]]   ;;  %s16314_s22 = smov 36  }
  0x38   :  { %18416 = sst [smem:[#allocation109_spill]] %s16572_s24 }
  0x39   :  { %s16592_s24 = sld [smem:[%s18344_s0 + %s16312_s7]]   ;;  %s16316_s7 = smov 38  }
  0x3a   :  { %s16607_s3 = sld [smem:[%s18344_s0 + %s16315_s28]]   ;;  %s16319_s28 = smov 41  }
  0x3b   :  { %s16617_s21 = sld [smem:[%s18344_s0 + %s16317_s15]]   ;;  %s16321_s15 = smov 43  }
  0x3c   :  { %s16627_s5 = sld [smem:[%s18344_s0 + %s16319_s28]]   ;;  %s16323_s28 = smov 45  }
  0x3d   :  { %18417 = sst [smem:[#allocation110_spill]] %s16582_s13 }
  0x3e   :  { %s16602_s13 = sld [smem:[%s18344_s0 + %s16314_s22]]   ;;  %s16318_s22 = smov 40  }
  0x3f   :  { %18418 = sst [smem:[#allocation111_spill]] %s16592_s24 }
  0x40   :  { %s16612_s24 = sld [smem:[%s18344_s0 + %s16316_s7]]   ;;  %s16320_s7 = smov 42  }
  0x41   :  { %18421 = sst [smem:[#allocation114_spill]] %s16617_s21 }
  0x42   :  { %18423 = sst [smem:[#allocation116_spill]] %s16627_s5 }
  0x43   :  { %s16637_s21 = sld [smem:[%s18344_s0 + %s16321_s15]]   ;;  %s16325_s15 = smov 47  }
  0x44   :  { %18419 = sst [smem:[#allocation112_spill]] %s16602_s13 }
  0x45   :  { %s16622_s13 = sld [smem:[%s18344_s0 + %s16318_s22]]   ;;  %s16322_s22 = smov 44  }
  0x46   :  { %18420 = sst [smem:[#allocation113_spill]] %s16612_s24 }
  0x47   :  { %s16632_s24 = sld [smem:[%s18344_s0 + %s16320_s7]]   ;;  %s16324_s7 = smov 46  }
  0x48   :  { %s16647_s5 = sld [smem:[%s18344_s0 + %s16323_s28]]   ;;  %s16327_s28 = smov 49  }
  0x49   :  { %18425 = sst [smem:[#allocation118_spill]] %s16637_s21 }
  0x4a   :  { %s16657_s21 = sld [smem:[%s18344_s0 + %s16325_s15]]   ;;  %s16329_s15 = smov 51  }
  0x4b   :  { %18422 = sst [smem:[#allocation115_spill]] %s16622_s13 }
  0x4c   :  { %s16642_s13 = sld [smem:[%s18344_s0 + %s16322_s22]]   ;;  %s16326_s22 = smov 48  }
  0x4d   :  { %18424 = sst [smem:[#allocation117_spill]] %s16632_s24 }
  0x4e   :  { %18427 = sst [smem:[#allocation120_spill]] %s16647_s5 }
  0x4f   :  { %s16652_s24 = sld [smem:[%s18344_s0 + %s16324_s7]]   ;;  %s16328_s7 = smov 50  }
  0x50   :  { %18429 = sst [smem:[#allocation122_spill]] %s16657_s21 }
  0x51   :  { %s16667_s5 = sld [smem:[%s18344_s0 + %s16327_s28]]   ;;  %s16331_s28 = smov 53  }
  0x52   :  { %18426 = sst [smem:[#allocation119_spill]] %s16642_s13 }
  0x53   :  { %s16662_s13 = sld [smem:[%s18344_s0 + %s16326_s22]]   ;;  %s16330_s22 = smov 52  }
  0x54   :  { %s16677_s21 = sld [smem:[%s18344_s0 + %s16329_s15]]   ;;  %s16333_s15 = smov 55  }
  0x55   :  { %18428 = sst [smem:[#allocation121_spill]] %s16652_s24 }
  0x56   :  { %s16672_s24 = sld [smem:[%s18344_s0 + %s16328_s7]]   ;;  %s16332_s7 = smov 54  }
  0x57   :  { %18431 = sst [smem:[#allocation124_spill]] %s16667_s5 }
  0x58   :  { %s16687_s5 = sld [smem:[%s18344_s0 + %s16331_s28]]   ;;  %s16335_s28 = smov 57  }
  0x59   :  { %18430 = sst [smem:[#allocation123_spill]] %s16662_s13 }
  0x5a   :  { %18433 = sst [smem:[#allocation126_spill]] %s16677_s21 }
  0x5b   :  { %s16682_s13 = sld [smem:[%s18344_s0 + %s16330_s22]]   ;;  %s16334_s22 = smov 56  }
  0x5c   :  { %18432 = sst [smem:[#allocation125_spill]] %s16672_s24 }
  0x5d   :  { %s16692_s24 = sld [smem:[%s18344_s0 + %s16332_s7]]   ;;  %s16336_s7 = smov 58  }
  0x5e   :  { %18435 = sst [smem:[#allocation128_spill]] %s16687_s5 }
  0x5f   :  { %s16697_s21 = sld [smem:[%s18344_s0 + %s16333_s15]]  }
  0x60   :  { %s16707_s5 = sld [smem:[%s18344_s0 + %s16335_s28]]  }
  0x61   :  { %18434 = sst [smem:[#allocation127_spill]] %s16682_s13 }
  0x62   :  { %s16702_s13 = sld [smem:[%s18344_s0 + %s16334_s22]]  }
  0x63   :  { %18436 = sst [smem:[#allocation129_spill]] %s16692_s24 }
  0x64   :  { %s16712_s24 = sld [smem:[%s18344_s0 + %s16336_s7]]  }
  0x65   :  { %123 = vsyncpa [#allocation3], 0 }
  0x66   :  { %124 = vsyncpa [#allocation5], 0 }
  0x67   :  { %125 = vsyncpa [#allocation8], 0 }
  0x68   :  { %126 = vsyncpa [#allocation11], 0 }
  0x69   :  { %127 = vsyncpa [#allocation14], 0 }
  0x6a   :  { %128 = vsyncpa [#allocation17], 0 }
  0x6b   :  { %129 = vsyncpa [#allocation20], 0 }
  0x6c   :  { %130 = vsyncpa [#allocation23], 0 }
  0x6d   :  { %131 = vsyncpa [#allocation26], 0 }
  0x6e   :  { %132 = vsyncpa [#allocation29], 0 }
  0x6f   :  { %133 = vsyncpa [#allocation32], 0 }
  0x70   :  { %134 = vsyncpa [#allocation35], 0 }
  0x71   :  { %135 = vsyncpa [#allocation38], 0 }
  0x72   :  { %136 = vsyncpa [#allocation41], 0 }
  0x73   :  { %137 = vsyncpa [#allocation44], 0 }
  0x74   :  { %138 = vsyncpa [#allocation47], 0 }
  0x75   :  { %139 = vsyncpa [#allocation50], 0 }
  0x76   :  { %140 = vsyncpa [#allocation53], 0 }
  0x77   :  { %141 = vsyncpa [#allocation56], 0 }
  0x78   :  { %142 = vsyncpa [#allocation59], 0 }
  0x79   :  { %143 = vsyncpa [#allocation62], 0 }
  0x7a   :  { %144 = vsyncpa [#allocation65], 0  ;;  %s16337_s0 = smov [#allocation4]   ;;  %s16338_s16 = smov [#allocation7]  }
  0x7b   :  { %s162_s15 = sshll.u32 %s16337_s0, 4  ;;  %s192_s18 = sshll.u32 %s16338_s16, 4  ;;  %s163_s15 = int_to_ptr.vmem [resolvable:$true] %s162_s15  ;;  %s193_s18 = int_to_ptr.vmem [resolvable:$true] %s192_s18 }
  0x7c   :  { %s15383_s22 = scalar_lea.vmem %s163_s15, 256  ;;  %p15388_p1 = scmp.lt.s32.totalorder %s163_s15, %s163_s15 }
  0x7d   :  { %p15384_p0 = scmp.ne.s32.totalorder %s163_s15, %s15383_s22  ;;  %p15389_p2 = scmp.lt.s32.totalorder %s15383_s22, %s15383_s22 }
  0x7f   :  { %p15390_p3 = por %p15389_p2, %p15388_p1 }
  0x81   :  { %p15391_p4 = pnand %p15390_p3, %p15384_p0 }
  0x83   :  { %15394 = shalt.err (!%p15391_p4)
}
  0x84   :  { %s16339_s23 = smov 128   ;;  %s18357_s26 = smov 8  }
  0x85   :  { %168 = dma.hbm_to_vmem [thread:$0]  %s16427_s9, 256, %s163_s15, [#allocation5], %s16339_s23, %s16339_s23, %s18357_s26  }
  0x86   :  { %s15403_s28 = scalar_lea.vmem %s193_s18, 256  ;;  %p15408_p6 = scmp.lt.s32.totalorder %s193_s18, %s193_s18 }
  0x87   :  { %p15404_p5 = scmp.ne.s32.totalorder %s193_s18, %s15403_s28  ;;  %p15409_p7 = scmp.lt.s32.totalorder %s15403_s28, %s15403_s28 }
  0x89   :  { %p15410_p8 = por %p15409_p7, %p15408_p6 }
  0x8b   :  { %p15411_p9 = pnand %p15410_p8, %p15404_p5 }
  0x8d   :  { %15414 = shalt.err (!%p15411_p9)
}
  0x8e   :  { %198 = dma.hbm_to_vmem [thread:$0]  %s16452_s29, 256, %s193_s18, [#allocation8], %s16339_s23, %s16339_s23, %s18357_s26  }
  0x8f   :  { %s16341_s1 = smov [#allocation10]   ;;  %s16342_s7 = smov [#allocation13]  }
  0x90   :  { %s214_s2 = sshll.u32 %s16341_s1, 4  ;;  %s241_s10 = sshll.u32 %s16342_s7, 4  ;;  %s215_s2 = int_to_ptr.vmem [resolvable:$true] %s214_s2  ;;  %s242_s10 = int_to_ptr.vmem [resolvable:$true] %s241_s10 }
  0x91   :  { %s15423_s11 = scalar_lea.vmem %s215_s2, 256  ;;  %p15428_p11 = scmp.lt.s32.totalorder %s215_s2, %s215_s2 }
  0x92   :  { %p15424_p10 = scmp.ne.s32.totalorder %s215_s2, %s15423_s11  ;;  %p15429_p12 = scmp.lt.s32.totalorder %s15423_s11, %s15423_s11 }
  0x94   :  { %p15430_p13 = por %p15429_p12, %p15428_p11 }
  0x96   :  { %p15431_p0 = pnand %p15430_p13, %p15424_p10 }
  0x98   :  { %15434 = shalt.err (!%p15431_p0)
}
  0x99   :  { %220 = dma.hbm_to_vmem [thread:$0]  %s16462_s8, 256, %s215_s2, [#allocation11], %s16339_s23, %s16339_s23, %s18357_s26  }
  0x9a   :  { %s15443_s9 = scalar_lea.vmem %s242_s10, 16  ;;  %s15447_s29 = scalar_lea.vmem %s242_s10, 32 }
  0x9b   :  { %p15444_p1 = scmp.ne.s32.totalorder %s242_s10, %s15443_s9  ;;  %p15448_p2 = scmp.lt.s32.totalorder %s242_s10, %s242_s10 }
  0x9c   :  { %p15449_p3 = scmp.lt.s32.totalorder %s15447_s29, %s15443_s9 }
  0x9e   :  { %p15450_p4 = por %p15449_p3, %p15448_p2 }
  0xa0   :  { %p15451_p5 = pnand %p15450_p4, %p15444_p1 }
  0xa2   :  { %15454 = shalt.err (!%p15451_p5)
}
  0xa3   :  { %244 = dma.hbm_to_vmem [thread:$0]  %s16482_s30, 16, %s242_s10, [#allocation14]  }
  0xa4   :  { %s16343_s0 = smov [#allocation16]   ;;  %s16344_s16 = smov [#allocation19]  }
  0xa5   :  { %s265_s15 = sshll.u32 %s16343_s0, 4  ;;  %s289_s18 = sshll.u32 %s16344_s16, 4  ;;  %s266_s15 = int_to_ptr.vmem [resolvable:$true] %s265_s15  ;;  %s290_s18 = int_to_ptr.vmem [resolvable:$true] %s289_s18 }
  0xa6   :  { %s15463_s22 = scalar_lea.vmem %s266_s15, 16  ;;  %s15467_s28 = scalar_lea.vmem %s266_s15, 32 }
  0xa7   :  { %p15464_p6 = scmp.ne.s32.totalorder %s266_s15, %s15463_s22  ;;  %p15468_p7 = scmp.lt.s32.totalorder %s266_s15, %s266_s15 }
  0xa8   :  { %p15469_p8 = scmp.lt.s32.totalorder %s15467_s28, %s15463_s22 }
  0xaa   :  { %p15470_p9 = por %p15469_p8, %p15468_p7 }
  0xac   :  { %p15471_p10 = pnand %p15470_p9, %p15464_p6 }
  0xae   :  { %15474 = shalt.err (!%p15471_p10)
}
  0xaf   :  { %268 = dma.hbm_to_vmem [thread:$0]  %s16502_s27, 16, %s266_s15, [#allocation17]  }
  0xb0   :  { %s15483_s8 = scalar_lea.vmem %s290_s18, 16  ;;  %s15487_s1 = scalar_lea.vmem %s290_s18, 32 }
  0xb1   :  { %p15484_p11 = scmp.ne.s32.totalorder %s290_s18, %s15483_s8  ;;  %p15488_p12 = scmp.lt.s32.totalorder %s290_s18, %s290_s18 }
  0xb2   :  { %p15489_p13 = scmp.lt.s32.totalorder %s15487_s1, %s15483_s8 }
  0xb4   :  { %p15490_p0 = por %p15489_p13, %p15488_p12 }
  0xb6   :  { %p15491_p1 = pnand %p15490_p0, %p15484_p11 }
  0xb8   :  { %15494 = shalt.err (!%p15491_p1)
}
  0xb9   :  { %292 = dma.hbm_to_vmem [thread:$0]  %s16522_s17, 16, %s290_s18, [#allocation20]  }
  0xba   :  { %s16345_s30 = smov [#allocation22]   ;;  %s16346_s7 = smov [#allocation25]  }
  0xbb   :  { %s311_s2 = sshll.u32 %s16345_s30, 4  ;;  %s330_s10 = sshll.u32 %s16346_s7, 4  ;;  %s312_s2 = int_to_ptr.vmem [resolvable:$true] %s311_s2  ;;  %s331_s10 = int_to_ptr.vmem [resolvable:$true] %s330_s10 }
  0xbc   :  { %s15503_s11 = scalar_lea.vmem %s312_s2, 16  ;;  %s15507_s9 = scalar_lea.vmem %s312_s2, 32 }
  0xbd   :  { %p15504_p2 = scmp.ne.s32.totalorder %s312_s2, %s15503_s11  ;;  %p15508_p3 = scmp.lt.s32.totalorder %s312_s2, %s312_s2 }
  0xbe   :  { %p15509_p4 = scmp.lt.s32.totalorder %s15507_s9, %s15503_s11 }
  0xc0   :  { %p15510_p5 = por %p15509_p4, %p15508_p3 }
  0xc2   :  { %p15511_p6 = pnand %p15510_p5, %p15504_p2 }
  0xc4   :  { %15514 = shalt.err (!%p15511_p6)
}
  0xc5   :  { %314 = dma.hbm_to_vmem [thread:$0]  %s16537_s20, 16, %s312_s2, [#allocation23]  }
  0xc6   :  { %s15523_s27 = scalar_lea.vmem %s331_s10, 512  ;;  %p15528_p8 = scmp.lt.s32.totalorder %s331_s10, %s331_s10 }
  0xc7   :  { %p15524_p7 = scmp.ne.s32.totalorder %s331_s10, %s15523_s27  ;;  %p15529_p9 = scmp.lt.s32.totalorder %s15523_s27, %s15523_s27 }
  0xc9   :  { %p15530_p10 = por %p15529_p9, %p15528_p8 }
  0xcb   :  { %p15531_p11 = pnand %p15530_p10, %p15524_p7 }
  0xcd   :  { %15534 = shalt.err (!%p15531_p11)
}
  0xce   :  { %336 = dma.hbm_to_vmem [thread:$0]  %s16547_s4, 512, %s331_s10, [#allocation26], %s16339_s23, %s16339_s23, %s18357_s26  }
  0xcf   :  { %s16347_s17 = smov [#allocation28]   ;;  %s16348_s0 = smov [#allocation31]  }
  0xd0   :  { %s352_s29 = sshll.u32 %s16347_s17, 4  ;;  %s375_s15 = sshll.u32 %s16348_s0, 4  ;;  %s353_s29 = int_to_ptr.vmem [resolvable:$true] %s352_s29  ;;  %s376_s15 = int_to_ptr.vmem [resolvable:$true] %s375_s15 }
  0xd1   :  { %s15543_s16 = scalar_lea.vmem %s353_s29, 512  ;;  %p15548_p13 = scmp.lt.s32.totalorder %s353_s29, %s353_s29 }
  0xd2   :  { %p15544_p12 = scmp.ne.s32.totalorder %s353_s29, %s15543_s16  ;;  %p15549_p0 = scmp.lt.s32.totalorder %s15543_s16, %s15543_s16 }
  0xd4   :  { %p15550_p1 = por %p15549_p0, %p15548_p13 }
  0xd6   :  { %p15551_p2 = pnand %p15550_p1, %p15544_p12 }
  0xd8   :  { %15554 = shalt.err (!%p15551_p2)
}
  0xd9   :  { %358 = dma.hbm_to_vmem [thread:$0]  %s16557_s19, 512, %s353_s29, [#allocation29], %s16339_s23, %s16339_s23, %s18357_s26  }
  0xda   :  { %s15563_s20 = scalar_lea.vmem %s376_s15, 16  ;;  %s15567_s4 = scalar_lea.vmem %s376_s15, 32 }
  0xdb   :  { %p15564_p3 = scmp.ne.s32.totalorder %s376_s15, %s15563_s20  ;;  %p15568_p4 = scmp.lt.s32.totalorder %s376_s15, %s376_s15 }
  0xdc   :  { %p15569_p5 = scmp.lt.s32.totalorder %s15567_s4, %s15563_s20 }
  0xde   :  { %p15570_p6 = por %p15569_p5, %p15568_p4 }
  0xe0   :  { %p15571_p7 = pnand %p15570_p6, %p15564_p3 }
  0xe2   :  { %15574 = shalt.err (!%p15571_p7)
}
  0xe3   :  { %378 = dma.hbm_to_vmem [thread:$0]  %s16567_s25, 16, %s376_s15, [#allocation32]  }
  0xe4   :  { %s16349_s18 = smov [#allocation34]   ;;  %s16350_s28 = smov [#allocation37]  }
  0xe5   :  { %s394_s22 = sshll.u32 %s16349_s18, 4  ;;  %s416_s8 = sshll.u32 %s16350_s28, 4  ;;  %s395_s22 = int_to_ptr.vmem [resolvable:$true] %s394_s22  ;;  %s417_s8 = int_to_ptr.vmem [resolvable:$true] %s416_s8 }
  0xe6   :  { %s15583_s1 = scalar_lea.vmem %s395_s22, 512  ;;  %p15588_p9 = scmp.lt.s32.totalorder %s395_s22, %s395_s22 }
  0xe7   :  { %p15584_p8 = scmp.ne.s32.totalorder %s395_s22, %s15583_s1  ;;  %p15589_p10 = scmp.lt.s32.totalorder %s15583_s1, %s15583_s1 }
  0xe9   :  { %p15590_p11 = por %p15589_p10, %p15588_p9 }
  0xeb   :  { %p15591_p12 = pnand %p15590_p11, %p15584_p8 }
  0xed   :  { %15594 = shalt.err (!%p15591_p12)
}
  0xee   :  { %400 = dma.hbm_to_vmem [thread:$0]  %s16577_s6, 512, %s395_s22, [#allocation35], %s16339_s23, %s16339_s23, %s18357_s26  }
  0xef   :  { %s15603_s19 = scalar_lea.vmem %s417_s8, 512  ;;  %p15608_p0 = scmp.lt.s32.totalorder %s417_s8, %s417_s8 }
  0xf0   :  { %p15604_p13 = scmp.ne.s32.totalorder %s417_s8, %s15603_s19  ;;  %p15609_p1 = scmp.lt.s32.totalorder %s15603_s19, %s15603_s19 }
  0xf2   :  { %p15610_p2 = por %p15609_p1, %p15608_p0 }
  0xf4   :  { %p15611_p3 = pnand %p15610_p2, %p15604_p13 }
  0xf6   :  { %15614 = shalt.err (!%p15611_p3)
}
  0xf7   :  { %422 = dma.hbm_to_vmem [thread:$0]  %s16587_s12, 512, %s417_s8, [#allocation38], %s16339_s23, %s16339_s23, %s18357_s26  }
  0xf8   :  { %s16351_s25 = smov [#allocation40]   ;;  %s16352_s2 = smov [#allocation43]  }
  0xf9   :  { %s439_s30 = sshll.u32 %s16351_s25, 4  ;;  %s458_s7 = sshll.u32 %s16352_s2, 4  ;;  %s440_s30 = int_to_ptr.vmem [resolvable:$true] %s439_s30  ;;  %s459_s7 = int_to_ptr.vmem [resolvable:$true] %s458_s7 }
  0xfa   :  { %s15623_s10 = scalar_lea.vmem %s440_s30, 16  ;;  %s15627_s6 = scalar_lea.vmem %s440_s30, 32 }
  0xfb   :  { %p15624_p4 = scmp.ne.s32.totalorder %s440_s30, %s15623_s10  ;;  %p15628_p5 = scmp.lt.s32.totalorder %s440_s30, %s440_s30 }
  0xfc   :  { %p15629_p6 = scmp.lt.s32.totalorder %s15627_s6, %s15623_s10 }
  0xfe   :  { %p15630_p7 = por %p15629_p6, %p15628_p5 }
 0x100   :  { %p15631_p8 = pnand %p15630_p7, %p15624_p4 }
 0x102   :  { %15634 = shalt.err (!%p15631_p8)
}
 0x103   :  { %442 = dma.hbm_to_vmem [thread:$0]  %s16597_s14, 16, %s440_s30, [#allocation41]  }
 0x104   :  { %s15643_s11 = scalar_lea.vmem %s459_s7, 512  ;;  %p15648_p10 = scmp.lt.s32.totalorder %s459_s7, %s459_s7 }
 0x105   :  { %p15644_p9 = scmp.ne.s32.totalorder %s459_s7, %s15643_s11  ;;  %p15649_p11 = scmp.lt.s32.totalorder %s15643_s11, %s15643_s11 }
 0x107   :  { %p15650_p12 = por %p15649_p11, %p15648_p10 }
 0x109   :  { %p15651_p13 = pnand %p15650_p12, %p15644_p9 }
 0x10b   :  { %15654 = shalt.err (!%p15651_p13)
}
 0x10c   :  { %464 = dma.hbm_to_vmem [thread:$0]  %s16607_s3, 512, %s459_s7, [#allocation44], %s16339_s23, %s16339_s23, %s18357_s26  }
 0x10d   :  { %s16353_s12 = smov [#allocation46]   ;;  %s16354_s27 = smov [#allocation49]  }
 0x10e   :  { %s480_s9 = sshll.u32 %s16353_s12, 4  ;;  %s502_s17 = sshll.u32 %s16354_s27, 4  ;;  %s481_s9 = int_to_ptr.vmem [resolvable:$true] %s480_s9  ;;  %s503_s17 = int_to_ptr.vmem [resolvable:$true] %s502_s17 }
 0x10f   :  { %s15663_s29 = scalar_lea.vmem %s481_s9, 512  ;;  %p15668_p1 = scmp.lt.s32.totalorder %s481_s9, %s481_s9 }
 0x110   :  { %p15664_p0 = scmp.ne.s32.totalorder %s481_s9, %s15663_s29  ;;  %p15669_p2 = scmp.lt.s32.totalorder %s15663_s29, %s15663_s29 }
 0x112   :  { %p15670_p3 = por %p15669_p2, %p15668_p1 }
 0x114   :  { %p15671_p4 = pnand %p15670_p3, %p15664_p0 }
 0x116   :  { %15674 = shalt.err (!%p15671_p4)
}
 0x117   :  { %s18437_s14 = sld [smem:[#allocation114_spill]]  ;;  %s15683_s0 = scalar_lea.vmem %s503_s17, 512 }
 0x118   :  { %p15684_p5 = scmp.ne.s32.totalorder %s503_s17, %s15683_s0  ;;  %p15688_p6 = scmp.lt.s32.totalorder %s503_s17, %s503_s17 }
 0x119   :  { %p15689_p7 = scmp.lt.s32.totalorder %s15683_s0, %s15683_s0 }
 0x11b   :  { %p15690_p8 = por %p15689_p7, %p15688_p6 }
 0x11d   :  { %486 = dma.hbm_to_vmem [thread:$0]  %s18437_s14, 512, %s481_s9, [#allocation47], %s16339_s23, %s16339_s23, %s18357_s26  }
 0x11e   :  { %p15691_p9 = pnand %p15690_p8, %p15684_p5 }
 0x120   :  { %15694 = shalt.err (!%p15691_p9)
}
 0x121   :  { %s18438_s3 = sld [smem:[#allocation116_spill]]  ;;  %s16355_s15 = smov [#allocation52]  }
 0x122   :  { %s525_s16 = sshll.u32 %s16355_s15, 4  ;;  %s16356_s20 = smov [#allocation55]   ;;  %s526_s16 = int_to_ptr.vmem [resolvable:$true] %s525_s16 }
 0x123   :  { %s544_s4 = sshll.u32 %s16356_s20, 4  ;;  %s15703_s18 = scalar_lea.vmem %s526_s16, 16  ;;  %s545_s4 = int_to_ptr.vmem [resolvable:$true] %s544_s4 }
 0x124   :  { %p15704_p10 = scmp.ne.s32.totalorder %s526_s16, %s15703_s18  ;;  %s15707_s22 = scalar_lea.vmem %s526_s16, 32 }
 0x125   :  { %p15708_p11 = scmp.lt.s32.totalorder %s526_s16, %s526_s16  ;;  %p15709_p12 = scmp.lt.s32.totalorder %s15707_s22, %s15703_s18 }
 0x127   :  { %508 = dma.hbm_to_vmem [thread:$0]  %s18438_s3, 512, %s503_s17, [#allocation50], %s16339_s23, %s16339_s23, %s18357_s26  }
 0x128   :  { %p15710_p13 = por %p15709_p12, %p15708_p11 }
 0x12a   :  { %p15711_p0 = pnand %p15710_p13, %p15704_p10 }
 0x12c   :  { %15714 = shalt.err (!%p15711_p0)
}
 0x12d   :  { %s18439_s28 = sld [smem:[#allocation118_spill]]  ;;  %s15723_s8 = scalar_lea.vmem %s545_s4, 512 }
 0x12e   :  { %p15724_p1 = scmp.ne.s32.totalorder %s545_s4, %s15723_s8  ;;  %p15728_p2 = scmp.lt.s32.totalorder %s545_s4, %s545_s4 }
 0x12f   :  { %p15729_p3 = scmp.lt.s32.totalorder %s15723_s8, %s15723_s8 }
 0x131   :  { %p15730_p4 = por %p15729_p3, %p15728_p2 }
 0x133   :  { %528 = dma.hbm_to_vmem [thread:$0]  %s18439_s28, 16, %s526_s16, [#allocation53]  }
 0x134   :  { %p15731_p5 = pnand %p15730_p4, %p15724_p1 }
 0x136   :  { %15734 = shalt.err (!%p15731_p5)
}
 0x137   :  { %s18440_s1 = sld [smem:[#allocation120_spill]]  ;;  %s16357_s19 = smov [#allocation58]  }
 0x138   :  { %s566_s25 = sshll.u32 %s16357_s19, 4  ;;  %s16358_s30 = smov [#allocation61]   ;;  %s567_s25 = int_to_ptr.vmem [resolvable:$true] %s566_s25 }
 0x139   :  { %s589_s2 = sshll.u32 %s16358_s30, 4  ;;  %s15743_s7 = scalar_lea.vmem %s567_s25, 512  ;;  %s590_s2 = int_to_ptr.vmem [resolvable:$true] %s589_s2 }
 0x13a   :  { %p15744_p6 = scmp.ne.s32.totalorder %s567_s25, %s15743_s7  ;;  %p15748_p7 = scmp.lt.s32.totalorder %s567_s25, %s567_s25 }
 0x13b   :  { %p15749_p8 = scmp.lt.s32.totalorder %s15743_s7, %s15743_s7 }
 0x13d   :  { %550 = dma.hbm_to_vmem [thread:$0]  %s18440_s1, 512, %s545_s4, [#allocation56], %s16339_s23, %s16339_s23, %s18357_s26  }
 0x13e   :  { %p15750_p9 = por %p15749_p8, %p15748_p7 }
 0x140   :  { %p15751_p10 = pnand %p15750_p9, %p15744_p6 }
 0x142   :  { %15754 = shalt.err (!%p15751_p10)
}
 0x143   :  { %s18441_s10 = sld [smem:[#allocation122_spill]]  ;;  %s15763_s6 = scalar_lea.vmem %s590_s2, 16 }
 0x144   :  { %p15764_p11 = scmp.ne.s32.totalorder %s590_s2, %s15763_s6  ;;  %s15767_s11 = scalar_lea.vmem %s590_s2, 32 }
 0x145   :  { %p15768_p12 = scmp.lt.s32.totalorder %s590_s2, %s590_s2  ;;  %p15769_p13 = scmp.lt.s32.totalorder %s15767_s11, %s15763_s6 }
 0x147   :  { %p15770_p0 = por %p15769_p13, %p15768_p12 }
 0x149   :  { %572 = dma.hbm_to_vmem [thread:$0]  %s18441_s10, 512, %s567_s25, [#allocation59], %s16339_s23, %s16339_s23, %s18357_s26  }
 0x14a   :  { %p15771_p1 = pnand %p15770_p0, %p15764_p11 }
 0x14c   :  { %15774 = shalt.err (!%p15771_p1)
}
 0x14d   :  { %s18442_s12 = sld [smem:[#allocation124_spill]]  ;;  %s16359_s9 = smov [#allocation64]  }
 0x14e   :  { %s611_s27 = sshll.u32 %s16359_s9, 4  ;;  %s16360_s17 = smov [#allocation2]   ;;  %s612_s27 = int_to_ptr.vmem [resolvable:$true] %s611_s27 }
 0x14f   :  { %s150_s29 = sshll.u32 %s16360_s17, 4  ;;  %s15783_s14 = scalar_lea.vmem %s612_s27, 16  ;;  %s151_s29 = int_to_ptr.vmem [resolvable:$true] %s150_s29 }
 0x150   :  { %p15784_p2 = scmp.ne.s32.totalorder %s612_s27, %s15783_s14  ;;  %s15787_s0 = scalar_lea.vmem %s612_s27, 32 }
 0x151   :  { %p15788_p3 = scmp.lt.s32.totalorder %s612_s27, %s612_s27  ;;  %p15789_p4 = scmp.lt.s32.totalorder %s15787_s0, %s15783_s14 }
 0x153   :  { %592 = dma.hbm_to_vmem [thread:$0]  %s18442_s12, 16, %s590_s2, [#allocation62]  }
 0x154   :  { %p15790_p5 = por %p15789_p4, %p15788_p3 }
 0x156   :  { %p15791_p6 = pnand %p15790_p5, %p15784_p2 }
 0x158   :  { %15794 = shalt.err (!%p15791_p6)
}
 0x159   :  { %s18443_s3 = sld [smem:[#allocation127_spill]]  ;;  %s15803_s15 = scalar_lea.vmem %s151_s29, 256 }
 0x15a   :  { %p15804_p7 = scmp.ne.s32.totalorder %s151_s29, %s15803_s15  ;;  %p15808_p8 = scmp.lt.s32.totalorder %s151_s29, %s151_s29 }
 0x15b   :  { %p15809_p9 = scmp.lt.s32.totalorder %s15803_s15, %s15803_s15 }
 0x15d   :  { %p15810_p10 = por %p15809_p9, %p15808_p8 }
 0x15f   :  { %614 = dma.hbm_to_vmem [thread:$0]  %s18443_s3, 16, %s612_s27, [#allocation65]  }
 0x160   :  { %p15811_p11 = pnand %p15810_p10, %p15804_p7 }
 0x162   :  { %15814 = shalt.err (!%p15811_p11)
}
 0x163   :  { %s18444_s16 = sld [smem:[#allocation89_spill]]  ;;  %s16361_s20 = smov [#allocation6]  }
 0x164   :  { %s178_s4 = sshll.u32 %s16361_s20, 4  ;;  %s16362_s18 = smov [#allocation9]   ;;  %s179_s4 = int_to_ptr.vmem [resolvable:$true] %s178_s4 }
 0x165   :  { %s205_s22 = sshll.u32 %s16362_s18, 4  ;;  %s15823_s28 = scalar_lea.vmem %s179_s4, 256  ;;  %s206_s22 = int_to_ptr.vmem [resolvable:$true] %s205_s22 }
 0x166   :  { %p15824_p12 = scmp.ne.s32.totalorder %s179_s4, %s15823_s28  ;;  %p15828_p13 = scmp.lt.s32.totalorder %s179_s4, %s179_s4 }
 0x167   :  { %p15829_p0 = scmp.lt.s32.totalorder %s15823_s28, %s15823_s28 }
 0x169   :  { %156 = dma.hbm_to_vmem [thread:$0]  %s18444_s16, 256, %s151_s29, [#allocation3], %s16339_s23, %s16339_s23, %s18357_s26  }
 0x16a   :  { %p15830_p1 = por %p15829_p0, %p15828_p13 }
 0x16c   :  { %p15831_p2 = pnand %p15830_p1, %p15824_p12 }
 0x16e   :  { %15834 = shalt.err (!%p15831_p2)
}
 0x16f   :  { %s18445_s8 = sld [smem:[#allocation92_spill]]  ;;  %s15843_s1 = scalar_lea.vmem %s206_s22, 16 }
 0x170   :  { %p15844_p3 = scmp.ne.s32.totalorder %s206_s22, %s15843_s1  ;;  %s15847_s19 = scalar_lea.vmem %s206_s22, 32 }
 0x171   :  { %p15848_p4 = scmp.lt.s32.totalorder %s206_s22, %s206_s22  ;;  %p15849_p5 = scmp.lt.s32.totalorder %s15847_s19, %s15843_s1 }
 0x173   :  { %p15850_p6 = por %p15849_p5, %p15848_p4 }
 0x175   :  { %184 = dma.hbm_to_vmem [thread:$0]  %s18445_s8, 256, %s179_s4, [#allocation5], %s16339_s23, %s16339_s23, %s18357_s26  }
 0x176   :  { %p15851_p7 = pnand %p15850_p6, %p15844_p3 }
 0x178   :  { %15854 = shalt.err (!%p15851_p7)
}
 0x179   :  { %s18446_s25 = sld [smem:[#allocation94_spill]]  ;;  %s16363_s30 = smov [#allocation12]  }
 0x17a   :  { %s227_s2 = sshll.u32 %s16363_s30, 4  ;;  %s16364_s7 = smov [#allocation15]   ;;  %s228_s2 = int_to_ptr.vmem [resolvable:$true] %s227_s2 }
 0x17b   :  { %s253_s10 = sshll.u32 %s16364_s7, 4  ;;  %s15863_s6 = scalar_lea.vmem %s228_s2, 16  ;;  %s254_s10 = int_to_ptr.vmem [resolvable:$true] %s253_s10 }
 0x17c   :  { %p15864_p8 = scmp.ne.s32.totalorder %s228_s2, %s15863_s6  ;;  %s15867_s11 = scalar_lea.vmem %s228_s2, 32 }
 0x17d   :  { %p15868_p9 = scmp.lt.s32.totalorder %s228_s2, %s228_s2  ;;  %p15869_p10 = scmp.lt.s32.totalorder %s15867_s11, %s15863_s6 }
 0x17f   :  { %208 = dma.hbm_to_vmem [thread:$0]  %s18446_s25, 16, %s206_s22, [#allocation8]  }
 0x180   :  { %p15870_p11 = por %p15869_p10, %p15868_p9 }
 0x182   :  { %p15871_p12 = pnand %p15870_p11, %p15864_p8 }
 0x184   :  { %15874 = shalt.err (!%p15871_p12)
}
 0x185   :  { %s18447_s23 = sld [smem:[#allocation95_spill]]  ;;  %s15883_s12 = scalar_lea.vmem %s254_s10, 16 }
 0x186   :  { %p15884_p13 = scmp.ne.s32.totalorder %s254_s10, %s15883_s12  ;;  %s15887_s9 = scalar_lea.vmem %s254_s10, 32 }
 0x187   :  { %p15888_p0 = scmp.lt.s32.totalorder %s254_s10, %s254_s10  ;;  %p15889_p1 = scmp.lt.s32.totalorder %s15887_s9, %s15883_s12 }
 0x189   :  { %p15890_p2 = por %p15889_p1, %p15888_p0 }
 0x18b   :  { %230 = dma.hbm_to_vmem [thread:$0]  %s18447_s23, 16, %s228_s2, [#allocation11]  }
 0x18c   :  { %p15891_p3 = pnand %p15890_p2, %p15884_p13 }
 0x18e   :  { %15894 = shalt.err (!%p15891_p3)
}
 0x18f   :  { %s18448_s27 = sld [smem:[#allocation99_spill]]  ;;  %s16365_s17 = smov [#allocation18]  }
 0x190   :  { %s277_s29 = sshll.u32 %s16365_s17, 4  ;;  %s16366_s14 = smov [#allocation21]   ;;  %s278_s29 = int_to_ptr.vmem [resolvable:$true] %s277_s29 }
 0x191   :  { %s301_s0 = sshll.u32 %s16366_s14, 4  ;;  %s15903_s3 = scalar_lea.vmem %s278_s29, 16  ;;  %s302_s0 = int_to_ptr.vmem [resolvable:$true] %s301_s0 }
 0x192   :  { %p15904_p4 = scmp.ne.s32.totalorder %s278_s29, %s15903_s3  ;;  %s15907_s15 = scalar_lea.vmem %s278_s29, 32 }
 0x193   :  { %p15908_p5 = scmp.lt.s32.totalorder %s278_s29, %s278_s29  ;;  %p15909_p6 = scmp.lt.s32.totalorder %s15907_s15, %s15903_s3 }
 0x195   :  { %256 = dma.hbm_to_vmem [thread:$0]  %s18448_s27, 16, %s254_s10, [#allocation14]  }
 0x196   :  { %p15910_p7 = por %p15909_p6, %p15908_p5 }
 0x198   :  { %p15911_p8 = pnand %p15910_p7, %p15904_p4 }
 0x19a   :  { %15914 = shalt.err (!%p15911_p8)
}
 0x19b   :  { %s18449_s16 = sld [smem:[#allocation102_spill]]  ;;  %s15923_s20 = scalar_lea.vmem %s302_s0, 16 }
 0x19c   :  { %p15924_p9 = scmp.ne.s32.totalorder %s302_s0, %s15923_s20  ;;  %s15927_s4 = scalar_lea.vmem %s302_s0, 32 }
 0x19d   :  { %p15928_p10 = scmp.lt.s32.totalorder %s302_s0, %s302_s0  ;;  %p15929_p11 = scmp.lt.s32.totalorder %s15927_s4, %s15923_s20 }
 0x19f   :  { %p15930_p12 = por %p15929_p11, %p15928_p10 }
 0x1a1   :  { %280 = dma.hbm_to_vmem [thread:$0]  %s18449_s16, 16, %s278_s29, [#allocation17]  }
 0x1a2   :  { %p15931_p13 = pnand %p15930_p12, %p15924_p9 }
 0x1a4   :  { %15934 = shalt.err (!%p15931_p13)
}
 0x1a5   :  { %s18450_s18 = sld [smem:[#allocation105_spill]]  ;;  %s16367_s22 = smov [#allocation24]  }
 0x1a6   :  { %s321_s28 = sshll.u32 %s16367_s22, 4  ;;  %s16368_s8 = smov [#allocation27]   ;;  %s322_s28 = int_to_ptr.vmem [resolvable:$true] %s321_s28 }
 0x1a7   :  { %s343_s1 = sshll.u32 %s16368_s8, 4  ;;  %s15943_s19 = scalar_lea.vmem %s322_s28, 16  ;;  %s344_s1 = int_to_ptr.vmem [resolvable:$true] %s343_s1 }
 0x1a8   :  { %p15944_p0 = scmp.ne.s32.totalorder %s322_s28, %s15943_s19  ;;  %s15947_s25 = scalar_lea.vmem %s322_s28, 32 }
 0x1a9   :  { %p15948_p1 = scmp.lt.s32.totalorder %s322_s28, %s322_s28  ;;  %p15949_p2 = scmp.lt.s32.totalorder %s15947_s25, %s15943_s19 }
 0x1ab   :  { %304 = dma.hbm_to_vmem [thread:$0]  %s18450_s18, 16, %s302_s0, [#allocation20]  }
 0x1ac   :  { %p15950_p3 = por %p15949_p2, %p15948_p1 }
 0x1ae   :  { %p15951_p4 = pnand %p15950_p3, %p15944_p0 }
 0x1b0   :  { %15954 = shalt.err (!%p15951_p4)
}
 0x1b1   :  { %s18451_s30 = sld [smem:[#allocation106_spill]]  ;;  %s15963_s2 = scalar_lea.vmem %s344_s1, 16 }
 0x1b2   :  { %p15964_p5 = scmp.ne.s32.totalorder %s344_s1, %s15963_s2  ;;  %s15967_s7 = scalar_lea.vmem %s344_s1, 32 }
 0x1b3   :  { %p15968_p6 = scmp.lt.s32.totalorder %s344_s1, %s344_s1  ;;  %p15969_p7 = scmp.lt.s32.totalorder %s15967_s7, %s15963_s2 }
 0x1b5   :  { %p15970_p8 = por %p15969_p7, %p15968_p6 }
 0x1b7   :  { %324 = dma.hbm_to_vmem [thread:$0]  %s18451_s30, 16, %s322_s28, [#allocation23]  }
 0x1b8   :  { %p15971_p9 = pnand %p15970_p8, %p15964_p5 }
 0x1ba   :  { %15974 = shalt.err (!%p15971_p9)
}
 0x1bb   :  { %s18452_s10 = sld [smem:[#allocation107_spill]]  ;;  %s16369_s6 = smov [#allocation30]  }
 0x1bc   :  { %s365_s11 = sshll.u32 %s16369_s6, 4  ;;  %s16370_s23 = smov [#allocation33]   ;;  %s366_s11 = int_to_ptr.vmem [resolvable:$true] %s365_s11 }
 0x1bd   :  { %s385_s12 = sshll.u32 %s16370_s23, 4  ;;  %s15983_s9 = scalar_lea.vmem %s366_s11, 16  ;;  %s386_s12 = int_to_ptr.vmem [resolvable:$true] %s385_s12 }
 0x1be   :  { %p15984_p10 = scmp.ne.s32.totalorder %s366_s11, %s15983_s9  ;;  %s15987_s27 = scalar_lea.vmem %s366_s11, 32 }
 0x1bf   :  { %p15988_p11 = scmp.lt.s32.totalorder %s366_s11, %s366_s11  ;;  %p15989_p12 = scmp.lt.s32.totalorder %s15987_s27, %s15983_s9 }
 0x1c1   :  { %346 = dma.hbm_to_vmem [thread:$0]  %s18452_s10, 16, %s344_s1, [#allocation26]  }
 0x1c2   :  { %p15990_p13 = por %p15989_p12, %p15988_p11 }
 0x1c4   :  { %p15991_p0 = pnand %p15990_p13, %p15984_p10 }
 0x1c6   :  { %15994 = shalt.err (!%p15991_p0)
}
 0x1c7   :  { %s18453_s17 = sld [smem:[#allocation108_spill]]  ;;  %s16003_s29 = scalar_lea.vmem %s386_s12, 16 }
 0x1c8   :  { %p16004_p1 = scmp.ne.s32.totalorder %s386_s12, %s16003_s29  ;;  %s16007_s14 = scalar_lea.vmem %s386_s12, 32 }
 0x1c9   :  { %p16008_p2 = scmp.lt.s32.totalorder %s386_s12, %s386_s12  ;;  %p16009_p3 = scmp.lt.s32.totalorder %s16007_s14, %s16003_s29 }
 0x1cb   :  { %p16010_p4 = por %p16009_p3, %p16008_p2 }
 0x1cd   :  { %368 = dma.hbm_to_vmem [thread:$0]  %s18453_s17, 16, %s366_s11, [#allocation29]  }
 0x1ce   :  { %p16011_p5 = pnand %p16010_p4, %p16004_p1 }
 0x1d0   :  { %16014 = shalt.err (!%p16011_p5)
}
 0x1d1   :  { %s18454_s0 = sld [smem:[#allocation109_spill]]  ;;  %s16371_s3 = smov [#allocation36]  }
 0x1d2   :  { %s407_s15 = sshll.u32 %s16371_s3, 4  ;;  %s16372_s16 = smov [#allocation39]   ;;  %s408_s15 = int_to_ptr.vmem [resolvable:$true] %s407_s15 }
 0x1d3   :  { %s429_s20 = sshll.u32 %s16372_s16, 4  ;;  %s16023_s4 = scalar_lea.vmem %s408_s15, 16  ;;  %s430_s20 = int_to_ptr.vmem [resolvable:$true] %s429_s20 }
 0x1d4   :  { %p16024_p6 = scmp.ne.s32.totalorder %s408_s15, %s16023_s4  ;;  %s16027_s18 = scalar_lea.vmem %s408_s15, 32 }
 0x1d5   :  { %p16028_p7 = scmp.lt.s32.totalorder %s408_s15, %s408_s15  ;;  %p16029_p8 = scmp.lt.s32.totalorder %s16027_s18, %s16023_s4 }
 0x1d7   :  { %388 = dma.hbm_to_vmem [thread:$0]  %s18454_s0, 16, %s386_s12, [#allocation32]  }
 0x1d8   :  { %p16030_p9 = por %p16029_p8, %p16028_p7 }
 0x1da   :  { %p16031_p10 = pnand %p16030_p9, %p16024_p6 }
 0x1dc   :  { %16034 = shalt.err (!%p16031_p10)
}
 0x1dd   :  { %s18455_s22 = sld [smem:[#allocation110_spill]]  ;;  %s16043_s28 = scalar_lea.vmem %s430_s20, 16 }
 0x1de   :  { %p16044_p11 = scmp.ne.s32.totalorder %s430_s20, %s16043_s28  ;;  %s16047_s8 = scalar_lea.vmem %s430_s20, 32 }
 0x1df   :  { %p16048_p12 = scmp.lt.s32.totalorder %s430_s20, %s430_s20  ;;  %p16049_p13 = scmp.lt.s32.totalorder %s16047_s8, %s16043_s28 }
 0x1e1   :  { %p16050_p0 = por %p16049_p13, %p16048_p12 }
 0x1e3   :  { %410 = dma.hbm_to_vmem [thread:$0]  %s18455_s22, 16, %s408_s15, [#allocation35]  }
 0x1e4   :  { %p16051_p1 = pnand %p16050_p0, %p16044_p11 }
 0x1e6   :  { %16054 = shalt.err (!%p16051_p1)
}
 0x1e7   :  { %s18456_s1 = sld [smem:[#allocation111_spill]]  ;;  %s16373_s19 = smov [#allocation42]  }
 0x1e8   :  { %s449_s25 = sshll.u32 %s16373_s19, 4  ;;  %s16374_s30 = smov [#allocation45]   ;;  %s450_s25 = int_to_ptr.vmem [resolvable:$true] %s449_s25 }
 0x1e9   :  { %s471_s2 = sshll.u32 %s16374_s30, 4  ;;  %s16063_s7 = scalar_lea.vmem %s450_s25, 16  ;;  %s472_s2 = int_to_ptr.vmem [resolvable:$true] %s471_s2 }
 0x1ea   :  { %p16064_p2 = scmp.ne.s32.totalorder %s450_s25, %s16063_s7  ;;  %s16067_s10 = scalar_lea.vmem %s450_s25, 32 }
 0x1eb   :  { %p16068_p3 = scmp.lt.s32.totalorder %s450_s25, %s450_s25  ;;  %p16069_p4 = scmp.lt.s32.totalorder %s16067_s10, %s16063_s7 }
 0x1ed   :  { %432 = dma.hbm_to_vmem [thread:$0]  %s18456_s1, 16, %s430_s20, [#allocation38]  }
 0x1ee   :  { %p16070_p5 = por %p16069_p4, %p16068_p3 }
 0x1f0   :  { %p16071_p6 = pnand %p16070_p5, %p16064_p2 }
 0x1f2   :  { %16074 = shalt.err (!%p16071_p6)
}
 0x1f3   :  { %s18457_s6 = sld [smem:[#allocation112_spill]]  ;;  %s16083_s11 = scalar_lea.vmem %s472_s2, 16 }
 0x1f4   :  { %p16084_p7 = scmp.ne.s32.totalorder %s472_s2, %s16083_s11  ;;  %s16087_s23 = scalar_lea.vmem %s472_s2, 32 }
 0x1f5   :  { %p16088_p8 = scmp.lt.s32.totalorder %s472_s2, %s472_s2  ;;  %p16089_p9 = scmp.lt.s32.totalorder %s16087_s23, %s16083_s11 }
 0x1f7   :  { %p16090_p10 = por %p16089_p9, %p16088_p8 }
 0x1f9   :  { %452 = dma.hbm_to_vmem [thread:$0]  %s18457_s6, 16, %s450_s25, [#allocation41]  }
 0x1fa   :  { %p16091_p11 = pnand %p16090_p10, %p16084_p7 }
 0x1fc   :  { %16094 = shalt.err (!%p16091_p11)
}
 0x1fd   :  { %s18458_s12 = sld [smem:[#allocation113_spill]]  ;;  %s16375_s9 = smov [#allocation48]  }
 0x1fe   :  { %s493_s27 = sshll.u32 %s16375_s9, 4  ;;  %s16376_s17 = smov [#allocation51]   ;;  %s494_s27 = int_to_ptr.vmem [resolvable:$true] %s493_s27 }
 0x1ff   :  { %s515_s29 = sshll.u32 %s16376_s17, 4  ;;  %s16103_s14 = scalar_lea.vmem %s494_s27, 16  ;;  %s516_s29 = int_to_ptr.vmem [resolvable:$true] %s515_s29 }
 0x200   :  { %p16104_p12 = scmp.ne.s32.totalorder %s494_s27, %s16103_s14  ;;  %s16107_s0 = scalar_lea.vmem %s494_s27, 32 }
 0x201   :  { %p16108_p13 = scmp.lt.s32.totalorder %s494_s27, %s494_s27  ;;  %p16109_p0 = scmp.lt.s32.totalorder %s16107_s0, %s16103_s14 }
 0x203   :  { %474 = dma.hbm_to_vmem [thread:$0]  %s18458_s12, 16, %s472_s2, [#allocation44]  }
 0x204   :  { %p16110_p1 = por %p16109_p0, %p16108_p13 }
 0x206   :  { %p16111_p2 = pnand %p16110_p1, %p16104_p12 }
 0x208   :  { %16114 = shalt.err (!%p16111_p2)
}
 0x209   :  { %s18459_s3 = sld [smem:[#allocation115_spill]]  ;;  %s16123_s15 = scalar_lea.vmem %s516_s29, 16 }
 0x20a   :  { %p16124_p3 = scmp.ne.s32.totalorder %s516_s29, %s16123_s15  ;;  %s16127_s16 = scalar_lea.vmem %s516_s29, 32 }
 0x20b   :  { %p16128_p4 = scmp.lt.s32.totalorder %s516_s29, %s516_s29  ;;  %p16129_p5 = scmp.lt.s32.totalorder %s16127_s16, %s16123_s15 }
 0x20d   :  { %p16130_p6 = por %p16129_p5, %p16128_p4 }
 0x20f   :  { %496 = dma.hbm_to_vmem [thread:$0]  %s18459_s3, 16, %s494_s27, [#allocation47]  }
 0x210   :  { %p16131_p7 = pnand %p16130_p6, %p16124_p3 }
 0x212   :  { %16134 = shalt.err (!%p16131_p7)
}
 0x213   :  { %s18460_s20 = sld [smem:[#allocation117_spill]]  ;;  %s16377_s4 = smov [#allocation54]  }
 0x214   :  { %s535_s18 = sshll.u32 %s16377_s4, 4  ;;  %s16378_s22 = smov [#allocation57]   ;;  %s536_s18 = int_to_ptr.vmem [resolvable:$true] %s535_s18 }
 0x215   :  { %s557_s28 = sshll.u32 %s16378_s22, 4  ;;  %s16143_s8 = scalar_lea.vmem %s536_s18, 16  ;;  %s558_s28 = int_to_ptr.vmem [resolvable:$true] %s557_s28 }
 0x216   :  { %p16144_p8 = scmp.ne.s32.totalorder %s536_s18, %s16143_s8  ;;  %s16147_s1 = scalar_lea.vmem %s536_s18, 32 }
 0x217   :  { %p16148_p9 = scmp.lt.s32.totalorder %s536_s18, %s536_s18  ;;  %p16149_p10 = scmp.lt.s32.totalorder %s16147_s1, %s16143_s8 }
 0x219   :  { %518 = dma.hbm_to_vmem [thread:$0]  %s18460_s20, 16, %s516_s29, [#allocation50]  }
 0x21a   :  { %p16150_p11 = por %p16149_p10, %p16148_p9 }
 0x21c   :  { %p16151_p12 = pnand %p16150_p11, %p16144_p8 }
 0x21e   :  { %16154 = shalt.err (!%p16151_p12)
}
 0x21f   :  { %s18461_s19 = sld [smem:[#allocation119_spill]]  ;;  %s16163_s25 = scalar_lea.vmem %s558_s28, 16 }
 0x220   :  { %p16164_p13 = scmp.ne.s32.totalorder %s558_s28, %s16163_s25  ;;  %s16167_s30 = scalar_lea.vmem %s558_s28, 32 }
 0x221   :  { %p16168_p0 = scmp.lt.s32.totalorder %s558_s28, %s558_s28  ;;  %p16169_p1 = scmp.lt.s32.totalorder %s16167_s30, %s16163_s25 }
 0x223   :  { %p16170_p2 = por %p16169_p1, %p16168_p0 }
 0x225   :  { %538 = dma.hbm_to_vmem [thread:$0]  %s18461_s19, 16, %s536_s18, [#allocation53]  }
 0x226   :  { %p16171_p3 = pnand %p16170_p2, %p16164_p13 }
 0x228   :  { %16174 = shalt.err (!%p16171_p3)
}
 0x229   :  { %s18462_s2 = sld [smem:[#allocation121_spill]]  ;;  %s16379_s7 = smov [#allocation60]  }
 0x22a   :  { %s579_s10 = sshll.u32 %s16379_s7, 4  ;;  %s16380_s6 = smov [#allocation63]   ;;  %s580_s10 = int_to_ptr.vmem [resolvable:$true] %s579_s10 }
 0x22b   :  { %s599_s11 = sshll.u32 %s16380_s6, 4  ;;  %s16183_s23 = scalar_lea.vmem %s580_s10, 16  ;;  %s600_s11 = int_to_ptr.vmem [resolvable:$true] %s599_s11 }
 0x22c   :  { %p16184_p4 = scmp.ne.s32.totalorder %s580_s10, %s16183_s23  ;;  %s16187_s12 = scalar_lea.vmem %s580_s10, 32 }
 0x22d   :  { %p16188_p5 = scmp.lt.s32.totalorder %s580_s10, %s580_s10  ;;  %p16189_p6 = scmp.lt.s32.totalorder %s16187_s12, %s16183_s23 }
 0x22f   :  { %560 = dma.hbm_to_vmem [thread:$0]  %s18462_s2, 16, %s558_s28, [#allocation56]  }
 0x230   :  { %p16190_p7 = por %p16189_p6, %p16188_p5 }
 0x232   :  { %p16191_p8 = pnand %p16190_p7, %p16184_p4 }
 0x234   :  { %16194 = shalt.err (!%p16191_p8)
}
 0x235   :  { %s18463_s9 = sld [smem:[#allocation123_spill]]  ;;  %s16203_s27 = scalar_lea.vmem %s600_s11, 16 }
 0x236   :  { %p16204_p9 = scmp.ne.s32.totalorder %s600_s11, %s16203_s27  ;;  %s16207_s17 = scalar_lea.vmem %s600_s11, 32 }
 0x237   :  { %p16208_p10 = scmp.lt.s32.totalorder %s600_s11, %s600_s11  ;;  %p16209_p11 = scmp.lt.s32.totalorder %s16207_s17, %s16203_s27 }
 0x239   :  { %p16210_p12 = por %p16209_p11, %p16208_p10 }
 0x23b   :  { %582 = dma.hbm_to_vmem [thread:$0]  %s18463_s9, 16, %s580_s10, [#allocation59]  }
 0x23c   :  { %p16211_p13 = pnand %p16210_p12, %p16204_p9 }
 0x23e   :  { %16214 = shalt.err (!%p16211_p13)
}
 0x23f   :  { %s18464_s29 = sld [smem:[#allocation125_spill]]  ;;  %s16381_s14 = smov [#allocation66]  }
 0x240   :  { %s623_s0 = sshll.u32 %s16381_s14, 4  ;;  %s624_s0 = int_to_ptr.vmem [resolvable:$true] %s623_s0 }
 0x241   :  { %s16223_s3 = scalar_lea.vmem %s624_s0, 16  ;;  %s16227_s15 = scalar_lea.vmem %s624_s0, 32 }
 0x242   :  { %p16224_p0 = scmp.ne.s32.totalorder %s624_s0, %s16223_s3  ;;  %p16228_p1 = scmp.lt.s32.totalorder %s624_s0, %s624_s0 }
 0x243   :  { %p16229_p2 = scmp.lt.s32.totalorder %s16227_s15, %s16223_s3 }
 0x245   :  { %602 = dma.hbm_to_vmem [thread:$0]  %s18464_s29, 16, %s600_s11, [#allocation62]  }
 0x246   :  { %p16230_p3 = por %p16229_p2, %p16228_p1 }
 0x248   :  { %p16231_p4 = pnand %p16230_p3, %p16224_p0 }
 0x24a   :  { %16234 = shalt.err (!%p16231_p4)
}
 0x24b   :  { %s18465_s16 = sld [smem:[#allocation129_spill]] }
 0x251   :  { %626 = dma.hbm_to_vmem [thread:$0]  %s18465_s16, 16, %s624_s0, [#allocation65]  }
 0x252   :  { %16235 = dma.done.wait [#allocation3], 256  }
 0x253   :  { %16236 = vsyncadd [#allocation3], 4294967040 }
 0x254   :  { %16237 = dma.done.wait [#allocation5], 512  }
 0x255   :  { %16238 = vsyncadd [#allocation5], 4294966784 }
 0x256   :  { %16239 = dma.done.wait [#allocation8], 272  }
 0x257   :  { %16240 = vsyncadd [#allocation8], 4294967024 }
 0x258   :  { %16241 = dma.done.wait [#allocation11], 272  }
 0x259   :  { %16242 = vsyncadd [#allocation11], 4294967024 }
 0x25a   :  { %16243 = dma.done.wait [#allocation14], 32  }
 0x25b   :  { %16244 = vsyncadd [#allocation14], 4294967264 }
 0x25c   :  { %16245 = dma.done.wait [#allocation17], 32  }
 0x25d   :  { %16246 = vsyncadd [#allocation17], 4294967264 }
 0x25e   :  { %16247 = dma.done.wait [#allocation20], 32  }
 0x25f   :  { %16248 = vsyncadd [#allocation20], 4294967264 }
 0x260   :  { %16249 = dma.done.wait [#allocation23], 32  }
 0x261   :  { %16250 = vsyncadd [#allocation23], 4294967264 }
 0x262   :  { %16251 = dma.done.wait [#allocation26], 528  }
 0x263   :  { %16252 = vsyncadd [#allocation26], 4294966768 }
 0x264   :  { %16253 = dma.done.wait [#allocation29], 528  }
 0x265   :  { %16254 = vsyncadd [#allocation29], 4294966768 }
 0x266   :  { %16255 = dma.done.wait [#allocation32], 32  }
 0x267   :  { %16256 = vsyncadd [#allocation32], 4294967264 }
 0x268   :  { %16257 = dma.done.wait [#allocation35], 528  }
 0x269   :  { %16258 = vsyncadd [#allocation35], 4294966768 }
 0x26a   :  { %16259 = dma.done.wait [#allocation38], 528  }
 0x26b   :  { %16260 = vsyncadd [#allocation38], 4294966768 }
 0x26c   :  { %16261 = dma.done.wait [#allocation41], 32  }
 0x26d   :  { %16262 = vsyncadd [#allocation41], 4294967264 }
 0x26e   :  { %16263 = dma.done.wait [#allocation44], 528  }
 0x26f   :  { %16264 = vsyncadd [#allocation44], 4294966768 }
 0x270   :  { %16265 = dma.done.wait [#allocation47], 528  }
 0x271   :  { %16266 = vsyncadd [#allocation47], 4294966768 }
 0x272   :  { %16267 = dma.done.wait [#allocation50], 528  }
 0x273   :  { %16268 = vsyncadd [#allocation50], 4294966768 }
 0x274   :  { %16269 = dma.done.wait [#allocation53], 32  }
 0x275   :  { %16270 = vsyncadd [#allocation53], 4294967264 }
 0x276   :  { %16271 = dma.done.wait [#allocation56], 528  }
 0x277   :  { %16272 = vsyncadd [#allocation56], 4294966768 }
 0x278   :  { %16273 = dma.done.wait [#allocation59], 528  }
 0x279   :  { %16274 = vsyncadd [#allocation59], 4294966768 }
 0x27a   :  { %16275 = dma.done.wait [#allocation62], 32  }
 0x27b   :  { %16276 = vsyncadd [#allocation62], 4294967264 }
 0x27c   :  { %16277 = dma.done.wait [#allocation65], 32  }
 0x27d   :  { %16278 = vsyncadd [#allocation65], 4294967264  ;;  %vm775_vm0 = vcmask 130048   ;;  %s18466_s20 = sld [smem:[#allocation96_spill]]  ;;  %v767_v0 = vld [vmem:[#allocation6 + $0x8] sm:$0xff]  ;;  %v766_v1 = vld [vmem:[#allocation6] sm:$0xff] }
 0x27e   :  { %v760_v2 = vld [vmem:[#allocation2] sm:$0xff]  ;;  %14012 = vmatprep.subr.mxu0 %v767_v0  ;;  %v860_v3 = vld [vmem:[#allocation7 + $0x8] sm:$0xff]  ;;  %v761_v4 = vld [vmem:[#allocation2 + $0x8] sm:$0xff]  ;;  %s18467_s4 = sld [smem:[#allocation97_spill]]  ;;  %v16382_v8 = vmov 0.0   ;;  %vm16383_vm1 = vmmov 0  }
 0x27f   :  { %14016 = vmatprep.mubr.msk.f32.mxu0 %vm775_vm0, %v760_v2  ;;  %14013 = vmatpush3.msra.mxu0 %v767_v0  ;;  %v859_v5 = vld [vmem:[#allocation7] sm:$0xff]  ;;  %s18468_s18 = sld [smem:[#allocation90_spill]]  ;;  %vm956_vm2 = vcmask 261120   ;;  %s18381_s8 = smov 64   ;;  %vm1888_vm3 = vcmask 1041408   ;;  %vm1890_vm4 = vcmask 1043456  }
 0x280   :  { %14019 = vmatprep.subr.mxu1 %v860_v3  ;;  %14014 = vmatprep.subr.mxu0 %v766_v1  ;;  %s18469_s22 = sld [smem:[#allocation93_spill]]  ;;  %v13344_v27 = vld [vmem:[#allocation13] ss:$0 sm:$0xff]  ;;  %s18354_s1 = smov 32   ;;  %vm1892_vm5 = vcmask 1045504   ;;  %vm2396_vm6 = vcmask 1040384  }
 0x281   :  { %14020 = vmatpush3.msra.mxu1 %v860_v3  ;;  %14015 = vmatpush3.msra.mxu0 %v766_v1  ;;  %s18470_s28 = sld [smem:[#allocation91_spill]]  ;;  %vm2399_vm7 = vcmask 1042432   ;;  %vm2402_vm8 = vcmask 1044480   ;;  %vm2405_vm9 = vcmask 1046528   ;;  %s18390_s7 = smov 92   ;;  %vm2523_vm10 = vcmask 31744  }
 0x282   :  { %14023 = vmatprep.mubr.msk.f32.mxu1 %vm775_vm0, %v760_v2  ;;  %14017 = vmatmul.mubr.msk.f32.vlgmr.msra.gmra.mxu0 %vm775_vm0, %v761_v4  ;;  %s18471_s19 = sld [smem:[#allocation98_spill]]  ;;  %s18393_s10 = smov 96   ;;  %vm2599_vm11 = vcmask 64512   ;;  %vm3872_vm12 = vcmask 97280   ;;  %vm3875_vm13 = vcmask 162816   ;;  %vm3877_vm14 = vcmask 195584  }
 0x283   :  { %v948_v6 = vld [vmem:[%s18466_s20 + $0x18] sm:$0xff]  ;;  %14021 = vmatprep.subr.mxu1 %v859_v5  ;;  %v947_v7 = vld [vmem:[%s18466_s20 + $0x10] sm:$0xff]  ;;  %v946_v10 = vld [vmem:[%s18466_s20 + $0x8] sm:$0xff]  ;;  %s18472_s25 = sld [smem:[#allocation100_spill]]  ;;  %s18391_s6 = smov 88   ;;  %vm3879_vm15 = vcmask 228352  }
 0x284   :  { %14026 = vmatprep.subr.mxu0 %v948_v6  ;;  %14022 = vmatpush3.msra.mxu1 %v859_v5  ;;  %v16806_v9 = vld [vmem:[%s18467_s4 + $0x18] sm:$0xff]  ;;  %v16812_v11 = vld [vmem:[%s18467_s4 + $0x10] sm:$0xff]  ;;  %v945_v12 = vld [vmem:[%s18466_s20] sm:$0xff]  ;;  %s18473_s30 = sld [smem:[#allocation101_spill]]  ;;  %s16389_s11 = smov 124  }
 0x285   :  { %14027 = vmatpush3.msra.mxu0 %v948_v6  ;;  %14037 = vmatprep.subr.mxu1 %v16382_v8  ;;  %v16818_v13 = vld [vmem:[%s18467_s4 + $0x8] sm:$0xff]  ;;  %v16823_v14 = vld [vmem:[%s18467_s4] sm:$0xff]  ;;  %s18474_s2 = sld [smem:[#allocation103_spill]]  ;;  %s18392_s23 = smov 84  }
 0x286   :  { %14028 = vmatprep.subr.mxu0 %v947_v7  ;;  %14024 = vmatmul.mubr.msk.f32.vlgmr.msra.gmra.mxu1 %vm775_vm0, %v761_v4  ;;  %v764_v15 = vld [vmem:[%s18468_s18] sm:$0x3]  ;;  %s16391_s12 = smov 120   ;;  %s18395_s9 = smov 80  }
 0x287   :  { %14029 = vmatpush3.msra.mxu0 %v947_v7  ;;  %14038 = vmatpush3.msra.mxu1 %v16806_v9  ;;  %v13338_v16 = vld [vmem:[%s18469_s22] ss:$0 sm:$0xff]  ;;  %s16393_s27 = smov 116   ;;  %s16394_s17 = smov 76  }
 0x288   :  { %14030 = vmatprep.subr.mxu0 %v946_v10  ;;  %14039 = vmatprep.subr.mxu1 %v16382_v8  ;;  %v765_v34 = vld [vmem:[%s18470_s28] sm:$0x3]  ;;  %s16395_s29 = smov 112   ;;  %s18388_s14 = smov 72  }
 0x289   :  { %14031 = vmatpush3.msra.mxu0 %v946_v10  ;;  %14040 = vmatpush3.msra.mxu1 %v16812_v11  ;;  %s18386_s0 = smov 108   ;;  %s18384_s3 = smov 68  }
 0x28a   :  { %14032 = vmatprep.subr.mxu0 %v945_v12  ;;  %14041 = vmatprep.subr.mxu1 %v16382_v8  ;;  %s18382_s15 = smov 104   ;;  %s18379_s16 = smov 100  }
 0x28b   :  { %14033 = vmatpush3.msra.mxu0 %v945_v12  ;;  %14042 = vmatpush3.msra.mxu1 %v16818_v13  ;;  %s18369_s20 = smov 56   ;;  %s18373_s4 = smov 60  }
 0x28c   :  { %14048 = vmatprep.subr.mxu0 %v16382_v8  ;;  %14043 = vmatprep.subr.mxu1 %v16382_v8  ;;  %s18371_s18 = smov 52   ;;  %s18365_s22 = smov 48  }
 0x28d   :  { %14045 = vmatprep.mubr.msk.f32.mxu1 %vm16383_vm1, %v16382_v8  ;;  %14044 = vmatpush3.msra.mxu1 %v16823_v14  ;;  %s18367_s28 = smov 44  }
 0x28e   :  { %14046 = vmatmul.mubr.msk.f32.vlgmr.msra.gmra.mxu1 %vm956_vm2, %v764_v15  ;;  %14059 = vmatprep.subr.mxu1 %v16382_v8 }
 0x28f   :  { %14060 = vmatpush3.msra.mxu1 %v16806_v9  ;;  %14067 = vmatprep.mubr.msk.f32.mxu1 %vm16383_vm1, %v16382_v8 }
 0x290   :  { %14061 = vmatprep.subr.mxu1 %v16382_v8 }
 0x291   :  { %14062 = vmatpush3.msra.mxu1 %v16812_v11 }
 0x292   :  { %14063 = vmatprep.subr.mxu1 %v16382_v8 }
 0x293   :  { %14064 = vmatpush3.msra.mxu1 %v16818_v13 }
 0x294   :  { %14065 = vmatprep.subr.mxu1 %v16382_v8 }
 0x295   :  { %14066 = vmatpush3.msra.mxu1 %v16823_v14 }
 0x296   :  { %14081 = vmatprep.subr.mxu1 %v16382_v8 }
 0x342   :  { %v14018_v17 = vpop.f32.mrf.mxu0 }
 0x343   :  { %v854_v18 = vadd.f32 %v14018_v17, %v13338_v16 }
 0x344   :  { %v848_v19 = vpop.f32.mrf.mxu0 }
 0x345   :  { %v849_v20 = vadd.f32 %v13338_v16, %v848_v19  ;;  %v858_v22 = vmax.f32 %v854_v18, 0.0 }
 0x346   :  { %v16856_v23 = vpop.f32.mrf.mxu1 }
 0x347   :  { %v857_v21 = vmax.f32 %v849_v20, 0.0 }
 0x348   :  { %v16858_v24 = vpop.f32.mrf.mxu1 }
 0x349   :  { %14034 = vmatprep.mubr.msk.f32.mxu0 %vm956_vm2, %v857_v21 }
 0x34a   :  { %14035 = vmatmul.mubr.msk.f32.vlgmr.msra.gmra.mxu0 %vm956_vm2, %v858_v22 }
 0x34b   :  { %14049 = vmatpush3.msra.mxu0 %v16806_v9  ;;  %14056 = vmatprep.mubr.msk.f32.mxu0 %vm16383_vm1, %v16382_v8 }
 0x34c   :  { %14050 = vmatprep.subr.mxu0 %v16382_v8 }
 0x34d   :  { %14051 = vmatpush3.msra.mxu0 %v16812_v11 }
 0x34e   :  { %14052 = vmatprep.subr.mxu0 %v16382_v8  ;;  %v1111_v25 = vpop.f32.mrf.mxu1 }
 0x34f   :  { %14053 = vmatpush3.msra.mxu0 %v16818_v13 }
 0x350   :  { %14054 = vmatprep.subr.mxu0 %v16382_v8  ;;  %v14047_v26 = vpop.f32.mrf.mxu1 }
 0x351   :  { %14055 = vmatpush3.msra.mxu0 %v16823_v14 }
 0x352   :  { %14070 = vmatprep.subr.mxu0 %v16382_v8 }
 0x40a   :  { %v14036_v28 = vpop.f32.mrf.mxu0 }
 0x40b   :  { %v16860_v29 = vadd.f32 %v14036_v28, %v13344_v27 }
 0x40c   :  { %v1029_v30 = vpop.f32.mrf.mxu0 }
 0x40d   :  { %v16862_v31 = vadd.f32 %v13344_v27, %v1029_v30 }
 0x40f   :  { %v1115_v32 = vadd.f32 %v1111_v25, %v16862_v31 }
 0x411   :  { %15099 = vtanh.f32 %v1115_v32  ;;  %v13348_v35 = vmul.f32 -1.442695, %v1115_v32 }
 0x413   :  { %15101 = vpow2.f32 %v13348_v35 }
 0x41e   :  { %v15100_v33 = vpop.eup %15099 }
 0x41f   :  { %1129 = vrot.lane.b32.xlu0 %v15100_v33, %s18381_s8 }
 0x420   :  { %v15102_v36 = vpop.eup %15101 }
 0x421   :  { %v1119_v37 = vadd.f32 1.0, %v15102_v36 }
 0x423   :  { %1124 = vrot.lane.b32.xlu0 %v765_v34, %s18354_s1  ;;  %15103 = vrcp.f32 %v1119_v37 }
 0x430   :  { %v15104_v38 = vpop.eup %15103 }
 0x491   :  { %v1130_v39 = vpop.permute.xlu0 %1129 }
 0x492   :  { %v1132_v40 = vmul.f32 %v15104_v38, %v1130_v39 }
 0x494   :  { %1134 = vrot.lane.b32.xlu1 %v1132_v40, %s18354_s1 }
 0x495   :  { %v1125_v41 = vpop.permute.xlu0 %1124 }
 0x496   :  { %v1127_v42 = vmul.f32 %v15104_v38, %v1125_v41 }
 0x506   :  { %v1135_v43 = vpop.permute.xlu1 %1134 }
 0x507   :  { %v1137_v44 = vadd.f32 %v1135_v43, %v1127_v42 }
 0x509   :  { %15105 = vtanh.f32 %v1137_v44  ;;  %v1231_v60 = vrot.slane %v1137_v44, 6 }
 0x516   :  { %v15106_v45 = vpop.eup %15105 }
 0x517   :  { %1140 = vrot.lane.b32.xlu1 %v15106_v45, %s18381_s8 }
 0x589   :  { %v1141_v46 = vpop.permute.xlu1 %1140 }
 0x58a   :  { %v16870_v47 = vmul.f32 %v15104_v38, %v1141_v46 }
 0x58c   :  { %1145 = vrot.lane.b32.xlu0 %v16870_v47, %s18354_s1 }
 0x5fe   :  { %v1146_v48 = vpop.permute.xlu0 %1145 }
 0x5ff   :  { %14057 = vmatmul.mubr.msk.f32.vlgmr.msra.gmra.mxu0 %vm956_vm2, %v1146_v48 }
 0x600   :  { %14071 = vmatpush3.msra.mxu0 %v16806_v9  ;;  %14078 = vmatprep.mubr.msk.f32.mxu0 %vm16383_vm1, %v16382_v8 }
 0x601   :  { %14072 = vmatprep.subr.mxu0 %v16382_v8 }
 0x602   :  { %14073 = vmatpush3.msra.mxu0 %v16812_v11 }
 0x603   :  { %14074 = vmatprep.subr.mxu0 %v16382_v8 }
 0x604   :  { %14075 = vmatpush3.msra.mxu0 %v16818_v13 }
 0x605   :  { %14076 = vmatprep.subr.mxu0 %v16382_v8 }
 0x606   :  { %14077 = vmatpush3.msra.mxu0 %v16823_v14 }
 0x607   :  { %14092 = vmatprep.subr.mxu0 %v16382_v8 }
 0x6bf   :  { %v1215_v49 = vpop.f32.mrf.mxu0 }
 0x6c0   :  { %v1220_v50 = vrot.slane %v1215_v49, 6 }
 0x6c1   :  { %v14058_v51 = vpop.f32.mrf.mxu0 }
 0x6c2   :  { %v1222_v52 = vadd.f32 %v1220_v50, %v16862_v31 }
 0x6c4   :  { %15107 = vtanh.f32 %v1222_v52  ;;  %v13350_v54 = vmul.f32 -1.442695, %v1222_v52 }
 0x6c6   :  { %15109 = vpow2.f32 %v13350_v54 }
 0x6d1   :  { %v15108_v53 = vpop.eup %15107 }
 0x6d2   :  { %1235 = vrot.lane.b32.xlu1 %v15108_v53, %s18381_s8 }
 0x6d3   :  { %v15110_v55 = vpop.eup %15109 }
 0x6d4   :  { %v1226_v56 = vadd.f32 1.0, %v15110_v55 }
 0x6d6   :  { %15111 = vrcp.f32 %v1226_v56 }
 0x6e3   :  { %v15112_v57 = vpop.eup %15111 }
 0x6e4   :  { %v1233_v61 = vmul.f32 %v15112_v57, %v1231_v60 }
 0x744   :  { %v1236_v58 = vpop.permute.xlu1 %1235 }
 0x745   :  { %v1238_v59 = vmul.f32 %v15112_v57, %v1236_v58 }
 0x747   :  { %1240 = vrot.lane.b32.xlu0 %v1238_v59, %s18354_s1 }
 0x7b9   :  { %v1241_v62 = vpop.permute.xlu0 %1240 }
 0x7ba   :  { %v1243_v63 = vadd.f32 %v1241_v62, %v1233_v61 }
 0x7bc   :  { %15113 = vtanh.f32 %v1243_v63  ;;  %v1338_v21 = vrot.slane %v1243_v63, 6 }
 0x7c9   :  { %v15114_v0 = vpop.eup %15113 }
 0x7ca   :  { %1246 = vrot.lane.b32.xlu1 %v15114_v0, %s18381_s8 }
 0x83c   :  { %v1247_v1 = vpop.permute.xlu1 %1246 }
 0x83d   :  { %v1249_v2 = vmul.f32 %v15112_v57, %v1247_v1 }
 0x83f   :  { %v1251_v3 = vrot.slane %v1249_v2, 2  ;;  %v1889_v32 = vsel %vm1888_vm3, %v16870_v47, %v1249_v2 }
 0x841   :  { %1252 = vrot.lane.b32.xlu0 %v1251_v3, %s18354_s1 }
 0x8b3   :  { %v1253_v4 = vpop.permute.xlu0 %1252 }
 0x8b4   :  { %14068 = vmatmul.mubr.msk.f32.vlgmr.msra.gmra.mxu1 %vm956_vm2, %v1253_v4 }
 0x8b5   :  { %14082 = vmatpush3.msra.mxu1 %v16806_v9  ;;  %14089 = vmatprep.mubr.msk.f32.mxu1 %vm16383_vm1, %v16382_v8 }
 0x8b6   :  { %14083 = vmatprep.subr.mxu1 %v16382_v8 }
 0x8b7   :  { %14084 = vmatpush3.msra.mxu1 %v16812_v11 }
 0x8b8   :  { %14085 = vmatprep.subr.mxu1 %v16382_v8 }
 0x8b9   :  { %14086 = vmatpush3.msra.mxu1 %v16818_v13 }
 0x8ba   :  { %14087 = vmatprep.subr.mxu1 %v16382_v8 }
 0x8bb   :  { %14088 = vmatpush3.msra.mxu1 %v16823_v14 }
 0x8bc   :  { %14103 = vmatprep.subr.mxu1 %v16382_v8 }
 0x974   :  { %v1322_v5 = vpop.f32.mrf.mxu1 }
 0x975   :  { %v1327_v6 = vrot.slane %v1322_v5, 4 }
 0x976   :  { %v14069_v7 = vpop.f32.mrf.mxu1 }
 0x977   :  { %v1329_v10 = vadd.f32 %v1327_v6, %v16862_v31 }
 0x979   :  { %15115 = vtanh.f32 %v1329_v10  ;;  %v13352_v15 = vmul.f32 -1.442695, %v1329_v10 }
 0x97b   :  { %15117 = vpow2.f32 %v13352_v15 }
 0x986   :  { %v15116_v12 = vpop.eup %15115 }
 0x987   :  { %1342 = vrot.lane.b32.xlu1 %v15116_v12, %s18381_s8 }
 0x988   :  { %v15118_v16 = vpop.eup %15117 }
 0x989   :  { %v1333_v17 = vadd.f32 1.0, %v15118_v16 }
 0x98b   :  { %15119 = vrcp.f32 %v1333_v17 }
 0x998   :  { %v15120_v18 = vpop.eup %15119 }
 0x999   :  { %v1340_v22 = vmul.f32 %v15120_v18, %v1338_v21 }
 0x9f9   :  { %v1343_v19 = vpop.permute.xlu1 %1342 }
 0x9fa   :  { %v1345_v20 = vmul.f32 %v15120_v18, %v1343_v19 }
 0x9fc   :  { %1347 = vrot.lane.b32.xlu0 %v1345_v20, %s18354_s1 }
 0xa6e   :  { %v1348_v25 = vpop.permute.xlu0 %1347 }
 0xa6f   :  { %v1350_v26 = vadd.f32 %v1348_v25, %v1340_v22 }
 0xa71   :  { %15121 = vtanh.f32 %v1350_v26  ;;  %v1445_v47 = vrot.slane %v1350_v26, 6 }
 0xa7e   :  { %v15122_v27 = vpop.eup %15121 }
 0xa7f   :  { %1353 = vrot.lane.b32.xlu1 %v15122_v27, %s18381_s8 }
 0xaf1   :  { %v1354_v28 = vpop.permute.xlu1 %1353 }
 0xaf2   :  { %v1356_v30 = vmul.f32 %v15120_v18, %v1354_v28  ;;  %v1922_v28 = vld [vmem:[%s18471_s19 + $0x38] sm:$0xff] }
 0xaf4   :  { %v1358_v33 = vrot.slane %v1356_v30, 4  ;;  %v1891_v34 = vsel %vm1890_vm4, %v1889_v32, %v1356_v30 }
 0xaf6   :  { %1359 = vrot.lane.b32.xlu0 %v1358_v33, %s18354_s1 }
 0xb68   :  { %v1360_v35 = vpop.permute.xlu0 %1359 }
 0xb69   :  { %14079 = vmatmul.mubr.msk.f32.vlgmr.msra.gmra.mxu0 %vm956_vm2, %v1360_v35  ;;  %v13341_v35 = vld [vmem:[#allocation9] ss:$0 sm:$0xff] }
 0xb6a   :  { %14093 = vmatpush3.msra.mxu0 %v16806_v9  ;;  %14100 = vmatprep.mubr.msk.f32.mxu0 %vm16383_vm1, %v16382_v8 }
 0xb6b   :  { %14094 = vmatprep.subr.mxu0 %v16382_v8 }
 0xb6c   :  { %14095 = vmatpush3.msra.mxu0 %v16812_v11 }
 0xb6d   :  { %14096 = vmatprep.subr.mxu0 %v16382_v8 }
 0xb6e   :  { %14097 = vmatpush3.msra.mxu0 %v16818_v13 }
 0xb6f   :  { %14098 = vmatprep.subr.mxu0 %v16382_v8 }
 0xb70   :  { %14099 = vmatpush3.msra.mxu0 %v16823_v14 }
 0xb71   :  { %14114 = vmatprep.subr.mxu0 %v16382_v8 }
 0xc29   :  { %v1429_v36 = vpop.f32.mrf.mxu0 }
 0xc2a   :  { %v1434_v37 = vrot.slane %v1429_v36, 2  ;;  %v935_v36 = vadd.f32 %v13341_v35, %v16858_v24 }
 0xc2b   :  { %v14080_v38 = vpop.f32.mrf.mxu0 }
 0xc2c   :  { %v1436_v39 = vadd.f32 %v1434_v37, %v16862_v31  ;;  %v943_v37 = vmax.f32 %v935_v36, 0.0 }
 0xc2e   :  { %15123 = vtanh.f32 %v1436_v39  ;;  %v13354_v41 = vmul.f32 -1.442695, %v1436_v39  ;;  %v1921_v39 = vld [vmem:[%s18471_s19 + $0x30] sm:$0xff] }
 0xc30   :  { %15125 = vpow2.f32 %v13354_v41  ;;  %v940_v41 = vadd.f32 %v16856_v23, %v13341_v35  ;;  %v13367_v35 = vld [vmem:[#allocation15] ss:$0 sm:$0xff] }
 0xc3b   :  { %v15124_v40 = vpop.eup %15123 }
 0xc3c   :  { %1449 = vrot.lane.b32.xlu1 %v15124_v40, %s18381_s8  ;;  %v1920_v40 = vld [vmem:[%s18471_s19 + $0x28] sm:$0xff] }
 0xc3d   :  { %v15126_v42 = vpop.eup %15125 }
 0xc3e   :  { %v1440_v43 = vadd.f32 1.0, %v15126_v42  ;;  %v1919_v42 = vld [vmem:[%s18471_s19 + $0x20] sm:$0xff] }
 0xc40   :  { %15127 = vrcp.f32 %v1440_v43  ;;  %v944_v43 = vmax.f32 %v940_v41, 0.0 }
 0xc4d   :  { %v15128_v44 = vpop.eup %15127 }
 0xc4e   :  { %v1447_v48 = vmul.f32 %v15128_v44, %v1445_v47 }
 0xcae   :  { %v1450_v45 = vpop.permute.xlu1 %1449 }
 0xcaf   :  { %v1452_v46 = vmul.f32 %v15128_v44, %v1450_v45 }
 0xcb1   :  { %1454 = vrot.lane.b32.xlu0 %v1452_v46, %s18354_s1 }
 0xd23   :  { %v1455_v49 = vpop.permute.xlu0 %1454 }
 0xd24   :  { %v1457_v50 = vadd.f32 %v1455_v49, %v1447_v48 }
 0xd26   :  { %15129 = vtanh.f32 %v1457_v50  ;;  %v1549_v2 = vrot.slane %v1457_v50, 6 }
 0xd33   :  { %v15130_v31 = vpop.eup %15129 }
 0xd34   :  { %1460 = vrot.lane.b32.xlu1 %v15130_v31, %s18381_s8 }
 0xda6   :  { %v1461_v51 = vpop.permute.xlu1 %1460 }
 0xda7   :  { %v1463_v52 = vmul.f32 %v15128_v44, %v1461_v51 }
 0xda9   :  { %v1465_v53 = vrot.slane %v1463_v52, 6  ;;  %v16925_v54 = vsel %vm1892_vm5, %v1891_v34, %v1463_v52 }
 0xdab   :  { %1466 = vrot.lane.b32.xlu0 %v1465_v53, %s18354_s1 }
 0xe1d   :  { %v1467_v55 = vpop.permute.xlu0 %1466 }
 0xe1e   :  { %14090 = vmatmul.mubr.msk.f32.vlgmr.msra.gmra.mxu1 %vm956_vm2, %v1467_v55 }
 0xe1f   :  { %14104 = vmatpush3.msra.mxu1 %v16806_v9  ;;  %14111 = vmatprep.mubr.msk.f32.mxu1 %vm16383_vm1, %v16382_v8 }
 0xe20   :  { %14105 = vmatprep.subr.mxu1 %v16382_v8 }
 0xe21   :  { %14106 = vmatpush3.msra.mxu1 %v16812_v11 }
 0xe22   :  { %14107 = vmatprep.subr.mxu1 %v16382_v8 }
 0xe23   :  { %14108 = vmatpush3.msra.mxu1 %v16818_v13 }
 0xe24   :  { %14109 = vmatprep.subr.mxu1 %v16382_v8 }
 0xe25   :  { %14110 = vmatpush3.msra.mxu1 %v16823_v14 }
 0xe26   :  { %14125 = vmatprep.subr.mxu1 %v1922_v28 }
 0xede   :  { %v1536_v56 = vpop.f32.mrf.mxu1 }
 0xedf   :  { %v1540_v57 = vadd.f32 %v1536_v56, %v16860_v29 }
 0xee0   :  { %v14091_v58 = vpop.f32.mrf.mxu1 }
 0xee1   :  { %15131 = vtanh.f32 %v1540_v57  ;;  %v13356_v60 = vmul.f32 -1.442695, %v1540_v57 }
 0xee3   :  { %15133 = vpow2.f32 %v13356_v60 }
 0xeee   :  { %v15132_v59 = vpop.eup %15131 }
 0xeef   :  { %1553 = vrot.lane.b32.xlu1 %v15132_v59, %s18381_s8 }
 0xef0   :  { %v15134_v61 = vpop.eup %15133 }
 0xef1   :  { %v1544_v62 = vadd.f32 1.0, %v15134_v61 }
 0xef3   :  { %15135 = vrcp.f32 %v1544_v62 }
 0xf00   :  { %v15136_v63 = vpop.eup %15135 }
 0xf01   :  { %v1551_v3 = vmul.f32 %v15136_v63, %v1549_v2 }
 0xf61   :  { %v1554_v0 = vpop.permute.xlu1 %1553 }
 0xf62   :  { %v1556_v1 = vmul.f32 %v15136_v63, %v1554_v0 }
 0xf64   :  { %1558 = vrot.lane.b32.xlu0 %v1556_v1, %s18354_s1 }
 0xfd6   :  { %v1559_v4 = vpop.permute.xlu0 %1558 }
 0xfd7   :  { %v1561_v5 = vadd.f32 %v1559_v4, %v1551_v3 }
 0xfd9   :  { %15137 = vtanh.f32 %v1561_v5 }
 0xfe6   :  { %v15138_v6 = vpop.eup %15137 }
 0xfe7   :  { %1564 = vrot.lane.b32.xlu1 %v15138_v6, %s18381_s8 }
0x1059   :  { %v1565_v7 = vpop.permute.xlu1 %1564 }
0x105a   :  { %v16942_v10 = vmul.f32 %v15136_v63, %v1565_v7 }
0x105c   :  { %1569 = vrot.lane.b32.xlu0 %v16942_v10, %s18354_s1 }
0x10ce   :  { %v1570_v12 = vpop.permute.xlu0 %1569 }
0x10cf   :  { %14101 = vmatmul.mubr.msk.f32.vlgmr.msra.gmra.mxu0 %vm956_vm2, %v1570_v12 }
0x10d0   :  { %14115 = vmatpush3.msra.mxu0 %v16806_v9  ;;  %14122 = vmatprep.mubr.msk.f32.mxu0 %vm16383_vm1, %v16382_v8 }
0x10d1   :  { %14116 = vmatprep.subr.mxu0 %v16382_v8 }
0x10d2   :  { %14117 = vmatpush3.msra.mxu0 %v16812_v11 }
0x10d3   :  { %14118 = vmatprep.subr.mxu0 %v16382_v8 }
0x10d4   :  { %14119 = vmatpush3.msra.mxu0 %v16818_v13 }
0x10d5   :  { %14120 = vmatprep.subr.mxu0 %v16382_v8 }
0x10d6   :  { %14121 = vmatpush3.msra.mxu0 %v16823_v14  ;;  %v1655_v14 = vrot.slane %v1561_v5, 6 }
0x118f   :  { %v1639_v15 = vpop.f32.mrf.mxu0 }
0x1190   :  { %v1644_v16 = vrot.slane %v1639_v15, 6 }
0x1191   :  { %v14102_v17 = vpop.f32.mrf.mxu0 }
0x1192   :  { %v1646_v9 = vadd.f32 %v1644_v16, %v16860_v29 }
0x1194   :  { %15139 = vtanh.f32 %v1646_v9  ;;  %v13358_v19 = vmul.f32 -1.442695, %v1646_v9 }
0x1196   :  { %15141 = vpow2.f32 %v13358_v19  ;;  %v1918_v19 = vld [vmem:[%s18471_s19 + $0x18] sm:$0xff] }
0x1197   :  { %14136 = vmatprep.subr.mxu0 %v1918_v19 }
0x11a1   :  { %v15140_v18 = vpop.eup %15139 }
0x11a2   :  { %1659 = vrot.lane.b32.xlu1 %v15140_v18, %s18381_s8 }
0x11a3   :  { %v15142_v11 = vpop.eup %15141 }
0x11a4   :  { %v1650_v20 = vadd.f32 1.0, %v15142_v11  ;;  %v1917_v11 = vld [vmem:[%s18471_s19 + $0x10] sm:$0xff] }
0x11a6   :  { %15143 = vrcp.f32 %v1650_v20  ;;  %v1916_v20 = vld [vmem:[%s18471_s19 + $0x8] sm:$0xff] }
0x11b3   :  { %v15144_v13 = vpop.eup %15143 }
0x11b4   :  { %v1657_v25 = vmul.f32 %v15144_v13, %v1655_v14 }
0x1214   :  { %v1660_v21 = vpop.permute.xlu1 %1659 }
0x1215   :  { %v1662_v22 = vmul.f32 %v15144_v13, %v1660_v21 }
0x1217   :  { %1664 = vrot.lane.b32.xlu0 %v1662_v22, %s18354_s1 }
0x1289   :  { %v1665_v26 = vpop.permute.xlu0 %1664 }
0x128a   :  { %v1667_v27 = vadd.f32 %v1665_v26, %v1657_v25  ;;  %v2103_v26 = vld [vmem:[%s18472_s25 + $0x18] sm:$0xff] }
0x128c   :  { %15145 = vtanh.f32 %v1667_v27  ;;  %v1762_v52 = vrot.slane %v1667_v27, 6  ;;  %v2102_v27 = vld [vmem:[%s18472_s25 + $0x10] sm:$0xff] }
0x1299   :  { %v15146_v30 = vpop.eup %15145 }
0x129a   :  { %1670 = vrot.lane.b32.xlu1 %v15146_v30, %s18381_s8  ;;  %v2100_v30 = vld [vmem:[%s18472_s25] sm:$0xff] }
0x130c   :  { %v1671_v32 = vpop.permute.xlu1 %1670 }
0x130d   :  { %v1673_v33 = vmul.f32 %v15144_v13, %v1671_v32  ;;  %v1915_v13 = vld [vmem:[%s18471_s19] sm:$0xff]  ;;  %s18363_s19 = smov 40  }
0x130f   :  { %v1675_v34 = vrot.slane %v1673_v33, 2  ;;  %v1894_v60 = vsel %vm1888_vm3, %v16942_v10, %v1673_v33 }
0x1311   :  { %1676 = vrot.lane.b32.xlu0 %v1675_v34, %s18354_s1 }
0x1383   :  { %v1677_v38 = vpop.permute.xlu0 %1676 }
0x1384   :  { %14112 = vmatmul.mubr.msk.f32.vlgmr.msra.gmra.mxu1 %vm956_vm2, %v1677_v38 }
0x1385   :  { %14126 = vmatpush3.msra.mxu1 %v1922_v28  ;;  %14133 = vmatprep.mubr.msk.f32.mxu1 %vm956_vm2, %v943_v37  ;;  %v2101_v28 = vld [vmem:[%s18472_s25 + $0x8] sm:$0xff]  ;;  %s18355_s25 = smov 36  }
0x1386   :  { %14127 = vmatprep.subr.mxu1 %v1921_v39 }
0x1387   :  { %14128 = vmatpush3.msra.mxu1 %v1921_v39 }
0x1388   :  { %14129 = vmatprep.subr.mxu1 %v1920_v40 }
0x1389   :  { %14130 = vmatpush3.msra.mxu1 %v1920_v40 }
0x138a   :  { %14131 = vmatprep.subr.mxu1 %v1919_v42 }
0x138b   :  { %14132 = vmatpush3.msra.mxu1 %v1919_v42 }
0x138c   :  { %14134 = vmatmul.mubr.msk.f32.vlgmr.msra.gmra.mxu1 %vm956_vm2, %v944_v43  ;;  %14147 = vmatprep.subr.mxu1 %v2103_v26  ;;  %v2197_v43 = vld [vmem:[%s18473_s30 + $0x18] sm:$0xff] }
0x138d   :  { %14148 = vmatpush3.msra.mxu1 %v2103_v26 }
0x138e   :  { %14149 = vmatprep.subr.mxu1 %v2102_v27 }
0x138f   :  { %14150 = vmatpush3.msra.mxu1 %v2102_v27 }
0x1390   :  { %14151 = vmatprep.subr.mxu1 %v2101_v28 }
0x1391   :  { %14152 = vmatpush3.msra.mxu1 %v2101_v28 }
0x1392   :  { %14153 = vmatprep.subr.mxu1 %v2100_v30 }
0x1393   :  { %14154 = vmatpush3.msra.mxu1 %v2100_v30  ;;  %v13374_v30 = vld [vmem:[#allocation12] ss:$0 sm:$0xff] }
0x1444   :  { %v1746_v24 = vpop.f32.mrf.mxu1 }
0x1445   :  { %v1751_v44 = vrot.slane %v1746_v24, 4  ;;  %v2196_v24 = vld [vmem:[%s18473_s30 + $0x10] sm:$0xff] }
0x1446   :  { %v14113_v45 = vpop.f32.mrf.mxu1 }
0x1447   :  { %v1753_v46 = vadd.f32 %v1751_v44, %v16860_v29  ;;  %v2195_v44 = vld [vmem:[%s18473_s30 + $0x8] sm:$0xff]  ;;  %v2194_v45 = vld [vmem:[%s18473_s30] sm:$0xff]  ;;  %s18475_s30 = sld [smem:[#allocation104_spill]] }
0x1449   :  { %15147 = vtanh.f32 %v1753_v46  ;;  %v13360_v23 = vmul.f32 -1.442695, %v1753_v46  ;;  %v2289_v46 = vld [vmem:[#allocation10 + $0x8] sm:$0xff] }
0x144a   :  { %14169 = vmatprep.subr.mxu1 %v2289_v46 }
0x144b   :  { %15149 = vpow2.f32 %v13360_v23  ;;  %v762_v23 = vld [vmem:[#allocation4] sm:$0xff] }
0x144c   :  { %v14135_v32 = vpop.f32.mrf.mxu1 }
0x144e   :  { %v1995_v36 = vpop.f32.mrf.mxu1 }
0x1456   :  { %v15148_v47 = vpop.eup %15147 }
0x1457   :  { %1766 = vrot.lane.b32.xlu1 %v15148_v47, %s18381_s8  ;;  %v2288_v47 = vld [vmem:[#allocation10] sm:$0xff] }
0x1458   :  { %v15150_v48 = vpop.eup %15149 }
0x1459   :  { %v1757_v49 = vadd.f32 1.0, %v15150_v48  ;;  %v763_v48 = vld [vmem:[#allocation4 + $0x8] sm:$0xff] }
0x145b   :  { %15151 = vrcp.f32 %v1757_v49  ;;  %v13368_v49 = vld [vmem:[#allocation16] ss:$0 sm:$0xff] }
0x1468   :  { %v15152_v50 = vpop.eup %15151 }
0x1469   :  { %v1764_v53 = vmul.f32 %v15152_v50, %v1762_v52 }
0x14c9   :  { %v1767_v31 = vpop.permute.xlu1 %1766 }
0x14ca   :  { %v1769_v51 = vmul.f32 %v15152_v50, %v1767_v31 }
0x14cc   :  { %1771 = vrot.lane.b32.xlu0 %v1769_v51, %s18354_s1 }
0x153e   :  { %v1772_v55 = vpop.permute.xlu0 %1771 }
0x153f   :  { %v1774_v56 = vadd.f32 %v1772_v55, %v1764_v53 }
0x1541   :  { %15153 = vtanh.f32 %v1774_v56 }
0x154e   :  { %v15154_v57 = vpop.eup %15153 }
0x154f   :  { %1777 = vrot.lane.b32.xlu1 %v15154_v57, %s18381_s8  ;;  %v2432_v57 = vld [vmem:[%s18474_s2 + $0x10] sm:$0xff] }
0x15c1   :  { %v1778_v58 = vpop.permute.xlu1 %1777 }
0x15c2   :  { %v1780_v59 = vmul.f32 %v15152_v50, %v1778_v58  ;;  %v2431_v58 = vld [vmem:[%s18474_s2 + $0x8] sm:$0xff] }
0x15c4   :  { %v1782_v61 = vrot.slane %v1780_v59, 4  ;;  %v1895_v62 = vsel %vm1890_vm4, %v1894_v60, %v1780_v59  ;;  %v2430_v59 = vld [vmem:[%s18474_s2] sm:$0xff]  ;;  %v13371_v60 = vld [vmem:[#allocation18] ss:$0 sm:$0xff] }
0x15c6   :  { %1783 = vrot.lane.b32.xlu0 %v1782_v61, %s18354_s1 }
0x1638   :  { %v1784_v63 = vpop.permute.xlu0 %1783 }
0x1639   :  { %14123 = vmatmul.mubr.msk.f32.vlgmr.msra.gmra.mxu0 %vm956_vm2, %v1784_v63 }
0x163a   :  { %14137 = vmatpush3.msra.mxu0 %v1918_v19 }
0x163b   :  { %14138 = vmatprep.subr.mxu0 %v1917_v11 }
0x163c   :  { %14139 = vmatpush3.msra.mxu0 %v1917_v11 }
0x163d   :  { %14140 = vmatprep.subr.mxu0 %v1916_v20 }
0x163e   :  { %14141 = vmatpush3.msra.mxu0 %v1916_v20 }
0x163f   :  { %14142 = vmatprep.subr.mxu0 %v1915_v13 }
0x1640   :  { %14143 = vmatpush3.msra.mxu0 %v1915_v13 }
0x1641   :  { %14158 = vmatprep.subr.mxu0 %v2197_v43 }
0x16f9   :  { %v1853_v0 = vpop.f32.mrf.mxu0 }
0x16fa   :  { %v1858_v1 = vrot.slane %v1853_v0, 2 }
0x16fb   :  { %v14124_v2 = vpop.f32.mrf.mxu0 }
0x16fc   :  { %v1860_v3 = vadd.f32 %v1858_v1, %v16860_v29  ;;  %v1869_v29 = vrot.slane %v1774_v56, 6  ;;  %v2433_v56 = vld [vmem:[%s18474_s2 + $0x18] sm:$0xff] }
0x16fe   :  { %15155 = vtanh.f32 %v1860_v3  ;;  %v13362_v5 = vmul.f32 -1.442695, %v1860_v3 }
0x1700   :  { %15157 = vpow2.f32 %v13362_v5 }
0x170b   :  { %v15156_v4 = vpop.eup %15155 }
0x170c   :  { %1873 = vrot.lane.b32.xlu1 %v15156_v4, %s18381_s8 }
0x170d   :  { %v15158_v6 = vpop.eup %15157 }
0x170e   :  { %v1864_v7 = vadd.f32 1.0, %v15158_v6 }
0x1710   :  { %15159 = vrcp.f32 %v1864_v7 }
0x171d   :  { %v15160_v10 = vpop.eup %15159 }
0x171e   :  { %v1871_v16 = vmul.f32 %v15160_v10, %v1869_v29 }
0x177e   :  { %v1874_v12 = vpop.permute.xlu1 %1873 }
0x177f   :  { %v1876_v15 = vmul.f32 %v15160_v10, %v1874_v12 }
0x1781   :  { %1878 = vrot.lane.b32.xlu0 %v1876_v15, %s18354_s1 }
0x1785   :  { %2006 = vrot.lane.b32.xlu0 %v16925_v54, %s18354_s1 }
0x17f3   :  { %v1879_v17 = vpop.permute.xlu0 %1878 }
0x17f4   :  { %v16984_v9 = vadd.f32 %v1879_v17, %v1871_v16 }
0x17f6   :  { %15161 = vtanh.f32 %v16984_v9 }
0x17f7   :  { %v2007_v18 = vpop.permute.xlu0 %2006 }
0x17f8   :  { %14144 = vmatprep.mubr.msk.f32.mxu0 %vm956_vm2, %v2007_v18 }
0x1803   :  { %v15162_v54 = vpop.eup %15161 }
0x1804   :  { %1884 = vrot.lane.b32.xlu1 %v15162_v54, %s18381_s8 }
0x1876   :  { %v1885_v21 = vpop.permute.xlu1 %1884 }
0x1877   :  { %v16993_v22 = vmul.f32 %v15160_v10, %v1885_v21 }
0x1879   :  { %v1896_v14 = vsel %vm1892_vm5, %v1895_v62, %v16993_v22 }
0x187a   :  { %2008 = vrot.lane.b32.xlu1 %v1896_v14, %s18354_s1  ;;  %s18359_s1 = smov 4  }
0x18ec   :  { %v2009_v25 = vpop.permute.xlu1 %2008 }
0x18ed   :  { %14145 = vmatmul.mubr.msk.f32.vlgmr.msra.gmra.mxu0 %vm956_vm2, %v2009_v25 }
0x18ee   :  { %14159 = vmatpush3.msra.mxu0 %v2197_v43 }
0x18ef   :  { %14160 = vmatprep.subr.mxu0 %v2196_v24 }
0x18f0   :  { %14161 = vmatpush3.msra.mxu0 %v2196_v24 }
0x18f1   :  { %14162 = vmatprep.subr.mxu0 %v2195_v44 }
0x18f2   :  { %14163 = vmatpush3.msra.mxu0 %v2195_v44 }
0x18f3   :  { %14164 = vmatprep.subr.mxu0 %v2194_v45 }
0x18f4   :  { %14165 = vmatpush3.msra.mxu0 %v2194_v45 }
0x18f5   :  { %14187 = vmatprep.subr.mxu0 %v16382_v8 }
0x19ad   :  { %v14146_v33 = vpop.f32.mrf.mxu0 }
0x19ae   :  { %v2086_v34 = vadd.f32 %v14146_v33, %v14135_v32 }
0x19af   :  { %v2080_v37 = vpop.f32.mrf.mxu0 }
0x19b0   :  { %v2081_v38 = vadd.f32 %v2080_v37, %v1995_v36  ;;  %v2097_v39 = vadd.f32 %v13367_v35, %v2086_v34 }
0x19b2   :  { %v2096_v40 = vadd.f32 %v13367_v35, %v2081_v38  ;;  %v2099_v42 = vmax.f32 %v2097_v39, 0.0 }
0x19b4   :  { %v2098_v41 = vmax.f32 %v2096_v40, 0.0 }
0x19b6   :  { %14155 = vmatprep.mubr.msk.f32.mxu1 %vm956_vm2, %v2098_v41 }
0x19b7   :  { %14156 = vmatmul.mubr.msk.f32.vlgmr.msra.gmra.mxu1 %vm956_vm2, %v2099_v42 }
0x19b8   :  { %14173 = vmatprep.mubr.msk.f32.mxu1 %vm775_vm0, %v762_v23  ;;  %14170 = vmatpush3.msra.mxu1 %v2289_v46 }
0x19b9   :  { %14171 = vmatprep.subr.mxu1 %v2288_v47 }
0x19ba   :  { %14172 = vmatpush3.msra.mxu1 %v2288_v47 }
0x19bb   :  { %14174 = vmatmul.mubr.msk.f32.vlgmr.msra.gmra.mxu1 %vm775_vm0, %v763_v48  ;;  %14176 = vmatprep.subr.mxu1 %v16382_v8  ;;  %v13377_v48 = vld [vmem:[#allocation19] ss:$0 sm:$0xff] }
0x19bc   :  { %14184 = vmatprep.mubr.msk.f32.mxu1 %vm16383_vm1, %v16382_v8  ;;  %14177 = vmatpush3.msra.mxu1 %v2433_v56 }
0x19bd   :  { %14178 = vmatprep.subr.mxu1 %v16382_v8 }
0x19be   :  { %14179 = vmatpush3.msra.mxu1 %v2432_v57 }
0x19bf   :  { %14180 = vmatprep.subr.mxu1 %v16382_v8 }
0x19c0   :  { %14181 = vmatpush3.msra.mxu1 %v2431_v58 }
0x19c1   :  { %14182 = vmatprep.subr.mxu1 %v16382_v8 }
0x19c2   :  { %14183 = vmatpush3.msra.mxu1 %v2430_v59 }
0x19c3   :  { %14197 = vmatprep.subr.mxu1 %v16382_v8 }
0x1a77   :  { %v14157_v50 = vpop.f32.mrf.mxu1 }
0x1a78   :  { %v2189_v31 = vadd.f32 %v14157_v50, %v13368_v49 }
0x1a79   :  { %v2183_v51 = vpop.f32.mrf.mxu1 }
0x1a7a   :  { %v2184_v52 = vadd.f32 %v13368_v49, %v2183_v51  ;;  %v2193_v55 = vmax.f32 %v2189_v31, 0.0 }
0x1a7b   :  { %v14175_v28 = vpop.f32.mrf.mxu1 }
0x1a7c   :  { %v2192_v53 = vmax.f32 %v2184_v52, 0.0  ;;  %v2375_v35 = vadd.f32 %v14175_v28, %v13374_v30 }
0x1a7d   :  { %v2369_v32 = vpop.f32.mrf.mxu1 }
0x1a7e   :  { %14166 = vmatprep.mubr.msk.f32.mxu0 %vm956_vm2, %v2192_v53  ;;  %v2370_v33 = vadd.f32 %v13374_v30, %v2369_v32  ;;  %v17053_v38 = vmax.f32 %v2375_v35, 0.0 }
0x1a7f   :  { %14167 = vmatmul.mubr.msk.f32.vlgmr.msra.gmra.mxu0 %vm956_vm2, %v2193_v55 }
0x1a80   :  { %14189 = vmatprep.mubr.msk.f32.mxu0 %vm16383_vm1, %v16382_v8  ;;  %v17049_v34 = vmax.f32 %v2370_v33, 0.0  ;;  %v2417_v42 = vrot.slane %v17053_v38, 5  ;;  %v2419_v24 = vrot.slane %v17053_v38, 6  ;;  %v2421_v44 = vrot.slane %v17053_v38, 7 }
0x1a82   :  { %v2408_v36 = vrot.slane %v17049_v34, 1  ;;  %v2410_v37 = vrot.slane %v17049_v34, 2  ;;  %v2412_v39 = vrot.slane %v17049_v34, 3  ;;  %v7843_v41 = vrot.slane %v17049_v34, 4 }
0x1a84   :  { %v7845_v40 = vsel %vm2396_vm6, %v2408_v36, %v2410_v37 }
0x1a85   :  { %v7846_v43 = vsel %vm1888_vm3, %v7845_v40, %v2412_v39 }
0x1a86   :  { %v7847_v45 = vsel %vm2399_vm7, %v7846_v43, %v7843_v41 }
0x1a87   :  { %v7848_v46 = vsel %vm1890_vm4, %v7847_v45, %v2417_v42 }
0x1a88   :  { %v7849_v47 = vsel %vm2402_vm8, %v7848_v46, %v2419_v24 }
0x1a89   :  { %v17078_v23 = vsel %vm1892_vm5, %v7849_v47, %v2421_v44 }
0x1b3f   :  { %v14168_v61 = vpop.f32.mrf.mxu0 }
0x1b40   :  { %v2283_v62 = vadd.f32 %v14168_v61, %v13371_v60 }
0x1b41   :  { %v2277_v63 = vpop.f32.mrf.mxu0 }
0x1b42   :  { %v2278_v0 = vadd.f32 %v13371_v60, %v2277_v63  ;;  %v2287_v2 = vmax.f32 %v2283_v62, 0.0 }
0x1b44   :  { %v2286_v1 = vmax.f32 %v2278_v0, 0.0  ;;  %v2388_v12 = vrot.slane %v2287_v2, 4  ;;  %v2390_v15 = vrot.slane %v2287_v2, 5  ;;  %v2392_v17 = vrot.slane %v2287_v2, 6 }
0x1b45   :  { %v2394_v11 = vrot.slane %v2287_v2, 7 }
0x1b46   :  { %v2381_v3 = vrot.slane %v2286_v1, 1  ;;  %v2383_v4 = vrot.slane %v2286_v1, 2  ;;  %v2385_v5 = vrot.slane %v2286_v1, 3  ;;  %v7834_v7 = vrot.slane %v2286_v1, 4 }
0x1b48   :  { %v2397_v6 = vsel %vm2396_vm6, %v2286_v1, %v2381_v3  ;;  %v7836_v10 = vsel %vm2396_vm6, %v2381_v3, %v2383_v4 }
0x1b49   :  { %v2398_v29 = vsel %vm1888_vm3, %v2397_v6, %v2383_v4  ;;  %v7837_v16 = vsel %vm1888_vm3, %v7836_v10, %v2385_v5 }
0x1b4a   :  { %v2400_v18 = vsel %vm2399_vm7, %v2398_v29, %v2385_v5  ;;  %v7838_v19 = vsel %vm2399_vm7, %v7837_v16, %v7834_v7 }
0x1b4b   :  { %v2401_v20 = vsel %vm1890_vm4, %v2400_v18, %v2388_v12  ;;  %v7839_v13 = vsel %vm1890_vm4, %v7838_v19, %v2390_v15 }
0x1b4c   :  { %v2403_v54 = vsel %vm2402_vm8, %v2401_v20, %v2390_v15  ;;  %v7840_v21 = vsel %vm2402_vm8, %v7839_v13, %v2392_v17 }
0x1b4d   :  { %v2404_v14 = vsel %vm1892_vm5, %v2403_v54, %v2392_v17  ;;  %v7841_v25 = vsel %vm1892_vm5, %v7840_v21, %v2394_v11 }
0x1b4e   :  { %v17040_v26 = vsel %vm2405_vm9, %v2404_v14, %v2394_v11  ;;  %v17043_v27 = vsel %vm2405_vm9, %v7841_v25, %v2287_v2 }
0x1b4f   :  { %14185 = vmatmul.mubr.msk.f32.vlgmr.msra.gmra.mxu1 %vm956_vm2, %v17040_v26 }
0x1b50   :  { %14199 = vmatprep.mubr.msk.f32.mxu1 %vm16383_vm1, %v16382_v8 }
0x1c0f   :  { %v2510_v49 = vpop.f32.mrf.mxu1 }
0x1c10   :  { %v17080_v50 = vadd.f32 %v13377_v48, %v2510_v49 }
0x1c11   :  { %v14186_v31 = vpop.f32.mrf.mxu1 }
0x1c12   :  { %2689 = vrot.lane.b32.xlu1 %v17080_v50, %s18390_s7  ;;  %2521 = vrot.lane.b32.xlu0 %v17080_v50, %s18393_s10  ;;  %v2519_v51 = vmul.f32 0.5, %v17080_v50 }
0x1c16   :  { %2854 = vrot.lane.b32.xlu1 %v17080_v50, %s18391_s6  ;;  %2687 = vrot.lane.b32.xlu0 %v2519_v51, %s16389_s11 }
0x1c1a   :  { %3019 = vrot.lane.b32.xlu1 %v17080_v50, %s18392_s23  ;;  %2852 = vrot.lane.b32.xlu0 %v2519_v51, %s16391_s12 }
0x1c1e   :  { %3184 = vrot.lane.b32.xlu1 %v17080_v50, %s18395_s9  ;;  %3017 = vrot.lane.b32.xlu0 %v2519_v51, %s16393_s27 }
0x1c22   :  { %3349 = vrot.lane.b32.xlu1 %v17080_v50, %s16394_s17  ;;  %3182 = vrot.lane.b32.xlu0 %v2519_v51, %s16395_s29 }
0x1c26   :  { %3514 = vrot.lane.b32.xlu1 %v17080_v50, %s18388_s14  ;;  %3347 = vrot.lane.b32.xlu0 %v2519_v51, %s18386_s0 }
0x1c2a   :  { %3679 = vrot.lane.b32.xlu1 %v17080_v50, %s18384_s3  ;;  %3512 = vrot.lane.b32.xlu0 %v2519_v51, %s18382_s15 }
0x1c2e   :  { %2611 = vrot.lane.b32.xlu1 %v17080_v50, %s18381_s8  ;;  %3677 = vrot.lane.b32.xlu0 %v2519_v51, %s18379_s16 }
0x1c84   :  { %v2690_v52 = vpop.permute.xlu1 %2689  ;;  %v2522_v53 = vpop.permute.xlu0 %2521 }
0x1c85   :  { %14188 = vmatpush3.xpose.msk.msra.mxu0 %vm2523_vm10, %v2522_v53  ;;  %14198 = vmatpush3.xpose.msk.msra.mxu1 %vm2523_vm10, %v2690_v52 }
0x1c86   :  { %14207 = vmatprep.subr.mxu1 %v16382_v8  ;;  %14192 = vmatprep.subr.mxu0 %v16382_v8 }
0x1c88   :  { %v2855_v55 = vpop.permute.xlu1 %2854  ;;  %v2688_v56 = vpop.permute.xlu0 %2687  ;;  %14190 = vmatmul.mubr.msk.f32.vlgmr.msra.gmra.mxu0 %vm2523_vm10, %v2519_v51 }
0x1c89   :  { %14200 = vmatmul.mubr.msk.f32.vlgmr.msra.gmra.mxu1 %vm2523_vm10, %v2688_v56  ;;  %14194 = vmatprep.mubr.msk.f32.mxu0 %vm16383_vm1, %v16382_v8 }
0x1c8a   :  { %14208 = vmatpush3.xpose.msk.msra.mxu1 %vm2523_vm10, %v2855_v55  ;;  %14209 = vmatprep.mubr.msk.f32.mxu1 %vm16383_vm1, %v16382_v8 }
0x1c8b   :  { %14217 = vmatprep.subr.mxu1 %v16382_v8 }
0x1c8c   :  { %v3020_v57 = vpop.permute.xlu1 %3019  ;;  %v2853_v58 = vpop.permute.xlu0 %2852 }
0x1c8d   :  { %14210 = vmatmul.mubr.msk.f32.vlgmr.msra.gmra.mxu1 %vm2523_vm10, %v2853_v58 }
0x1c8e   :  { %14218 = vmatpush3.xpose.msk.msra.mxu1 %vm2523_vm10, %v3020_v57  ;;  %14219 = vmatprep.mubr.msk.f32.mxu1 %vm16383_vm1, %v16382_v8 }
0x1c8f   :  { %14227 = vmatprep.subr.mxu1 %v16382_v8 }
0x1c90   :  { %v3185_v59 = vpop.permute.xlu1 %3184  ;;  %v3018_v60 = vpop.permute.xlu0 %3017 }
0x1c91   :  { %14220 = vmatmul.mubr.msk.f32.vlgmr.msra.gmra.mxu1 %vm2523_vm10, %v3018_v60 }
0x1c92   :  { %14228 = vmatpush3.xpose.msk.msra.mxu1 %vm2523_vm10, %v3185_v59  ;;  %14229 = vmatprep.mubr.msk.f32.mxu1 %vm16383_vm1, %v16382_v8 }
0x1c93   :  { %14237 = vmatprep.subr.mxu1 %v16382_v8 }
0x1c94   :  { %v3350_v61 = vpop.permute.xlu1 %3349  ;;  %v3183_v62 = vpop.permute.xlu0 %3182 }
0x1c95   :  { %14230 = vmatmul.mubr.msk.f32.vlgmr.msra.gmra.mxu1 %vm2523_vm10, %v3183_v62 }
0x1c96   :  { %14238 = vmatpush3.xpose.msk.msra.mxu1 %vm2523_vm10, %v3350_v61  ;;  %14239 = vmatprep.mubr.msk.f32.mxu1 %vm16383_vm1, %v16382_v8 }
0x1c97   :  { %14247 = vmatprep.subr.mxu1 %v16382_v8 }
0x1c98   :  { %v3515_v63 = vpop.permute.xlu1 %3514  ;;  %v3348_v0 = vpop.permute.xlu0 %3347 }
0x1c99   :  { %14240 = vmatmul.mubr.msk.f32.vlgmr.msra.gmra.mxu1 %vm2523_vm10, %v3348_v0 }
0x1c9a   :  { %14248 = vmatpush3.xpose.msk.msra.mxu1 %vm2523_vm10, %v3515_v63  ;;  %14249 = vmatprep.mubr.msk.f32.mxu1 %vm16383_vm1, %v16382_v8 }
0x1c9b   :  { %14257 = vmatprep.subr.mxu1 %v16382_v8 }
0x1c9c   :  { %v3680_v1 = vpop.permute.xlu1 %3679  ;;  %v3513_v2 = vpop.permute.xlu0 %3512 }
0x1c9d   :  { %14250 = vmatmul.mubr.msk.f32.vlgmr.msra.gmra.mxu1 %vm2523_vm10, %v3513_v2 }
0x1c9e   :  { %14258 = vmatpush3.xpose.msk.msra.mxu1 %vm2523_vm10, %v3680_v1  ;;  %14259 = vmatprep.mubr.msk.f32.mxu1 %vm16383_vm1, %v16382_v8 }
0x1c9f   :  { %14267 = vmatprep.subr.mxu1 %v16382_v8 }
0x1ca0   :  { %v2612_v3 = vpop.permute.xlu1 %2611  ;;  %v3678_v4 = vpop.permute.xlu0 %3677 }
0x1ca1   :  { %14193 = vmatpush3.msra.mxu0 %v2612_v3  ;;  %14260 = vmatmul.mubr.msk.f32.vlgmr.msra.gmra.mxu1 %vm2523_vm10, %v3678_v4 }
0x1ca2   :  { %14202 = vmatprep.subr.mxu0 %v16382_v8  ;;  %14275 = vmatprep.mubr.msk.f32.mxu1 %vm16383_vm1, %v16382_v8 }
0x1d48   :  { %v2595_v5 = vpop.f32.mrf.mxu0 }
0x1d49   :  { %v2761_v6 = vpop.f32.mrf.mxu1  ;;  %v2600_v7 = vsel %vm2599_vm11, %v2595_v5, -inf }
0x1d4a   :  { %2601 = vmax.xlane.f32.xlu1 %v2600_v7  ;;  %v14191_v10 = vpop.f32.mrf.mxu0  ;;  %v2765_v12 = vsel %vm2599_vm11, %v2761_v6, -inf }
0x1d4b   :  { %2766 = vmax.xlane.f32.xlu0 %v2765_v12  ;;  %v14201_v15 = vpop.f32.mrf.mxu1 }
0x1d4d   :  { %v2926_v29 = vpop.f32.mrf.mxu1 }
0x1d4e   :  { %v2930_v16 = vsel %vm2599_vm11, %v2926_v29, -inf }
0x1d4f   :  { %2931 = vmax.xlane.f32.xlu0 %v2930_v16  ;;  %v14211_v17 = vpop.f32.mrf.mxu1 }
0x1d51   :  { %v3091_v18 = vpop.f32.mrf.mxu1 }
0x1d52   :  { %v3095_v19 = vsel %vm2599_vm11, %v3091_v18, -inf }
0x1d53   :  { %3096 = vmax.xlane.f32.xlu1 %v3095_v19  ;;  %v14221_v11 = vpop.f32.mrf.mxu1 }
0x1d55   :  { %v3256_v20 = vpop.f32.mrf.mxu1 }
0x1d56   :  { %v3260_v13 = vsel %vm2599_vm11, %v3256_v20, -inf }
0x1d57   :  { %3261 = vmax.xlane.f32.xlu0 %v3260_v13  ;;  %v14231_v54 = vpop.f32.mrf.mxu1 }
0x1d59   :  { %v3421_v21 = vpop.f32.mrf.mxu1 }
0x1d5a   :  { %v3425_v14 = vsel %vm2599_vm11, %v3421_v21, -inf }
0x1d5b   :  { %3426 = vmax.xlane.f32.xlu1 %v3425_v14  ;;  %v14241_v25 = vpop.f32.mrf.mxu1 }
0x1d5d   :  { %v3586_v28 = vpop.f32.mrf.mxu1 }
0x1d5e   :  { %v3590_v30 = vsel %vm2599_vm11, %v3586_v28, -inf }
0x1d5f   :  { %3591 = vmax.xlane.f32.xlu0 %v3590_v30  ;;  %v14251_v32 = vpop.f32.mrf.mxu1 }
0x1d61   :  { %v3751_v33 = vpop.f32.mrf.mxu1 }
0x1d62   :  { %v3755_v40 = vsel %vm2599_vm11, %v3751_v33, -inf }
0x1d63   :  { %v14261_v35 = vpop.f32.mrf.mxu1 }
0x1d6c   :  { %2941 = vrot.lane.b32.xlu1 %v17080_v50, %s18369_s20 }
0x1d75   :  { %2776 = vrot.lane.b32.xlu0 %v17080_v50, %s18373_s4 }
0x1d90   :  { %3756 = vmax.xlane.f32.xlu1 %v3755_v40 }
0x1da1   :  { %3106 = vrot.lane.b32.xlu1 %v17080_v50, %s18371_s18 }
0x1dd3   :  { %v2602_v41 = vpop.xlane.xlu1 %2601 }
0x1dd4   :  { %v2603_v43 = vsub.f32 %v2595_v5, %v2602_v41  ;;  %v2767_v45 = vpop.xlane.xlu0 %2766 }
0x1dd5   :  { %v2768_v46 = vsub.f32 %v2761_v6, %v2767_v45 }
0x1dd6   :  { %v2604_v47 = vmul.f32 1.442695, %v2603_v43 }
0x1dd7   :  { %v2769_v48 = vmul.f32 1.442695, %v2768_v46 }
0x1dd8   :  { %15163 = vpow2.f32 %v2604_v47  ;;  %v2932_v49 = vpop.xlane.xlu0 %2931 }
0x1dd9   :  { %15165 = vpow2.f32 %v2769_v48  ;;  %v2933_v31 = vsub.f32 %v2926_v29, %v2932_v49 }
0x1ddb   :  { %v2934_v51 = vmul.f32 1.442695, %v2933_v31 }
0x1ddc   :  { %v3097_v59 = vpop.xlane.xlu1 %3096 }
0x1ddd   :  { %15167 = vpow2.f32 %v2934_v51  ;;  %v3098_v60 = vsub.f32 %v3091_v18, %v3097_v59 }
0x1ddf   :  { %v3099_v0 = vmul.f32 1.442695, %v3098_v60 }
0x1de0   :  { %v3262_v61 = vpop.xlane.xlu0 %3261 }
0x1de1   :  { %v3263_v63 = vsub.f32 %v3256_v20, %v3262_v61  ;;  %15169 = vpow2.f32 %v3099_v0 }
0x1de3   :  { %v3264_v3 = vmul.f32 1.442695, %v3263_v63 }
0x1de4   :  { %v3427_v62 = vpop.xlane.xlu1 %3426 }
0x1de5   :  { %v15164_v52 = vpop.eup %15163  ;;  %v3428_v1 = vsub.f32 %v3421_v21, %v3427_v62  ;;  %15171 = vpow2.f32 %v3264_v3 }
0x1de6   :  { %v17163_v53 = vpop.eup %15165  ;;  %v2606_v55 = vsel %vm2599_vm11, %v15164_v52, 0.0 }
0x1de7   :  { %2607 = vadd.xlane.f32.xlu0 %v2606_v55  ;;  %v2771_v56 = vsel %vm2599_vm11, %v17163_v53, 0.0  ;;  %v3429_v4 = vmul.f32 1.442695, %v3428_v1 }
0x1de8   :  { %2772 = vadd.xlane.f32.xlu1 %v2771_v56  ;;  %v3592_v2 = vpop.xlane.xlu0 %3591  ;;  %v2942_v7 = vpop.permute.xlu1 %2941 }
0x1de9   :  { %v3593_v5 = vsub.f32 %v3586_v28, %v3592_v2  ;;  %15173 = vpow2.f32 %v3429_v4 }
0x1dea   :  { %v17168_v57 = vpop.eup %15167 }
0x1deb   :  { %v2936_v58 = vsel %vm2599_vm11, %v17168_v57, 0.0  ;;  %v3594_v6 = vmul.f32 1.442695, %v3593_v5 }
0x1dec   :  { %2937 = vadd.xlane.f32.xlu0 %v2936_v58  ;;  %v2777_v14 = vpop.permute.xlu0 %2776 }
0x1ded   :  { %15175 = vpow2.f32 %v3594_v6 }
0x1dee   :  { %v15170_v10 = vpop.eup %15169 }
0x1def   :  { %v3101_v17 = vsel %vm2599_vm11, %v15170_v10, 0.0 }
0x1df2   :  { %v17176_v29 = vpop.eup %15171 }
0x1df3   :  { %v3266_v19 = vsel %vm2599_vm11, %v17176_v29, 0.0 }
0x1df6   :  { %v17179_v18 = vpop.eup %15173 }
0x1df7   :  { %v3431_v11 = vsel %vm2599_vm11, %v17179_v18, 0.0 }
0x1df9   :  { %3271 = vrot.lane.b32.xlu1 %v17080_v50, %s18365_s22 }
0x1dfa   :  { %v17185_v20 = vpop.eup %15175 }
0x1dfb   :  { %v3596_v13 = vsel %vm2599_vm11, %v17185_v20, 0.0 }
0x1e02   :  { %3436 = vrot.lane.b32.xlu0 %v17080_v50, %s18367_s28 }
0x1e19   :  { %v3757_v12 = vpop.xlane.xlu1 %3756 }
0x1e1a   :  { %v3758_v15 = vsub.f32 %v3751_v33, %v3757_v12  ;;  %v2516_v12 = vld [vmem:[%s18475_s30 + $0x10] sm:$0xff] }
0x1e1c   :  { %v3759_v16 = vmul.f32 1.442695, %v3758_v15  ;;  %v2515_v15 = vld [vmem:[%s18475_s30 + $0x8] sm:$0xff] }
0x1e1d   :  { %3102 = vadd.xlane.f32.xlu1 %v3101_v17  ;;  %v3107_v25 = vpop.permute.xlu1 %3106  ;;  %v2514_v17 = vld [vmem:[%s18475_s30] sm:$0xff] }
0x1e1e   :  { %15177 = vpow2.f32 %v3759_v16 }
0x1e21   :  { %3267 = vadd.xlane.f32.xlu0 %v3266_v19  ;;  %3432 = vadd.xlane.f32.xlu1 %v3431_v11 }
0x1e25   :  { %3597 = vadd.xlane.f32.xlu0 %v3596_v13 }
0x1e2b   :  { %v17189_v54 = vpop.eup %15177 }
0x1e2c   :  { %v3761_v21 = vsel %vm2599_vm11, %v17189_v54, 0.0 }
0x1e2d   :  { %3762 = vadd.xlane.f32.xlu0 %v3761_v21 }
0x1e32   :  { %3601 = vrot.lane.b32.xlu1 %v17080_v50, %s18363_s19  ;;  %s18375_s19 = smov 28  }
0x1e43   :  { %3766 = vrot.lane.b32.xlu0 %v17080_v50, %s18355_s25  ;;  %s18361_s25 = smov 12  }
0x1e70   :  { %v2608_v28 = vpop.xlane.xlu0 %2607 }
0x1e71   :  { %15179 = vrcp.f32 %v2608_v28  ;;  %v2773_v30 = vpop.xlane.xlu1 %2772 }
0x1e72   :  { %15181 = vrcp.f32 %v2773_v30 }
0x1e75   :  { %v2938_v32 = vpop.xlane.xlu0 %2937  ;;  %v3272_v45 = vpop.permute.xlu1 %3271 }
0x1e76   :  { %15183 = vrcp.f32 %v2938_v32 }
0x1e79   :  { %v3437_v46 = vpop.permute.xlu0 %3436 }
0x1e7e   :  { %v15180_v33 = vpop.eup %15179 }
0x1e7f   :  { %v2610_v35 = vmul.f32 %v15180_v33, %v15164_v52  ;;  %v15182_v40 = vpop.eup %15181 }
0x1e80   :  { %v2775_v50 = vmul.f32 %v15182_v40, %v17163_v53 }
0x1e81   :  { %14195 = vmatmul.mubr.msk.f32.vlgmr.msra.gmra.mxu0 %vm2599_vm11, %v2610_v35 }
0x1e82   :  { %14203 = vmatpush3.msra.mxu0 %v2777_v14  ;;  %14204 = vmatprep.mubr.msk.f32.mxu0 %vm16383_vm1, %v16382_v8 }
0x1e83   :  { %14212 = vmatprep.subr.mxu0 %v16382_v8  ;;  %v15184_v41 = vpop.eup %15183 }
0x1e84   :  { %v2940_v43 = vmul.f32 %v15184_v41, %v17168_v57 }
0x1e85   :  { %14205 = vmatmul.mubr.msk.f32.vlgmr.msra.gmra.mxu0 %vm2599_vm11, %v2775_v50 }
0x1e86   :  { %14213 = vmatpush3.msra.mxu0 %v2942_v7  ;;  %14214 = vmatprep.mubr.msk.f32.mxu0 %vm16383_vm1, %v16382_v8  ;;  %v2517_v7 = vld [vmem:[%s18475_s30 + $0x18] sm:$0xff] }
0x1e87   :  { %14222 = vmatprep.subr.mxu0 %v16382_v8  ;;  %14268 = vmatpush3.msra.mxu1 %v2517_v7 }
0x1e88   :  { %14269 = vmatprep.subr.mxu1 %v16382_v8 }
0x1e89   :  { %14215 = vmatmul.mubr.msk.f32.vlgmr.msra.gmra.mxu0 %vm2599_vm11, %v2940_v43  ;;  %14270 = vmatpush3.msra.mxu1 %v2516_v12  ;;  %v4078_v12 = vld [vmem:[#allocation28 + $0x10] sm:$0xff] }
0x1e8a   :  { %14223 = vmatpush3.msra.mxu0 %v3107_v25  ;;  %14224 = vmatprep.mubr.msk.f32.mxu0 %vm16383_vm1, %v16382_v8 }
0x1e8b   :  { %14232 = vmatprep.subr.mxu0 %v16382_v8  ;;  %14271 = vmatprep.subr.mxu1 %v16382_v8 }
0x1e8c   :  { %14272 = vmatpush3.msra.mxu1 %v2515_v15  ;;  %v4077_v15 = vld [vmem:[#allocation28 + $0x8] sm:$0xff] }
0x1e8d   :  { %14273 = vmatprep.subr.mxu1 %v16382_v8 }
0x1e8e   :  { %14274 = vmatpush3.msra.mxu1 %v2514_v17 }
0x1e8f   :  { %14289 = vmatprep.subr.mxu1 %v16382_v8 }
0x1ea6   :  { %v3103_v47 = vpop.xlane.xlu1 %3102 }
0x1ea7   :  { %15185 = vrcp.f32 %v3103_v47 }
0x1eaa   :  { %v3268_v48 = vpop.xlane.xlu0 %3267  ;;  %v3433_v49 = vpop.xlane.xlu1 %3432 }
0x1eab   :  { %15187 = vrcp.f32 %v3268_v48  ;;  %v13403_v48 = vld [vmem:[#allocation21] ss:$0 sm:$0xff] }
0x1eac   :  { %15189 = vrcp.f32 %v3433_v49 }
0x1eae   :  { %v3598_v31 = vpop.xlane.xlu0 %3597  ;;  %v3602_v60 = vpop.permute.xlu1 %3601 }
0x1eaf   :  { %15191 = vrcp.f32 %v3598_v31 }
0x1eb4   :  { %v15186_v51 = vpop.eup %15185 }
0x1eb5   :  { %v3105_v52 = vmul.f32 %v15186_v51, %v15170_v10 }
0x1eb6   :  { %v3763_v53 = vpop.xlane.xlu0 %3762 }
0x1eb7   :  { %15193 = vrcp.f32 %v3763_v53  ;;  %14225 = vmatmul.mubr.msk.f32.vlgmr.msra.gmra.mxu0 %vm2599_vm11, %v3105_v52 }
0x1eb8   :  { %v15188_v55 = vpop.eup %15187  ;;  %14233 = vmatpush3.msra.mxu0 %v3272_v45  ;;  %14234 = vmatprep.mubr.msk.f32.mxu0 %vm16383_vm1, %v16382_v8 }
0x1eb9   :  { %14242 = vmatprep.subr.mxu0 %v16382_v8  ;;  %v3270_v56 = vmul.f32 %v15188_v55, %v17176_v29  ;;  %v15190_v57 = vpop.eup %15189 }
0x1eba   :  { %v3435_v58 = vmul.f32 %v15190_v57, %v17179_v18  ;;  %v3767_v62 = vpop.permute.xlu0 %3766 }
0x1ebb   :  { %14235 = vmatmul.mubr.msk.f32.vlgmr.msra.gmra.mxu0 %vm2599_vm11, %v3270_v56 }
0x1ebc   :  { %14243 = vmatpush3.msra.mxu0 %v3437_v46  ;;  %14244 = vmatprep.mubr.msk.f32.mxu0 %vm16383_vm1, %v16382_v8  ;;  %v15192_v59 = vpop.eup %15191 }
0x1ebd   :  { %14252 = vmatprep.subr.mxu0 %v16382_v8  ;;  %v3600_v61 = vmul.f32 %v15192_v59, %v17185_v20 }
0x1ebf   :  { %14245 = vmatmul.mubr.msk.f32.vlgmr.msra.gmra.mxu0 %vm2599_vm11, %v3435_v58 }
0x1ec0   :  { %14253 = vmatpush3.msra.mxu0 %v3602_v60  ;;  %14254 = vmatprep.mubr.msk.f32.mxu0 %vm16383_vm1, %v16382_v8  ;;  %v3994_v60 = vld [vmem:[#allocation25 + $0x18] sm:$0xff] }
0x1ec1   :  { %14262 = vmatprep.subr.mxu0 %v16382_v8 }
0x1ec3   :  { %14255 = vmatmul.mubr.msk.f32.vlgmr.msra.gmra.mxu0 %vm2599_vm11, %v3600_v61  ;;  %v3993_v61 = vld [vmem:[#allocation25 + $0x10] sm:$0xff] }
0x1ec4   :  { %v15194_v63 = vpop.eup %15193  ;;  %14263 = vmatpush3.msra.mxu0 %v3767_v62  ;;  %14264 = vmatprep.mubr.msk.f32.mxu0 %vm16383_vm1, %v16382_v8  ;;  %v3992_v62 = vld [vmem:[#allocation25 + $0x8] sm:$0xff] }
0x1ec5   :  { %v3765_v0 = vmul.f32 %v15194_v63, %v17189_v54  ;;  %14278 = vmatprep.subr.mxu0 %v16382_v8  ;;  %v4079_v63 = vld [vmem:[#allocation28 + $0x18] sm:$0xff] }
0x1ec7   :  { %14265 = vmatmul.mubr.msk.f32.vlgmr.msra.gmra.mxu0 %vm2599_vm11, %v3765_v0 }
0x1ec8   :  { %14286 = vmatprep.mubr.msk.f32.mxu0 %vm16383_vm1, %v16382_v8  ;;  %14279 = vmatpush3.msra.mxu0 %v3994_v60 }
0x1ec9   :  { %14280 = vmatprep.subr.mxu0 %v16382_v8 }
0x1eca   :  { %14281 = vmatpush3.msra.mxu0 %v3993_v61 }
0x1ecb   :  { %14282 = vmatprep.subr.mxu0 %v16382_v8 }
0x1ecc   :  { %14283 = vmatpush3.msra.mxu0 %v3992_v62 }
0x1ecd   :  { %14284 = vmatprep.subr.mxu0 %v16382_v8 }
0x1f41   :  { %v2683_v1 = vpop.f32.mrf.mxu0 }
0x1f43   :  { %v14196_v2 = vpop.f32.mrf.mxu0 }
0x1f45   :  { %v2848_v3 = vpop.f32.mrf.mxu0 }
0x1f46   :  { %3843 = vrot.lane.b32.xlu1 %v2848_v3, %s18359_s1  ;;  %s16411_s1 = smov 20  }
0x1f47   :  { %v14206_v4 = vpop.f32.mrf.mxu0 }
0x1f48   :  { %v13405_v4 = vld [vmem:[#allocation22] ss:$0 sm:$0xff] }
0x1f49   :  { %v3013_v5 = vpop.f32.mrf.mxu0 }
0x1f4a   :  { %3847 = vrot.lane.b32.xlu0 %v3013_v5, %s18357_s26  ;;  %s16410_s26 = smov 16  }
0x1f4b   :  { %v14216_v6 = vpop.f32.mrf.mxu0 }
0x1f4c   :  { %v13406_v6 = vld [vmem:[#allocation24] ss:$0 sm:$0xff] }
0x1f77   :  { %v3178_v10 = vpop.f32.mrf.mxu0 }
0x1f78   :  { %3851 = vrot.lane.b32.xlu1 %v3178_v10, %s18361_s25  ;;  %s18377_s25 = smov 24  }
0x1f79   :  { %v14226_v29 = vpop.f32.mrf.mxu0 }
0x1f7a   :  { %v4076_v29 = vld [vmem:[#allocation28] sm:$0xff] }
0x1f7b   :  { %v3343_v16 = vpop.f32.mrf.mxu0 }
0x1f7c   :  { %3855 = vrot.lane.b32.xlu0 %v3343_v16, %s16410_s26  ;;  %v13407_v16 = vld [vmem:[#allocation27] ss:$0 sm:$0xff] }
0x1f7d   :  { %v14236_v18 = vpop.f32.mrf.mxu0 }
0x1f7f   :  { %v3508_v19 = vpop.f32.mrf.mxu0 }
0x1f80   :  { %3859 = vrot.lane.b32.xlu1 %v3508_v19, %s16411_s1 }
0x1f81   :  { %v14246_v11 = vpop.f32.mrf.mxu0 }
0x1f83   :  { %v3673_v20 = vpop.f32.mrf.mxu0 }
0x1f84   :  { %3863 = vrot.lane.b32.xlu0 %v3673_v20, %s18377_s25  ;;  %v13409_v20 = vld [vmem:[#allocation30] ss:$0 sm:$0xff] }
0x1f85   :  { %v14256_v13 = vpop.f32.mrf.mxu0 }
0x1f87   :  { %v3838_v54 = vpop.f32.mrf.mxu0 }
0x1f88   :  { %3867 = vrot.lane.b32.xlu1 %v3838_v54, %s18375_s19 }
0x1f89   :  { %v14266_v21 = vpop.f32.mrf.mxu0 }
0x1fb8   :  { %v3844_v14 = vpop.permute.xlu1 %3843 }
0x1fb9   :  { %v3870_v32 = vsel %vm2523_vm10, %v2683_v1, %v3844_v14 }
0x1fbc   :  { %v3848_v25 = vpop.permute.xlu0 %3847 }
0x1fbd   :  { %v3871_v33 = vsel %vm2599_vm11, %v3870_v32, %v3848_v25 }
0x1fea   :  { %v3852_v28 = vpop.permute.xlu1 %3851 }
0x1feb   :  { %v3873_v40 = vsel %vm3872_vm12, %v3871_v33, %v3852_v28 }
0x1fee   :  { %v3856_v30 = vpop.permute.xlu0 %3855 }
0x1fef   :  { %v3874_v41 = vsel %vm775_vm0, %v3873_v40, %v3856_v30  ;;  %v4193_v40 = vld [vmem:[#allocation34 + $0x18] sm:$0xff] }
0x1ff2   :  { %v3860_v35 = vpop.permute.xlu1 %3859 }
0x1ff3   :  { %v3876_v43 = vsel %vm3875_vm13, %v3874_v41, %v3860_v35  ;;  %v4191_v41 = vld [vmem:[#allocation34 + $0x8] sm:$0xff] }
0x1ff6   :  { %v3864_v50 = vpop.permute.xlu0 %3863 }
0x1ff7   :  { %v3878_v45 = vsel %vm3877_vm14, %v3876_v43, %v3864_v50  ;;  %v4192_v50 = vld [vmem:[#allocation34 + $0x10] sm:$0xff]  ;;  %v4190_v43 = vld [vmem:[#allocation34] sm:$0xff] }
0x1ffa   :  { %v3868_v46 = vpop.permute.xlu1 %3867 }
0x1ffb   :  { %v3880_v47 = vsel %vm3879_vm15, %v3878_v45, %v3868_v46 }
0x1ffc   :  { %14276 = vmatmul.mubr.msk.f32.vlgmr.msra.gmra.mxu1 %vm956_vm2, %v3880_v47 }
0x1ffd   :  { %14297 = vmatprep.mubr.msk.f32.mxu1 %vm16383_vm1, %v16382_v8  ;;  %14290 = vmatpush3.msra.mxu1 %v4079_v63 }
0x1ffe   :  { %14291 = vmatprep.subr.mxu1 %v16382_v8 }
0x1fff   :  { %14292 = vmatpush3.msra.mxu1 %v4078_v12 }
0x2000   :  { %14293 = vmatprep.subr.mxu1 %v16382_v8 }
0x2001   :  { %14294 = vmatpush3.msra.mxu1 %v4077_v15 }
0x2002   :  { %14295 = vmatprep.subr.mxu1 %v16382_v8 }
0x2003   :  { %14296 = vmatpush3.msra.mxu1 %v4076_v29 }
0x2004   :  { %14311 = vmatprep.subr.mxu1 %v16382_v8 }
0x20bc   :  { %v3956_v49 = vpop.f32.mrf.mxu1 }
0x20bd   :  { %v3957_v31 = vadd.f32 %v13403_v48, %v3956_v49  ;;  %v13411_v49 = vld [vmem:[#allocation31] ss:$0 sm:$0xff] }
0x20be   :  { %v14277_v51 = vpop.f32.mrf.mxu1 }
0x20bf   :  { %v3962_v52 = vadd.f32 %v3957_v31, %v17040_v26  ;;  %v3991_v26 = vld [vmem:[#allocation25] sm:$0xff] }
0x20c0   :  { %14285 = vmatpush3.msra.mxu0 %v3991_v26  ;;  %v13412_v51 = vld [vmem:[#allocation33] ss:$0 sm:$0xff] }
0x20c1   :  { %v3963_v53 = vsel %vm956_vm2, %v3962_v52, 0.0  ;;  %14300 = vmatprep.subr.mxu0 %v16382_v8 }
0x20c2   :  { %3964 = vadd.xlane.f32.xlu0 %v3963_v53 }
0x214b   :  { %v3965_v55 = vpop.xlane.xlu0 %3964 }
0x214c   :  { %v3967_v56 = vmul.f32 0.03125, %v3965_v55  ;;  %v13413_v55 = vld [vmem:[#allocation36] ss:$0 sm:$0xff] }
0x214e   :  { %v3968_v57 = vsub.f32 %v3962_v52, %v3967_v56 }
0x2150   :  { %v3969_v58 = vmul.f32 %v3968_v57, %v3968_v57 }
0x2152   :  { %v3970_v59 = vsel %vm956_vm2, %v3969_v58, 0.0 }
0x2153   :  { %3971 = vadd.xlane.f32.xlu1 %v3970_v59 }
0x21dc   :  { %v3972_v0 = vpop.xlane.xlu1 %3971 }
0x21dd   :  { %v3973_v1 = vmul.f32 0.03125, %v3972_v0 }
0x21df   :  { %v3974_v2 = vadd.f32 1e-05, %v3973_v1 }
0x21e1   :  { %15195 = vrsqrt.f32 %v3974_v2 }
0x21ee   :  { %v15196_v3 = vpop.eup %15195 }
0x21ef   :  { %v3976_v5 = vmul.f32 %v15196_v3, %v3968_v57 }
0x21f1   :  { %v3983_v7 = vmul.f32 %v13405_v4, %v3976_v5 }
0x21f3   :  { %v3990_v10 = vadd.f32 %v13406_v6, %v3983_v7 }
0x21f5   :  { %14287 = vmatmul.mubr.msk.f32.vlgmr.msra.gmra.mxu0 %vm956_vm2, %v3990_v10 }
0x21f6   :  { %14308 = vmatprep.mubr.msk.f32.mxu0 %vm16383_vm1, %v16382_v8  ;;  %14301 = vmatpush3.msra.mxu0 %v4193_v40 }
0x21f7   :  { %14302 = vmatprep.subr.mxu0 %v16382_v8 }
0x21f8   :  { %14303 = vmatpush3.msra.mxu0 %v4192_v50 }
0x21f9   :  { %14304 = vmatprep.subr.mxu0 %v16382_v8 }
0x21fa   :  { %14305 = vmatpush3.msra.mxu0 %v4191_v41 }
0x21fb   :  { %14306 = vmatprep.subr.mxu0 %v16382_v8 }
0x21fc   :  { %14307 = vmatpush3.msra.mxu0 %v4190_v43 }
0x21fd   :  { %14316 = vmatprep.subr.mxu0 %v16382_v8 }
0x22b5   :  { %v4071_v17 = vpop.f32.mrf.mxu0 }
0x22b6   :  { %v4072_v18 = vadd.f32 %v13407_v16, %v4071_v17 }
0x22b7   :  { %v14288_v19 = vpop.f32.mrf.mxu0 }
0x22b8   :  { %v4075_v11 = vmax.f32 %v4072_v18, 0.0 }
0x22ba   :  { %14298 = vmatmul.mubr.msk.f32.vlgmr.msra.gmra.mxu1 %vm956_vm2, %v4075_v11 }
0x22bb   :  { %14313 = vmatprep.mubr.msk.f32.mxu1 %vm16383_vm1, %v16382_v8 }
0x237a   :  { %v4156_v13 = vpop.f32.mrf.mxu1 }
0x237b   :  { %v4157_v54 = vadd.f32 %v13409_v20, %v4156_v13 }
0x237c   :  { %v14299_v21 = vpop.f32.mrf.mxu1 }
0x237d   :  { %v4162_v14 = vadd.f32 %v4157_v54, %v3990_v10 }
0x237f   :  { %v4163_v25 = vsel %vm956_vm2, %v4162_v14, 0.0 }
0x2380   :  { %4164 = vadd.xlane.f32.xlu0 %v4163_v25 }
0x2409   :  { %v4165_v28 = vpop.xlane.xlu0 %4164 }
0x240a   :  { %v4166_v30 = vmul.f32 0.03125, %v4165_v28 }
0x240c   :  { %v4167_v32 = vsub.f32 %v4162_v14, %v4166_v30 }
0x240e   :  { %v4168_v33 = vmul.f32 %v4167_v32, %v4167_v32 }
0x2410   :  { %v4169_v35 = vsel %vm956_vm2, %v4168_v33, 0.0 }
0x2411   :  { %4170 = vadd.xlane.f32.xlu0 %v4169_v35 }
0x249a   :  { %v4171_v45 = vpop.xlane.xlu0 %4170 }
0x249b   :  { %v4172_v46 = vmul.f32 0.03125, %v4171_v45 }
0x249d   :  { %v4173_v47 = vadd.f32 1e-05, %v4172_v46 }
0x249f   :  { %15197 = vrsqrt.f32 %v4173_v47 }
0x24ac   :  { %v15198_v48 = vpop.eup %15197 }
0x24ad   :  { %v4175_v31 = vmul.f32 %v15198_v48, %v4167_v32 }
0x24af   :  { %v4182_v52 = vmul.f32 %v13411_v49, %v4175_v31 }
0x24b1   :  { %v17282_v53 = vadd.f32 %v13412_v51, %v4182_v52 }
0x24b3   :  { %14309 = vmatmul.mubr.msk.f32.vlgmr.msra.gmra.mxu0 %vm956_vm2, %v17282_v53 }
0x24b4   :  { %14318 = vmatprep.mubr.msk.f32.mxu0 %vm16383_vm1, %v16382_v8 }
0x2573   :  { %v4270_v56 = vpop.f32.mrf.mxu0 }
0x2574   :  { %v17288_v57 = vadd.f32 %v13413_v55, %v4270_v56 }
0x2575   :  { %v14310_v58 = vpop.f32.mrf.mxu0 }
0x2576   :  { %4447 = vrot.lane.b32.xlu0 %v17288_v57, %s18390_s7  ;;  %4281 = vrot.lane.b32.xlu1 %v17288_v57, %s18393_s10  ;;  %v4279_v59 = vmul.f32 0.5, %v17288_v57 }
0x257a   :  { %4610 = vrot.lane.b32.xlu0 %v4279_v59, %s16391_s12  ;;  %4445 = vrot.lane.b32.xlu1 %v4279_v59, %s16389_s11 }
0x257e   :  { %4775 = vrot.lane.b32.xlu0 %v4279_v59, %s16393_s27  ;;  %4612 = vrot.lane.b32.xlu1 %v17288_v57, %s18391_s6 }
0x2582   :  { %4940 = vrot.lane.b32.xlu0 %v4279_v59, %s16395_s29  ;;  %4777 = vrot.lane.b32.xlu1 %v17288_v57, %s18392_s23 }
0x2586   :  { %5105 = vrot.lane.b32.xlu0 %v4279_v59, %s18386_s0  ;;  %4942 = vrot.lane.b32.xlu1 %v17288_v57, %s18395_s9 }
0x258a   :  { %5270 = vrot.lane.b32.xlu0 %v4279_v59, %s18382_s15  ;;  %5107 = vrot.lane.b32.xlu1 %v17288_v57, %s16394_s17 }
0x258e   :  { %5435 = vrot.lane.b32.xlu0 %v4279_v59, %s18379_s16  ;;  %5272 = vrot.lane.b32.xlu1 %v17288_v57, %s18388_s14 }
0x2592   :  { %5437 = vrot.lane.b32.xlu1 %v17288_v57, %s18384_s3 }
0x2596   :  { %4369 = vrot.lane.b32.xlu1 %v17288_v57, %s18381_s8 }
0x25e8   :  { %v4448_v60 = vpop.permute.xlu0 %4447  ;;  %v4282_v61 = vpop.permute.xlu1 %4281 }
0x25e9   :  { %14312 = vmatpush3.xpose.msk.msra.mxu1 %vm2523_vm10, %v4282_v61 }
0x25ea   :  { %14321 = vmatprep.subr.mxu1 %v16382_v8 }
0x25ec   :  { %v4611_v62 = vpop.permute.xlu0 %4610  ;;  %v4446_v26 = vpop.permute.xlu1 %4445  ;;  %14314 = vmatmul.mubr.msk.f32.vlgmr.msra.gmra.mxu1 %vm2523_vm10, %v4279_v59 }
0x25ed   :  { %14322 = vmatpush3.xpose.msk.msra.mxu1 %vm2523_vm10, %v4448_v60  ;;  %14323 = vmatprep.mubr.msk.f32.mxu1 %vm16383_vm1, %v16382_v8 }
0x25ee   :  { %14331 = vmatprep.subr.mxu1 %v16382_v8 }
0x25f0   :  { %v4776_v63 = vpop.permute.xlu0 %4775  ;;  %v4613_v0 = vpop.permute.xlu1 %4612  ;;  %14324 = vmatmul.mubr.msk.f32.vlgmr.msra.gmra.mxu1 %vm2523_vm10, %v4446_v26 }
0x25f1   :  { %14332 = vmatpush3.xpose.msk.msra.mxu1 %vm2523_vm10, %v4613_v0  ;;  %14333 = vmatprep.mubr.msk.f32.mxu1 %vm16383_vm1, %v16382_v8 }
0x25f2   :  { %14341 = vmatprep.subr.mxu1 %v16382_v8 }
0x25f4   :  { %v4778_v1 = vpop.permute.xlu1 %4777  ;;  %14334 = vmatmul.mubr.msk.f32.vlgmr.msra.gmra.mxu1 %vm2523_vm10, %v4611_v62  ;;  %v4941_v2 = vpop.permute.xlu0 %4940 }
0x25f5   :  { %14342 = vmatpush3.xpose.msk.msra.mxu1 %vm2523_vm10, %v4778_v1  ;;  %14343 = vmatprep.mubr.msk.f32.mxu1 %vm16383_vm1, %v16382_v8 }
0x25f6   :  { %14351 = vmatprep.subr.mxu1 %v16382_v8 }
0x25f8   :  { %v4943_v3 = vpop.permute.xlu1 %4942  ;;  %14344 = vmatmul.mubr.msk.f32.vlgmr.msra.gmra.mxu1 %vm2523_vm10, %v4776_v63  ;;  %v5106_v4 = vpop.permute.xlu0 %5105 }
0x25f9   :  { %14352 = vmatpush3.xpose.msk.msra.mxu1 %vm2523_vm10, %v4943_v3  ;;  %14353 = vmatprep.mubr.msk.f32.mxu1 %vm16383_vm1, %v16382_v8 }
0x25fa   :  { %14361 = vmatprep.subr.mxu1 %v16382_v8 }
0x25fc   :  { %v5108_v5 = vpop.permute.xlu1 %5107  ;;  %14354 = vmatmul.mubr.msk.f32.vlgmr.msra.gmra.mxu1 %vm2523_vm10, %v4941_v2  ;;  %v5271_v7 = vpop.permute.xlu0 %5270 }
0x25fd   :  { %14362 = vmatpush3.xpose.msk.msra.mxu1 %vm2523_vm10, %v5108_v5  ;;  %14363 = vmatprep.mubr.msk.f32.mxu1 %vm16383_vm1, %v16382_v8 }
0x25fe   :  { %14371 = vmatprep.subr.mxu1 %v16382_v8 }
0x2600   :  { %v5273_v6 = vpop.permute.xlu1 %5272  ;;  %14364 = vmatmul.mubr.msk.f32.vlgmr.msra.gmra.mxu1 %vm2523_vm10, %v5106_v4  ;;  %v5436_v12 = vpop.permute.xlu0 %5435 }
0x2601   :  { %14372 = vmatpush3.xpose.msk.msra.mxu1 %vm2523_vm10, %v5273_v6  ;;  %14373 = vmatprep.mubr.msk.f32.mxu1 %vm16383_vm1, %v16382_v8 }
0x2602   :  { %14381 = vmatprep.subr.mxu1 %v16382_v8 }
0x2604   :  { %v5438_v10 = vpop.permute.xlu1 %5437  ;;  %14374 = vmatmul.mubr.msk.f32.vlgmr.msra.gmra.mxu1 %vm2523_vm10, %v5271_v7 }
0x2605   :  { %14382 = vmatpush3.xpose.msk.msra.mxu1 %vm2523_vm10, %v5438_v10  ;;  %14383 = vmatprep.mubr.msk.f32.mxu1 %vm16383_vm1, %v16382_v8 }
0x2606   :  { %14391 = vmatprep.subr.mxu1 %v16382_v8 }
0x2608   :  { %v4370_v15 = vpop.permute.xlu1 %4369  ;;  %14384 = vmatmul.mubr.msk.f32.vlgmr.msra.gmra.mxu1 %vm2523_vm10, %v5436_v12 }
0x2609   :  { %14317 = vmatpush3.msra.mxu0 %v4370_v15  ;;  %14399 = vmatprep.mubr.msk.f32.mxu1 %vm16383_vm1, %v16382_v8 }
0x260a   :  { %14326 = vmatprep.subr.mxu0 %v16382_v8 }
0x26ac   :  { %v4354_v29 = vpop.f32.mrf.mxu1 }
0x26ad   :  { %v4358_v16 = vsel %vm2599_vm11, %v4354_v29, -inf }
0x26ae   :  { %4359 = vmax.xlane.f32.xlu1 %v4358_v16  ;;  %v14315_v17 = vpop.f32.mrf.mxu1 }
0x26b0   :  { %v4519_v18 = vpop.f32.mrf.mxu1 }
0x26b1   :  { %v4523_v19 = vsel %vm2599_vm11, %v4519_v18, -inf }
0x26b2   :  { %4524 = vmax.xlane.f32.xlu0 %v4523_v19  ;;  %v14325_v11 = vpop.f32.mrf.mxu1 }
0x26b4   :  { %v4684_v20 = vpop.f32.mrf.mxu1 }
0x26b5   :  { %v4688_v13 = vsel %vm2599_vm11, %v4684_v20, -inf }
0x26b6   :  { %4689 = vmax.xlane.f32.xlu0 %v4688_v13  ;;  %v14335_v54 = vpop.f32.mrf.mxu1 }
0x26b8   :  { %v4849_v21 = vpop.f32.mrf.mxu1 }
0x26b9   :  { %v4853_v14 = vsel %vm2599_vm11, %v4849_v21, -inf }
0x26ba   :  { %4854 = vmax.xlane.f32.xlu1 %v4853_v14  ;;  %v14345_v25 = vpop.f32.mrf.mxu1 }
0x26bc   :  { %v5014_v28 = vpop.f32.mrf.mxu1 }
0x26bd   :  { %v5018_v30 = vsel %vm2599_vm11, %v5014_v28, -inf }
0x26be   :  { %5019 = vmax.xlane.f32.xlu0 %v5018_v30  ;;  %v14355_v32 = vpop.f32.mrf.mxu1 }
0x26c0   :  { %v5179_v33 = vpop.f32.mrf.mxu1 }
0x26c1   :  { %v5183_v35 = vsel %vm2599_vm11, %v5179_v33, -inf }
0x26c2   :  { %5184 = vmax.xlane.f32.xlu1 %v5183_v35  ;;  %v14365_v40 = vpop.f32.mrf.mxu1 }
0x26c4   :  { %v5344_v50 = vpop.f32.mrf.mxu1 }
0x26c5   :  { %v5348_v41 = vsel %vm2599_vm11, %v5344_v50, -inf }
0x26c6   :  { %5349 = vmax.xlane.f32.xlu0 %v5348_v41  ;;  %v14375_v43 = vpop.f32.mrf.mxu1 }
0x26c8   :  { %v5509_v45 = vpop.f32.mrf.mxu1 }
0x26c9   :  { %v5513_v47 = vsel %vm2599_vm11, %v5509_v45, -inf }
0x26ca   :  { %v14385_v46 = vpop.f32.mrf.mxu1 }
0x26d3   :  { %4699 = vrot.lane.b32.xlu1 %v17288_v57, %s18369_s20  ;;  %s18478_s20 = smov 4  }
0x26dc   :  { %4534 = vrot.lane.b32.xlu0 %v17288_v57, %s18373_s4  ;;  %s18480_s4 = smov 12  }
0x26f7   :  { %5514 = vmax.xlane.f32.xlu1 %v5513_v47 }
0x2708   :  { %4864 = vrot.lane.b32.xlu1 %v17288_v57, %s18371_s18  ;;  %s18479_s18 = smov 8  }
0x2737   :  { %v4360_v48 = vpop.xlane.xlu1 %4359 }
0x2738   :  { %v4361_v49 = vsub.f32 %v4354_v29, %v4360_v48 }
0x273a   :  { %v4362_v31 = vmul.f32 1.442695, %v4361_v49 }
0x273b   :  { %v4525_v51 = vpop.xlane.xlu0 %4524 }
0x273c   :  { %15199 = vpow2.f32 %v4362_v31  ;;  %v4526_v52 = vsub.f32 %v4519_v18, %v4525_v51 }
0x273e   :  { %v4527_v55 = vmul.f32 1.442695, %v4526_v52 }
0x273f   :  { %v4690_v56 = vpop.xlane.xlu0 %4689 }
0x2740   :  { %15201 = vpow2.f32 %v4527_v55  ;;  %v4691_v58 = vsub.f32 %v4684_v20, %v4690_v56 }
0x2742   :  { %v4692_v59 = vmul.f32 1.442695, %v4691_v58 }
0x2743   :  { %v4855_v1 = vpop.xlane.xlu1 %4854 }
0x2744   :  { %15203 = vpow2.f32 %v4692_v59  ;;  %v4856_v2 = vsub.f32 %v4849_v21, %v4855_v1 }
0x2746   :  { %v4857_v6 = vmul.f32 1.442695, %v4856_v2 }
0x2747   :  { %v5020_v3 = vpop.xlane.xlu0 %5019 }
0x2748   :  { %v5021_v5 = vsub.f32 %v5014_v28, %v5020_v3  ;;  %15205 = vpow2.f32 %v4857_v6 }
0x2749   :  { %v15200_v60 = vpop.eup %15199 }
0x274a   :  { %v4364_v61 = vsel %vm2599_vm11, %v15200_v60, 0.0  ;;  %v5022_v12 = vmul.f32 1.442695, %v5021_v5 }
0x274b   :  { %4365 = vadd.xlane.f32.xlu0 %v4364_v61  ;;  %v5185_v4 = vpop.xlane.xlu1 %5184 }
0x274c   :  { %v5186_v7 = vsub.f32 %v5179_v33, %v5185_v4  ;;  %15207 = vpow2.f32 %v5022_v12 }
0x274d   :  { %v15202_v62 = vpop.eup %15201 }
0x274e   :  { %v4529_v26 = vsel %vm2599_vm11, %v15202_v62, 0.0  ;;  %v5187_v15 = vmul.f32 1.442695, %v5186_v7 }
0x274f   :  { %4530 = vadd.xlane.f32.xlu1 %v4529_v26  ;;  %v5350_v10 = vpop.xlane.xlu0 %5349  ;;  %v4700_v17 = vpop.permute.xlu1 %4699 }
0x2750   :  { %v5351_v29 = vsub.f32 %v5344_v50, %v5350_v10  ;;  %15209 = vpow2.f32 %v5187_v15 }
0x2751   :  { %v17373_v63 = vpop.eup %15203 }
0x2752   :  { %v4694_v0 = vsel %vm2599_vm11, %v17373_v63, 0.0  ;;  %v5352_v16 = vmul.f32 1.442695, %v5351_v29 }
0x2753   :  { %4695 = vadd.xlane.f32.xlu0 %v4694_v0  ;;  %v4535_v35 = vpop.permute.xlu0 %4534 }
0x2754   :  { %15211 = vpow2.f32 %v5352_v16 }
0x2755   :  { %v15206_v18 = vpop.eup %15205 }
0x2756   :  { %v4859_v54 = vsel %vm2599_vm11, %v15206_v18, 0.0 }
0x2759   :  { %v17381_v20 = vpop.eup %15207 }
0x275a   :  { %v5024_v14 = vsel %vm2599_vm11, %v17381_v20, 0.0 }
0x275d   :  { %v17384_v21 = vpop.eup %15209 }
0x275e   :  { %v5189_v25 = vsel %vm2599_vm11, %v17384_v21, 0.0 }
0x2760   :  { %5029 = vrot.lane.b32.xlu1 %v17288_v57, %s18365_s22  ;;  %s18476_s22 = smov 40  }
0x2761   :  { %v17390_v28 = vpop.eup %15211 }
0x2762   :  { %v5354_v30 = vsel %vm2599_vm11, %v17390_v28, 0.0 }
0x2769   :  { %5194 = vrot.lane.b32.xlu0 %v17288_v57, %s18367_s28  ;;  %s18477_s28 = smov 36  }
0x2780   :  { %v5515_v19 = vpop.xlane.xlu1 %5514 }
0x2781   :  { %v5516_v11 = vsub.f32 %v5509_v45, %v5515_v19 }
0x2783   :  { %v5517_v13 = vmul.f32 1.442695, %v5516_v11  ;;  %v4275_v11 = vld [vmem:[#allocation37 + $0x8] sm:$0xff] }
0x2784   :  { %4860 = vadd.xlane.f32.xlu1 %v4859_v54  ;;  %v4865_v40 = vpop.permute.xlu1 %4864 }
0x2785   :  { %15213 = vpow2.f32 %v5517_v13 }
0x2788   :  { %5025 = vadd.xlane.f32.xlu0 %v5024_v14  ;;  %5190 = vadd.xlane.f32.xlu1 %v5189_v25 }
0x278c   :  { %5355 = vadd.xlane.f32.xlu0 %v5354_v30 }
0x2792   :  { %v17394_v32 = vpop.eup %15213 }
0x2793   :  { %v5519_v33 = vsel %vm2599_vm11, %v17394_v32, 0.0 }
0x2794   :  { %5520 = vadd.xlane.f32.xlu0 %v5519_v33 }
0x2799   :  { %5359 = vrot.lane.b32.xlu1 %v17288_v57, %s18476_s22 }
0x27aa   :  { %5524 = vrot.lane.b32.xlu0 %v17288_v57, %s18477_s28 }
0x27d4   :  { %v4366_v50 = vpop.xlane.xlu0 %4365 }
0x27d5   :  { %15215 = vrcp.f32 %v4366_v50  ;;  %v2423_v50 = vsel %vm2396_vm6, %v17049_v34, %v2408_v36 }
0x27d8   :  { %v4531_v41 = vpop.xlane.xlu1 %4530 }
0x27d9   :  { %15217 = vrcp.f32 %v4531_v41 }
0x27dc   :  { %v4696_v43 = vpop.xlane.xlu0 %4695  ;;  %v5030_v31 = vpop.permute.xlu1 %5029 }
0x27dd   :  { %15219 = vrcp.f32 %v4696_v43 }
0x27e0   :  { %v5195_v51 = vpop.permute.xlu0 %5194 }
0x27e2   :  { %v15216_v45 = vpop.eup %15215 }
0x27e3   :  { %v4368_v46 = vmul.f32 %v15216_v45, %v15200_v60  ;;  %v2424_v45 = vsel %vm1888_vm3, %v2423_v50, %v2410_v37  ;;  %v13443_v50 = vld [vmem:[#allocation45] ss:$0 sm:$0xff] }
0x27e4   :  { %v2425_v36 = vsel %vm2399_vm7, %v2424_v45, %v2412_v39  ;;  %v5829_v39 = vld [vmem:[#allocation46 + $0x8] sm:$0xff] }
0x27e5   :  { %14319 = vmatmul.mubr.msk.f32.vlgmr.msra.gmra.mxu0 %vm2599_vm11, %v4368_v46 }
0x27e6   :  { %v15218_v47 = vpop.eup %15217  ;;  %14327 = vmatpush3.msra.mxu0 %v4535_v35  ;;  %14328 = vmatprep.mubr.msk.f32.mxu0 %vm16383_vm1, %v16382_v8 }
0x27e7   :  { %14336 = vmatprep.subr.mxu0 %v16382_v8  ;;  %v4533_v57 = vmul.f32 %v15218_v47, %v15202_v62  ;;  %v2415_v47 = vrot.slane %v17053_v38, 4 }
0x27e9   :  { %14329 = vmatmul.mubr.msk.f32.vlgmr.msra.gmra.mxu0 %vm2599_vm11, %v4533_v57 }
0x27ea   :  { %v15220_v48 = vpop.eup %15219  ;;  %14337 = vmatpush3.msra.mxu0 %v4700_v17  ;;  %14338 = vmatprep.mubr.msk.f32.mxu0 %vm16383_vm1, %v16382_v8  ;;  %v4277_v17 = vld [vmem:[#allocation37 + $0x18] sm:$0xff] }
0x27eb   :  { %14346 = vmatprep.subr.mxu0 %v16382_v8  ;;  %v4698_v49 = vmul.f32 %v15220_v48, %v17373_v63  ;;  %14392 = vmatpush3.msra.mxu1 %v4277_v17  ;;  %v5745_v17 = vld [vmem:[#allocation43 + $0x8] sm:$0xff] }
0x27ec   :  { %14393 = vmatprep.subr.mxu1 %v16382_v8 }
0x27ed   :  { %14339 = vmatmul.mubr.msk.f32.vlgmr.msra.gmra.mxu0 %vm2599_vm11, %v4698_v49 }
0x27ee   :  { %14347 = vmatpush3.msra.mxu0 %v4865_v40  ;;  %14348 = vmatprep.mubr.msk.f32.mxu0 %vm16383_vm1, %v16382_v8 }
0x27ef   :  { %14356 = vmatprep.subr.mxu0 %v16382_v8 }
0x280d   :  { %v4861_v52 = vpop.xlane.xlu1 %4860 }
0x280e   :  { %15221 = vrcp.f32 %v4861_v52 }
0x2811   :  { %v5026_v55 = vpop.xlane.xlu0 %5025  ;;  %v5191_v56 = vpop.xlane.xlu1 %5190 }
0x2812   :  { %15223 = vrcp.f32 %v5026_v55 }
0x2813   :  { %15225 = vrcp.f32 %v5191_v56  ;;  %v5831_v56 = vld [vmem:[#allocation46 + $0x18] sm:$0xff] }
0x2815   :  { %v5356_v58 = vpop.xlane.xlu0 %5355  ;;  %v5360_v2 = vpop.permute.xlu1 %5359 }
0x2816   :  { %15227 = vrcp.f32 %v5356_v58  ;;  %v2426_v58 = vsel %vm1890_vm4, %v2425_v36, %v2415_v47 }
0x2817   :  { %v2427_v34 = vsel %vm2402_vm8, %v2426_v58, %v2417_v42  ;;  %v13439_v42 = vld [vmem:[#allocation39] ss:$0 sm:$0xff] }
0x281b   :  { %v15222_v59 = vpop.eup %15221 }
0x281c   :  { %v4863_v60 = vmul.f32 %v15222_v59, %v15206_v18  ;;  %v4276_v18 = vld [vmem:[#allocation37 + $0x10] sm:$0xff] }
0x281d   :  { %v5521_v61 = vpop.xlane.xlu0 %5520  ;;  %14394 = vmatpush3.msra.mxu1 %v4276_v18  ;;  %v5744_v18 = vld [vmem:[#allocation43] sm:$0xff] }
0x281e   :  { %15229 = vrcp.f32 %v5521_v61  ;;  %14349 = vmatmul.mubr.msk.f32.vlgmr.msra.gmra.mxu0 %vm2599_vm11, %v4863_v60  ;;  %14395 = vmatprep.subr.mxu1 %v16382_v8  ;;  %v5830_v60 = vld [vmem:[#allocation46 + $0x10] sm:$0xff]  ;;  %v5828_v61 = vld [vmem:[#allocation46] sm:$0xff] }
0x281f   :  { %v15224_v62 = vpop.eup %15223  ;;  %14357 = vmatpush3.msra.mxu0 %v5030_v31  ;;  %14358 = vmatprep.mubr.msk.f32.mxu0 %vm16383_vm1, %v16382_v8 }
0x2820   :  { %14366 = vmatprep.subr.mxu0 %v16382_v8  ;;  %v5028_v26 = vmul.f32 %v15224_v62, %v17381_v20  ;;  %v15226_v63 = vpop.eup %15225  ;;  %v4274_v20 = vld [vmem:[#allocation37] sm:$0xff]  ;;  %14396 = vmatpush3.msra.mxu1 %v4275_v11  ;;  %v2428_v62 = vsel %vm1892_vm5, %v2427_v34, %v2419_v24 }
0x2821   :  { %v5193_v0 = vmul.f32 %v15226_v63, %v17384_v21  ;;  %v5525_v4 = vpop.permute.xlu0 %5524  ;;  %14397 = vmatprep.subr.mxu1 %v16382_v8 }
0x2822   :  { %14359 = vmatmul.mubr.msk.f32.vlgmr.msra.gmra.mxu0 %vm2599_vm11, %v5028_v26  ;;  %14398 = vmatpush3.msra.mxu1 %v4274_v20  ;;  %v2429_v26 = vsel %vm2405_vm9, %v2428_v62, %v2421_v44 }
0x2823   :  { %14367 = vmatpush3.msra.mxu0 %v5195_v51  ;;  %14368 = vmatprep.mubr.msk.f32.mxu0 %vm16383_vm1, %v16382_v8  ;;  %v15228_v1 = vpop.eup %15227 }
0x2824   :  { %14376 = vmatprep.subr.mxu0 %v16382_v8  ;;  %v5358_v3 = vmul.f32 %v15228_v1, %v17390_v28  ;;  %14413 = vmatprep.subr.mxu1 %v16382_v8 }
0x2826   :  { %14369 = vmatmul.mubr.msk.f32.vlgmr.msra.gmra.mxu0 %vm2599_vm11, %v5193_v0 }
0x2827   :  { %14377 = vmatpush3.msra.mxu0 %v5360_v2  ;;  %14378 = vmatprep.mubr.msk.f32.mxu0 %vm16383_vm1, %v16382_v8 }
0x2828   :  { %14386 = vmatprep.subr.mxu0 %v16382_v8 }
0x282a   :  { %14379 = vmatmul.mubr.msk.f32.vlgmr.msra.gmra.mxu0 %vm2599_vm11, %v5358_v3 }
0x282b   :  { %v15230_v5 = vpop.eup %15229  ;;  %14387 = vmatpush3.msra.mxu0 %v5525_v4  ;;  %14388 = vmatprep.mubr.msk.f32.mxu0 %vm16383_vm1, %v16382_v8 }
0x282c   :  { %v5523_v6 = vmul.f32 %v15230_v5, %v17394_v32  ;;  %14402 = vmatprep.subr.mxu0 %v16382_v8  ;;  %v13445_v5 = vld [vmem:[#allocation48] ss:$0 sm:$0xff] }
0x282e   :  { %14389 = vmatmul.mubr.msk.f32.vlgmr.msra.gmra.mxu0 %vm2599_vm11, %v5523_v6 }
0x282f   :  { %14410 = vmatprep.mubr.msk.f32.mxu0 %vm16383_vm1, %v16382_v8 }
0x28a5   :  { %v4441_v7 = vpop.f32.mrf.mxu0 }
0x28a7   :  { %v14320_v10 = vpop.f32.mrf.mxu0 }
0x28a9   :  { %v4606_v12 = vpop.f32.mrf.mxu0 }
0x28aa   :  { %5601 = vrot.lane.b32.xlu1 %v4606_v12, %s18478_s20 }
0x28ab   :  { %v14330_v15 = vpop.f32.mrf.mxu0 }
0x28ad   :  { %v4771_v29 = vpop.f32.mrf.mxu0 }
0x28ae   :  { %5605 = vrot.lane.b32.xlu0 %v4771_v29, %s18479_s18  ;;  %v5747_v29 = vld [vmem:[#allocation43 + $0x18] sm:$0xff] }
0x28af   :  { %v14340_v16 = vpop.f32.mrf.mxu0  ;;  %14403 = vmatpush3.msra.mxu0 %v5747_v29 }
0x28b0   :  { %v5746_v16 = vld [vmem:[#allocation43 + $0x10] sm:$0xff]  ;;  %14404 = vmatprep.subr.mxu0 %v16382_v8 }
0x28b1   :  { %14405 = vmatpush3.msra.mxu0 %v5746_v16 }
0x28b2   :  { %14406 = vmatprep.subr.mxu0 %v16382_v8 }
0x28b3   :  { %14407 = vmatpush3.msra.mxu0 %v5745_v17 }
0x28b4   :  { %14408 = vmatprep.subr.mxu0 %v16382_v8 }
0x28b5   :  { %14409 = vmatpush3.msra.mxu0 %v5744_v18 }
0x28b6   :  { %14424 = vmatprep.subr.mxu0 %v16382_v8 }
0x28de   :  { %v4936_v19 = vpop.f32.mrf.mxu0 }
0x28df   :  { %5609 = vrot.lane.b32.xlu1 %v4936_v19, %s18480_s4 }
0x28e0   :  { %v14350_v13 = vpop.f32.mrf.mxu0 }
0x28e2   :  { %v5101_v54 = vpop.f32.mrf.mxu0 }
0x28e3   :  { %5613 = vrot.lane.b32.xlu0 %v5101_v54, %s16410_s26  ;;  %v13441_v54 = vld [vmem:[#allocation40] ss:$0 sm:$0xff] }
0x28e4   :  { %v14360_v21 = vpop.f32.mrf.mxu0 }
0x28e6   :  { %v5266_v14 = vpop.f32.mrf.mxu0 }
0x28e7   :  { %5617 = vrot.lane.b32.xlu1 %v5266_v14, %s16411_s1  ;;  %v13442_v14 = vld [vmem:[#allocation42] ss:$0 sm:$0xff] }
0x28e8   :  { %v14370_v25 = vpop.f32.mrf.mxu0 }
0x28ea   :  { %v5431_v28 = vpop.f32.mrf.mxu0 }
0x28eb   :  { %5621 = vrot.lane.b32.xlu0 %v5431_v28, %s18377_s25 }
0x28ec   :  { %v14380_v30 = vpop.f32.mrf.mxu0 }
0x28ee   :  { %v5596_v32 = vpop.f32.mrf.mxu0 }
0x28ef   :  { %5625 = vrot.lane.b32.xlu1 %v5596_v32, %s18375_s19 }
0x28f0   :  { %v14390_v33 = vpop.f32.mrf.mxu0 }
0x291c   :  { %v5602_v35 = vpop.permute.xlu1 %5601 }
0x291d   :  { %v5628_v46 = vsel %vm2523_vm10, %v4441_v7, %v5602_v35 }
0x2920   :  { %v5606_v40 = vpop.permute.xlu0 %5605 }
0x2921   :  { %v5629_v57 = vsel %vm2599_vm11, %v5628_v46, %v5606_v40 }
0x2951   :  { %v5610_v41 = vpop.permute.xlu1 %5609 }
0x2952   :  { %v5630_v49 = vsel %vm3872_vm12, %v5629_v57, %v5610_v41 }
0x2955   :  { %v5614_v43 = vpop.permute.xlu0 %5613 }
0x2956   :  { %v5631_v51 = vsel %vm775_vm0, %v5630_v49, %v5614_v43 }
0x2959   :  { %v5618_v48 = vpop.permute.xlu1 %5617 }
0x295a   :  { %v5632_v52 = vsel %vm3875_vm13, %v5631_v51, %v5618_v48 }
0x295d   :  { %v5622_v31 = vpop.permute.xlu0 %5621 }
0x295e   :  { %v5633_v37 = vsel %vm3877_vm14, %v5632_v52, %v5622_v31 }
0x2961   :  { %v5626_v55 = vpop.permute.xlu1 %5625 }
0x2962   :  { %v5634_v59 = vsel %vm3879_vm15, %v5633_v37, %v5626_v55 }
0x2963   :  { %14400 = vmatmul.mubr.msk.f32.vlgmr.msra.gmra.mxu1 %vm956_vm2, %v5634_v59 }
0x2964   :  { %14414 = vmatpush3.msra.mxu1 %v5831_v56  ;;  %14421 = vmatprep.mubr.msk.f32.mxu1 %vm16383_vm1, %v16382_v8 }
0x2965   :  { %14415 = vmatprep.subr.mxu1 %v16382_v8 }
0x2966   :  { %14416 = vmatpush3.msra.mxu1 %v5830_v60 }
0x2967   :  { %14417 = vmatprep.subr.mxu1 %v16382_v8 }
0x2968   :  { %14418 = vmatpush3.msra.mxu1 %v5829_v39 }
0x2969   :  { %14419 = vmatprep.subr.mxu1 %v16382_v8 }
0x296a   :  { %14420 = vmatpush3.msra.mxu1 %v5828_v61 }
0x296b   :  { %14422 = vmatmul.mubr.msk.f32.vlgmr.msra.gmra.mxu1 %vm956_vm2, %v2429_v26  ;;  %14434 = vmatprep.subr.mxu1 %v16382_v8 }
0x296c   :  { %14436 = vmatprep.mubr.msk.f32.mxu1 %vm16383_vm1, %v16382_v8 }
0x2a23   :  { %v5710_v63 = vpop.f32.mrf.mxu1 }
0x2a24   :  { %v5711_v0 = vadd.f32 %v13439_v42, %v5710_v63 }
0x2a25   :  { %v14401_v1 = vpop.f32.mrf.mxu1 }
0x2a26   :  { %v5716_v24 = vadd.f32 %v5711_v0, %v17282_v53 }
0x2a28   :  { %v5717_v2 = vsel %vm956_vm2, %v5716_v24, 0.0 }
0x2a29   :  { %5718 = vadd.xlane.f32.xlu0 %v5717_v2 }
0x2a2b   :  { %v5908_v3 = vpop.f32.mrf.mxu1 }
0x2a2c   :  { %v17489_v44 = vadd.f32 %v13445_v5, %v5908_v3 }
0x2a2d   :  { %v14423_v4 = vpop.f32.mrf.mxu1 }
0x2a3f   :  { %6083 = vrot.lane.b32.xlu0 %v17489_v44, %s16389_s11 }
0x2a43   :  { %6248 = vrot.lane.b32.xlu0 %v17489_v44, %s16391_s12 }
0x2a47   :  { %6413 = vrot.lane.b32.xlu0 %v17489_v44, %s16393_s27 }
0x2a4b   :  { %6578 = vrot.lane.b32.xlu0 %v17489_v44, %s16395_s29 }
0x2a4f   :  { %6743 = vrot.lane.b32.xlu0 %v17489_v44, %s18386_s0 }
0x2a53   :  { %6908 = vrot.lane.b32.xlu0 %v17489_v44, %s18382_s15 }
0x2a57   :  { %7073 = vrot.lane.b32.xlu0 %v17489_v44, %s18379_s16 }
0x2a5b   :  { %6005 = vrot.lane.b32.xlu0 %v17489_v44, %s18393_s10 }
0x2ab2   :  { %v5719_v53 = vpop.xlane.xlu0 %5718 }
0x2ab3   :  { %v5720_v6 = vmul.f32 0.03125, %v5719_v53 }
0x2ab5   :  { %v5721_v7 = vsub.f32 %v5716_v24, %v5720_v6 }
0x2ab6   :  { %v6084_v10 = vpop.permute.xlu0 %6083 }
0x2ab7   :  { %14435 = vmatpush3.xpose.msk.msra.mxu1 %vm2523_vm10, %v6084_v10  ;;  %v5722_v12 = vmul.f32 %v5721_v7, %v5721_v7 }
0x2ab8   :  { %14444 = vmatprep.subr.mxu1 %v16382_v8 }
0x2ab9   :  { %v5723_v15 = vsel %vm956_vm2, %v5722_v12, 0.0 }
0x2aba   :  { %5724 = vadd.xlane.f32.xlu1 %v5723_v15  ;;  %v6249_v30 = vpop.permute.xlu0 %6248 }
0x2abe   :  { %v6414_v32 = vpop.permute.xlu0 %6413 }
0x2ac2   :  { %v6579_v33 = vpop.permute.xlu0 %6578 }
0x2ac6   :  { %v6744_v35 = vpop.permute.xlu0 %6743 }
0x2aca   :  { %v6909_v40 = vpop.permute.xlu0 %6908 }
0x2ace   :  { %v7074_v41 = vpop.permute.xlu0 %7073 }
0x2ad2   :  { %v6006_v57 = vpop.permute.xlu0 %6005 }
0x2b43   :  { %v5725_v19 = vpop.xlane.xlu1 %5724 }
0x2b44   :  { %v5726_v11 = vmul.f32 0.03125, %v5725_v19 }
0x2b46   :  { %v5727_v20 = vadd.f32 1e-05, %v5726_v11 }
0x2b48   :  { %15231 = vrsqrt.f32 %v5727_v20 }
0x2b55   :  { %v15232_v13 = vpop.eup %15231 }
0x2b56   :  { %v5729_v21 = vmul.f32 %v15232_v13, %v5721_v7 }
0x2b58   :  { %v5736_v25 = vmul.f32 %v13441_v54, %v5729_v21 }
0x2b5a   :  { %v17514_v28 = vadd.f32 %v13442_v14, %v5736_v25 }
0x2b5c   :  { %14411 = vmatmul.mubr.msk.f32.vlgmr.msra.gmra.mxu0 %vm956_vm2, %v17514_v28 }
0x2b5d   :  { %14425 = vmatpush3.xpose.msk.msra.mxu0 %vm2523_vm10, %v17489_v44  ;;  %14426 = vmatprep.mubr.msk.f32.mxu0 %vm16383_vm1, %v16382_v8 }
0x2b5e   :  { %14429 = vmatprep.subr.mxu0 %v16382_v8 }
0x2c1c   :  { %v5824_v43 = vpop.f32.mrf.mxu0 }
0x2c1d   :  { %v5825_v45 = vadd.f32 %v13443_v50, %v5824_v43 }
0x2c1e   :  { %v14412_v46 = vpop.f32.mrf.mxu0 }
0x2c1f   :  { %v5917_v47 = vmul.f32 0.5, %v5825_v45 }
0x2c21   :  { %6081 = vrot.lane.b32.xlu1 %v5917_v47, %s16389_s11  ;;  %14427 = vmatmul.mubr.msk.f32.vlgmr.msra.gmra.mxu0 %vm2523_vm10, %v5917_v47 }
0x2c22   :  { %14430 = vmatpush3.msra.mxu0 %v6006_v57  ;;  %14431 = vmatprep.mubr.msk.f32.mxu0 %vm16383_vm1, %v16382_v8 }
0x2c23   :  { %14439 = vmatprep.subr.mxu0 %v16382_v8 }
0x2c25   :  { %6246 = vrot.lane.b32.xlu1 %v5917_v47, %s16391_s12 }
0x2c29   :  { %6411 = vrot.lane.b32.xlu1 %v5917_v47, %s16393_s27 }
0x2c2d   :  { %6576 = vrot.lane.b32.xlu1 %v5917_v47, %s16395_s29 }
0x2c31   :  { %6741 = vrot.lane.b32.xlu1 %v5917_v47, %s18386_s0 }
0x2c35   :  { %6906 = vrot.lane.b32.xlu1 %v5917_v47, %s18382_s15 }
0x2c39   :  { %7071 = vrot.lane.b32.xlu1 %v5917_v47, %s18379_s16 }
0x2c3d   :  { %6170 = vrot.lane.b32.xlu1 %v17489_v44, %s18390_s7 }
0x2c93   :  { %v6082_v48 = vpop.permute.xlu1 %6081 }
0x2c94   :  { %14437 = vmatmul.mubr.msk.f32.vlgmr.msra.gmra.mxu1 %vm2523_vm10, %v6082_v48 }
0x2c95   :  { %14445 = vmatpush3.xpose.msk.msra.mxu1 %vm2523_vm10, %v6249_v30  ;;  %14446 = vmatprep.mubr.msk.f32.mxu1 %vm16383_vm1, %v16382_v8 }
0x2c96   :  { %14454 = vmatprep.subr.mxu1 %v16382_v8 }
0x2c97   :  { %v6247_v49 = vpop.permute.xlu1 %6246 }
0x2c98   :  { %14447 = vmatmul.mubr.msk.f32.vlgmr.msra.gmra.mxu1 %vm2523_vm10, %v6247_v49 }
0x2c99   :  { %14455 = vmatpush3.xpose.msk.msra.mxu1 %vm2523_vm10, %v6414_v32  ;;  %14456 = vmatprep.mubr.msk.f32.mxu1 %vm16383_vm1, %v16382_v8 }
0x2c9a   :  { %14464 = vmatprep.subr.mxu1 %v16382_v8 }
0x2c9b   :  { %v6412_v31 = vpop.permute.xlu1 %6411 }
0x2c9c   :  { %14457 = vmatmul.mubr.msk.f32.vlgmr.msra.gmra.mxu1 %vm2523_vm10, %v6412_v31 }
0x2c9d   :  { %14465 = vmatpush3.xpose.msk.msra.mxu1 %vm2523_vm10, %v6579_v33  ;;  %14466 = vmatprep.mubr.msk.f32.mxu1 %vm16383_vm1, %v16382_v8 }
0x2c9e   :  { %14474 = vmatprep.subr.mxu1 %v16382_v8 }
0x2c9f   :  { %v6577_v36 = vpop.permute.xlu1 %6576 }
0x2ca0   :  { %14467 = vmatmul.mubr.msk.f32.vlgmr.msra.gmra.mxu1 %vm2523_vm10, %v6577_v36 }
0x2ca1   :  { %14475 = vmatpush3.xpose.msk.msra.mxu1 %vm2523_vm10, %v6744_v35  ;;  %14476 = vmatprep.mubr.msk.f32.mxu1 %vm16383_vm1, %v16382_v8 }
0x2ca2   :  { %14484 = vmatprep.subr.mxu1 %v16382_v8 }
0x2ca3   :  { %v6742_v51 = vpop.permute.xlu1 %6741 }
0x2ca4   :  { %14477 = vmatmul.mubr.msk.f32.vlgmr.msra.gmra.mxu1 %vm2523_vm10, %v6742_v51 }
0x2ca5   :  { %14485 = vmatpush3.xpose.msk.msra.mxu1 %vm2523_vm10, %v6909_v40  ;;  %14486 = vmatprep.mubr.msk.f32.mxu1 %vm16383_vm1, %v16382_v8 }
0x2ca6   :  { %14494 = vmatprep.subr.mxu1 %v16382_v8 }
0x2ca7   :  { %v6907_v52 = vpop.permute.xlu1 %6906 }
0x2ca8   :  { %14487 = vmatmul.mubr.msk.f32.vlgmr.msra.gmra.mxu1 %vm2523_vm10, %v6907_v52 }
0x2ca9   :  { %14495 = vmatpush3.xpose.msk.msra.mxu1 %vm2523_vm10, %v7074_v41  ;;  %14496 = vmatprep.mubr.msk.f32.mxu1 %vm16383_vm1, %v16382_v8 }
0x2caa   :  { %14504 = vmatprep.subr.mxu1 %v16382_v8 }
0x2cab   :  { %v7072_v37 = vpop.permute.xlu1 %7071 }
0x2cac   :  { %14497 = vmatmul.mubr.msk.f32.vlgmr.msra.gmra.mxu1 %vm2523_vm10, %v7072_v37 }
0x2cad   :  { %14512 = vmatprep.mubr.msk.f32.mxu1 %vm16383_vm1, %v16382_v8 }
0x2caf   :  { %v6171_v19 = vpop.permute.xlu1 %6170 }
0x2ce1   :  { %v5990_v55 = vpop.f32.mrf.mxu0 }
0x2ce2   :  { %v5994_v56 = vsel %vm2599_vm11, %v5990_v55, -inf }
0x2ce3   :  { %5995 = vmax.xlane.f32.xlu0 %v5994_v56  ;;  %v14428_v58 = vpop.f32.mrf.mxu0 }
0x2d54   :  { %v6155_v59 = vpop.f32.mrf.mxu1 }
0x2d55   :  { %v6159_v60 = vsel %vm2599_vm11, %v6155_v59, -inf }
0x2d56   :  { %6160 = vmax.xlane.f32.xlu1 %v6159_v60  ;;  %v14438_v34 = vpop.f32.mrf.mxu1 }
0x2d58   :  { %v6320_v39 = vpop.f32.mrf.mxu1 }
0x2d59   :  { %v6324_v61 = vsel %vm2599_vm11, %v6320_v39, -inf }
0x2d5a   :  { %6325 = vmax.xlane.f32.xlu0 %v6324_v61  ;;  %v14448_v62 = vpop.f32.mrf.mxu1 }
0x2d5c   :  { %v6485_v26 = vpop.f32.mrf.mxu1 }
0x2d5d   :  { %v6489_v42 = vsel %vm2599_vm11, %v6485_v26, -inf }
0x2d5e   :  { %6490 = vmax.xlane.f32.xlu0 %v6489_v42  ;;  %v14458_v63 = vpop.f32.mrf.mxu1 }
0x2d60   :  { %v6650_v0 = vpop.f32.mrf.mxu1 }
0x2d61   :  { %v6654_v1 = vsel %vm2599_vm11, %v6650_v0, -inf }
0x2d62   :  { %6655 = vmax.xlane.f32.xlu1 %v6654_v1  ;;  %v14468_v24 = vpop.f32.mrf.mxu1 }
0x2d64   :  { %v6815_v2 = vpop.f32.mrf.mxu1 }
0x2d65   :  { %v6819_v3 = vsel %vm2599_vm11, %v6815_v2, -inf }
0x2d66   :  { %6820 = vmax.xlane.f32.xlu0 %v6819_v3  ;;  %v14478_v4 = vpop.f32.mrf.mxu1 }
0x2d68   :  { %v6980_v5 = vpop.f32.mrf.mxu1 }
0x2d69   :  { %v6984_v53 = vsel %vm2599_vm11, %v6980_v5, -inf }
0x2d6a   :  { %6985 = vmax.xlane.f32.xlu1 %v6984_v53  ;;  %v14488_v6 = vpop.f32.mrf.mxu1 }
0x2d6c   :  { %v7145_v7 = vpop.f32.mrf.mxu1  ;;  %v5996_v15 = vpop.xlane.xlu0 %5995 }
0x2d6d   :  { %v7149_v10 = vsel %vm2599_vm11, %v7145_v7, -inf  ;;  %v5997_v29 = vsub.f32 %v5990_v55, %v5996_v15 }
0x2d6e   :  { %7150 = vmax.xlane.f32.xlu0 %v7149_v10  ;;  %v14498_v12 = vpop.f32.mrf.mxu1 }
0x2d6f   :  { %v5998_v16 = vmul.f32 1.442695, %v5997_v29 }
0x2d71   :  { %15233 = vpow2.f32 %v5998_v16 }
0x2d7b   :  { %6500 = vrot.lane.b32.xlu1 %v17489_v44, %s18392_s23 }
0x2d7e   :  { %v15234_v17 = vpop.eup %15233 }
0x2d7f   :  { %v6000_v18 = vsel %vm2599_vm11, %v15234_v17, 0.0 }
0x2d84   :  { %6335 = vrot.lane.b32.xlu0 %v17489_v44, %s18391_s6 }
0x2d9f   :  { %6001 = vadd.xlane.f32.xlu1 %v6000_v18 }
0x2ddf   :  { %v6161_v11 = vpop.xlane.xlu1 %6160 }
0x2de0   :  { %v6162_v20 = vsub.f32 %v6155_v59, %v6161_v11 }
0x2de2   :  { %v6163_v13 = vmul.f32 1.442695, %v6162_v20 }
0x2de3   :  { %v6326_v54 = vpop.xlane.xlu0 %6325 }
0x2de4   :  { %15235 = vpow2.f32 %v6163_v13  ;;  %v6327_v21 = vsub.f32 %v6320_v39, %v6326_v54 }
0x2de6   :  { %v6328_v14 = vmul.f32 1.442695, %v6327_v21 }
0x2de7   :  { %v6491_v25 = vpop.xlane.xlu0 %6490 }
0x2de8   :  { %15237 = vpow2.f32 %v6328_v14  ;;  %v6492_v30 = vsub.f32 %v6485_v26, %v6491_v25 }
0x2dea   :  { %v6493_v32 = vmul.f32 1.442695, %v6492_v30 }
0x2deb   :  { %v6656_v45 = vpop.xlane.xlu1 %6655 }
0x2dec   :  { %15239 = vpow2.f32 %v6493_v32  ;;  %v6657_v46 = vsub.f32 %v6650_v0, %v6656_v45 }
0x2dee   :  { %v6658_v49 = vmul.f32 1.442695, %v6657_v46  ;;  %v5915_v46 = vld [vmem:[#allocation49 + $0x18] sm:$0xff] }
0x2def   :  { %v6821_v47 = vpop.xlane.xlu0 %6820  ;;  %14505 = vmatpush3.msra.mxu1 %v5915_v46 }
0x2df0   :  { %v6822_v48 = vsub.f32 %v6815_v2, %v6821_v47  ;;  %15241 = vpow2.f32 %v6658_v49  ;;  %14506 = vmatprep.subr.mxu1 %v16382_v8  ;;  %v5914_v47 = vld [vmem:[#allocation49 + $0x10] sm:$0xff]  ;;  %v5912_v49 = vld [vmem:[#allocation49] sm:$0xff] }
0x2df1   :  { %v15236_v33 = vpop.eup %15235  ;;  %14507 = vmatpush3.msra.mxu1 %v5914_v47  ;;  %v13477_v47 = vld [vmem:[#allocation60] ss:$0 sm:$0xff] }
0x2df2   :  { %v6165_v35 = vsel %vm2599_vm11, %v15236_v33, 0.0  ;;  %v6823_v51 = vmul.f32 1.442695, %v6822_v48  ;;  %14508 = vmatprep.subr.mxu1 %v16382_v8 }
0x2df3   :  { %6166 = vadd.xlane.f32.xlu0 %v6165_v35  ;;  %v6986_v57 = vpop.xlane.xlu1 %6985 }
0x2df4   :  { %v6987_v31 = vsub.f32 %v6980_v5, %v6986_v57  ;;  %15243 = vpow2.f32 %v6823_v51  ;;  %v5913_v57 = vld [vmem:[#allocation49 + $0x8] sm:$0xff] }
0x2df5   :  { %v15238_v40 = vpop.eup %15237  ;;  %14509 = vmatpush3.msra.mxu1 %v5913_v57 }
0x2df6   :  { %v6330_v50 = vsel %vm2599_vm11, %v15238_v40, 0.0  ;;  %v6988_v52 = vmul.f32 1.442695, %v6987_v31  ;;  %14510 = vmatprep.subr.mxu1 %v16382_v8 }
0x2df7   :  { %6331 = vadd.xlane.f32.xlu1 %v6330_v50  ;;  %v7151_v36 = vpop.xlane.xlu0 %7150  ;;  %v6501_v56 = vpop.permute.xlu1 %6500  ;;  %14511 = vmatpush3.msra.mxu1 %v5912_v49 }
0x2df8   :  { %v7152_v37 = vsub.f32 %v7145_v7, %v7151_v36  ;;  %15245 = vpow2.f32 %v6988_v52  ;;  %14526 = vmatprep.subr.mxu1 %v16382_v8 }
0x2df9   :  { %v17584_v41 = vpop.eup %15239 }
0x2dfa   :  { %v6495_v43 = vsel %vm2599_vm11, %v17584_v41, 0.0  ;;  %v7153_v55 = vmul.f32 1.442695, %v7152_v37 }
0x2dfb   :  { %6496 = vadd.xlane.f32.xlu0 %v6495_v43  ;;  %v6336_v1 = vpop.permute.xlu0 %6335 }
0x2dfc   :  { %15247 = vpow2.f32 %v7153_v55 }
0x2dfd   :  { %v15242_v58 = vpop.eup %15241 }
0x2dfe   :  { %v6660_v34 = vsel %vm2599_vm11, %v15242_v58, 0.0 }
0x2e01   :  { %v15244_v60 = vpop.eup %15243 }
0x2e02   :  { %v6825_v62 = vsel %vm2599_vm11, %v15244_v60, 0.0 }
0x2e05   :  { %v17593_v39 = vpop.eup %15245 }
0x2e06   :  { %v6990_v61 = vsel %vm2599_vm11, %v17593_v39, 0.0 }
0x2e08   :  { %6830 = vrot.lane.b32.xlu1 %v17489_v44, %s16394_s17 }
0x2e09   :  { %v17598_v26 = vpop.eup %15247 }
0x2e0a   :  { %v7155_v42 = vsel %vm2599_vm11, %v17598_v26, 0.0 }
0x2e11   :  { %6665 = vrot.lane.b32.xlu0 %v17489_v44, %s18395_s9 }
0x2e28   :  { %v6002_v59 = vpop.xlane.xlu1 %6001 }
0x2e29   :  { %15249 = vrcp.f32 %v6002_v59 }
0x2e2c   :  { %6661 = vadd.xlane.f32.xlu1 %v6660_v34 }
0x2e30   :  { %6991 = vadd.xlane.f32.xlu1 %v6990_v61  ;;  %6826 = vadd.xlane.f32.xlu0 %v6825_v62 }
0x2e34   :  { %7156 = vadd.xlane.f32.xlu1 %v7155_v42 }
0x2e36   :  { %v15250_v63 = vpop.eup %15249 }
0x2e37   :  { %v6004_v0 = vmul.f32 %v15250_v63, %v15234_v17 }
0x2e39   :  { %14432 = vmatmul.mubr.msk.f32.vlgmr.msra.gmra.mxu0 %vm2599_vm11, %v6004_v0 }
0x2e3a   :  { %14440 = vmatpush3.msra.mxu0 %v6171_v19  ;;  %14441 = vmatprep.mubr.msk.f32.mxu0 %vm16383_vm1, %v16382_v8 }
0x2e3b   :  { %14449 = vmatprep.subr.mxu0 %v16382_v8 }
0x2e45   :  { %7160 = vrot.lane.b32.xlu1 %v17489_v44, %s18384_s3 }
0x2e46   :  { %6995 = vrot.lane.b32.xlu0 %v17489_v44, %s18388_s14 }
0x2e7c   :  { %v6167_v24 = vpop.xlane.xlu0 %6166 }
0x2e7d   :  { %15251 = vrcp.f32 %v6167_v24 }
0x2e80   :  { %v6332_v2 = vpop.xlane.xlu1 %6331 }
0x2e81   :  { %15253 = vrcp.f32 %v6332_v2 }
0x2e84   :  { %v6497_v3 = vpop.xlane.xlu0 %6496  ;;  %v6831_v12 = vpop.permute.xlu1 %6830 }
0x2e85   :  { %15255 = vrcp.f32 %v6497_v3  ;;  %v13471_v3 = vld [vmem:[#allocation51] ss:$0 sm:$0xff] }
0x2e88   :  { %v6666_v10 = vpop.permute.xlu0 %6665 }
0x2e8a   :  { %v15252_v4 = vpop.eup %15251 }
0x2e8b   :  { %v6169_v5 = vmul.f32 %v15252_v4, %v15236_v33 }
0x2e8d   :  { %14442 = vmatmul.mubr.msk.f32.vlgmr.msra.gmra.mxu0 %vm2599_vm11, %v6169_v5 }
0x2e8e   :  { %v15254_v53 = vpop.eup %15253  ;;  %14450 = vmatpush3.msra.mxu0 %v6336_v1  ;;  %14451 = vmatprep.mubr.msk.f32.mxu0 %vm16383_vm1, %v16382_v8 }
0x2e8f   :  { %14459 = vmatprep.subr.mxu0 %v16382_v8  ;;  %v6334_v6 = vmul.f32 %v15254_v53, %v15238_v40 }
0x2e91   :  { %14452 = vmatmul.mubr.msk.f32.vlgmr.msra.gmra.mxu0 %vm2599_vm11, %v6334_v6 }
0x2e92   :  { %v15256_v44 = vpop.eup %15255  ;;  %14460 = vmatpush3.msra.mxu0 %v6501_v56  ;;  %14461 = vmatprep.mubr.msk.f32.mxu0 %vm16383_vm1, %v16382_v8 }
0x2e93   :  { %14469 = vmatprep.subr.mxu0 %v16382_v8  ;;  %v6499_v7 = vmul.f32 %v15256_v44, %v17584_v41 }
0x2e95   :  { %14462 = vmatmul.mubr.msk.f32.vlgmr.msra.gmra.mxu0 %vm2599_vm11, %v6499_v7 }
0x2e96   :  { %14470 = vmatpush3.msra.mxu0 %v6666_v10  ;;  %14471 = vmatprep.mubr.msk.f32.mxu0 %vm16383_vm1, %v16382_v8 }
0x2e97   :  { %14479 = vmatprep.subr.mxu0 %v16382_v8 }
0x2eb5   :  { %v6662_v15 = vpop.xlane.xlu1 %6661 }
0x2eb6   :  { %15257 = vrcp.f32 %v6662_v15 }
0x2eb9   :  { %v6992_v29 = vpop.xlane.xlu1 %6991  ;;  %v6827_v16 = vpop.xlane.xlu0 %6826 }
0x2eba   :  { %15259 = vrcp.f32 %v6827_v16  ;;  %v7383_v16 = vld [vmem:[#allocation55 + $0x18] sm:$0xff] }
0x2ebb   :  { %15261 = vrcp.f32 %v6992_v29 }
0x2ebd   :  { %v7157_v17 = vpop.xlane.xlu1 %7156  ;;  %v6996_v54 = vpop.permute.xlu0 %6995 }
0x2ebe   :  { %15263 = vrcp.f32 %v7157_v17  ;;  %v7382_v17 = vld [vmem:[#allocation55 + $0x10] sm:$0xff] }
0x2ec1   :  { %v7161_v25 = vpop.permute.xlu1 %7160 }
0x2ec3   :  { %v15258_v18 = vpop.eup %15257 }
0x2ec4   :  { %v6664_v19 = vmul.f32 %v15258_v18, %v15242_v58  ;;  %v7381_v18 = vld [vmem:[#allocation55 + $0x8] sm:$0xff] }
0x2ec6   :  { %14472 = vmatmul.mubr.msk.f32.vlgmr.msra.gmra.mxu0 %vm2599_vm11, %v6664_v19  ;;  %v7468_v19 = vld [vmem:[#allocation58 + $0x18] sm:$0xff] }
0x2ec7   :  { %14480 = vmatpush3.msra.mxu0 %v6831_v12  ;;  %14481 = vmatprep.mubr.msk.f32.mxu0 %vm16383_vm1, %v16382_v8  ;;  %v15260_v11 = vpop.eup %15259 }
0x2ec8   :  { %14489 = vmatprep.subr.mxu0 %v16382_v8  ;;  %v6829_v20 = vmul.f32 %v15260_v11, %v15244_v60  ;;  %v15262_v13 = vpop.eup %15261 }
0x2ec9   :  { %v6994_v21 = vmul.f32 %v15262_v13, %v17593_v39 }
0x2eca   :  { %14482 = vmatmul.mubr.msk.f32.vlgmr.msra.gmra.mxu0 %vm2599_vm11, %v6829_v20 }
0x2ecb   :  { %14490 = vmatpush3.msra.mxu0 %v6996_v54  ;;  %14491 = vmatprep.mubr.msk.f32.mxu0 %vm16383_vm1, %v16382_v8  ;;  %v15264_v14 = vpop.eup %15263 }
0x2ecc   :  { %14499 = vmatprep.subr.mxu0 %v16382_v8  ;;  %v7159_v30 = vmul.f32 %v15264_v14, %v17598_v26 }
0x2ece   :  { %14492 = vmatmul.mubr.msk.f32.vlgmr.msra.gmra.mxu0 %vm2599_vm11, %v6994_v21  ;;  %v13473_v21 = vld [vmem:[#allocation52] ss:$0 sm:$0xff] }
0x2ecf   :  { %14500 = vmatpush3.msra.mxu0 %v7161_v25  ;;  %14501 = vmatprep.mubr.msk.f32.mxu0 %vm16383_vm1, %v16382_v8  ;;  %v13474_v25 = vld [vmem:[#allocation54] ss:$0 sm:$0xff] }
0x2ed0   :  { %14515 = vmatprep.subr.mxu0 %v16382_v8 }
0x2ed2   :  { %14502 = vmatmul.mubr.msk.f32.vlgmr.msra.gmra.mxu0 %vm2599_vm11, %v7159_v30 }
0x2ed3   :  { %14523 = vmatprep.mubr.msk.f32.mxu0 %vm16383_vm1, %v16382_v8  ;;  %14516 = vmatpush3.msra.mxu0 %v7383_v16  ;;  %v7853_v16 = vld [vmem:[%s18474_s2 + $0x8] sm:$0xff] }
0x2ed4   :  { %14517 = vmatprep.subr.mxu0 %v16382_v8 }
0x2ed5   :  { %14518 = vmatpush3.msra.mxu0 %v7382_v17  ;;  %v7852_v17 = vld [vmem:[%s18474_s2] sm:$0xff] }
0x2ed6   :  { %14519 = vmatprep.subr.mxu0 %v16382_v8 }
0x2ed7   :  { %14520 = vmatpush3.msra.mxu0 %v7381_v18  ;;  %v7751_v18 = vld [vmem:[%s16697_s21 + $0x10] sm:$0xff] }
0x2ed8   :  { %14521 = vmatprep.subr.mxu0 %v16382_v8 }
0x2ef9   :  { %v6077_v32 = vpop.f32.mrf.mxu0 }
0x2efb   :  { %v14433_v33 = vpop.f32.mrf.mxu0 }
0x2efc   :  { %v7467_v33 = vld [vmem:[#allocation58 + $0x10] sm:$0xff] }
0x2f4d   :  { %v6242_v35 = vpop.f32.mrf.mxu0 }
0x2f4e   :  { %7237 = vrot.lane.b32.xlu0 %v6242_v35, %s18478_s20  ;;  %v7466_v35 = vld [vmem:[#allocation58 + $0x8] sm:$0xff] }
0x2f4f   :  { %v14443_v40 = vpop.f32.mrf.mxu0 }
0x2f50   :  { %v7465_v40 = vld [vmem:[#allocation58] sm:$0xff] }
0x2f51   :  { %v6407_v50 = vpop.f32.mrf.mxu0 }
0x2f52   :  { %7241 = vrot.lane.b32.xlu1 %v6407_v50, %s18479_s18  ;;  %v13475_v50 = vld [vmem:[#allocation57] ss:$0 sm:$0xff] }
0x2f53   :  { %v14453_v41 = vpop.f32.mrf.mxu0 }
0x2f55   :  { %v6572_v43 = vpop.f32.mrf.mxu0 }
0x2f56   :  { %7245 = vrot.lane.b32.xlu0 %v6572_v43, %s18480_s4 }
0x2f57   :  { %v14463_v45 = vpop.f32.mrf.mxu0 }
0x2f86   :  { %v6737_v48 = vpop.f32.mrf.mxu0 }
0x2f87   :  { %7249 = vrot.lane.b32.xlu1 %v6737_v48, %s16410_s26 }
0x2f88   :  { %v14473_v31 = vpop.f32.mrf.mxu0 }
0x2f8a   :  { %v6902_v36 = vpop.f32.mrf.mxu0 }
0x2f8b   :  { %7253 = vrot.lane.b32.xlu0 %v6902_v36, %s16411_s1 }
0x2f8c   :  { %v14483_v51 = vpop.f32.mrf.mxu0 }
0x2f8e   :  { %v7067_v52 = vpop.f32.mrf.mxu0 }
0x2f8f   :  { %7257 = vrot.lane.b32.xlu1 %v7067_v52, %s18377_s25  ;;  %s18482_s25 = sld [smem:[#allocation128_spill]] }
0x2f90   :  { %v14493_v37 = vpop.f32.mrf.mxu0 }
0x2f92   :  { %v7232_v55 = vpop.f32.mrf.mxu0 }
0x2f93   :  { %7261 = vrot.lane.b32.xlu0 %v7232_v55, %s18375_s19  ;;  %s18481_s19 = sld [smem:[#allocation126_spill]] }
0x2f94   :  { %v14503_v56 = vpop.f32.mrf.mxu0 }
0x2fc0   :  { %v7238_v58 = vpop.permute.xlu0 %7237 }
0x2fc1   :  { %v7264_v39 = vsel %vm2523_vm10, %v6077_v32, %v7238_v58  ;;  %v7582_v58 = vld [vmem:[%s18481_s19 + $0x18] sm:$0xff] }
0x2fc4   :  { %v7242_v59 = vpop.permute.xlu1 %7241 }
0x2fc5   :  { %v7265_v61 = vsel %vm2599_vm11, %v7264_v39, %v7242_v59  ;;  %v7581_v59 = vld [vmem:[%s18481_s19 + $0x10] sm:$0xff]  ;;  %v7667_v39 = vld [vmem:[%s18482_s25 + $0x18] sm:$0xff] }
0x2fc8   :  { %v7246_v60 = vpop.permute.xlu0 %7245 }
0x2fc9   :  { %v7266_v26 = vsel %vm3872_vm12, %v7265_v61, %v7246_v60  ;;  %v7580_v60 = vld [vmem:[%s18481_s19 + $0x8] sm:$0xff]  ;;  %v7666_v61 = vld [vmem:[%s18482_s25 + $0x10] sm:$0xff] }
0x2ff9   :  { %v7250_v34 = vpop.permute.xlu1 %7249 }
0x2ffa   :  { %v7267_v63 = vsel %vm775_vm0, %v7266_v26, %v7250_v34  ;;  %v7579_v34 = vld [vmem:[%s18481_s19] sm:$0xff] }
0x2ffd   :  { %v7254_v62 = vpop.permute.xlu0 %7253 }
0x2ffe   :  { %v7268_v0 = vsel %vm3875_vm13, %v7267_v63, %v7254_v62 }
0x3001   :  { %v7258_v42 = vpop.permute.xlu1 %7257 }
0x3002   :  { %v7269_v1 = vsel %vm3877_vm14, %v7268_v0, %v7258_v42  ;;  %v13479_v0 = vld [vmem:[#allocation61] ss:$0 sm:$0xff] }
0x3005   :  { %v7262_v24 = vpop.permute.xlu0 %7261 }
0x3006   :  { %v7270_v2 = vsel %vm3879_vm15, %v7269_v1, %v7262_v24  ;;  %v13480_v24 = vld [vmem:[#allocation63] ss:$0 sm:$0xff] }
0x3007   :  { %14513 = vmatmul.mubr.msk.f32.vlgmr.msra.gmra.mxu1 %vm956_vm2, %v7270_v2 }
0x3008   :  { %14534 = vmatprep.mubr.msk.f32.mxu1 %vm16383_vm1, %v16382_v8  ;;  %14527 = vmatpush3.msra.mxu1 %v7468_v19  ;;  %v7749_v19 = vld [vmem:[%s16697_s21] sm:$0xff] }
0x3009   :  { %14528 = vmatprep.subr.mxu1 %v16382_v8 }
0x300a   :  { %14529 = vmatpush3.msra.mxu1 %v7467_v33 }
0x300b   :  { %14530 = vmatprep.subr.mxu1 %v16382_v8 }
0x300c   :  { %14531 = vmatpush3.msra.mxu1 %v7466_v35 }
0x300d   :  { %14532 = vmatprep.subr.mxu1 %v16382_v8 }
0x300e   :  { %14533 = vmatpush3.msra.mxu1 %v7465_v40 }
0x300f   :  { %14548 = vmatprep.subr.mxu1 %v16382_v8 }
0x30c7   :  { %v7346_v4 = vpop.f32.mrf.mxu1 }
0x30c8   :  { %v7347_v5 = vadd.f32 %v13471_v3, %v7346_v4  ;;  %v7665_v4 = vld [vmem:[%s18482_s25 + $0x8] sm:$0xff] }
0x30c9   :  { %v14514_v53 = vpop.f32.mrf.mxu1 }
0x30ca   :  { %v7352_v6 = vadd.f32 %v7347_v5, %v17514_v28  ;;  %v7380_v28 = vld [vmem:[#allocation55] sm:$0xff] }
0x30cb   :  { %14522 = vmatpush3.msra.mxu0 %v7380_v28  ;;  %v7664_v5 = vld [vmem:[%s18482_s25] sm:$0xff]  ;;  %v7752_v53 = vld [vmem:[%s16697_s21 + $0x18] sm:$0xff]  ;;  %v7750_v28 = vld [vmem:[%s16697_s21 + $0x8] sm:$0xff] }
0x30cc   :  { %v7353_v44 = vsel %vm956_vm2, %v7352_v6, 0.0  ;;  %14537 = vmatprep.subr.mxu0 %v16382_v8 }
0x30cd   :  { %7354 = vadd.xlane.f32.xlu1 %v7353_v44 }
0x3156   :  { %v7355_v7 = vpop.xlane.xlu1 %7354 }
0x3157   :  { %v7356_v10 = vmul.f32 0.03125, %v7355_v7 }
0x3159   :  { %v7357_v12 = vsub.f32 %v7352_v6, %v7356_v10  ;;  %v13481_v6 = vld [vmem:[#allocation64] ss:$0 sm:$0xff] }
0x315b   :  { %v7358_v15 = vmul.f32 %v7357_v12, %v7357_v12 }
0x315d   :  { %v7359_v29 = vsel %vm956_vm2, %v7358_v15, 0.0  ;;  %v7855_v15 = vld [vmem:[%s18474_s2 + $0x18] sm:$0xff] }
0x315e   :  { %7360 = vadd.xlane.f32.xlu0 %v7359_v29  ;;  %v7854_v29 = vld [vmem:[%s18474_s2 + $0x10] sm:$0xff]  ;;  %s18483_s2 = smov 60  }
0x31e7   :  { %v7361_v11 = vpop.xlane.xlu0 %7360 }
0x31e8   :  { %v7362_v20 = vmul.f32 0.03125, %v7361_v11  ;;  %v13483_v11 = vld [vmem:[#allocation66] ss:$0 sm:$0xff] }
0x31ea   :  { %v7363_v13 = vadd.f32 1e-05, %v7362_v20 }
0x31ec   :  { %15265 = vrsqrt.f32 %v7363_v13 }
0x31f9   :  { %v15266_v54 = vpop.eup %15265 }
0x31fa   :  { %v7365_v14 = vmul.f32 %v15266_v54, %v7357_v12 }
0x31fc   :  { %v7372_v30 = vmul.f32 %v13473_v21, %v7365_v14  ;;  %v13487_v14 = vld [vmem:[#allocation19] ss:$0 sm:$0xff] }
0x31fe   :  { %v7379_v32 = vadd.f32 %v13474_v25, %v7372_v30 }
0x3200   :  { %14524 = vmatmul.mubr.msk.f32.vlgmr.msra.gmra.mxu0 %vm956_vm2, %v7379_v32 }
0x3201   :  { %14545 = vmatprep.mubr.msk.f32.mxu0 %vm16383_vm1, %v16382_v8  ;;  %14538 = vmatpush3.msra.mxu0 %v7582_v58 }
0x3202   :  { %14539 = vmatprep.subr.mxu0 %v16382_v8 }
0x3203   :  { %14540 = vmatpush3.msra.mxu0 %v7581_v59 }
0x3204   :  { %14541 = vmatprep.subr.mxu0 %v16382_v8 }
0x3205   :  { %14542 = vmatpush3.msra.mxu0 %v7580_v60 }
0x3206   :  { %14543 = vmatprep.subr.mxu0 %v16382_v8 }
0x3207   :  { %14544 = vmatpush3.msra.mxu0 %v7579_v34 }
0x3208   :  { %14559 = vmatprep.subr.mxu0 %v16382_v8 }
0x32c0   :  { %v7460_v41 = vpop.f32.mrf.mxu0 }
0x32c1   :  { %v7461_v43 = vadd.f32 %v13475_v50, %v7460_v41 }
0x32c2   :  { %v14525_v45 = vpop.f32.mrf.mxu0 }
0x32c3   :  { %v7464_v46 = vmax.f32 %v7461_v43, 0.0 }
0x32c5   :  { %14535 = vmatmul.mubr.msk.f32.vlgmr.msra.gmra.mxu1 %vm956_vm2, %v7464_v46 }
0x32c6   :  { %14556 = vmatprep.mubr.msk.f32.mxu1 %vm16383_vm1, %v16382_v8  ;;  %14549 = vmatpush3.msra.mxu1 %v7667_v39 }
0x32c7   :  { %14550 = vmatprep.subr.mxu1 %v16382_v8 }
0x32c8   :  { %14551 = vmatpush3.msra.mxu1 %v7666_v61 }
0x32c9   :  { %14552 = vmatprep.subr.mxu1 %v16382_v8 }
0x32ca   :  { %14553 = vmatpush3.msra.mxu1 %v7665_v4 }
0x32cb   :  { %14554 = vmatprep.subr.mxu1 %v16382_v8 }
0x32cc   :  { %14555 = vmatpush3.msra.mxu1 %v7664_v5 }
0x32cd   :  { %14570 = vmatprep.subr.mxu1 %v16382_v8 }
0x3385   :  { %v7545_v57 = vpop.f32.mrf.mxu1 }
0x3386   :  { %v7546_v48 = vadd.f32 %v13477_v47, %v7545_v57 }
0x3387   :  { %v14536_v49 = vpop.f32.mrf.mxu1 }
0x3388   :  { %v7551_v31 = vadd.f32 %v7546_v48, %v7379_v32 }
0x338a   :  { %v7552_v36 = vsel %vm956_vm2, %v7551_v31, 0.0 }
0x338b   :  { %7553 = vadd.xlane.f32.xlu0 %v7552_v36 }
0x3414   :  { %v7554_v51 = vpop.xlane.xlu0 %7553 }
0x3415   :  { %v7555_v52 = vmul.f32 0.03125, %v7554_v51 }
0x3417   :  { %v7556_v37 = vsub.f32 %v7551_v31, %v7555_v52 }
0x3419   :  { %v7557_v55 = vmul.f32 %v7556_v37, %v7556_v37 }
0x341b   :  { %v7558_v56 = vsel %vm956_vm2, %v7557_v55, 0.0  ;;  %v13485_v55 = vld [vmem:[%s16702_s13] ss:$0 sm:$0xff] }
0x341c   :  { %7559 = vadd.xlane.f32.xlu1 %v7558_v56 }
0x34a5   :  { %v7560_v62 = vpop.xlane.xlu1 %7559 }
0x34a6   :  { %v7561_v26 = vmul.f32 0.03125, %v7560_v62 }
0x34a8   :  { %v7562_v42 = vadd.f32 1e-05, %v7561_v26 }
0x34aa   :  { %15267 = vrsqrt.f32 %v7562_v42 }
0x34b7   :  { %v15268_v63 = vpop.eup %15267 }
0x34b8   :  { %v7564_v1 = vmul.f32 %v15268_v63, %v7556_v37 }
0x34ba   :  { %v7571_v2 = vmul.f32 %v13479_v0, %v7564_v1 }
0x34bc   :  { %v7578_v3 = vadd.f32 %v13480_v24, %v7571_v2 }
0x34be   :  { %14546 = vmatmul.mubr.msk.f32.vlgmr.msra.gmra.mxu0 %vm956_vm2, %v7578_v3 }
0x34bf   :  { %14567 = vmatprep.mubr.msk.f32.mxu0 %vm16383_vm1, %v16382_v8  ;;  %14560 = vmatpush3.msra.mxu0 %v7752_v53 }
0x34c0   :  { %14561 = vmatprep.subr.mxu0 %v16382_v8 }
0x34c1   :  { %14562 = vmatpush3.msra.mxu0 %v7751_v18 }
0x34c2   :  { %14563 = vmatprep.subr.mxu0 %v16382_v8 }
0x34c3   :  { %14564 = vmatpush3.msra.mxu0 %v7750_v28 }
0x34c4   :  { %14565 = vmatprep.subr.mxu0 %v16382_v8 }
0x34c5   :  { %14566 = vmatpush3.msra.mxu0 %v7749_v19 }
0x34c6   :  { %14581 = vmatprep.subr.mxu0 %v16382_v8 }
0x357e   :  { %v7659_v44 = vpop.f32.mrf.mxu0 }
0x357f   :  { %v7660_v7 = vadd.f32 %v13481_v6, %v7659_v44 }
0x3580   :  { %v14547_v10 = vpop.f32.mrf.mxu0 }
0x3581   :  { %v7663_v12 = vmax.f32 %v7660_v7, 0.0 }
0x3583   :  { %14557 = vmatmul.mubr.msk.f32.vlgmr.msra.gmra.mxu1 %vm956_vm2, %v7663_v12 }
0x3584   :  { %14571 = vmatpush3.msra.mxu1 %v7855_v15  ;;  %14578 = vmatprep.mubr.msk.f32.mxu1 %vm16383_vm1, %v16382_v8 }
0x3585   :  { %14572 = vmatprep.subr.mxu1 %v16382_v8 }
0x3586   :  { %14573 = vmatpush3.msra.mxu1 %v7854_v29 }
0x3587   :  { %14574 = vmatprep.subr.mxu1 %v16382_v8 }
0x3588   :  { %14575 = vmatpush3.msra.mxu1 %v7853_v16 }
0x3589   :  { %14576 = vmatprep.subr.mxu1 %v16382_v8 }
0x358a   :  { %14577 = vmatpush3.msra.mxu1 %v7852_v17 }
0x358b   :  { %14579 = vmatmul.mubr.msk.f32.vlgmr.msra.gmra.mxu1 %vm956_vm2, %v17043_v27  ;;  %14591 = vmatprep.subr.mxu1 %v16382_v8 }
0x358c   :  { %14593 = vmatprep.mubr.msk.f32.mxu1 %vm16383_vm1, %v16382_v8 }
0x3643   :  { %v7744_v20 = vpop.f32.mrf.mxu1 }
0x3644   :  { %v7745_v13 = vadd.f32 %v13483_v11, %v7744_v20 }
0x3645   :  { %v14558_v54 = vpop.f32.mrf.mxu1 }
0x3646   :  { %v7748_v21 = vmax.f32 %v7745_v13, 0.0 }
0x3648   :  { %14568 = vmatmul.mubr.msk.f32.vlgmr.msra.gmra.mxu0 %vm956_vm2, %v7748_v21 }
0x3649   :  { %14583 = vmatprep.mubr.msk.f32.mxu0 %vm16383_vm1, %v16382_v8 }
0x364b   :  { %v7932_v25 = vpop.f32.mrf.mxu1 }
0x364c   :  { %v17725_v30 = vadd.f32 %v13487_v14, %v7932_v25 }
0x364d   :  { %v14580_v32 = vpop.f32.mrf.mxu1 }
0x364e   :  { %8109 = vrot.lane.b32.xlu1 %v17725_v30, %s18390_s7  ;;  %7943 = vrot.lane.b32.xlu0 %v17725_v30, %s18393_s10  ;;  %v7941_v33 = vmul.f32 0.5, %v17725_v30 }
0x3652   :  { %8274 = vrot.lane.b32.xlu0 %v17725_v30, %s18391_s6  ;;  %8107 = vrot.lane.b32.xlu1 %v7941_v33, %s16389_s11 }
0x3656   :  { %8439 = vrot.lane.b32.xlu0 %v17725_v30, %s18392_s23  ;;  %8272 = vrot.lane.b32.xlu1 %v7941_v33, %s16391_s12 }
0x365a   :  { %8604 = vrot.lane.b32.xlu0 %v17725_v30, %s18395_s9  ;;  %8437 = vrot.lane.b32.xlu1 %v7941_v33, %s16393_s27 }
0x365e   :  { %8769 = vrot.lane.b32.xlu0 %v17725_v30, %s16394_s17  ;;  %8602 = vrot.lane.b32.xlu1 %v7941_v33, %s16395_s29 }
0x3662   :  { %8934 = vrot.lane.b32.xlu0 %v17725_v30, %s18388_s14  ;;  %8767 = vrot.lane.b32.xlu1 %v7941_v33, %s18386_s0  ;;  %s18488_s0 = smov 24   ;;  %s18489_s14 = smov 28  }
0x3666   :  { %9099 = vrot.lane.b32.xlu0 %v17725_v30, %s18384_s3  ;;  %8932 = vrot.lane.b32.xlu1 %v7941_v33, %s18382_s15  ;;  %s18486_s15 = smov 44   ;;  %s18487_s3 = smov 48  }
0x366a   :  { %8031 = vrot.lane.b32.xlu0 %v17725_v30, %s18381_s8  ;;  %9097 = vrot.lane.b32.xlu1 %v7941_v33, %s18379_s16  ;;  %s18484_s16 = smov 52   ;;  %s18485_s8 = smov 56  }
0x366e   :  { %8196 = vrot.lane.b32.xlu1 %v17725_v30, %s18483_s2 }
0x36c0   :  { %v8110_v35 = vpop.permute.xlu1 %8109  ;;  %v7944_v40 = vpop.permute.xlu0 %7943 }
0x36c1   :  { %14582 = vmatpush3.xpose.msk.msra.mxu0 %vm2523_vm10, %v7944_v40  ;;  %14592 = vmatpush3.xpose.msk.msra.mxu1 %vm2523_vm10, %v8110_v35 }
0x36c2   :  { %14601 = vmatprep.subr.mxu1 %v16382_v8  ;;  %14586 = vmatprep.subr.mxu0 %v16382_v8 }
0x36c4   :  { %v8275_v50 = vpop.permute.xlu0 %8274  ;;  %v8108_v41 = vpop.permute.xlu1 %8107  ;;  %14584 = vmatmul.mubr.msk.f32.vlgmr.msra.gmra.mxu0 %vm2523_vm10, %v7941_v33 }
0x36c5   :  { %14594 = vmatmul.mubr.msk.f32.vlgmr.msra.gmra.mxu1 %vm2523_vm10, %v8108_v41  ;;  %14588 = vmatprep.mubr.msk.f32.mxu0 %vm16383_vm1, %v16382_v8 }
0x36c6   :  { %14602 = vmatpush3.xpose.msk.msra.mxu1 %vm2523_vm10, %v8275_v50  ;;  %14603 = vmatprep.mubr.msk.f32.mxu1 %vm16383_vm1, %v16382_v8 }
0x36c7   :  { %14611 = vmatprep.subr.mxu1 %v16382_v8 }
0x36c8   :  { %v8440_v43 = vpop.permute.xlu0 %8439  ;;  %v8273_v45 = vpop.permute.xlu1 %8272 }
0x36c9   :  { %14604 = vmatmul.mubr.msk.f32.vlgmr.msra.gmra.mxu1 %vm2523_vm10, %v8273_v45 }
0x36ca   :  { %14612 = vmatpush3.xpose.msk.msra.mxu1 %vm2523_vm10, %v8440_v43  ;;  %14613 = vmatprep.mubr.msk.f32.mxu1 %vm16383_vm1, %v16382_v8 }
0x36cb   :  { %14621 = vmatprep.subr.mxu1 %v16382_v8 }
0x36cc   :  { %v8605_v46 = vpop.permute.xlu0 %8604  ;;  %v8438_v47 = vpop.permute.xlu1 %8437 }
0x36cd   :  { %14614 = vmatmul.mubr.msk.f32.vlgmr.msra.gmra.mxu1 %vm2523_vm10, %v8438_v47 }
0x36ce   :  { %14622 = vmatpush3.xpose.msk.msra.mxu1 %vm2523_vm10, %v8605_v46  ;;  %14623 = vmatprep.mubr.msk.f32.mxu1 %vm16383_vm1, %v16382_v8 }
0x36cf   :  { %14631 = vmatprep.subr.mxu1 %v16382_v8 }
0x36d0   :  { %v8770_v57 = vpop.permute.xlu0 %8769  ;;  %v8603_v48 = vpop.permute.xlu1 %8602 }
0x36d1   :  { %14624 = vmatmul.mubr.msk.f32.vlgmr.msra.gmra.mxu1 %vm2523_vm10, %v8603_v48 }
0x36d2   :  { %14632 = vmatpush3.xpose.msk.msra.mxu1 %vm2523_vm10, %v8770_v57  ;;  %14633 = vmatprep.mubr.msk.f32.mxu1 %vm16383_vm1, %v16382_v8 }
0x36d3   :  { %14641 = vmatprep.subr.mxu1 %v16382_v8 }
0x36d4   :  { %v8935_v49 = vpop.permute.xlu0 %8934  ;;  %v8768_v31 = vpop.permute.xlu1 %8767 }
0x36d5   :  { %14634 = vmatmul.mubr.msk.f32.vlgmr.msra.gmra.mxu1 %vm2523_vm10, %v8768_v31 }
0x36d6   :  { %14642 = vmatpush3.xpose.msk.msra.mxu1 %vm2523_vm10, %v8935_v49  ;;  %14643 = vmatprep.mubr.msk.f32.mxu1 %vm16383_vm1, %v16382_v8 }
0x36d7   :  { %14651 = vmatprep.subr.mxu1 %v16382_v8 }
0x36d8   :  { %v9100_v36 = vpop.permute.xlu0 %9099  ;;  %v8933_v51 = vpop.permute.xlu1 %8932 }
0x36d9   :  { %14644 = vmatmul.mubr.msk.f32.vlgmr.msra.gmra.mxu1 %vm2523_vm10, %v8933_v51 }
0x36da   :  { %14652 = vmatpush3.xpose.msk.msra.mxu1 %vm2523_vm10, %v9100_v36  ;;  %14653 = vmatprep.mubr.msk.f32.mxu1 %vm16383_vm1, %v16382_v8 }
0x36db   :  { %14661 = vmatprep.subr.mxu1 %v16382_v8 }
0x36dc   :  { %v8032_v52 = vpop.permute.xlu0 %8031  ;;  %v9098_v37 = vpop.permute.xlu1 %9097 }
0x36dd   :  { %14587 = vmatpush3.msra.mxu0 %v8032_v52  ;;  %14654 = vmatmul.mubr.msk.f32.vlgmr.msra.gmra.mxu1 %vm2523_vm10, %v9098_v37 }
0x36de   :  { %14596 = vmatprep.subr.mxu0 %v16382_v8  ;;  %14669 = vmatprep.mubr.msk.f32.mxu1 %vm16383_vm1, %v16382_v8 }
0x36e0   :  { %v17810_v17 = vpop.permute.xlu1 %8196 }
0x3708   :  { %v7829_v56 = vpop.f32.mrf.mxu0 }
0x3709   :  { %v7830_v58 = vadd.f32 %v13485_v55, %v7829_v56 }
0x370a   :  { %v14569_v59 = vpop.f32.mrf.mxu0 }
0x370b   :  { %7833 = vst [vmem:[%s16707_s5] sm:$0xff] %v7830_v58 }
0x3784   :  { %v8016_v60 = vpop.f32.mrf.mxu0 }
0x3785   :  { %v8181_v34 = vpop.f32.mrf.mxu1  ;;  %v8020_v39 = vsel %vm2599_vm11, %v8016_v60, -inf }
0x3786   :  { %8021 = vmax.xlane.f32.xlu0 %v8020_v39  ;;  %v14585_v61 = vpop.f32.mrf.mxu0  ;;  %v8185_v62 = vsel %vm2599_vm11, %v8181_v34, -inf }
0x3787   :  { %8186 = vmax.xlane.f32.xlu1 %v8185_v62  ;;  %v14595_v26 = vpop.f32.mrf.mxu1 }
0x3789   :  { %v8346_v42 = vpop.f32.mrf.mxu1 }
0x378a   :  { %v8350_v63 = vsel %vm2599_vm11, %v8346_v42, -inf }
0x378b   :  { %8351 = vmax.xlane.f32.xlu0 %v8350_v63  ;;  %v14605_v0 = vpop.f32.mrf.mxu1 }
0x378d   :  { %v8511_v1 = vpop.f32.mrf.mxu1 }
0x378e   :  { %v8515_v24 = vsel %vm2599_vm11, %v8511_v1, -inf }
0x378f   :  { %8516 = vmax.xlane.f32.xlu0 %v8515_v24  ;;  %v14615_v2 = vpop.f32.mrf.mxu1 }
0x3791   :  { %v8676_v3 = vpop.f32.mrf.mxu1 }
0x3792   :  { %v8680_v4 = vsel %vm2599_vm11, %v8676_v3, -inf }
0x3793   :  { %8681 = vmax.xlane.f32.xlu1 %v8680_v4  ;;  %v14625_v5 = vpop.f32.mrf.mxu1 }
0x3795   :  { %v8841_v53 = vpop.f32.mrf.mxu1 }
0x3796   :  { %v8845_v6 = vsel %vm2599_vm11, %v8841_v53, -inf }
0x3797   :  { %8846 = vmax.xlane.f32.xlu0 %v8845_v6  ;;  %v14635_v44 = vpop.f32.mrf.mxu1 }
0x3799   :  { %v9006_v7 = vpop.f32.mrf.mxu1 }
0x379a   :  { %v9010_v10 = vsel %vm2599_vm11, %v9006_v7, -inf }
0x379b   :  { %9011 = vmax.xlane.f32.xlu1 %v9010_v10  ;;  %v14645_v12 = vpop.f32.mrf.mxu1 }
0x379d   :  { %v9171_v15 = vpop.f32.mrf.mxu1 }
0x379e   :  { %v9175_v29 = vsel %vm2599_vm11, %v9171_v15, -inf }
0x379f   :  { %9176 = vmax.xlane.f32.xlu0 %v9175_v29  ;;  %v14655_v16 = vpop.f32.mrf.mxu1 }
0x37ac   :  { %8526 = vrot.lane.b32.xlu1 %v17725_v30, %s18484_s16 }
0x37b5   :  { %8361 = vrot.lane.b32.xlu0 %v17725_v30, %s18485_s8 }
0x380f   :  { %v8022_v18 = vpop.xlane.xlu0 %8021 }
0x3810   :  { %v8023_v28 = vsub.f32 %v8016_v60, %v8022_v18  ;;  %v8187_v19 = vpop.xlane.xlu1 %8186 }
0x3811   :  { %v8188_v11 = vsub.f32 %v8181_v34, %v8187_v19 }
0x3812   :  { %v8024_v20 = vmul.f32 1.442695, %v8023_v28 }
0x3813   :  { %v8189_v13 = vmul.f32 1.442695, %v8188_v11 }
0x3814   :  { %15269 = vpow2.f32 %v8024_v20  ;;  %v8352_v54 = vpop.xlane.xlu0 %8351 }
0x3815   :  { %15271 = vpow2.f32 %v8189_v13  ;;  %v8353_v21 = vsub.f32 %v8346_v42, %v8352_v54 }
0x3817   :  { %v8354_v14 = vmul.f32 1.442695, %v8353_v21 }
0x3818   :  { %v8517_v25 = vpop.xlane.xlu0 %8516 }
0x3819   :  { %15273 = vpow2.f32 %v8354_v14  ;;  %v8518_v32 = vsub.f32 %v8511_v1, %v8517_v25 }
0x381b   :  { %v8519_v33 = vmul.f32 1.442695, %v8518_v32 }
0x381c   :  { %v8682_v57 = vpop.xlane.xlu1 %8681 }
0x381d   :  { %15275 = vpow2.f32 %v8519_v33  ;;  %v8683_v48 = vsub.f32 %v8676_v3, %v8682_v57  ;;  %v7939_v57 = vld [vmem:[%s18475_s30 + $0x18] sm:$0xff] }
0x381e   :  { %14662 = vmatpush3.msra.mxu1 %v7939_v57  ;;  %v13519_v57 = vld [vmem:[#allocation30] ss:$0 sm:$0xff] }
0x381f   :  { %v8684_v51 = vmul.f32 1.442695, %v8683_v48  ;;  %14663 = vmatprep.subr.mxu1 %v16382_v8  ;;  %v7938_v48 = vld [vmem:[%s18475_s30 + $0x10] sm:$0xff] }
0x3820   :  { %v8847_v49 = vpop.xlane.xlu0 %8846  ;;  %14664 = vmatpush3.msra.mxu1 %v7938_v48 }
0x3821   :  { %v15270_v35 = vpop.eup %15269  ;;  %v8848_v36 = vsub.f32 %v8841_v53, %v8847_v49  ;;  %15277 = vpow2.f32 %v8684_v51  ;;  %v7937_v49 = vld [vmem:[%s18475_s30 + $0x8] sm:$0xff]  ;;  %14665 = vmatprep.subr.mxu1 %v16382_v8 }
0x3822   :  { %v15272_v40 = vpop.eup %15271  ;;  %v8026_v50 = vsel %vm2599_vm11, %v15270_v35, 0.0  ;;  %14666 = vmatpush3.msra.mxu1 %v7937_v49 }
0x3823   :  { %8027 = vadd.xlane.f32.xlu1 %v8026_v50  ;;  %v8191_v41 = vsel %vm2599_vm11, %v15272_v40, 0.0  ;;  %v8849_v55 = vmul.f32 1.442695, %v8848_v36  ;;  %14667 = vmatprep.subr.mxu1 %v16382_v8  ;;  %v7936_v36 = vld [vmem:[%s18475_s30] sm:$0xff]  ;;  %s18490_s30 = smov 72  }
0x3824   :  { %8192 = vadd.xlane.f32.xlu0 %v8191_v41  ;;  %v9012_v31 = vpop.xlane.xlu1 %9011  ;;  %14668 = vmatpush3.msra.mxu1 %v7936_v36 }
0x3825   :  { %v9013_v52 = vsub.f32 %v9006_v7, %v9012_v31  ;;  %15279 = vpow2.f32 %v8849_v55  ;;  %14683 = vmatprep.subr.mxu1 %v16382_v8 }
0x3826   :  { %v15274_v43 = vpop.eup %15273 }
0x3827   :  { %v8356_v45 = vsel %vm2599_vm11, %v15274_v43, 0.0  ;;  %v9014_v56 = vmul.f32 1.442695, %v9013_v52 }
0x3828   :  { %8357 = vadd.xlane.f32.xlu1 %v8356_v45  ;;  %v9177_v37 = vpop.xlane.xlu0 %9176  ;;  %v8527_v0 = vpop.permute.xlu1 %8526 }
0x3829   :  { %v9178_v58 = vsub.f32 %v9171_v15, %v9177_v37  ;;  %15281 = vpow2.f32 %v9014_v56 }
0x382a   :  { %v17815_v46 = vpop.eup %15275 }
0x382b   :  { %v8521_v47 = vsel %vm2599_vm11, %v17815_v46, 0.0  ;;  %v9179_v59 = vmul.f32 1.442695, %v9178_v58 }
0x382c   :  { %8522 = vadd.xlane.f32.xlu0 %v8521_v47  ;;  %v8362_v1 = vpop.permute.xlu0 %8361 }
0x382d   :  { %15283 = vpow2.f32 %v9179_v59 }
0x382e   :  { %v15278_v60 = vpop.eup %15277 }
0x382f   :  { %v8686_v39 = vsel %vm2599_vm11, %v15278_v60, 0.0 }
0x3832   :  { %v17823_v34 = vpop.eup %15279 }
0x3833   :  { %v8851_v26 = vsel %vm2599_vm11, %v17823_v34, 0.0 }
0x3836   :  { %v17826_v61 = vpop.eup %15281 }
0x3837   :  { %v9016_v62 = vsel %vm2599_vm11, %v17826_v61, 0.0 }
0x3839   :  { %8856 = vrot.lane.b32.xlu1 %v17725_v30, %s18486_s15 }
0x383a   :  { %v17832_v42 = vpop.eup %15283 }
0x383b   :  { %v9181_v63 = vsel %vm2599_vm11, %v17832_v42, 0.0 }
0x3842   :  { %8691 = vrot.lane.b32.xlu0 %v17725_v30, %s18487_s3 }
0x385d   :  { %8687 = vadd.xlane.f32.xlu1 %v8686_v39 }
0x3861   :  { %9017 = vadd.xlane.f32.xlu1 %v9016_v62  ;;  %8852 = vadd.xlane.f32.xlu0 %v8851_v26 }
0x3865   :  { %9182 = vadd.xlane.f32.xlu1 %v9181_v63 }
0x3876   :  { %9186 = vrot.lane.b32.xlu1 %v17725_v30, %s18477_s28 }
0x3877   :  { %9021 = vrot.lane.b32.xlu0 %v17725_v30, %s18476_s22 }
0x38ac   :  { %v8028_v24 = vpop.xlane.xlu1 %8027 }
0x38ad   :  { %15285 = vrcp.f32 %v8028_v24  ;;  %v8193_v2 = vpop.xlane.xlu0 %8192 }
0x38ae   :  { %15287 = vrcp.f32 %v8193_v2 }
0x38b1   :  { %v8358_v3 = vpop.xlane.xlu1 %8357 }
0x38b2   :  { %15289 = vrcp.f32 %v8358_v3 }
0x38b5   :  { %v8523_v4 = vpop.xlane.xlu0 %8522  ;;  %v8857_v29 = vpop.permute.xlu1 %8856 }
0x38b6   :  { %15291 = vrcp.f32 %v8523_v4 }
0x38b9   :  { %v8692_v15 = vpop.permute.xlu0 %8691 }
0x38ba   :  { %v15286_v5 = vpop.eup %15285 }
0x38bb   :  { %v8030_v53 = vmul.f32 %v15286_v5, %v15270_v35  ;;  %v15288_v6 = vpop.eup %15287  ;;  %v13513_v5 = vld [vmem:[#allocation21] ss:$0 sm:$0xff] }
0x38bc   :  { %v8195_v30 = vmul.f32 %v15288_v6, %v15272_v40 }
0x38bd   :  { %14589 = vmatmul.mubr.msk.f32.vlgmr.msra.gmra.mxu0 %vm2599_vm11, %v8030_v53 }
0x38be   :  { %14597 = vmatpush3.msra.mxu0 %v17810_v17  ;;  %14598 = vmatprep.mubr.msk.f32.mxu0 %vm16383_vm1, %v16382_v8 }
0x38bf   :  { %14606 = vmatprep.subr.mxu0 %v16382_v8  ;;  %v15290_v44 = vpop.eup %15289 }
0x38c0   :  { %v8360_v7 = vmul.f32 %v15290_v44, %v15274_v43 }
0x38c1   :  { %14599 = vmatmul.mubr.msk.f32.vlgmr.msra.gmra.mxu0 %vm2599_vm11, %v8195_v30 }
0x38c2   :  { %14607 = vmatpush3.msra.mxu0 %v8362_v1  ;;  %14608 = vmatprep.mubr.msk.f32.mxu0 %vm16383_vm1, %v16382_v8 }
0x38c3   :  { %14616 = vmatprep.subr.mxu0 %v16382_v8  ;;  %v15292_v10 = vpop.eup %15291 }
0x38c4   :  { %v8525_v12 = vmul.f32 %v15292_v10, %v17815_v46 }
0x38c5   :  { %14609 = vmatmul.mubr.msk.f32.vlgmr.msra.gmra.mxu0 %vm2599_vm11, %v8360_v7 }
0x38c6   :  { %14617 = vmatpush3.msra.mxu0 %v8527_v0  ;;  %14618 = vmatprep.mubr.msk.f32.mxu0 %vm16383_vm1, %v16382_v8 }
0x38c7   :  { %14626 = vmatprep.subr.mxu0 %v16382_v8 }
0x38c9   :  { %14619 = vmatmul.mubr.msk.f32.vlgmr.msra.gmra.mxu0 %vm2599_vm11, %v8525_v12 }
0x38ca   :  { %14627 = vmatpush3.msra.mxu0 %v8692_v15  ;;  %14628 = vmatprep.mubr.msk.f32.mxu0 %vm16383_vm1, %v16382_v8 }
0x38cb   :  { %14636 = vmatprep.subr.mxu0 %v16382_v8 }
0x38e6   :  { %v8688_v16 = vpop.xlane.xlu1 %8687 }
0x38e7   :  { %15293 = vrcp.f32 %v8688_v16 }
0x38ea   :  { %v9018_v17 = vpop.xlane.xlu1 %9017  ;;  %v8853_v18 = vpop.xlane.xlu0 %8852 }
0x38eb   :  { %15295 = vrcp.f32 %v8853_v18  ;;  %v9408_v18 = vld [vmem:[#allocation25 + $0x10] sm:$0xff] }
0x38ec   :  { %15297 = vrcp.f32 %v9018_v17  ;;  %v9409_v17 = vld [vmem:[#allocation25 + $0x18] sm:$0xff] }
0x38ee   :  { %v9183_v28 = vpop.xlane.xlu1 %9182  ;;  %v9022_v21 = vpop.permute.xlu0 %9021 }
0x38ef   :  { %15299 = vrcp.f32 %v9183_v28  ;;  %v9407_v28 = vld [vmem:[#allocation25 + $0x8] sm:$0xff] }
0x38f2   :  { %v9187_v32 = vpop.permute.xlu1 %9186 }
0x38f4   :  { %v15294_v19 = vpop.eup %15293 }
0x38f5   :  { %v8690_v11 = vmul.f32 %v15294_v19, %v15278_v60  ;;  %v9494_v19 = vld [vmem:[#allocation28 + $0x18] sm:$0xff] }
0x38f7   :  { %14629 = vmatmul.mubr.msk.f32.vlgmr.msra.gmra.mxu0 %vm2599_vm11, %v8690_v11 }
0x38f8   :  { %14637 = vmatpush3.msra.mxu0 %v8857_v29  ;;  %14638 = vmatprep.mubr.msk.f32.mxu0 %vm16383_vm1, %v16382_v8  ;;  %v15296_v20 = vpop.eup %15295 }
0x38f9   :  { %14646 = vmatprep.subr.mxu0 %v16382_v8  ;;  %v8855_v13 = vmul.f32 %v15296_v20, %v17823_v34  ;;  %v15298_v54 = vpop.eup %15297 }
0x38fa   :  { %v9020_v14 = vmul.f32 %v15298_v54, %v17826_v61 }
0x38fb   :  { %14639 = vmatmul.mubr.msk.f32.vlgmr.msra.gmra.mxu0 %vm2599_vm11, %v8855_v13 }
0x38fc   :  { %14647 = vmatpush3.msra.mxu0 %v9022_v21  ;;  %14648 = vmatprep.mubr.msk.f32.mxu0 %vm16383_vm1, %v16382_v8  ;;  %v15300_v25 = vpop.eup %15299  ;;  %v13515_v21 = vld [vmem:[#allocation22] ss:$0 sm:$0xff] }
0x38fd   :  { %14656 = vmatprep.subr.mxu0 %v16382_v8  ;;  %v9185_v33 = vmul.f32 %v15300_v25, %v17832_v42  ;;  %v13516_v25 = vld [vmem:[#allocation24] ss:$0 sm:$0xff] }
0x38ff   :  { %14649 = vmatmul.mubr.msk.f32.vlgmr.msra.gmra.mxu0 %vm2599_vm11, %v9020_v14 }
0x3900   :  { %14657 = vmatpush3.msra.mxu0 %v9187_v32  ;;  %14658 = vmatprep.mubr.msk.f32.mxu0 %vm16383_vm1, %v16382_v8 }
0x3901   :  { %14672 = vmatprep.subr.mxu0 %v16382_v8 }
0x3903   :  { %14659 = vmatmul.mubr.msk.f32.vlgmr.msra.gmra.mxu0 %vm2599_vm11, %v9185_v33 }
0x3904   :  { %14680 = vmatprep.mubr.msk.f32.mxu0 %vm16383_vm1, %v16382_v8  ;;  %14673 = vmatpush3.msra.mxu0 %v9409_v17 }
0x3905   :  { %14674 = vmatprep.subr.mxu0 %v16382_v8 }
0x3906   :  { %14675 = vmatpush3.msra.mxu0 %v9408_v18 }
0x3907   :  { %14676 = vmatprep.subr.mxu0 %v16382_v8 }
0x3908   :  { %14677 = vmatpush3.msra.mxu0 %v9407_v28 }
0x3909   :  { %14678 = vmatprep.subr.mxu0 %v16382_v8 }
0x397d   :  { %v8103_v35 = vpop.f32.mrf.mxu0 }
0x397f   :  { %v14590_v40 = vpop.f32.mrf.mxu0 }
0x3980   :  { %v9492_v40 = vld [vmem:[#allocation28 + $0x8] sm:$0xff] }
0x3981   :  { %v8268_v50 = vpop.f32.mrf.mxu0 }
0x3982   :  { %9263 = vrot.lane.b32.xlu0 %v8268_v50, %s18478_s20  ;;  %v9491_v50 = vld [vmem:[#allocation28] sm:$0xff] }
0x3983   :  { %v14600_v41 = vpop.f32.mrf.mxu0 }
0x3984   :  { %v13517_v41 = vld [vmem:[#allocation27] ss:$0 sm:$0xff] }
0x3985   :  { %v8433_v43 = vpop.f32.mrf.mxu0 }
0x3986   :  { %9267 = vrot.lane.b32.xlu1 %v8433_v43, %s18479_s18 }
0x3987   :  { %v14610_v45 = vpop.f32.mrf.mxu0 }
0x3989   :  { %v8598_v46 = vpop.f32.mrf.mxu0 }
0x398a   :  { %9271 = vrot.lane.b32.xlu0 %v8598_v46, %s18480_s4 }
0x398b   :  { %v14620_v47 = vpop.f32.mrf.mxu0 }
0x39b7   :  { %v8763_v31 = vpop.f32.mrf.mxu0 }
0x39b8   :  { %9275 = vrot.lane.b32.xlu1 %v8763_v31, %s16410_s26 }
0x39b9   :  { %v14630_v51 = vpop.f32.mrf.mxu0 }
0x39bb   :  { %v8928_v52 = vpop.f32.mrf.mxu0 }
0x39bc   :  { %9279 = vrot.lane.b32.xlu0 %v8928_v52, %s16411_s1 }
0x39bd   :  { %v14640_v37 = vpop.f32.mrf.mxu0 }
0x39bf   :  { %v9093_v55 = vpop.f32.mrf.mxu0 }
0x39c0   :  { %9283 = vrot.lane.b32.xlu1 %v9093_v55, %s18488_s0 }
0x39c1   :  { %v14650_v56 = vpop.f32.mrf.mxu0 }
0x39c3   :  { %v9258_v58 = vpop.f32.mrf.mxu0 }
0x39c4   :  { %9287 = vrot.lane.b32.xlu0 %v9258_v58, %s18489_s14 }
0x39c5   :  { %v14660_v59 = vpop.f32.mrf.mxu0 }
0x39c6   :  { %v9608_v59 = vld [vmem:[#allocation34 + $0x18] sm:$0xff] }
0x39f4   :  { %v9264_v60 = vpop.permute.xlu0 %9263 }
0x39f5   :  { %v9290_v62 = vsel %vm2523_vm10, %v8103_v35, %v9264_v60  ;;  %v9493_v35 = vld [vmem:[#allocation28 + $0x10] sm:$0xff] }
0x39f6   :  { %v9607_v60 = vld [vmem:[#allocation34 + $0x10] sm:$0xff] }
0x39f8   :  { %v9268_v34 = vpop.permute.xlu1 %9267 }
0x39f9   :  { %v9291_v26 = vsel %vm2599_vm11, %v9290_v62, %v9268_v34  ;;  %v9606_v34 = vld [vmem:[#allocation34 + $0x8] sm:$0xff] }
0x39fc   :  { %v9272_v39 = vpop.permute.xlu0 %9271 }
0x39fd   :  { %v9292_v63 = vsel %vm3872_vm12, %v9291_v26, %v9272_v39  ;;  %v9605_v39 = vld [vmem:[#allocation34] sm:$0xff] }
0x3a2a   :  { %v9276_v61 = vpop.permute.xlu1 %9275 }
0x3a2b   :  { %v9293_v1 = vsel %vm775_vm0, %v9292_v63, %v9276_v61  ;;  %v13521_v63 = vld [vmem:[#allocation31] ss:$0 sm:$0xff] }
0x3a2e   :  { %v9280_v42 = vpop.permute.xlu0 %9279 }
0x3a2f   :  { %v9294_v24 = vsel %vm3875_vm13, %v9293_v1, %v9280_v42  ;;  %v13522_v1 = vld [vmem:[#allocation33] ss:$0 sm:$0xff] }
0x3a32   :  { %v9284_v0 = vpop.permute.xlu1 %9283 }
0x3a33   :  { %v9295_v2 = vsel %vm3877_vm14, %v9294_v24, %v9284_v0 }
0x3a36   :  { %v9288_v3 = vpop.permute.xlu0 %9287 }
0x3a37   :  { %v9296_v4 = vsel %vm3879_vm15, %v9295_v2, %v9288_v3  ;;  %v13523_v3 = vld [vmem:[#allocation36] ss:$0 sm:$0xff] }
0x3a38   :  { %14670 = vmatmul.mubr.msk.f32.vlgmr.msra.gmra.mxu1 %vm956_vm2, %v9296_v4 }
0x3a39   :  { %14691 = vmatprep.mubr.msk.f32.mxu1 %vm16383_vm1, %v16382_v8  ;;  %14684 = vmatpush3.msra.mxu1 %v9494_v19 }
0x3a3a   :  { %14685 = vmatprep.subr.mxu1 %v16382_v8 }
0x3a3b   :  { %14686 = vmatpush3.msra.mxu1 %v9493_v35 }
0x3a3c   :  { %14687 = vmatprep.subr.mxu1 %v16382_v8 }
0x3a3d   :  { %14688 = vmatpush3.msra.mxu1 %v9492_v40 }
0x3a3e   :  { %14689 = vmatprep.subr.mxu1 %v16382_v8 }
0x3a3f   :  { %14690 = vmatpush3.msra.mxu1 %v9491_v50 }
0x3a40   :  { %14705 = vmatprep.subr.mxu1 %v16382_v8 }
0x3af8   :  { %v9372_v53 = vpop.f32.mrf.mxu1 }
0x3af9   :  { %v9373_v6 = vadd.f32 %v13513_v5, %v9372_v53 }
0x3afa   :  { %v14671_v30 = vpop.f32.mrf.mxu1 }
0x3afb   :  { %v9378_v44 = vadd.f32 %v9373_v6, %v17043_v27  ;;  %v9406_v27 = vld [vmem:[#allocation25] sm:$0xff] }
0x3afc   :  { %14679 = vmatpush3.msra.mxu0 %v9406_v27 }
0x3afd   :  { %v9379_v7 = vsel %vm956_vm2, %v9378_v44, 0.0  ;;  %14694 = vmatprep.subr.mxu0 %v16382_v8 }
0x3afe   :  { %9380 = vadd.xlane.f32.xlu1 %v9379_v7 }
0x3b87   :  { %v9381_v10 = vpop.xlane.xlu1 %9380 }
0x3b88   :  { %v9382_v12 = vmul.f32 0.03125, %v9381_v10 }
0x3b8a   :  { %v9383_v15 = vsub.f32 %v9378_v44, %v9382_v12 }
0x3b8c   :  { %v9384_v29 = vmul.f32 %v9383_v15, %v9383_v15 }
0x3b8e   :  { %v9385_v16 = vsel %vm956_vm2, %v9384_v29, 0.0 }
0x3b8f   :  { %9386 = vadd.xlane.f32.xlu0 %v9385_v16 }
0x3c18   :  { %v9387_v11 = vpop.xlane.xlu0 %9386 }
0x3c19   :  { %v9388_v20 = vmul.f32 0.03125, %v9387_v11 }
0x3c1b   :  { %v9389_v13 = vadd.f32 1e-05, %v9388_v20 }
0x3c1d   :  { %15301 = vrsqrt.f32 %v9389_v13 }
0x3c2a   :  { %v15302_v54 = vpop.eup %15301 }
0x3c2b   :  { %v9391_v14 = vmul.f32 %v15302_v54, %v9383_v15 }
0x3c2d   :  { %v9398_v32 = vmul.f32 %v13515_v21, %v9391_v14 }
0x3c2f   :  { %v9405_v33 = vadd.f32 %v13516_v25, %v9398_v32 }
0x3c31   :  { %14681 = vmatmul.mubr.msk.f32.vlgmr.msra.gmra.mxu0 %vm956_vm2, %v9405_v33 }
0x3c32   :  { %14702 = vmatprep.mubr.msk.f32.mxu0 %vm16383_vm1, %v16382_v8  ;;  %14695 = vmatpush3.msra.mxu0 %v9608_v59 }
0x3c33   :  { %14696 = vmatprep.subr.mxu0 %v16382_v8 }
0x3c34   :  { %14697 = vmatpush3.msra.mxu0 %v9607_v60 }
0x3c35   :  { %14698 = vmatprep.subr.mxu0 %v16382_v8 }
0x3c36   :  { %14699 = vmatpush3.msra.mxu0 %v9606_v34 }
0x3c37   :  { %14700 = vmatprep.subr.mxu0 %v16382_v8 }
0x3c38   :  { %14701 = vmatpush3.msra.mxu0 %v9605_v39 }
0x3c39   :  { %14710 = vmatprep.subr.mxu0 %v16382_v8 }
0x3cf1   :  { %v9486_v43 = vpop.f32.mrf.mxu0 }
0x3cf2   :  { %v9487_v45 = vadd.f32 %v13517_v41, %v9486_v43 }
0x3cf3   :  { %v14682_v46 = vpop.f32.mrf.mxu0 }
0x3cf4   :  { %v9490_v47 = vmax.f32 %v9487_v45, 0.0 }
0x3cf6   :  { %14692 = vmatmul.mubr.msk.f32.vlgmr.msra.gmra.mxu1 %vm956_vm2, %v9490_v47 }
0x3cf7   :  { %14707 = vmatprep.mubr.msk.f32.mxu1 %vm16383_vm1, %v16382_v8 }
0x3db6   :  { %v9571_v48 = vpop.f32.mrf.mxu1 }
0x3db7   :  { %v9572_v49 = vadd.f32 %v13519_v57, %v9571_v48 }
0x3db8   :  { %v14693_v31 = vpop.f32.mrf.mxu1 }
0x3db9   :  { %v9577_v36 = vadd.f32 %v9572_v49, %v9405_v33 }
0x3dbb   :  { %v9578_v51 = vsel %vm956_vm2, %v9577_v36, 0.0 }
0x3dbc   :  { %9579 = vadd.xlane.f32.xlu0 %v9578_v51 }
0x3e45   :  { %v9580_v52 = vpop.xlane.xlu0 %9579 }
0x3e46   :  { %v9581_v37 = vmul.f32 0.03125, %v9580_v52 }
0x3e48   :  { %v9582_v55 = vsub.f32 %v9577_v36, %v9581_v37 }
0x3e4a   :  { %v9583_v56 = vmul.f32 %v9582_v55, %v9582_v55 }
0x3e4c   :  { %v9584_v58 = vsel %vm956_vm2, %v9583_v56, 0.0 }
0x3e4d   :  { %9585 = vadd.xlane.f32.xlu1 %v9584_v58 }
0x3ed6   :  { %v9586_v61 = vpop.xlane.xlu1 %9585 }
0x3ed7   :  { %v9587_v62 = vmul.f32 0.03125, %v9586_v61 }
0x3ed9   :  { %v9588_v26 = vadd.f32 1e-05, %v9587_v62 }
0x3edb   :  { %15303 = vrsqrt.f32 %v9588_v26 }
0x3ee8   :  { %v15304_v42 = vpop.eup %15303 }
0x3ee9   :  { %v9590_v0 = vmul.f32 %v15304_v42, %v9582_v55 }
0x3eeb   :  { %v9597_v24 = vmul.f32 %v13521_v63, %v9590_v0 }
0x3eed   :  { %v17924_v2 = vadd.f32 %v13522_v1, %v9597_v24 }
0x3eef   :  { %14703 = vmatmul.mubr.msk.f32.vlgmr.msra.gmra.mxu0 %vm956_vm2, %v17924_v2 }
0x3ef0   :  { %14712 = vmatprep.mubr.msk.f32.mxu0 %vm16383_vm1, %v16382_v8 }
0x3faf   :  { %v9685_v4 = vpop.f32.mrf.mxu0 }
0x3fb0   :  { %v17930_v5 = vadd.f32 %v13523_v3, %v9685_v4 }
0x3fb1   :  { %v14704_v53 = vpop.f32.mrf.mxu0 }
0x3fb2   :  { %9862 = vrot.lane.b32.xlu1 %v17930_v5, %s18390_s7  ;;  %9696 = vrot.lane.b32.xlu0 %v17930_v5, %s18393_s10  ;;  %v9694_v6 = vmul.f32 0.5, %v17930_v5  ;;  %s18491_s7 = smov 108   ;;  %s18494_s10 = smov 64  }
0x3fb6   :  { %10027 = vrot.lane.b32.xlu0 %v17930_v5, %s18391_s6  ;;  %9860 = vrot.lane.b32.xlu1 %v9694_v6, %s16389_s11  ;;  %s18492_s6 = smov 68  }
0x3fba   :  { %10192 = vrot.lane.b32.xlu0 %v17930_v5, %s18392_s23  ;;  %10025 = vrot.lane.b32.xlu1 %v9694_v6, %s16391_s12  ;;  %s18493_s23 = smov 104  }
0x3fbe   :  { %10357 = vrot.lane.b32.xlu0 %v17930_v5, %s18395_s9  ;;  %10190 = vrot.lane.b32.xlu1 %v9694_v6, %s16393_s27  ;;  %s18495_s9 = smov 100  }
0x3fc2   :  { %10522 = vrot.lane.b32.xlu0 %v17930_v5, %s16394_s17  ;;  %10355 = vrot.lane.b32.xlu1 %v9694_v6, %s16395_s29 }
0x3fc6   :  { %10687 = vrot.lane.b32.xlu0 %v17930_v5, %s18490_s30  ;;  %10520 = vrot.lane.b32.xlu1 %v9694_v6, %s18491_s7 }
0x3fca   :  { %10852 = vrot.lane.b32.xlu0 %v17930_v5, %s18492_s6  ;;  %10685 = vrot.lane.b32.xlu1 %v9694_v6, %s18493_s23 }
0x3fce   :  { %9784 = vrot.lane.b32.xlu0 %v17930_v5, %s18494_s10  ;;  %10850 = vrot.lane.b32.xlu1 %v9694_v6, %s18495_s9  ;;  %s18498_s10 = smov 92  }
0x3fd2   :  { %9949 = vrot.lane.b32.xlu1 %v17930_v5, %s18483_s2 }
0x4024   :  { %v9863_v30 = vpop.permute.xlu1 %9862  ;;  %v9697_v44 = vpop.permute.xlu0 %9696 }
0x4025   :  { %14706 = vmatpush3.xpose.msk.msra.mxu1 %vm2523_vm10, %v9697_v44 }
0x4026   :  { %14715 = vmatprep.subr.mxu1 %v16382_v8 }
0x4028   :  { %v10028_v7 = vpop.permute.xlu0 %10027  ;;  %v9861_v10 = vpop.permute.xlu1 %9860  ;;  %14708 = vmatmul.mubr.msk.f32.vlgmr.msra.gmra.mxu1 %vm2523_vm10, %v9694_v6 }
0x4029   :  { %14716 = vmatpush3.xpose.msk.msra.mxu1 %vm2523_vm10, %v9863_v30  ;;  %14717 = vmatprep.mubr.msk.f32.mxu1 %vm16383_vm1, %v16382_v8 }
0x402a   :  { %14725 = vmatprep.subr.mxu1 %v16382_v8 }
0x402c   :  { %v10193_v12 = vpop.permute.xlu0 %10192  ;;  %v10026_v15 = vpop.permute.xlu1 %10025  ;;  %14718 = vmatmul.mubr.msk.f32.vlgmr.msra.gmra.mxu1 %vm2523_vm10, %v9861_v10 }
0x402d   :  { %14726 = vmatpush3.xpose.msk.msra.mxu1 %vm2523_vm10, %v10028_v7  ;;  %14727 = vmatprep.mubr.msk.f32.mxu1 %vm16383_vm1, %v16382_v8 }
0x402e   :  { %14735 = vmatprep.subr.mxu1 %v16382_v8 }
0x4030   :  { %v10358_v29 = vpop.permute.xlu0 %10357  ;;  %v10191_v16 = vpop.permute.xlu1 %10190  ;;  %14728 = vmatmul.mubr.msk.f32.vlgmr.msra.gmra.mxu1 %vm2523_vm10, %v10026_v15 }
0x4031   :  { %14736 = vmatpush3.xpose.msk.msra.mxu1 %vm2523_vm10, %v10193_v12  ;;  %14737 = vmatprep.mubr.msk.f32.mxu1 %vm16383_vm1, %v16382_v8 }
0x4032   :  { %14745 = vmatprep.subr.mxu1 %v16382_v8 }
0x4034   :  { %v10523_v17 = vpop.permute.xlu0 %10522  ;;  %v10356_v18 = vpop.permute.xlu1 %10355  ;;  %14738 = vmatmul.mubr.msk.f32.vlgmr.msra.gmra.mxu1 %vm2523_vm10, %v10191_v16 }
0x4035   :  { %14746 = vmatpush3.xpose.msk.msra.mxu1 %vm2523_vm10, %v10358_v29  ;;  %14747 = vmatprep.mubr.msk.f32.mxu1 %vm16383_vm1, %v16382_v8 }
0x4036   :  { %14755 = vmatprep.subr.mxu1 %v16382_v8 }
0x4038   :  { %v10688_v28 = vpop.permute.xlu0 %10687  ;;  %v10521_v27 = vpop.permute.xlu1 %10520  ;;  %14748 = vmatmul.mubr.msk.f32.vlgmr.msra.gmra.mxu1 %vm2523_vm10, %v10356_v18 }
0x4039   :  { %14756 = vmatpush3.xpose.msk.msra.mxu1 %vm2523_vm10, %v10523_v17  ;;  %14757 = vmatprep.mubr.msk.f32.mxu1 %vm16383_vm1, %v16382_v8 }
0x403a   :  { %14765 = vmatprep.subr.mxu1 %v16382_v8 }
0x403c   :  { %v10853_v19 = vpop.permute.xlu0 %10852  ;;  %14758 = vmatmul.mubr.msk.f32.vlgmr.msra.gmra.mxu1 %vm2523_vm10, %v10521_v27  ;;  %v10686_v11 = vpop.permute.xlu1 %10685 }
0x403d   :  { %14766 = vmatpush3.xpose.msk.msra.mxu1 %vm2523_vm10, %v10688_v28  ;;  %14767 = vmatprep.mubr.msk.f32.mxu1 %vm16383_vm1, %v16382_v8 }
0x403e   :  { %14775 = vmatprep.subr.mxu1 %v16382_v8 }
0x4040   :  { %v9785_v20 = vpop.permute.xlu0 %9784  ;;  %14768 = vmatmul.mubr.msk.f32.vlgmr.msra.gmra.mxu1 %vm2523_vm10, %v10686_v11  ;;  %v10851_v13 = vpop.permute.xlu1 %10850 }
0x4041   :  { %14711 = vmatpush3.msra.mxu0 %v9785_v20  ;;  %14776 = vmatpush3.xpose.msk.msra.mxu1 %vm2523_vm10, %v10853_v19 }
0x4042   :  { %14777 = vmatprep.mubr.msk.f32.mxu1 %vm16383_vm1, %v16382_v8  ;;  %14720 = vmatprep.subr.mxu0 %v16382_v8 }
0x4043   :  { %14785 = vmatprep.subr.mxu1 %v16382_v8 }
0x4044   :  { %14778 = vmatmul.mubr.msk.f32.vlgmr.msra.gmra.mxu1 %vm2523_vm10, %v10851_v13  ;;  %v18013_v58 = vpop.permute.xlu1 %9949 }
0x4045   :  { %14793 = vmatprep.mubr.msk.f32.mxu1 %vm16383_vm1, %v16382_v8 }
0x40e8   :  { %v9769_v54 = vpop.f32.mrf.mxu1 }
0x40e9   :  { %v9773_v21 = vsel %vm2599_vm11, %v9769_v54, -inf }
0x40ea   :  { %9774 = vmax.xlane.f32.xlu0 %v9773_v21  ;;  %v14709_v14 = vpop.f32.mrf.mxu1 }
0x40ec   :  { %v9934_v25 = vpop.f32.mrf.mxu1 }
0x40ed   :  { %v9938_v32 = vsel %vm2599_vm11, %v9934_v25, -inf }
0x40ee   :  { %9939 = vmax.xlane.f32.xlu1 %v9938_v32  ;;  %v14719_v33 = vpop.f32.mrf.mxu1 }
0x40f0   :  { %v10099_v35 = vpop.f32.mrf.mxu1 }
0x40f1   :  { %v10103_v40 = vsel %vm2599_vm11, %v10099_v35, -inf }
0x40f2   :  { %10104 = vmax.xlane.f32.xlu0 %v10103_v40  ;;  %v14729_v50 = vpop.f32.mrf.mxu1 }
0x40f4   :  { %v10264_v41 = vpop.f32.mrf.mxu1 }
0x40f5   :  { %v10268_v43 = vsel %vm2599_vm11, %v10264_v41, -inf }
0x40f6   :  { %10269 = vmax.xlane.f32.xlu0 %v10268_v43  ;;  %v14739_v45 = vpop.f32.mrf.mxu1 }
0x40f8   :  { %v10429_v46 = vpop.f32.mrf.mxu1 }
0x40f9   :  { %v10433_v47 = vsel %vm2599_vm11, %v10429_v46, -inf }
0x40fa   :  { %10434 = vmax.xlane.f32.xlu1 %v10433_v47  ;;  %v14749_v57 = vpop.f32.mrf.mxu1 }
0x40fc   :  { %v10594_v48 = vpop.f32.mrf.mxu1 }
0x40fd   :  { %v10598_v49 = vsel %vm2599_vm11, %v10594_v48, -inf }
0x40fe   :  { %10599 = vmax.xlane.f32.xlu0 %v10598_v49  ;;  %v14759_v31 = vpop.f32.mrf.mxu1 }
0x4100   :  { %v10759_v36 = vpop.f32.mrf.mxu1 }
0x4101   :  { %v10763_v51 = vsel %vm2599_vm11, %v10759_v36, -inf }
0x4102   :  { %10764 = vmax.xlane.f32.xlu1 %v10763_v51  ;;  %v14769_v52 = vpop.f32.mrf.mxu1 }
0x4104   :  { %v10924_v37 = vpop.f32.mrf.mxu1 }
0x4105   :  { %v10928_v55 = vsel %vm2599_vm11, %v10924_v37, -inf }
0x4106   :  { %10929 = vmax.xlane.f32.xlu0 %v10928_v55  ;;  %v14779_v56 = vpop.f32.mrf.mxu1 }
0x4113   :  { %10279 = vrot.lane.b32.xlu1 %v17930_v5, %s18484_s16 }
0x411c   :  { %10114 = vrot.lane.b32.xlu0 %v17930_v5, %s18485_s8  ;;  %s18496_s8 = smov 96  }
0x4173   :  { %v9775_v59 = vpop.xlane.xlu0 %9774 }
0x4174   :  { %v9776_v60 = vsub.f32 %v9769_v54, %v9775_v59 }
0x4176   :  { %v9777_v34 = vmul.f32 1.442695, %v9776_v60 }
0x4177   :  { %v9940_v39 = vpop.xlane.xlu1 %9939 }
0x4178   :  { %15305 = vpow2.f32 %v9777_v34  ;;  %v9941_v61 = vsub.f32 %v9934_v25, %v9940_v39 }
0x417a   :  { %v9942_v62 = vmul.f32 1.442695, %v9941_v61 }
0x417b   :  { %v10105_v26 = vpop.xlane.xlu0 %10104 }
0x417c   :  { %15307 = vpow2.f32 %v9942_v62  ;;  %v10106_v42 = vsub.f32 %v10099_v35, %v10105_v26 }
0x417e   :  { %v10107_v63 = vmul.f32 1.442695, %v10106_v42 }
0x417f   :  { %v10270_v0 = vpop.xlane.xlu0 %10269 }
0x4180   :  { %15309 = vpow2.f32 %v10107_v63  ;;  %v10271_v1 = vsub.f32 %v10264_v41, %v10270_v0 }
0x4182   :  { %v10272_v24 = vmul.f32 1.442695, %v10271_v1 }
0x4183   :  { %v10435_v12 = vpop.xlane.xlu1 %10434 }
0x4184   :  { %15311 = vpow2.f32 %v10272_v24  ;;  %v10436_v15 = vsub.f32 %v10429_v46, %v10435_v12  ;;  %v9692_v12 = vld [vmem:[#allocation37 + $0x18] sm:$0xff] }
0x4185   :  { %v15306_v3 = vpop.eup %15305  ;;  %14786 = vmatpush3.msra.mxu1 %v9692_v12 }
0x4186   :  { %v9779_v4 = vsel %vm2599_vm11, %v15306_v3, 0.0  ;;  %v10437_v18 = vmul.f32 1.442695, %v10436_v15  ;;  %v9691_v15 = vld [vmem:[#allocation37 + $0x10] sm:$0xff]  ;;  %14787 = vmatprep.subr.mxu1 %v16382_v8 }
0x4187   :  { %9780 = vadd.xlane.f32.xlu1 %v9779_v4  ;;  %v10600_v29 = vpop.xlane.xlu0 %10599  ;;  %14788 = vmatpush3.msra.mxu1 %v9691_v15 }
0x4188   :  { %v10601_v17 = vsub.f32 %v10594_v48, %v10600_v29  ;;  %15313 = vpow2.f32 %v10437_v18  ;;  %14789 = vmatprep.subr.mxu1 %v16382_v8  ;;  %v9690_v29 = vld [vmem:[#allocation37 + $0x8] sm:$0xff] }
0x4189   :  { %v15308_v53 = vpop.eup %15307  ;;  %14790 = vmatpush3.msra.mxu1 %v9690_v29 }
0x418a   :  { %v9944_v6 = vsel %vm2599_vm11, %v15308_v53, 0.0  ;;  %v10602_v19 = vmul.f32 1.442695, %v10601_v17  ;;  %14791 = vmatprep.subr.mxu1 %v16382_v8 }
0x418b   :  { %9945 = vadd.xlane.f32.xlu0 %v9944_v6  ;;  %v10765_v16 = vpop.xlane.xlu1 %10764 }
0x418c   :  { %v10766_v28 = vsub.f32 %v10759_v36, %v10765_v16  ;;  %15315 = vpow2.f32 %v10602_v19  ;;  %v9689_v16 = vld [vmem:[#allocation37] sm:$0xff] }
0x418d   :  { %v15310_v30 = vpop.eup %15309  ;;  %14792 = vmatpush3.msra.mxu1 %v9689_v16 }
0x418e   :  { %v10109_v44 = vsel %vm2599_vm11, %v15310_v30, 0.0  ;;  %v10767_v11 = vmul.f32 1.442695, %v10766_v28  ;;  %14807 = vmatprep.subr.mxu1 %v16382_v8 }
0x418f   :  { %10110 = vadd.xlane.f32.xlu1 %v10109_v44  ;;  %v10930_v27 = vpop.xlane.xlu0 %10929  ;;  %v10280_v50 = vpop.permute.xlu1 %10279 }
0x4190   :  { %v10931_v20 = vsub.f32 %v10924_v37, %v10930_v27  ;;  %15317 = vpow2.f32 %v10767_v11 }
0x4191   :  { %v18018_v7 = vpop.eup %15311 }
0x4192   :  { %v10274_v10 = vsel %vm2599_vm11, %v18018_v7, 0.0  ;;  %v10932_v13 = vmul.f32 1.442695, %v10931_v20 }
0x4193   :  { %10275 = vadd.xlane.f32.xlu0 %v10274_v10  ;;  %v10115_v41 = vpop.permute.xlu0 %10114 }
0x4194   :  { %15319 = vpow2.f32 %v10932_v13 }
0x4195   :  { %v15314_v54 = vpop.eup %15313 }
0x4196   :  { %v10439_v14 = vsel %vm2599_vm11, %v15314_v54, 0.0 }
0x4199   :  { %v18026_v21 = vpop.eup %15315 }
0x419a   :  { %v10604_v33 = vsel %vm2599_vm11, %v18026_v21, 0.0 }
0x419d   :  { %v18029_v25 = vpop.eup %15317 }
0x419e   :  { %v10769_v32 = vsel %vm2599_vm11, %v18029_v25, 0.0 }
0x41a0   :  { %10609 = vrot.lane.b32.xlu1 %v17930_v5, %s18486_s15 }
0x41a1   :  { %v18035_v35 = vpop.eup %15319 }
0x41a2   :  { %v10934_v40 = vsel %vm2599_vm11, %v18035_v35, 0.0 }
0x41a9   :  { %10444 = vrot.lane.b32.xlu0 %v17930_v5, %s18487_s3 }
0x41c4   :  { %10440 = vadd.xlane.f32.xlu1 %v10439_v14 }
0x41c8   :  { %10770 = vadd.xlane.f32.xlu1 %v10769_v32  ;;  %10605 = vadd.xlane.f32.xlu0 %v10604_v33 }
0x41cc   :  { %10935 = vadd.xlane.f32.xlu1 %v10934_v40 }
0x41dd   :  { %10939 = vrot.lane.b32.xlu1 %v17930_v5, %s18477_s28 }
0x41de   :  { %10774 = vrot.lane.b32.xlu0 %v17930_v5, %s18476_s22 }
0x4210   :  { %v9781_v43 = vpop.xlane.xlu1 %9780 }
0x4211   :  { %15321 = vrcp.f32 %v9781_v43 }
0x4214   :  { %v9946_v45 = vpop.xlane.xlu0 %9945 }
0x4215   :  { %15323 = vrcp.f32 %v9946_v45 }
0x4218   :  { %v10111_v46 = vpop.xlane.xlu1 %10110 }
0x4219   :  { %15325 = vrcp.f32 %v10111_v46 }
0x421c   :  { %v10276_v47 = vpop.xlane.xlu0 %10275  ;;  %v10610_v55 = vpop.permute.xlu1 %10609 }
0x421d   :  { %15327 = vrcp.f32 %v10276_v47  ;;  %v11246_v47 = vld [vmem:[#allocation46 + $0x18] sm:$0xff] }
0x421e   :  { %v15322_v57 = vpop.eup %15321 }
0x421f   :  { %v9783_v48 = vmul.f32 %v15322_v57, %v15306_v3 }
0x4220   :  { %v10445_v37 = vpop.permute.xlu0 %10444 }
0x4221   :  { %14713 = vmatmul.mubr.msk.f32.vlgmr.msra.gmra.mxu0 %vm2599_vm11, %v9783_v48  ;;  %v11245_v48 = vld [vmem:[#allocation46 + $0x10] sm:$0xff] }
0x4222   :  { %v15324_v49 = vpop.eup %15323  ;;  %14721 = vmatpush3.msra.mxu0 %v18013_v58  ;;  %14722 = vmatprep.mubr.msk.f32.mxu0 %vm16383_vm1, %v16382_v8 }
0x4223   :  { %14730 = vmatprep.subr.mxu0 %v16382_v8  ;;  %v9948_v5 = vmul.f32 %v15324_v49, %v15308_v53  ;;  %v11244_v49 = vld [vmem:[#allocation46 + $0x8] sm:$0xff] }
0x4225   :  { %14723 = vmatmul.mubr.msk.f32.vlgmr.msra.gmra.mxu0 %vm2599_vm11, %v9948_v5  ;;  %v11243_v5 = vld [vmem:[#allocation46] sm:$0xff] }
0x4226   :  { %v15326_v31 = vpop.eup %15325  ;;  %14731 = vmatpush3.msra.mxu0 %v10115_v41  ;;  %14732 = vmatprep.mubr.msk.f32.mxu0 %vm16383_vm1, %v16382_v8 }
0x4227   :  { %14740 = vmatprep.subr.mxu0 %v16382_v8  ;;  %v10113_v36 = vmul.f32 %v15326_v31, %v15310_v30  ;;  %v7851_v31 = vsel %vm2405_vm9, %v17078_v23, %v17053_v38 }
0x4229   :  { %14733 = vmatmul.mubr.msk.f32.vlgmr.msra.gmra.mxu0 %vm2599_vm11, %v10113_v36  ;;  %v13549_v36 = vld [vmem:[#allocation39] ss:$0 sm:$0xff] }
0x422a   :  { %v15328_v51 = vpop.eup %15327  ;;  %14741 = vmatpush3.msra.mxu0 %v10280_v50  ;;  %14742 = vmatprep.mubr.msk.f32.mxu0 %vm16383_vm1, %v16382_v8 }
0x422b   :  { %14750 = vmatprep.subr.mxu0 %v16382_v8  ;;  %v10278_v52 = vmul.f32 %v15328_v51, %v18018_v7 }
0x422d   :  { %14743 = vmatmul.mubr.msk.f32.vlgmr.msra.gmra.mxu0 %vm2599_vm11, %v10278_v52 }
0x422e   :  { %14751 = vmatpush3.msra.mxu0 %v10445_v37  ;;  %14752 = vmatprep.mubr.msk.f32.mxu0 %vm16383_vm1, %v16382_v8 }
0x422f   :  { %14760 = vmatprep.subr.mxu0 %v16382_v8 }
0x424d   :  { %v10441_v56 = vpop.xlane.xlu1 %10440 }
0x424e   :  { %15329 = vrcp.f32 %v10441_v56 }
0x4251   :  { %v10771_v58 = vpop.xlane.xlu1 %10770  ;;  %v10606_v59 = vpop.xlane.xlu0 %10605 }
0x4252   :  { %15331 = vrcp.f32 %v10606_v59 }
0x4253   :  { %15333 = vrcp.f32 %v10771_v58 }
0x4255   :  { %v10936_v60 = vpop.xlane.xlu1 %10935  ;;  %v10775_v42 = vpop.permute.xlu0 %10774 }
0x4256   :  { %15335 = vrcp.f32 %v10936_v60 }
0x4259   :  { %v10940_v1 = vpop.permute.xlu1 %10939 }
0x425b   :  { %v15330_v34 = vpop.eup %15329 }
0x425c   :  { %v10443_v39 = vmul.f32 %v15330_v34, %v15314_v54 }
0x425e   :  { %14753 = vmatmul.mubr.msk.f32.vlgmr.msra.gmra.mxu0 %vm2599_vm11, %v10443_v39 }
0x425f   :  { %14761 = vmatpush3.msra.mxu0 %v10610_v55  ;;  %14762 = vmatprep.mubr.msk.f32.mxu0 %vm16383_vm1, %v16382_v8  ;;  %v15332_v61 = vpop.eup %15331 }
0x4260   :  { %14770 = vmatprep.subr.mxu0 %v16382_v8  ;;  %v10608_v62 = vmul.f32 %v15332_v61, %v18026_v21  ;;  %v15334_v26 = vpop.eup %15333  ;;  %v13555_v61 = vld [vmem:[#allocation48] ss:$0 sm:$0xff] }
0x4261   :  { %v10773_v63 = vmul.f32 %v15334_v26, %v18029_v25  ;;  %v11162_v26 = vld [vmem:[#allocation43 + $0x18] sm:$0xff] }
0x4262   :  { %14763 = vmatmul.mubr.msk.f32.vlgmr.msra.gmra.mxu0 %vm2599_vm11, %v10608_v62 }
0x4263   :  { %14771 = vmatpush3.msra.mxu0 %v10775_v42  ;;  %14772 = vmatprep.mubr.msk.f32.mxu0 %vm16383_vm1, %v16382_v8  ;;  %v15336_v0 = vpop.eup %15335  ;;  %v11160_v42 = vld [vmem:[#allocation43 + $0x8] sm:$0xff] }
0x4264   :  { %14780 = vmatprep.subr.mxu0 %v16382_v8  ;;  %v10938_v24 = vmul.f32 %v15336_v0, %v18035_v35 }
0x4266   :  { %14773 = vmatmul.mubr.msk.f32.vlgmr.msra.gmra.mxu0 %vm2599_vm11, %v10773_v63  ;;  %v11159_v63 = vld [vmem:[#allocation43] sm:$0xff] }
0x4267   :  { %14781 = vmatpush3.msra.mxu0 %v10940_v1  ;;  %14782 = vmatprep.mubr.msk.f32.mxu0 %vm16383_vm1, %v16382_v8 }
0x4268   :  { %14796 = vmatprep.subr.mxu0 %v16382_v8 }
0x426a   :  { %14783 = vmatmul.mubr.msk.f32.vlgmr.msra.gmra.mxu0 %vm2599_vm11, %v10938_v24 }
0x426b   :  { %14804 = vmatprep.mubr.msk.f32.mxu0 %vm16383_vm1, %v16382_v8  ;;  %14797 = vmatpush3.msra.mxu0 %v11162_v26 }
0x426c   :  { %14798 = vmatprep.subr.mxu0 %v16382_v8 }
0x42e1   :  { %v9856_v3 = vpop.f32.mrf.mxu0 }
0x42e3   :  { %v14714_v4 = vpop.f32.mrf.mxu0 }
0x42e5   :  { %v10021_v53 = vpop.f32.mrf.mxu0 }
0x42e6   :  { %11016 = vrot.lane.b32.xlu0 %v10021_v53, %s18478_s20  ;;  %v13551_v53 = vld [vmem:[#allocation40] ss:$0 sm:$0xff] }
0x42e7   :  { %v14724_v6 = vpop.f32.mrf.mxu0 }
0x42e9   :  { %v10186_v30 = vpop.f32.mrf.mxu0 }
0x42ea   :  { %11020 = vrot.lane.b32.xlu1 %v10186_v30, %s18479_s18  ;;  %v13552_v30 = vld [vmem:[#allocation42] ss:$0 sm:$0xff] }
0x42eb   :  { %v14734_v44 = vpop.f32.mrf.mxu0 }
0x42ed   :  { %v10351_v7 = vpop.f32.mrf.mxu0 }
0x42ee   :  { %11024 = vrot.lane.b32.xlu0 %v10351_v7, %s18480_s4 }
0x42ef   :  { %v14744_v10 = vpop.f32.mrf.mxu0 }
0x42f0   :  { %v13553_v10 = vld [vmem:[#allocation45] ss:$0 sm:$0xff] }
0x431e   :  { %v10516_v17 = vpop.f32.mrf.mxu0 }
0x431f   :  { %11028 = vrot.lane.b32.xlu1 %v10516_v17, %s16410_s26 }
0x4320   :  { %v14754_v18 = vpop.f32.mrf.mxu0 }
0x4322   :  { %v10681_v28 = vpop.f32.mrf.mxu0 }
0x4323   :  { %11032 = vrot.lane.b32.xlu0 %v10681_v28, %s16411_s1 }
0x4324   :  { %v14764_v27 = vpop.f32.mrf.mxu0 }
0x4326   :  { %v10846_v19 = vpop.f32.mrf.mxu0 }
0x4327   :  { %11036 = vrot.lane.b32.xlu1 %v10846_v19, %s18488_s0 }
0x4328   :  { %v14774_v11 = vpop.f32.mrf.mxu0 }
0x432a   :  { %v11011_v20 = vpop.f32.mrf.mxu0 }
0x432b   :  { %11040 = vrot.lane.b32.xlu0 %v11011_v20, %s18489_s14 }
0x432c   :  { %v14784_v13 = vpop.f32.mrf.mxu0 }
0x4358   :  { %v11017_v54 = vpop.permute.xlu0 %11016 }
0x4359   :  { %v11043_v32 = vsel %vm2523_vm10, %v9856_v3, %v11017_v54 }
0x435c   :  { %v11021_v21 = vpop.permute.xlu1 %11020 }
0x435d   :  { %v11044_v33 = vsel %vm2599_vm11, %v11043_v32, %v11021_v21 }
0x4360   :  { %v11025_v14 = vpop.permute.xlu0 %11024 }
0x4361   :  { %v11045_v40 = vsel %vm3872_vm12, %v11044_v33, %v11025_v14 }
0x4391   :  { %v11029_v25 = vpop.permute.xlu1 %11028 }
0x4392   :  { %v11046_v41 = vsel %vm775_vm0, %v11045_v40, %v11029_v25 }
0x4395   :  { %v11033_v35 = vpop.permute.xlu0 %11032 }
0x4396   :  { %v11047_v43 = vsel %vm3875_vm13, %v11046_v41, %v11033_v35 }
0x4399   :  { %v11037_v50 = vpop.permute.xlu1 %11036 }
0x439a   :  { %v11048_v45 = vsel %vm3877_vm14, %v11047_v43, %v11037_v50 }
0x439d   :  { %v11041_v46 = vpop.permute.xlu0 %11040 }
0x439e   :  { %v11049_v57 = vsel %vm3879_vm15, %v11048_v45, %v11041_v46 }
0x439f   :  { %14794 = vmatmul.mubr.msk.f32.vlgmr.msra.gmra.mxu1 %vm956_vm2, %v11049_v57 }
0x43a0   :  { %14808 = vmatpush3.msra.mxu1 %v11246_v47  ;;  %14815 = vmatprep.mubr.msk.f32.mxu1 %vm16383_vm1, %v16382_v8 }
0x43a1   :  { %14809 = vmatprep.subr.mxu1 %v16382_v8 }
0x43a2   :  { %14810 = vmatpush3.msra.mxu1 %v11245_v48 }
0x43a3   :  { %14811 = vmatprep.subr.mxu1 %v16382_v8 }
0x43a4   :  { %14812 = vmatpush3.msra.mxu1 %v11244_v49 }
0x43a5   :  { %14813 = vmatprep.subr.mxu1 %v16382_v8 }
0x43a6   :  { %14814 = vmatpush3.msra.mxu1 %v11243_v5 }
0x43a7   :  { %14816 = vmatmul.mubr.msk.f32.vlgmr.msra.gmra.mxu1 %vm956_vm2, %v7851_v31  ;;  %14828 = vmatprep.subr.mxu1 %v16382_v8 }
0x43a8   :  { %14830 = vmatprep.mubr.msk.f32.mxu1 %vm16383_vm1, %v16382_v8 }
0x445f   :  { %v11125_v51 = vpop.f32.mrf.mxu1 }
0x4460   :  { %v11126_v52 = vadd.f32 %v13549_v36, %v11125_v51 }
0x4461   :  { %v14795_v37 = vpop.f32.mrf.mxu1 }
0x4462   :  { %v11131_v55 = vadd.f32 %v11126_v52, %v17924_v2  ;;  %v11161_v2 = vld [vmem:[#allocation43 + $0x10] sm:$0xff] }
0x4463   :  { %14799 = vmatpush3.msra.mxu0 %v11161_v2 }
0x4464   :  { %v11132_v56 = vsel %vm956_vm2, %v11131_v55, 0.0  ;;  %14800 = vmatprep.subr.mxu0 %v16382_v8 }
0x4465   :  { %11133 = vadd.xlane.f32.xlu1 %v11132_v56  ;;  %14801 = vmatpush3.msra.mxu0 %v11160_v42 }
0x4466   :  { %14802 = vmatprep.subr.mxu0 %v16382_v8 }
0x4467   :  { %v11323_v58 = vpop.f32.mrf.mxu1  ;;  %14803 = vmatpush3.msra.mxu0 %v11159_v63 }
0x4468   :  { %v18113_v62 = vadd.f32 %v13555_v61, %v11323_v58  ;;  %14818 = vmatprep.subr.mxu0 %v16382_v8 }
0x4469   :  { %v14817_v59 = vpop.f32.mrf.mxu1 }
0x44ee   :  { %v11134_v60 = vpop.xlane.xlu1 %11133 }
0x44ef   :  { %v11135_v38 = vmul.f32 0.03125, %v11134_v60 }
0x44f1   :  { %v11136_v23 = vsub.f32 %v11131_v55, %v11135_v38 }
0x44f3   :  { %v11137_v34 = vmul.f32 %v11136_v23, %v11136_v23 }
0x44f5   :  { %v11138_v39 = vsel %vm956_vm2, %v11137_v34, 0.0 }
0x44f6   :  { %11139 = vadd.xlane.f32.xlu0 %v11138_v39 }
0x450c   :  { %11498 = vrot.lane.b32.xlu0 %v18113_v62, %s16389_s11 }
0x457f   :  { %v11140_v0 = vpop.xlane.xlu0 %11139 }
0x4580   :  { %v11141_v1 = vmul.f32 0.03125, %v11140_v0 }
0x4582   :  { %v11142_v24 = vadd.f32 1e-05, %v11141_v1 }
0x4583   :  { %v11499_v3 = vpop.permute.xlu0 %11498 }
0x4584   :  { %15337 = vrsqrt.f32 %v11142_v24  ;;  %14829 = vmatpush3.xpose.msk.msra.mxu1 %vm2523_vm10, %v11499_v3 }
0x4585   :  { %14838 = vmatprep.subr.mxu1 %v16382_v8 }
0x4591   :  { %v15338_v4 = vpop.eup %15337 }
0x4592   :  { %v11144_v6 = vmul.f32 %v15338_v4, %v11136_v23 }
0x4594   :  { %v11151_v44 = vmul.f32 %v13551_v53, %v11144_v6 }
0x4596   :  { %v18123_v7 = vadd.f32 %v13552_v30, %v11151_v44 }
0x4598   :  { %14805 = vmatmul.mubr.msk.f32.vlgmr.msra.gmra.mxu0 %vm956_vm2, %v18123_v7 }
0x4599   :  { %14819 = vmatpush3.xpose.msk.msra.mxu0 %vm2523_vm10, %v18113_v62  ;;  %14820 = vmatprep.mubr.msk.f32.mxu0 %vm16383_vm1, %v16382_v8 }
0x459a   :  { %14823 = vmatprep.subr.mxu0 %v16382_v8 }
0x4658   :  { %v11239_v12 = vpop.f32.mrf.mxu0 }
0x4659   :  { %v11240_v15 = vadd.f32 %v13553_v10, %v11239_v12 }
0x465a   :  { %v14806_v29 = vpop.f32.mrf.mxu0 }
0x465b   :  { %v11332_v16 = vmul.f32 0.5, %v11240_v15 }
0x465d   :  { %11496 = vrot.lane.b32.xlu1 %v11332_v16, %s16389_s11  ;;  %11661 = vrot.lane.b32.xlu0 %v11332_v16, %s16391_s12  ;;  %s18499_s11 = smov 84  }
0x465e   :  { %14821 = vmatmul.mubr.msk.f32.vlgmr.msra.gmra.mxu0 %vm2523_vm10, %v11332_v16 }
0x465f   :  { %14825 = vmatprep.mubr.msk.f32.mxu0 %vm16383_vm1, %v16382_v8 }
0x4661   :  { %11663 = vrot.lane.b32.xlu1 %v18113_v62, %s16391_s12  ;;  %11826 = vrot.lane.b32.xlu0 %v11332_v16, %s16393_s27 }
0x4665   :  { %11828 = vrot.lane.b32.xlu1 %v18113_v62, %s16393_s27  ;;  %11991 = vrot.lane.b32.xlu0 %v11332_v16, %s16395_s29 }
0x4669   :  { %11993 = vrot.lane.b32.xlu1 %v18113_v62, %s16395_s29  ;;  %12156 = vrot.lane.b32.xlu0 %v11332_v16, %s18491_s7 }
0x466d   :  { %12158 = vrot.lane.b32.xlu1 %v18113_v62, %s18491_s7  ;;  %12321 = vrot.lane.b32.xlu0 %v11332_v16, %s18493_s23  ;;  %s18497_s7 = smov 88  }
0x4671   :  { %12323 = vrot.lane.b32.xlu1 %v18113_v62, %s18493_s23  ;;  %12486 = vrot.lane.b32.xlu0 %v11332_v16, %s18495_s9  ;;  %s18500_s23 = smov 80  }
0x4675   :  { %12488 = vrot.lane.b32.xlu1 %v18113_v62, %s18495_s9 }
0x4679   :  { %11420 = vrot.lane.b32.xlu1 %v18113_v62, %s18496_s8 }
0x46cf   :  { %v11497_v17 = vpop.permute.xlu1 %11496  ;;  %v11662_v18 = vpop.permute.xlu0 %11661 }
0x46d0   :  { %14831 = vmatmul.mubr.msk.f32.vlgmr.msra.gmra.mxu1 %vm2523_vm10, %v11497_v17 }
0x46d1   :  { %14840 = vmatprep.mubr.msk.f32.mxu1 %vm16383_vm1, %v16382_v8 }
0x46d3   :  { %v11664_v28 = vpop.permute.xlu1 %11663  ;;  %v11827_v27 = vpop.permute.xlu0 %11826 }
0x46d4   :  { %14839 = vmatpush3.xpose.msk.msra.mxu1 %vm2523_vm10, %v11664_v28 }
0x46d5   :  { %14848 = vmatprep.subr.mxu1 %v16382_v8 }
0x46d7   :  { %v11829_v19 = vpop.permute.xlu1 %11828  ;;  %14841 = vmatmul.mubr.msk.f32.vlgmr.msra.gmra.mxu1 %vm2523_vm10, %v11662_v18  ;;  %v11992_v11 = vpop.permute.xlu0 %11991 }
0x46d8   :  { %14849 = vmatpush3.xpose.msk.msra.mxu1 %vm2523_vm10, %v11829_v19  ;;  %14850 = vmatprep.mubr.msk.f32.mxu1 %vm16383_vm1, %v16382_v8 }
0x46d9   :  { %14858 = vmatprep.subr.mxu1 %v16382_v8 }
0x46db   :  { %v11994_v20 = vpop.permute.xlu1 %11993  ;;  %14851 = vmatmul.mubr.msk.f32.vlgmr.msra.gmra.mxu1 %vm2523_vm10, %v11827_v27  ;;  %v12157_v13 = vpop.permute.xlu0 %12156 }
0x46dc   :  { %14859 = vmatpush3.xpose.msk.msra.mxu1 %vm2523_vm10, %v11994_v20  ;;  %14860 = vmatprep.mubr.msk.f32.mxu1 %vm16383_vm1, %v16382_v8 }
0x46dd   :  { %14868 = vmatprep.subr.mxu1 %v16382_v8 }
0x46df   :  { %v12159_v54 = vpop.permute.xlu1 %12158  ;;  %14861 = vmatmul.mubr.msk.f32.vlgmr.msra.gmra.mxu1 %vm2523_vm10, %v11992_v11  ;;  %v12322_v14 = vpop.permute.xlu0 %12321 }
0x46e0   :  { %14869 = vmatpush3.xpose.msk.msra.mxu1 %vm2523_vm10, %v12159_v54  ;;  %14870 = vmatprep.mubr.msk.f32.mxu1 %vm16383_vm1, %v16382_v8 }
0x46e1   :  { %14878 = vmatprep.subr.mxu1 %v16382_v8 }
0x46e3   :  { %v12324_v21 = vpop.permute.xlu1 %12323  ;;  %14871 = vmatmul.mubr.msk.f32.vlgmr.msra.gmra.mxu1 %vm2523_vm10, %v12157_v13  ;;  %v12487_v32 = vpop.permute.xlu0 %12486 }
0x46e4   :  { %14879 = vmatpush3.xpose.msk.msra.mxu1 %vm2523_vm10, %v12324_v21  ;;  %14880 = vmatprep.mubr.msk.f32.mxu1 %vm16383_vm1, %v16382_v8 }
0x46e5   :  { %14888 = vmatprep.subr.mxu1 %v16382_v8 }
0x46e7   :  { %v12489_v25 = vpop.permute.xlu1 %12488  ;;  %14881 = vmatmul.mubr.msk.f32.vlgmr.msra.gmra.mxu1 %vm2523_vm10, %v12322_v14 }
0x46e8   :  { %14889 = vmatpush3.xpose.msk.msra.mxu1 %vm2523_vm10, %v12489_v25  ;;  %14890 = vmatprep.mubr.msk.f32.mxu1 %vm16383_vm1, %v16382_v8 }
0x46e9   :  { %14898 = vmatprep.subr.mxu1 %v16382_v8 }
0x46eb   :  { %v11421_v33 = vpop.permute.xlu1 %11420  ;;  %14891 = vmatmul.mubr.msk.f32.vlgmr.msra.gmra.mxu1 %vm2523_vm10, %v12487_v32 }
0x46ec   :  { %14824 = vmatpush3.msra.mxu0 %v11421_v33  ;;  %14906 = vmatprep.mubr.msk.f32.mxu1 %vm16383_vm1, %v16382_v8 }
0x46ed   :  { %14833 = vmatprep.subr.mxu0 %v16382_v8 }
0x471e   :  { %v11405_v35 = vpop.f32.mrf.mxu0 }
0x471f   :  { %v11409_v40 = vsel %vm2599_vm11, %v11405_v35, -inf }
0x4720   :  { %11410 = vmax.xlane.f32.xlu1 %v11409_v40  ;;  %v14822_v50 = vpop.f32.mrf.mxu0 }
0x4790   :  { %v11570_v41 = vpop.f32.mrf.mxu1 }
0x4791   :  { %v11574_v43 = vsel %vm2599_vm11, %v11570_v41, -inf }
0x4792   :  { %11575 = vmax.xlane.f32.xlu0 %v11574_v43  ;;  %v14832_v45 = vpop.f32.mrf.mxu1 }
0x4797   :  { %v11735_v46 = vpop.f32.mrf.mxu1 }
0x4798   :  { %v11739_v47 = vsel %vm2599_vm11, %v11735_v46, -inf }
0x4799   :  { %11740 = vmax.xlane.f32.xlu0 %v11739_v47  ;;  %v14842_v57 = vpop.f32.mrf.mxu1 }
0x479b   :  { %v11900_v48 = vpop.f32.mrf.mxu1 }
0x479c   :  { %v11904_v49 = vsel %vm2599_vm11, %v11900_v48, -inf }
0x479d   :  { %11905 = vmax.xlane.f32.xlu1 %v11904_v49  ;;  %v14852_v5 = vpop.f32.mrf.mxu1 }
0x479f   :  { %v12065_v31 = vpop.f32.mrf.mxu1 }
0x47a0   :  { %v12069_v36 = vsel %vm2599_vm11, %v12065_v31, -inf }
0x47a1   :  { %12070 = vmax.xlane.f32.xlu0 %v12069_v36  ;;  %v14862_v51 = vpop.f32.mrf.mxu1 }
0x47a3   :  { %v12230_v52 = vpop.f32.mrf.mxu1 }
0x47a4   :  { %v12234_v37 = vsel %vm2599_vm11, %v12230_v52, -inf }
0x47a5   :  { %12235 = vmax.xlane.f32.xlu1 %v12234_v37  ;;  %v14872_v55 = vpop.f32.mrf.mxu1 }
0x47a7   :  { %v12395_v56 = vpop.f32.mrf.mxu1 }
0x47a8   :  { %v12399_v58 = vsel %vm2599_vm11, %v12395_v56, -inf }
0x47a9   :  { %12400 = vmax.xlane.f32.xlu0 %v12399_v58  ;;  %v14882_v59 = vpop.f32.mrf.mxu1  ;;  %v11411_v23 = vpop.xlane.xlu1 %11410 }
0x47aa   :  { %v11412_v34 = vsub.f32 %v11405_v35, %v11411_v23 }
0x47ab   :  { %v12560_v60 = vpop.f32.mrf.mxu1 }
0x47ac   :  { %v11413_v39 = vmul.f32 1.442695, %v11412_v34  ;;  %v12564_v61 = vsel %vm2599_vm11, %v12560_v60, -inf }
0x47ad   :  { %v14892_v38 = vpop.f32.mrf.mxu1 }
0x47ae   :  { %15339 = vpow2.f32 %v11413_v39 }
0x47b6   :  { %11750 = vrot.lane.b32.xlu1 %v18113_v62, %s18497_s7 }
0x47bb   :  { %v15340_v26 = vpop.eup %15339 }
0x47bc   :  { %v11415_v2 = vsel %vm2599_vm11, %v15340_v26, 0.0 }
0x47bf   :  { %11585 = vrot.lane.b32.xlu0 %v18113_v62, %s18498_s10 }
0x47da   :  { %12565 = vmax.xlane.f32.xlu1 %v12564_v61 }
0x47de   :  { %11416 = vadd.xlane.f32.xlu0 %v11415_v2 }
0x47eb   :  { %11915 = vrot.lane.b32.xlu1 %v18113_v62, %s18499_s11 }
0x481b   :  { %v11576_v42 = vpop.xlane.xlu0 %11575 }
0x481c   :  { %v11577_v63 = vsub.f32 %v11570_v41, %v11576_v42 }
0x481e   :  { %v11578_v0 = vmul.f32 1.442695, %v11577_v63 }
0x4820   :  { %15341 = vpow2.f32 %v11578_v0 }
0x4822   :  { %v11741_v1 = vpop.xlane.xlu0 %11740 }
0x4823   :  { %v11742_v24 = vsub.f32 %v11735_v46, %v11741_v1 }
0x4825   :  { %v11743_v3 = vmul.f32 1.442695, %v11742_v24 }
0x4826   :  { %v11906_v44 = vpop.xlane.xlu1 %11905 }
0x4827   :  { %15343 = vpow2.f32 %v11743_v3  ;;  %v11907_v10 = vsub.f32 %v11900_v48, %v11906_v44 }
0x4829   :  { %v11908_v15 = vmul.f32 1.442695, %v11907_v10 }
0x482a   :  { %v12071_v29 = vpop.xlane.xlu0 %12070 }
0x482b   :  { %v12072_v17 = vsub.f32 %v12065_v31, %v12071_v29  ;;  %15345 = vpow2.f32 %v11908_v15 }
0x482d   :  { %v15342_v4 = vpop.eup %15341  ;;  %v12073_v27 = vmul.f32 1.442695, %v12072_v17  ;;  %v11328_v17 = vld [vmem:[#allocation49 + $0x8] sm:$0xff] }
0x482e   :  { %v11580_v53 = vsel %vm2599_vm11, %v15342_v4, 0.0  ;;  %v12236_v12 = vpop.xlane.xlu1 %12235 }
0x482f   :  { %11581 = vadd.xlane.f32.xlu1 %v11580_v53  ;;  %v12237_v16 = vsub.f32 %v12230_v52, %v12236_v12  ;;  %v11330_v12 = vld [vmem:[#allocation49 + $0x18] sm:$0xff] }
0x4830   :  { %14899 = vmatpush3.msra.mxu1 %v11330_v12  ;;  %v13585_v12 = vld [vmem:[#allocation57] ss:$0 sm:$0xff] }
0x4831   :  { %v12238_v18 = vmul.f32 1.442695, %v12237_v16  ;;  %14900 = vmatprep.subr.mxu1 %v16382_v8  ;;  %v11329_v16 = vld [vmem:[#allocation49 + $0x10] sm:$0xff] }
0x4832   :  { %v12401_v28 = vpop.xlane.xlu0 %12400  ;;  %v11751_v20 = vpop.permute.xlu1 %11750  ;;  %14901 = vmatpush3.msra.mxu1 %v11329_v16 }
0x4833   :  { %v12402_v19 = vsub.f32 %v12395_v56, %v12401_v28  ;;  %15347 = vpow2.f32 %v12238_v18  ;;  %14902 = vmatprep.subr.mxu1 %v16382_v8  ;;  %v11327_v28 = vld [vmem:[#allocation49] sm:$0xff] }
0x4834   :  { %v18206_v6 = vpop.eup %15343  ;;  %15349 = vpow2.f32 %v12073_v27  ;;  %14903 = vmatpush3.msra.mxu1 %v11328_v17 }
0x4835   :  { %v11745_v30 = vsel %vm2599_vm11, %v18206_v6, 0.0  ;;  %v12403_v11 = vmul.f32 1.442695, %v12402_v19  ;;  %14904 = vmatprep.subr.mxu1 %v16382_v8 }
0x4836   :  { %11746 = vadd.xlane.f32.xlu0 %v11745_v30  ;;  %v11586_v54 = vpop.permute.xlu0 %11585  ;;  %14905 = vmatpush3.msra.mxu1 %v11327_v28 }
0x4837   :  { %15351 = vpow2.f32 %v12403_v11  ;;  %14920 = vmatprep.subr.mxu1 %v16382_v8 }
0x4838   :  { %v15346_v13 = vpop.eup %15345 }
0x4839   :  { %v11910_v14 = vsel %vm2599_vm11, %v15346_v13, 0.0 }
0x4840   :  { %12080 = vrot.lane.b32.xlu1 %v18113_v62, %s18500_s23  ;;  %v18215_v25 = vpop.eup %15347 }
0x4841   :  { %v15350_v35 = vpop.eup %15349  ;;  %v12240_v50 = vsel %vm2599_vm11, %v18215_v25, 0.0 }
0x4842   :  { %v12075_v41 = vsel %vm2599_vm11, %v15350_v35, 0.0 }
0x4844   :  { %v18220_v43 = vpop.eup %15351 }
0x4845   :  { %v12405_v45 = vsel %vm2599_vm11, %v18220_v43, 0.0 }
0x484c   :  { %12245 = vrot.lane.b32.xlu0 %v18113_v62, %s16394_s17 }
0x4863   :  { %v12566_v21 = vpop.xlane.xlu1 %12565 }
0x4864   :  { %v12567_v32 = vsub.f32 %v12560_v60, %v12566_v21  ;;  %11911 = vadd.xlane.f32.xlu1 %v11910_v14 }
0x4866   :  { %v12568_v33 = vmul.f32 1.442695, %v12567_v32 }
0x4867   :  { %v11417_v40 = vpop.xlane.xlu0 %11416  ;;  %v11916_v49 = vpop.permute.xlu1 %11915 }
0x4868   :  { %15353 = vpow2.f32 %v12568_v33  ;;  %12241 = vadd.xlane.f32.xlu1 %v12240_v50 }
0x4869   :  { %15355 = vrcp.f32 %v11417_v40 }
0x486b   :  { %12076 = vadd.xlane.f32.xlu0 %v12075_v41 }
0x486f   :  { %12406 = vadd.xlane.f32.xlu0 %v12405_v45 }
0x4875   :  { %v18224_v46 = vpop.eup %15353 }
0x4876   :  { %v15356_v47 = vpop.eup %15355  ;;  %v12570_v57 = vsel %vm2599_vm11, %v18224_v46, 0.0 }
0x4877   :  { %v11419_v48 = vmul.f32 %v15356_v47, %v15340_v26  ;;  %12571 = vadd.xlane.f32.xlu0 %v12570_v57 }
0x4879   :  { %14826 = vmatmul.mubr.msk.f32.vlgmr.msra.gmra.mxu0 %vm2599_vm11, %v11419_v48  ;;  %12410 = vrot.lane.b32.xlu1 %v18113_v62, %s18490_s30 }
0x487a   :  { %14834 = vmatpush3.msra.mxu0 %v11586_v54  ;;  %14835 = vmatprep.mubr.msk.f32.mxu0 %vm16383_vm1, %v16382_v8 }
0x487b   :  { %14843 = vmatprep.subr.mxu0 %v16382_v8 }
0x488d   :  { %12575 = vrot.lane.b32.xlu0 %v18113_v62, %s18492_s6 }
0x48b8   :  { %v11582_v5 = vpop.xlane.xlu1 %11581 }
0x48b9   :  { %15357 = vrcp.f32 %v11582_v5 }
0x48bc   :  { %v12081_v62 = vpop.permute.xlu1 %12080 }
0x48bf   :  { %v11747_v31 = vpop.xlane.xlu0 %11746 }
0x48c0   :  { %15359 = vrcp.f32 %v11747_v31 }
0x48c3   :  { %v12246_v56 = vpop.permute.xlu0 %12245 }
0x48c6   :  { %v15358_v36 = vpop.eup %15357 }
0x48c7   :  { %v11584_v51 = vmul.f32 %v15358_v36, %v15342_v4 }
0x48c9   :  { %14836 = vmatmul.mubr.msk.f32.vlgmr.msra.gmra.mxu0 %vm2599_vm11, %v11584_v51 }
0x48ca   :  { %14844 = vmatpush3.msra.mxu0 %v11751_v20  ;;  %14845 = vmatprep.mubr.msk.f32.mxu0 %vm16383_vm1, %v16382_v8 }
0x48cb   :  { %14853 = vmatprep.subr.mxu0 %v16382_v8 }
0x48cd   :  { %v15360_v52 = vpop.eup %15359 }
0x48ce   :  { %v11749_v37 = vmul.f32 %v15360_v52, %v18206_v6 }
0x48d0   :  { %14846 = vmatmul.mubr.msk.f32.vlgmr.msra.gmra.mxu0 %vm2599_vm11, %v11749_v37 }
0x48d1   :  { %14854 = vmatpush3.msra.mxu0 %v11916_v49  ;;  %14855 = vmatprep.mubr.msk.f32.mxu0 %vm16383_vm1, %v16382_v8  ;;  %v13581_v49 = vld [vmem:[#allocation51] ss:$0 sm:$0xff] }
0x48d2   :  { %14863 = vmatprep.subr.mxu0 %v16382_v8 }
0x48ed   :  { %v11912_v55 = vpop.xlane.xlu1 %11911 }
0x48ee   :  { %15361 = vrcp.f32 %v11912_v55 }
0x48f1   :  { %v12242_v58 = vpop.xlane.xlu1 %12241 }
0x48f4   :  { %v12077_v59 = vpop.xlane.xlu0 %12076 }
0x48f5   :  { %15363 = vrcp.f32 %v12077_v59  ;;  %v12411_v63 = vpop.permute.xlu1 %12410  ;;  %v12798_v59 = vld [vmem:[#allocation55 + $0x18] sm:$0xff] }
0x48f6   :  { %15365 = vrcp.f32 %v12242_v58 }
0x48f8   :  { %v12407_v60 = vpop.xlane.xlu0 %12406 }
0x48f9   :  { %15367 = vrcp.f32 %v12407_v60  ;;  %v12796_v60 = vld [vmem:[#allocation55 + $0x8] sm:$0xff] }
0x48fb   :  { %v15362_v38 = vpop.eup %15361 }
0x48fc   :  { %v11914_v23 = vmul.f32 %v15362_v38, %v15346_v13  ;;  %v12883_v38 = vld [vmem:[#allocation58 + $0x18] sm:$0xff] }
0x48fe   :  { %14856 = vmatmul.mubr.msk.f32.vlgmr.msra.gmra.mxu0 %vm2599_vm11, %v11914_v23 }
0x48ff   :  { %14864 = vmatpush3.msra.mxu0 %v12081_v62  ;;  %14865 = vmatprep.mubr.msk.f32.mxu0 %vm16383_vm1, %v16382_v8 }
0x4900   :  { %v12572_v34 = vpop.xlane.xlu0 %12571  ;;  %14873 = vmatprep.subr.mxu0 %v16382_v8 }
0x4901   :  { %15369 = vrcp.f32 %v12572_v34 }
0x4902   :  { %v15364_v39 = vpop.eup %15363 }
0x4903   :  { %v12079_v61 = vmul.f32 %v15364_v39, %v15350_v35  ;;  %v15366_v26 = vpop.eup %15365 }
0x4904   :  { %v12244_v2 = vmul.f32 %v15366_v26, %v18215_v25  ;;  %v12576_v1 = vpop.permute.xlu0 %12575 }
0x4905   :  { %14866 = vmatmul.mubr.msk.f32.vlgmr.msra.gmra.mxu0 %vm2599_vm11, %v12079_v61 }
0x4906   :  { %14874 = vmatpush3.msra.mxu0 %v12246_v56  ;;  %14875 = vmatprep.mubr.msk.f32.mxu0 %vm16383_vm1, %v16382_v8  ;;  %v15368_v42 = vpop.eup %15367 }
0x4907   :  { %14883 = vmatprep.subr.mxu0 %v16382_v8  ;;  %v12409_v0 = vmul.f32 %v15368_v42, %v18220_v43 }
0x4909   :  { %14876 = vmatmul.mubr.msk.f32.vlgmr.msra.gmra.mxu0 %vm2599_vm11, %v12244_v2 }
0x490a   :  { %14884 = vmatpush3.msra.mxu0 %v12411_v63  ;;  %14885 = vmatprep.mubr.msk.f32.mxu0 %vm16383_vm1, %v16382_v8 }
0x490b   :  { %14893 = vmatprep.subr.mxu0 %v16382_v8 }
0x490d   :  { %14886 = vmatmul.mubr.msk.f32.vlgmr.msra.gmra.mxu0 %vm2599_vm11, %v12409_v0 }
0x490e   :  { %v15370_v24 = vpop.eup %15369  ;;  %14894 = vmatpush3.msra.mxu0 %v12576_v1  ;;  %14895 = vmatprep.mubr.msk.f32.mxu0 %vm16383_vm1, %v16382_v8 }
0x490f   :  { %v12574_v3 = vmul.f32 %v15370_v24, %v18224_v46  ;;  %14909 = vmatprep.subr.mxu0 %v16382_v8  ;;  %v13583_v24 = vld [vmem:[#allocation52] ss:$0 sm:$0xff] }
0x4911   :  { %14896 = vmatmul.mubr.msk.f32.vlgmr.msra.gmra.mxu0 %vm2599_vm11, %v12574_v3 }
0x4912   :  { %14917 = vmatprep.mubr.msk.f32.mxu0 %vm16383_vm1, %v16382_v8  ;;  %14910 = vmatpush3.msra.mxu0 %v12798_v59  ;;  %v13166_v59 = vld [vmem:[%s16697_s21 + $0x10] sm:$0xff] }
0x4913   :  { %14911 = vmatprep.subr.mxu0 %v16382_v8 }
0x4939   :  { %v11492_v4 = vpop.f32.mrf.mxu0 }
0x493b   :  { %v14827_v53 = vpop.f32.mrf.mxu0 }
0x4989   :  { %v11657_v6 = vpop.f32.mrf.mxu0 }
0x498a   :  { %12652 = vrot.lane.b32.xlu1 %v11657_v6, %s18478_s20 }
0x498b   :  { %v14837_v30 = vpop.f32.mrf.mxu0 }
0x498c   :  { %v12882_v30 = vld [vmem:[#allocation58 + $0x10] sm:$0xff] }
0x4990   :  { %v11822_v44 = vpop.f32.mrf.mxu0 }
0x4991   :  { %12656 = vrot.lane.b32.xlu0 %v11822_v44, %s18479_s18  ;;  %v12881_v44 = vld [vmem:[#allocation58 + $0x8] sm:$0xff] }
0x4992   :  { %v14847_v10 = vpop.f32.mrf.mxu0 }
0x4993   :  { %v12880_v10 = vld [vmem:[#allocation58] sm:$0xff] }
0x49be   :  { %v11987_v15 = vpop.f32.mrf.mxu0 }
0x49bf   :  { %12660 = vrot.lane.b32.xlu1 %v11987_v15, %s18480_s4 }
0x49c0   :  { %v14857_v29 = vpop.f32.mrf.mxu0 }
0x49c5   :  { %v12152_v18 = vpop.f32.mrf.mxu0 }
0x49c6   :  { %12664 = vrot.lane.b32.xlu0 %v12152_v18, %s16410_s26  ;;  %s18501_s26 = smov 32   ;;  %v13587_v18 = vld [vmem:[#allocation60] ss:$0 sm:$0xff] }
0x49c7   :  { %v14867_v27 = vpop.f32.mrf.mxu0 }
0x49c9   :  { %v12317_v19 = vpop.f32.mrf.mxu0 }
0x49ca   :  { %12668 = vrot.lane.b32.xlu1 %v12317_v19, %s16411_s1 }
0x49cb   :  { %v14877_v11 = vpop.f32.mrf.mxu0 }
0x49cd   :  { %v12482_v20 = vpop.f32.mrf.mxu0 }
0x49ce   :  { %12672 = vrot.lane.b32.xlu0 %v12482_v20, %s18488_s0 }
0x49cf   :  { %v14887_v13 = vpop.f32.mrf.mxu0 }
0x49d1   :  { %v12647_v54 = vpop.f32.mrf.mxu0 }
0x49d2   :  { %12676 = vrot.lane.b32.xlu1 %v12647_v54, %s18489_s14 }
0x49d3   :  { %v14897_v21 = vpop.f32.mrf.mxu0 }
0x49fc   :  { %v12653_v14 = vpop.permute.xlu1 %12652 }
0x49fd   :  { %v12679_v35 = vsel %vm2523_vm10, %v11492_v4, %v12653_v14  ;;  %v13584_v4 = vld [vmem:[#allocation54] ss:$0 sm:$0xff] }
0x4a03   :  { %v12657_v25 = vpop.permute.xlu0 %12656 }
0x4a04   :  { %v12680_v40 = vsel %vm2599_vm11, %v12679_v35, %v12657_v25  ;;  %v12995_v35 = vld [vmem:[%s18481_s19 + $0x8] sm:$0xff] }
0x4a31   :  { %v12661_v32 = vpop.permute.xlu1 %12660 }
0x4a32   :  { %v12681_v41 = vsel %vm3872_vm12, %v12680_v40, %v12661_v32  ;;  %v12997_v32 = vld [vmem:[%s18481_s19 + $0x18] sm:$0xff]  ;;  %v12994_v40 = vld [vmem:[%s18481_s19] sm:$0xff] }
0x4a38   :  { %v12665_v33 = vpop.permute.xlu0 %12664 }
0x4a39   :  { %v12682_v45 = vsel %vm775_vm0, %v12681_v41, %v12665_v33  ;;  %v12996_v33 = vld [vmem:[%s18481_s19 + $0x10] sm:$0xff] }
0x4a3c   :  { %v12669_v50 = vpop.permute.xlu1 %12668 }
0x4a3d   :  { %v12683_v46 = vsel %vm3875_vm13, %v12682_v45, %v12669_v50  ;;  %v13082_v50 = vld [vmem:[%s18482_s25 + $0x18] sm:$0xff] }
0x4a40   :  { %v12673_v43 = vpop.permute.xlu0 %12672 }
0x4a41   :  { %v12684_v47 = vsel %vm3877_vm14, %v12683_v46, %v12673_v43 }
0x4a44   :  { %v12677_v57 = vpop.permute.xlu1 %12676 }
0x4a45   :  { %v12685_v48 = vsel %vm3879_vm15, %v12684_v47, %v12677_v57  ;;  %v13589_v47 = vld [vmem:[#allocation61] ss:$0 sm:$0xff] }
0x4a46   :  { %14907 = vmatmul.mubr.msk.f32.vlgmr.msra.gmra.mxu1 %vm956_vm2, %v12685_v48  ;;  %v13590_v48 = vld [vmem:[#allocation63] ss:$0 sm:$0xff] }
0x4a47   :  { %14928 = vmatprep.mubr.msk.f32.mxu1 %vm16383_vm1, %v16382_v8  ;;  %14921 = vmatpush3.msra.mxu1 %v12883_v38 }
0x4a48   :  { %14922 = vmatprep.subr.mxu1 %v16382_v8 }
0x4a49   :  { %14923 = vmatpush3.msra.mxu1 %v12882_v30 }
0x4a4a   :  { %14924 = vmatprep.subr.mxu1 %v16382_v8 }
0x4a4b   :  { %14925 = vmatpush3.msra.mxu1 %v12881_v44 }
0x4a4c   :  { %14926 = vmatprep.subr.mxu1 %v16382_v8 }
0x4a4d   :  { %14927 = vmatpush3.msra.mxu1 %v12880_v10 }
0x4a4e   :  { %14942 = vmatprep.subr.mxu1 %v16382_v8 }
0x4b06   :  { %v12761_v5 = vpop.f32.mrf.mxu1 }
0x4b07   :  { %v12762_v31 = vadd.f32 %v13581_v49, %v12761_v5 }
0x4b08   :  { %v14908_v36 = vpop.f32.mrf.mxu1 }
0x4b09   :  { %v12767_v51 = vadd.f32 %v12762_v31, %v18123_v7  ;;  %v12797_v7 = vld [vmem:[#allocation55 + $0x10] sm:$0xff] }
0x4b0a   :  { %14912 = vmatpush3.msra.mxu0 %v12797_v7  ;;  %v13081_v31 = vld [vmem:[%s18482_s25 + $0x10] sm:$0xff]  ;;  %v13080_v36 = vld [vmem:[%s18482_s25 + $0x8] sm:$0xff] }
0x4b0b   :  { %v12768_v52 = vsel %vm956_vm2, %v12767_v51, 0.0  ;;  %14913 = vmatprep.subr.mxu0 %v16382_v8  ;;  %v13165_v7 = vld [vmem:[%s16697_s21 + $0x8] sm:$0xff] }
0x4b0c   :  { %12769 = vadd.xlane.f32.xlu0 %v12768_v52  ;;  %14914 = vmatpush3.msra.mxu0 %v12796_v60  ;;  %v13167_v52 = vld [vmem:[%s16697_s21 + $0x18] sm:$0xff]  ;;  %v13164_v60 = vld [vmem:[%s16697_s21] sm:$0xff] }
0x4b0d   :  { %14915 = vmatprep.subr.mxu0 %v16382_v8 }
0x4b22   :  { %1898 = vrot.lane.b32.xlu0 %v16993_v22, %s18501_s26  ;;  %v12795_v22 = vld [vmem:[#allocation55] sm:$0xff] }
0x4b23   :  { %14916 = vmatpush3.msra.mxu0 %v12795_v22  ;;  %v13593_v22 = vld [vmem:[#allocation66] ss:$0 sm:$0xff] }
0x4b24   :  { %14931 = vmatprep.subr.mxu0 %v16382_v8 }
0x4b95   :  { %v12770_v37 = vpop.xlane.xlu0 %12769 }
0x4b96   :  { %v12771_v62 = vmul.f32 0.03125, %v12770_v37  ;;  %v13591_v37 = vld [vmem:[#allocation64] ss:$0 sm:$0xff] }
0x4b98   :  { %v12772_v55 = vsub.f32 %v12767_v51, %v12771_v62  ;;  %v13079_v51 = vld [vmem:[%s18482_s25] sm:$0xff] }
0x4b9a   :  { %v12773_v56 = vmul.f32 %v12772_v55, %v12772_v55 }
0x4b9c   :  { %v12774_v58 = vsel %vm956_vm2, %v12773_v56, 0.0 }
0x4b9d   :  { %12775 = vadd.xlane.f32.xlu1 %v12774_v58 }
0x4bae   :  { %1903 = vrot.lane.b32.xlu1 %v16984_v9, %s18496_s8  ;;  %v1899_v9 = vpop.permute.xlu0 %1898 }
0x4baf   :  { %v1901_v39 = vsel %vm956_vm2, %v1899_v9, 0.0 }
0x4bb0   :  { %v1908_v42 = vrot.slane %v1901_v39, 6  ;;  %v13595_v39 = vld [vmem:[%s16702_s13] ss:$0 sm:$0xff] }
0x4c26   :  { %v12776_v23 = vpop.xlane.xlu1 %12775 }
0x4c27   :  { %v12777_v34 = vmul.f32 0.03125, %v12776_v23 }
0x4c29   :  { %v12778_v61 = vadd.f32 1e-05, %v12777_v34 }
0x4c2a   :  { %v1904_v26 = vpop.permute.xlu1 %1903 }
0x4c2b   :  { %15371 = vrsqrt.f32 %v12778_v61  ;;  %v1906_v2 = vsel %vm956_vm2, %v1904_v26, 0.0 }
0x4c2c   :  { %v1911_v63 = vrot.slane %v1906_v2, 4 }
0x4c2e   :  { %v1913_v0 = vsel %vm1888_vm3, %v1908_v42, %v1911_v63 }
0x4c2f   :  { %1914 = vst [vmem:[%s16712_s24] sm:$0xf] %v1913_v0 }
0x4c38   :  { %v15372_v1 = vpop.eup %15371 }
0x4c39   :  { %v12780_v3 = vmul.f32 %v15372_v1, %v12772_v55 }
0x4c3b   :  { %v12787_v53 = vmul.f32 %v13583_v24, %v12780_v3 }
0x4c3d   :  { %v12794_v6 = vadd.f32 %v13584_v4, %v12787_v53 }
0x4c3f   :  { %14918 = vmatmul.mubr.msk.f32.vlgmr.msra.gmra.mxu0 %vm956_vm2, %v12794_v6 }
0x4c40   :  { %14939 = vmatprep.mubr.msk.f32.mxu0 %vm16383_vm1, %v16382_v8  ;;  %14932 = vmatpush3.msra.mxu0 %v12997_v32 }
0x4c41   :  { %14933 = vmatprep.subr.mxu0 %v16382_v8 }
0x4c42   :  { %14934 = vmatpush3.msra.mxu0 %v12996_v33 }
0x4c43   :  { %14935 = vmatprep.subr.mxu0 %v16382_v8 }
0x4c44   :  { %14936 = vmatpush3.msra.mxu0 %v12995_v35 }
0x4c45   :  { %14937 = vmatprep.subr.mxu0 %v16382_v8 }
0x4c46   :  { %14938 = vmatpush3.msra.mxu0 %v12994_v40 }
0x4c47   :  { %14953 = vmatprep.subr.mxu0 %v16382_v8 }
0x4cff   :  { %v12875_v15 = vpop.f32.mrf.mxu0 }
0x4d00   :  { %v12876_v29 = vadd.f32 %v13585_v12, %v12875_v15 }
0x4d01   :  { %v14919_v16 = vpop.f32.mrf.mxu0 }
0x4d02   :  { %v12879_v17 = vmax.f32 %v12876_v29, 0.0 }
0x4d04   :  { %14929 = vmatmul.mubr.msk.f32.vlgmr.msra.gmra.mxu1 %vm956_vm2, %v12879_v17 }
0x4d05   :  { %14950 = vmatprep.mubr.msk.f32.mxu1 %vm16383_vm1, %v16382_v8  ;;  %14943 = vmatpush3.msra.mxu1 %v13082_v50 }
0x4d06   :  { %14944 = vmatprep.subr.mxu1 %v16382_v8 }
0x4d07   :  { %14945 = vmatpush3.msra.mxu1 %v13081_v31 }
0x4d08   :  { %14946 = vmatprep.subr.mxu1 %v16382_v8 }
0x4d09   :  { %14947 = vmatpush3.msra.mxu1 %v13080_v36 }
0x4d0a   :  { %14948 = vmatprep.subr.mxu1 %v16382_v8 }
0x4d0b   :  { %14949 = vmatpush3.msra.mxu1 %v13079_v51 }
0x4dc4   :  { %v12960_v28 = vpop.f32.mrf.mxu1 }
0x4dc5   :  { %v12961_v27 = vadd.f32 %v13587_v18, %v12960_v28 }
0x4dc6   :  { %v14930_v19 = vpop.f32.mrf.mxu1 }
0x4dc7   :  { %v12966_v11 = vadd.f32 %v12961_v27, %v12794_v6 }
0x4dc9   :  { %v12967_v20 = vsel %vm956_vm2, %v12966_v11, 0.0 }
0x4dca   :  { %12968 = vadd.xlane.f32.xlu0 %v12967_v20 }
0x4e53   :  { %v12969_v13 = vpop.xlane.xlu0 %12968 }
0x4e54   :  { %v12970_v54 = vmul.f32 0.03125, %v12969_v13 }
0x4e56   :  { %v12971_v21 = vsub.f32 %v12966_v11, %v12970_v54 }
0x4e58   :  { %v12972_v14 = vmul.f32 %v12971_v21, %v12971_v21 }
0x4e5a   :  { %v12973_v25 = vsel %vm956_vm2, %v12972_v14, 0.0 }
0x4e5b   :  { %12974 = vadd.xlane.f32.xlu1 %v12973_v25 }
0x4ee4   :  { %v12975_v41 = vpop.xlane.xlu1 %12974 }
0x4ee5   :  { %v12976_v43 = vmul.f32 0.03125, %v12975_v41 }
0x4ee7   :  { %v12977_v45 = vadd.f32 1e-05, %v12976_v43 }
0x4ee9   :  { %15373 = vrsqrt.f32 %v12977_v45 }
0x4ef6   :  { %v15374_v46 = vpop.eup %15373 }
0x4ef7   :  { %v12979_v57 = vmul.f32 %v15374_v46, %v12971_v21 }
0x4ef9   :  { %v12986_v49 = vmul.f32 %v13589_v47, %v12979_v57 }
0x4efb   :  { %v12993_v5 = vadd.f32 %v13590_v48, %v12986_v49 }
0x4efd   :  { %14940 = vmatmul.mubr.msk.f32.vlgmr.msra.gmra.mxu0 %vm956_vm2, %v12993_v5 }
0x4efe   :  { %14961 = vmatprep.mubr.msk.f32.mxu0 %vm16383_vm1, %v16382_v8  ;;  %14954 = vmatpush3.msra.mxu0 %v13167_v52 }
0x4eff   :  { %14955 = vmatprep.subr.mxu0 %v16382_v8 }
0x4f00   :  { %14956 = vmatpush3.msra.mxu0 %v13166_v59 }
0x4f01   :  { %14957 = vmatprep.subr.mxu0 %v16382_v8 }
0x4f02   :  { %14958 = vmatpush3.msra.mxu0 %v13165_v7 }
0x4f03   :  { %14959 = vmatprep.subr.mxu0 %v16382_v8 }
0x4f04   :  { %14960 = vmatpush3.msra.mxu0 %v13164_v60 }
0x4fbd   :  { %v13074_v62 = vpop.f32.mrf.mxu0 }
0x4fbe   :  { %v13075_v55 = vadd.f32 %v13591_v37, %v13074_v62 }
0x4fbf   :  { %v14941_v56 = vpop.f32.mrf.mxu0 }
0x4fc0   :  { %v13078_v58 = vmax.f32 %v13075_v55, 0.0 }
0x4fc2   :  { %14951 = vmatmul.mubr.msk.f32.vlgmr.msra.gmra.mxu1 %vm956_vm2, %v13078_v58 }
0x5082   :  { %v13159_v38 = vpop.f32.mrf.mxu1 }
0x5083   :  { %v13160_v9 = vadd.f32 %v13593_v22, %v13159_v38 }
0x5084   :  { %v14952_v23 = vpop.f32.mrf.mxu1 }
0x5085   :  { %v13163_v34 = vmax.f32 %v13160_v9, 0.0 }
0x5087   :  { %14962 = vmatmul.mubr.msk.f32.vlgmr.msra.gmra.mxu0 %vm956_vm2, %v13163_v34 }
0x5147   :  { %v13244_v61 = vpop.f32.mrf.mxu0 }
0x5148   :  { %v13245_v26 = vadd.f32 %v13595_v39, %v13244_v61 }
0x5149   :  { %v14963_v2 = vpop.f32.mrf.mxu0 }
0x514a   :  { %13597 = vst [vmem:[%s16707_s5 + $0x8] sm:$0xff] %v13245_v26 }
0x514b   :  { %13258 = vsyncpa [#allocation3], 1 }
0x514c   :  { %13259 = vsyncpa [#allocation5], 1 }
0x514d   :  { %13260 = vsyncpa [#allocation8], 1 }
0x514e   :  { %13261 = vsyncpa [#allocation11], 1 }
0x514f   :  { %13262 = vsyncpa [#allocation14], 1 }
0x5150   :  { %13263 = vsyncpa [#allocation17], 1 }
0x5151   :  { %13264 = vsyncpa [#allocation20], 1 }
0x5152   :  { %13265 = vsyncpa [#allocation23], 1 }
0x5153   :  { %13266 = vsyncpa [#allocation26], 1 }
0x5154   :  { %13267 = vsyncpa [#allocation29], 1 }
0x5155   :  { %13268 = vsyncpa [#allocation32], 1 }
0x5156   :  { %13269 = vsyncpa [#allocation35], 1 }
0x5157   :  { %13270 = vsyncpa [#allocation38], 1 }
0x5158   :  { %13271 = vsyncpa [#allocation41], 1 }
0x5159   :  { %13272 = vsyncpa [#allocation44], 1 }
0x515a   :  { %13273 = vsyncpa [#allocation47], 1 }
0x515b   :  { %13274 = vsyncpa [#allocation50], 1 }
0x515c   :  { %13275 = vsyncpa [#allocation53], 1 }
0x515d   :  { %13276 = vsyncpa [#allocation56], 1 }
0x515e   :  { %13277 = vsyncpa [#allocation59], 1 }
0x515f   :  { %13278 = vsyncpa [#allocation62], 1 }
0x5160   :  { %13279 = vsyncpa [#allocation65], 1 }

</bundles_post_ra>
